<compile_context>
chip_gen: v7x
topology: tpu7x:2x2x1
jax: 0.10.0
libtpu: 0.0.40
codegen_flags: <defaults>
</compile_context>

<pallas_src>
import numpy as np

import jax
import jax.numpy as jnp
from jax.experimental import pallas as pl
from jax.experimental.pallas import tpu as pltpu

F32 = jnp.float32
BF16 = jnp.bfloat16  # MXU operand dtype (accumulation stays f32)


# ----------------------------------------------------------------------------
# in-kernel helpers
# ----------------------------------------------------------------------------
def _gelu(x):
    # exact (erf-based) GELU, matching torch.nn.GELU() default (approximate='none')
    return 0.5 * x * (1.0 + jax.lax.erf(x * 0.7071067811865476))


def _layernorm(x, w, b, eps):
    # ConvNeXt channels_first LayerNorm: normalize over the channel dim per token
    u = jnp.mean(x, axis=-1, keepdims=True)
    xc = x - u
    s = jnp.mean(xc * xc, axis=-1, keepdims=True)
    return xc * jax.lax.rsqrt(s + eps) * w + b


def _rep(a):
    """Full-array BlockSpec for a weight replicated across the batch grid."""
    zeros = (0,) * a.ndim
    return pl.BlockSpec(a.shape, lambda b, _z=zeros: _z)


# ----------------------------------------------------------------------------
# fused network body (runs once per batch element, everything stays in VMEM)
# ----------------------------------------------------------------------------
def _mbconv(x, we_ref, wp_ref, ws_ref, bn_ref):
    # MBConv: PConvBlock stand-in -> (PAM = identity) -> proj(shortcut) + x1 -> GELU(BN(.))
    xb = x.astype(BF16)
    h = _gelu(jnp.dot(xb, we_ref[...], preferred_element_type=F32))
    x1 = jnp.dot(h.astype(BF16), wp_ref[...], preferred_element_type=F32)
    # TODO(synk): PAM(out, out) is undefined in the reference source; treated as identity.
    xs = jnp.dot(xb, ws_ref[...], preferred_element_type=F32) + x1
    return _gelu(xs * bn_ref[0:1, :] + bn_ref[1:2, :])          # gelu(bn(x))


def _attention(x, pmat, pos, ln1_ref, wq_ref, wk_ref, wv_ref, wout_ref, b_out):
    # pre-norm Attention with pooled k/v; heads handled via LEADING-axis indexing of the
    # host-split per-head weights (no lane slicing, no concat); per-head outputs are
    # accumulated directly through the row-split output projection.
    heads, _, d = wq_ref.shape
    scale = float(d) ** -0.5
    xn = _layernorm(x, ln1_ref[0:1, :], ln1_ref[1:2, :], 1e-6)
    xnb = xn.astype(BF16)                                        # bf16 cast hoisted once

    acc = None
    for h in range(heads):                                       # static, in-VMEM head loop
        qh = jnp.dot(xnb, wq_ref[h], preferred_element_type=F32)          # (N, d)
        kh = jax.nn.sigmoid(jnp.dot(                                      # pooled k tokens
            pmat, jnp.dot(xnb, wk_ref[h], preferred_element_type=F32).astype(BF16),
            preferred_element_type=F32))                                  # (Nk, d)
        vh = jax.nn.sigmoid(jnp.dot(                                      # pooled v tokens
            pmat, jnp.dot(xnb, wv_ref[h], preferred_element_type=F32).astype(BF16),
            preferred_element_type=F32))                                  # (Nk, d)
        dots = jax.lax.dot_general(qh.astype(BF16), kh.astype(BF16),
                                   (((1,), (1,)), ((), ())),
                                   preferred_element_type=F32) * scale + pos
        m = jnp.max(dots, axis=-1, keepdims=True)
        e = jnp.exp(dots - m)
        p_attn = e * pl.reciprocal(jnp.sum(e, axis=-1, keepdims=True), approx=True)
        oh = jnp.dot(p_attn.astype(BF16), vh.astype(BF16),
                     preferred_element_type=F32)                          # (N, d)
        po = jnp.dot(oh.astype(BF16), wout_ref[h],
                     preferred_element_type=F32)                          # (N, cout)
        acc = po if acc is None else acc + po
    return acc + b_out                                                    # to_out bias


def _mlp(x1, sdw_ref, cvec_ref, hvec_ref, wfc1_ref, wdw_ref, wfc2_ref):
    # MLP: LN -> fc1 -> GELU -> x + GELU(depthwise3x3(x)) -> fc2  (+ outer block residual)
    ln2w, ln2b, bfc2 = cvec_ref[1:2, :], cvec_ref[2:3, :], cvec_ref[3:4, :]
    bfc1, bdw = hvec_ref[0:1, :], hvec_ref[1:2, :]

    xn2 = _layernorm(x1, ln2w, ln2b, 1e-6)
    h1 = _gelu(jnp.dot(xn2.astype(BF16), wfc1_ref[...],
                       preferred_element_type=F32) + bfc1)       # (N, hid)
    h1b = h1.astype(BF16)

    # depthwise 3x3 (padding=1) as 9 token-shift matmuls; boundary masks live in the
    # 0/1 bf16 shift matrices, accumulation in f32.
    acc = h1 * wdw_ref[4:5, :]                                   # centre tap is identity
    for t in range(9):
        if t == 4:
            continue
        acc = acc + jnp.dot(sdw_ref[t], h1b,
                            preferred_element_type=F32) * wdw_ref[t:t + 1, :]
    h2 = h1 + _gelu(acc + bdw)                                   # x + act(pos(x))
    return jnp.dot(h2.astype(BF16), wfc2_ref[...],
                   preferred_element_type=F32) + bfc2 + x1       # fc2 + block residual


def _transformer(x, pmat, sdw_ref, refs, shortcut):
    if shortcut:
        (ln1_ref, wq_ref, wk_ref, wv_ref, wout_ref, pos_ref, wproj_ref,
         cvec_ref, wfc1_ref, hvec_ref, wdw_ref, wfc2_ref) = refs
    else:
        (ln1_ref, wq_ref, wk_ref, wv_ref, wout_ref, pos_ref,
         cvec_ref, wfc1_ref, hvec_ref, wdw_ref, wfc2_ref) = refs

    attn = _attention(x, pmat, pos_ref[...], ln1_ref, wq_ref, wk_ref, wv_ref,
                      wout_ref, cvec_ref[0:1, :])
    if shortcut:
        x1 = jnp.dot(x.astype(BF16), wproj_ref[...],
                     preferred_element_type=F32) + attn          # proj(x) + attn(x)
    else:
        x1 = x + attn                                            # x + attn(x)
    return _mlp(x1, sdw_ref, cvec_ref, hvec_ref, wfc1_ref, wdw_ref, wfc2_ref)


def _passnet_kernel(*refs):
    # refs = (x, 34 weights/constants, out).  One batch element per grid step.
    x_ref, o_ref = refs[0], refs[-1]
    w = refs[1:-1]
    (s1_we, s1_wp, s1_ws, s1_bn,
     s2_we, s2_wp, s2_ws, s2_bn,
     pmat_ref, sdw_ref) = w[:10]
    s3_refs = w[10:22]
    s4_refs = w[22:33]
    wfc_ref = w[33]

    pmat = pmat_ref[...]                                         # (Nk, N) bf16, shared
    x = x_ref[0]                                                 # (N, Cin) f32

    x = _mbconv(x, s1_we, s1_wp, s1_ws, s1_bn)                   # stage s1
    x = _mbconv(x, s2_we, s2_wp, s2_ws, s2_bn)                   # stage s2
    x = _transformer(x, pmat, sdw_ref, s3_refs, shortcut=True)   # stage s3
    y = _transformer(x, pmat, sdw_ref, s4_refs, shortcut=False)  # stage s4

    # AvgPool2d(ih) over tokens, then Linear (no bias).  Mean-first is exact and keeps
    # the MXU matmul to a single (1, C) row.
    pooled = jnp.mean(y, axis=0, keepdims=True)                  # (1, cout) f32
    o_ref[0] = jnp.dot(pooled.astype(BF16), wfc_ref[...],
                       preferred_element_type=F32)               # (1, ncls)


# ----------------------------------------------------------------------------
# single fused pallas_call wrapper
# ----------------------------------------------------------------------------
def _stage_args(t, shortcut):
    a = [t["ln1"], t["wq"], t["wk"], t["wv"], t["wout"], t["pos"]]
    if shortcut:
        a.append(t["wproj"])
    a += [t["cvec"], t["wfc1"], t["hvec"], t["wdw"], t["wfc2"]]
    return a


def _cost_estimate(prep, args, B, N, Nk, ncls, out_nbytes):
    def mm(m, k, n):
        return 2 * m * k * n
    fl = 0
    for s in ("s1", "s2"):
        p = prep[s]
        ci, hid = p["w_expand"].shape
        co = p["w_project"].shape[1]
        fl += mm(N, ci, hid) + mm(N, hid, co) + mm(N, ci, co)
    for s, shortcut in (("s3", True), ("s4", False)):
        t = prep[s]
        heads, ci, d = t["wq"].shape
        co, hid = t["wfc1"].shape
        fl += heads * (3 * mm(N, ci, d) + 2 * mm(Nk, N, d)
                       + mm(N, d, Nk) + mm(N, Nk, d) + mm(N, d, co))
        if shortcut:
            fl += mm(N, ci, co)
        fl += mm(N, co, hid) + 8 * mm(N, N, hid) + mm(N, hid, co)
    fl += mm(1, prep["w_fc"].shape[0], ncls)
    fl *= B
    trans = B * N * 2048                                         # rough gelu/exp/sigmoid count
    bytes_accessed = int(sum(int(np.prod(a.shape)) * np.dtype(a.dtype).itemsize
                             for a in args)) + int(out_nbytes)
    return pl.CostEstimate(flops=int(fl), transcendentals=int(trans),
                           bytes_accessed=bytes_accessed)


def passnet_forward(prep, x_nchw):
    B, Cin, H, W = x_nchw.shape
    N = H * W
    ncls = prep["w_fc"].shape[-1]
    Nk = prep["pool_mat"].shape[0]
    x = jnp.transpose(x_nchw, (0, 2, 3, 1)).reshape(B, N, Cin)   # NCHW -> tokens

    args = [x]
    for s in ("s1", "s2"):
        p = prep[s]
        args += [p["w_expand"], p["w_project"], p["w_proj"], p["bn"]]
    args += [prep["pool_mat"], prep["dw_shift"]]
    args += _stage_args(prep["s3"], True)
    args += _stage_args(prep["s4"], False)
    args += [prep["w_fc"]]

    in_specs = [pl.BlockSpec((1, N, Cin), lambda b: (b, 0, 0))] + [_rep(a) for a in args[1:]]
    cost = _cost_estimate(prep, args, B, N, Nk, ncls, out_nbytes=B * ncls * 4)

    logits = pl.pallas_call(
        _passnet_kernel,
        out_shape=jax.ShapeDtypeStruct((B, 1, ncls), F32),
        grid=(B,),
        in_specs=in_specs,
        out_specs=pl.BlockSpec((1, 1, ncls), lambda b: (b, 0, 0)),
        compiler_params=pltpu.CompilerParams(dimension_semantics=("parallel",)),
        cost_estimate=cost,
    )(*args)
    return logits.reshape(B, -1)                                 # (B, num_classes)


# ----------------------------------------------------------------------------
# host-side constant construction & parameter preparation (runs once, outside jit)
# ----------------------------------------------------------------------------
def build_pool_matrix(ih, iw):
    """Pooling matrix P (Nk, N) reproducing the Attention k/v construction
    (row-mean, col-mean, 2x2 average pool) for even square image sizes."""
    assert ih == iw and ih % 2 == 0 and iw % 2 == 0
    N = ih * iw
    Nk = ih + iw + (ih // 2) * (iw // 2)
    P = np.zeros((Nk, N), np.float32)
    for y in range(ih):                       # k_h : mean over width  -> ih rows
        for x in range(iw):
            P[y, y * iw + x] = 1.0 / iw
    for x in range(iw):                       # k_w : mean over height -> iw rows
        for y in range(ih):
            P[ih + x, y * iw + x] = 1.0 / ih
    for y2 in range(ih // 2):                 # k_p : exact 2x2 average pool
        for x2 in range(iw // 2):
            r = ih + iw + y2 * (iw // 2) + x2
            for dy in range(2):
                for dx in range(2):
                    P[r, (2 * y2 + dy) * iw + (2 * x2 + dx)] = 0.25
    return jnp.asarray(P)


def build_shift_matrices(ih, iw):
    """9 token-shift 0/1 matrices S[t] (N, N): (S[t] @ x)[p] = x[neighbour_t(p)] with zero
    padding at the image boundary — used to express the 3x3 depthwise conv as matmuls."""
    N = ih * iw
    S = np.zeros((9, N, N), np.float32)
    for dyi in range(3):
        for dxi in range(3):
            t = dyi * 3 + dxi
            dy, dx = dyi - 1, dxi - 1
            for y in range(ih):
                yy = y + dy
                if not (0 <= yy < ih):
                    continue
                for x in range(iw):
                    xx = x + dx
                    if 0 <= xx < iw:
                        S[t, y * iw + x, yy * iw + xx] = 1.0
    return jnp.asarray(S)


def prepare_params(params, image_size, heads):
    """Fold BatchNorm, pre-cast matmul weights to bf16, split attention weights per head,
    pack tiny per-channel vectors into per-stage slabs, build pooling/shift constants."""
    ih, iw = image_size
    P = build_pool_matrix(ih, iw).astype(BF16)           # 0/…/1 weights, exact in bf16
    S = build_shift_matrices(ih, iw).astype(BF16)        # 0/1, exact in bf16

    def prep_mbconv(p):
        eps = 1e-5                            # nn.BatchNorm2d default
        scale = p["bn_gamma"] / jnp.sqrt(p["bn_var"] + eps)
        shift = p["bn_beta"] - p["bn_mean"] * scale
        return dict(
            w_expand=p["w_expand"].astype(BF16),
            w_project=p["w_project"].astype(BF16),
            w_proj=p["w_proj"].astype(BF16),
            bn=jnp.stack([scale, shift], axis=0).astype(F32),          # (2, cout) slab
        )

    def split_heads(w, cin, d):
        # (cin, heads*d), output channel = h*d + dd  ->  (heads, cin, d)
        return jnp.transpose(w.reshape(cin, heads, d), (1, 0, 2))

    def prep_transformer(p, shortcut):
        m = p["mlp"]
        cin = p["ln_w"].shape[0]
        d = cin // heads
        cout = m["ln_w"].shape[0]
        wqkv = p["w_qkv"]                                              # (cin, 3*cin)
        out = dict(
            ln1=jnp.stack([p["ln_w"], p["ln_b"]], 0).astype(F32),      # (2, cin) slab
            wq=split_heads(wqkv[:, :cin], cin, d).astype(BF16),        # (heads, cin, d)
            wk=split_heads(wqkv[:, cin:2 * cin], cin, d).astype(BF16),
            wv=split_heads(wqkv[:, 2 * cin:], cin, d).astype(BF16),
            wout=p["w_out"].reshape(heads, d, cout).astype(BF16),      # rows in (h d) order
            pos=p["pos"].astype(F32),
            cvec=jnp.stack([p["b_out"], m["ln_w"], m["ln_b"], m["b_fc2"]],
                           0).astype(F32),                             # (4, cout) slab
            wfc1=m["w_fc1"].astype(BF16),
            hvec=jnp.stack([m["b_fc1"], m["b_dw"]], 0).astype(F32),    # (2, hid) slab
            wdw=m["w_dw"].reshape(9, -1).astype(F32),                  # per-tap dw scales
            wfc2=m["w_fc2"].astype(BF16),
        )
        if shortcut:
            out["wproj"] = p["w_proj"].astype(BF16)
        return out

    return dict(
        s1=prep_mbconv(params["s1"]),
        s2=prep_mbconv(params["s2"]),
        pool_mat=P,
        dw_shift=S,
        s3=prep_transformer(params["s3"], True),
        s4=prep_transformer(params["s4"], False),
        w_fc=params["fc"].astype(BF16),
    )


# ----------------------------------------------------------------------------
# deterministic parameter initialization (shapes from the module's __init__)
# ----------------------------------------------------------------------------
def init_params(key, in_channels, channels, image_size, num_classes):
    ih, iw = image_size
    N = ih * iw
    Nk = ih + iw + (ih // 2) * (iw // 2)
    keys = iter(jax.random.split(key, 128))

    def nrm(shape, scale=0.1):
        return (scale * jax.random.normal(next(keys), shape)).astype(F32)

    def mbconv(cin, cout, expansion=4):
        hid = cin * expansion
        return dict(
            w_expand=nrm((cin, hid)), w_project=nrm((hid, cout)), w_proj=nrm((cin, cout)),
            bn_gamma=1.0 + nrm((cout,)), bn_beta=nrm((cout,)),
            bn_mean=nrm((cout,)), bn_var=1.0 + 0.1 * jnp.abs(nrm((cout,))),
        )

    def mlp(dim, ratio=4):
        hid = dim * ratio
        return dict(
            ln_w=1.0 + nrm((dim,)), ln_b=nrm((dim,)),
            w_fc1=nrm((dim, hid)), b_fc1=nrm((hid,)),
            w_dw=nrm((3, 3, hid)), b_dw=nrm((hid,)),
            w_fc2=nrm((hid, dim)), b_fc2=nrm((dim,)),
        )

    def transformer(cin, cout, shortcut):
        p = dict(
            ln_w=1.0 + nrm((cin,)), ln_b=nrm((cin,)),
            w_qkv=nrm((cin, 3 * cin)),
            w_out=nrm((cin, cout)), b_out=nrm((cout,)),
            pos=nrm((N, Nk), scale=0.2),          # pos_embed (trunc_normal std=0.2)
            mlp=mlp(cout),
        )
        if shortcut:
            p["w_proj"] = nrm((cin, cout))
        return p

    return dict(
        s1=mbconv(in_channels, channels[0]),
        s2=mbconv(channels[0], channels[1]),
        s3=transformer(channels[1], channels[2], True),
        s4=transformer(channels[2], channels[3], False),
        fc=nrm((channels[3], num_classes)),
    )


# ----------------------------------------------------------------------------
if __name__ == "__main__":
    key = jax.random.PRNGKey(0)
    B, Cin = 2, 4
    image_size = (8, 8)            # even & square so adaptive pooling == exact 2x2 pool
    channels = (16, 32, 16, 16)    # channels[2] == channels[3] required by s4 residual
    num_classes = 8
    heads = 2                      # Transformer default

    assert channels[2] == channels[3]
    assert channels[1] % heads == 0 and channels[2] % heads == 0
    pkey, xkey = jax.random.split(key)
    params = init_params(pkey, Cin, channels, image_size, num_classes)
    x = jax.random.normal(xkey, (B, Cin, *image_size), dtype=F32)  # NCHW, like PyTorch

    prep = prepare_params(params, image_size, heads)               # one-time host prep
    fwd = jax.jit(passnet_forward)
    out = fwd(prep, x)
    jax.block_until_ready(out)
    assert out.shape == (B, num_classes) and out.dtype == jnp.float32
    print("KERNEL_OK")
</pallas_src>

<mosaic_0001>
module attributes {stable_mosaic.version = 11 : i64} {
  func.func @_passnet_kernel(%arg0: i32, %arg1: memref<1x64x4xf32, #tpu.memory_space<vmem>>, %arg2: memref<4x16xbf16, #tpu.memory_space<vmem>>, %arg3: memref<16x16xbf16, #tpu.memory_space<vmem>>, %arg4: memref<4x16xbf16, #tpu.memory_space<vmem>>, %arg5: memref<2x16xf32, #tpu.memory_space<vmem>>, %arg6: memref<16x64xbf16, #tpu.memory_space<vmem>>, %arg7: memref<64x32xbf16, #tpu.memory_space<vmem>>, %arg8: memref<16x32xbf16, #tpu.memory_space<vmem>>, %arg9: memref<2x32xf32, #tpu.memory_space<vmem>>, %arg10: memref<32x64xbf16, #tpu.memory_space<vmem>>, %arg11: memref<9x64x64xbf16, #tpu.memory_space<vmem>>, %arg12: memref<2x32xf32, #tpu.memory_space<vmem>>, %arg13: memref<2x32x16xbf16, #tpu.memory_space<vmem>>, %arg14: memref<2x32x16xbf16, #tpu.memory_space<vmem>>, %arg15: memref<2x32x16xbf16, #tpu.memory_space<vmem>>, %arg16: memref<2x16x16xbf16, #tpu.memory_space<vmem>>, %arg17: memref<64x32xf32, #tpu.memory_space<vmem>>, %arg18: memref<32x16xbf16, #tpu.memory_space<vmem>>, %arg19: memref<4x16xf32, #tpu.memory_space<vmem>>, %arg20: memref<16x64xbf16, #tpu.memory_space<vmem>>, %arg21: memref<2x64xf32, #tpu.memory_space<vmem>>, %arg22: memref<9x64xf32, #tpu.memory_space<vmem>>, %arg23: memref<64x16xbf16, #tpu.memory_space<vmem>>, %arg24: memref<2x16xf32, #tpu.memory_space<vmem>>, %arg25: memref<2x16x8xbf16, #tpu.memory_space<vmem>>, %arg26: memref<2x16x8xbf16, #tpu.memory_space<vmem>>, %arg27: memref<2x16x8xbf16, #tpu.memory_space<vmem>>, %arg28: memref<2x8x16xbf16, #tpu.memory_space<vmem>>, %arg29: memref<64x32xf32, #tpu.memory_space<vmem>>, %arg30: memref<4x16xf32, #tpu.memory_space<vmem>>, %arg31: memref<16x64xbf16, #tpu.memory_space<vmem>>, %arg32: memref<2x64xf32, #tpu.memory_space<vmem>>, %arg33: memref<9x64xf32, #tpu.memory_space<vmem>>, %arg34: memref<64x16xbf16, #tpu.memory_space<vmem>>, %arg35: memref<16x8xbf16, #tpu.memory_space<vmem>>, %arg36: memref<1x1x8xf32, #tpu.memory_space<vmem>>) attributes {dimension_semantics = [#tpu.dimension_semantics<parallel>], iteration_bounds = array<i64: 2>, scalar_prefetch = 0 : i64, scratch_operands = 0 : i64, tpu.core_type = #tpu.core_type<tc>, window_params = [{transform_indices = @transform_0, window_bounds = array<i64: 1, 64, 4>}, {pipeline_mode = #tpu.pipeline_mode<synchronous>, transform_indices = @transform_1, window_bounds = array<i64: 4, 16>}, {pipeline_mode = #tpu.pipeline_mode<synchronous>, transform_indices = @transform_2, window_bounds = array<i64: 16, 16>}, {pipeline_mode = #tpu.pipeline_mode<synchronous>, transform_indices = @transform_3, window_bounds = array<i64: 4, 16>}, {pipeline_mode = #tpu.pipeline_mode<synchronous>, transform_indices = @transform_4, window_bounds = array<i64: 2, 16>}, {pipeline_mode = #tpu.pipeline_mode<synchronous>, transform_indices = @transform_5, window_bounds = array<i64: 16, 64>}, {pipeline_mode = #tpu.pipeline_mode<synchronous>, transform_indices = @transform_6, window_bounds = array<i64: 64, 32>}, {pipeline_mode = #tpu.pipeline_mode<synchronous>, transform_indices = @transform_7, window_bounds = array<i64: 16, 32>}, {pipeline_mode = #tpu.pipeline_mode<synchronous>, transform_indices = @transform_8, window_bounds = array<i64: 2, 32>}, {pipeline_mode = #tpu.pipeline_mode<synchronous>, transform_indices = @transform_9, window_bounds = array<i64: 32, 64>}, {pipeline_mode = #tpu.pipeline_mode<synchronous>, transform_indices = @transform_10, window_bounds = array<i64: 9, 64, 64>}, {pipeline_mode = #tpu.pipeline_mode<synchronous>, transform_indices = @transform_11, window_bounds = array<i64: 2, 32>}, {pipeline_mode = #tpu.pipeline_mode<synchronous>, transform_indices = @transform_12, window_bounds = array<i64: 2, 32, 16>}, {pipeline_mode = #tpu.pipeline_mode<synchronous>, transform_indices = @transform_13, window_bounds = array<i64: 2, 32, 16>}, {pipeline_mode = #tpu.pipeline_mode<synchronous>, transform_indices = @transform_14, window_bounds = array<i64: 2, 32, 16>}, {pipeline_mode = #tpu.pipeline_mode<synchronous>, transform_indices = @transform_15, window_bounds = array<i64: 2, 16, 16>}, {pipeline_mode = #tpu.pipeline_mode<synchronous>, transform_indices = @transform_16, window_bounds = array<i64: 64, 32>}, {pipeline_mode = #tpu.pipeline_mode<synchronous>, transform_indices = @transform_17, window_bounds = array<i64: 32, 16>}, {pipeline_mode = #tpu.pipeline_mode<synchronous>, transform_indices = @transform_18, window_bounds = array<i64: 4, 16>}, {pipeline_mode = #tpu.pipeline_mode<synchronous>, transform_indices = @transform_19, window_bounds = array<i64: 16, 64>}, {pipeline_mode = #tpu.pipeline_mode<synchronous>, transform_indices = @transform_20, window_bounds = array<i64: 2, 64>}, {pipeline_mode = #tpu.pipeline_mode<synchronous>, transform_indices = @transform_21, window_bounds = array<i64: 9, 64>}, {pipeline_mode = #tpu.pipeline_mode<synchronous>, transform_indices = @transform_22, window_bounds = array<i64: 64, 16>}, {pipeline_mode = #tpu.pipeline_mode<synchronous>, transform_indices = @transform_23, window_bounds = array<i64: 2, 16>}, {pipeline_mode = #tpu.pipeline_mode<synchronous>, transform_indices = @transform_24, window_bounds = array<i64: 2, 16, 8>}, {pipeline_mode = #tpu.pipeline_mode<synchronous>, transform_indices = @transform_25, window_bounds = array<i64: 2, 16, 8>}, {pipeline_mode = #tpu.pipeline_mode<synchronous>, transform_indices = @transform_26, window_bounds = array<i64: 2, 16, 8>}, {pipeline_mode = #tpu.pipeline_mode<synchronous>, transform_indices = @transform_27, window_bounds = array<i64: 2, 8, 16>}, {pipeline_mode = #tpu.pipeline_mode<synchronous>, transform_indices = @transform_28, window_bounds = array<i64: 64, 32>}, {pipeline_mode = #tpu.pipeline_mode<synchronous>, transform_indices = @transform_29, window_bounds = array<i64: 4, 16>}, {pipeline_mode = #tpu.pipeline_mode<synchronous>, transform_indices = @transform_30, window_bounds = array<i64: 16, 64>}, {pipeline_mode = #tpu.pipeline_mode<synchronous>, transform_indices = @transform_31, window_bounds = array<i64: 2, 64>}, {pipeline_mode = #tpu.pipeline_mode<synchronous>, transform_indices = @transform_32, window_bounds = array<i64: 9, 64>}, {pipeline_mode = #tpu.pipeline_mode<synchronous>, transform_indices = @transform_33, window_bounds = array<i64: 64, 16>}, {pipeline_mode = #tpu.pipeline_mode<synchronous>, transform_indices = @transform_34, window_bounds = array<i64: 16, 8>}, {transform_indices = @transform_35, window_bounds = array<i64: 1, 1, 8>}]} {
    %c0 = arith.constant 0 : index
    %c0_0 = arith.constant 0 : index
    %0 = vector.load %arg10[%c0, %c0_0] : memref<32x64xbf16, #tpu.memory_space<vmem>>, vector<32x64xbf16>
    %c0_1 = arith.constant 0 : index
    %c0_2 = arith.constant 0 : index
    %c0_3 = arith.constant 0 : index
    %1 = vector.load %arg1[%c0_1, %c0_2, %c0_3] : memref<1x64x4xf32, #tpu.memory_space<vmem>>, vector<1x64x4xf32>
    %2 = vector.shape_cast %1 : vector<1x64x4xf32> to vector<64x4xf32>
    %3 = arith.truncf %2 : vector<64x4xf32> to vector<64x4xbf16>
    %c0_4 = arith.constant 0 : index
    %c0_5 = arith.constant 0 : index
    %4 = vector.load %arg2[%c0_4, %c0_5] : memref<4x16xbf16, #tpu.memory_space<vmem>>, vector<4x16xbf16>
    %cst = arith.constant dense<0.000000e+00> : vector<64x16xf32>
    %5 = tpu.matmul %3, %4, %cst {dimension_numbers = #tpu.dot_dimension_numbers<[1], [0], [0], [1], [0, 0, 1, 1], [], []>} : vector<64x4xbf16>, vector<4x16xbf16>, vector<64x16xf32> -> vector<64x16xf32>
    %cst_6 = arith.constant 5.000000e-01 : f32
    %6 = vector.broadcast %cst_6 : f32 to vector<64x16xf32>
    %7 = arith.mulf %6, %5 : vector<64x16xf32>
    %cst_7 = arith.constant 0.707106769 : f32
    %8 = vector.broadcast %cst_7 : f32 to vector<64x16xf32>
    %9 = arith.mulf %5, %8 : vector<64x16xf32>
    %10 = math.erf %9 : vector<64x16xf32>
    %cst_8 = arith.constant 1.000000e+00 : f32
    %11 = vector.broadcast %cst_8 : f32 to vector<64x16xf32>
    %12 = arith.addf %11, %10 : vector<64x16xf32>
    %13 = arith.mulf %7, %12 : vector<64x16xf32>
    %14 = arith.truncf %13 : vector<64x16xf32> to vector<64x16xbf16>
    %c0_9 = arith.constant 0 : index
    %c0_10 = arith.constant 0 : index
    %15 = vector.load %arg3[%c0_9, %c0_10] : memref<16x16xbf16, #tpu.memory_space<vmem>>, vector<16x16xbf16>
    %cst_11 = arith.constant dense<0.000000e+00> : vector<64x16xf32>
    %16 = tpu.matmul %14, %15, %cst_11 {dimension_numbers = #tpu.dot_dimension_numbers<[1], [0], [0], [1], [0, 0, 1, 1], [], []>} : vector<64x16xbf16>, vector<16x16xbf16>, vector<64x16xf32> -> vector<64x16xf32>
    %c0_12 = arith.constant 0 : index
    %c0_13 = arith.constant 0 : index
    %17 = vector.load %arg4[%c0_12, %c0_13] : memref<4x16xbf16, #tpu.memory_space<vmem>>, vector<4x16xbf16>
    %cst_14 = arith.constant dense<0.000000e+00> : vector<64x16xf32>
    %18 = tpu.matmul %3, %17, %cst_14 {dimension_numbers = #tpu.dot_dimension_numbers<[1], [0], [0], [1], [0, 0, 1, 1], [], []>} : vector<64x4xbf16>, vector<4x16xbf16>, vector<64x16xf32> -> vector<64x16xf32>
    %19 = arith.addf %18, %16 : vector<64x16xf32>
    %c0_15 = arith.constant 0 : index
    %c0_16 = arith.constant 0 : index
    %20 = vector.load %arg5[%c0_15, %c0_16] : memref<2x16xf32, #tpu.memory_space<vmem>>, vector<1x16xf32>
    %21 = vector.broadcast %20 : vector<1x16xf32> to vector<64x16xf32>
    %22 = arith.mulf %19, %21 : vector<64x16xf32>
    %c1 = arith.constant 1 : index
    %c0_17 = arith.constant 0 : index
    %23 = vector.load %arg5[%c1, %c0_17] : memref<2x16xf32, #tpu.memory_space<vmem>>, vector<1x16xf32>
    %24 = vector.broadcast %23 : vector<1x16xf32> to vector<64x16xf32>
    %25 = arith.addf %22, %24 : vector<64x16xf32>
    %cst_18 = arith.constant 5.000000e-01 : f32
    %26 = vector.broadcast %cst_18 : f32 to vector<64x16xf32>
    %27 = arith.mulf %26, %25 : vector<64x16xf32>
    %cst_19 = arith.constant 0.707106769 : f32
    %28 = vector.broadcast %cst_19 : f32 to vector<64x16xf32>
    %29 = arith.mulf %25, %28 : vector<64x16xf32>
    %30 = math.erf %29 : vector<64x16xf32>
    %cst_20 = arith.constant 1.000000e+00 : f32
    %31 = vector.broadcast %cst_20 : f32 to vector<64x16xf32>
    %32 = arith.addf %31, %30 : vector<64x16xf32>
    %33 = arith.mulf %27, %32 : vector<64x16xf32>
    %34 = arith.truncf %33 : vector<64x16xf32> to vector<64x16xbf16>
    %c0_21 = arith.constant 0 : index
    %c0_22 = arith.constant 0 : index
    %35 = vector.load %arg6[%c0_21, %c0_22] : memref<16x64xbf16, #tpu.memory_space<vmem>>, vector<16x64xbf16>
    %cst_23 = arith.constant dense<0.000000e+00> : vector<64x64xf32>
    %36 = tpu.matmul %34, %35, %cst_23 {dimension_numbers = #tpu.dot_dimension_numbers<[1], [0], [0], [1], [0, 0, 1, 1], [], []>} : vector<64x16xbf16>, vector<16x64xbf16>, vector<64x64xf32> -> vector<64x64xf32>
    %cst_24 = arith.constant 5.000000e-01 : f32
    %37 = vector.broadcast %cst_24 : f32 to vector<64x64xf32>
    %38 = arith.mulf %37, %36 : vector<64x64xf32>
    %cst_25 = arith.constant 0.707106769 : f32
    %39 = vector.broadcast %cst_25 : f32 to vector<64x64xf32>
    %40 = arith.mulf %36, %39 : vector<64x64xf32>
    %41 = math.erf %40 : vector<64x64xf32>
    %cst_26 = arith.constant 1.000000e+00 : f32
    %42 = vector.broadcast %cst_26 : f32 to vector<64x64xf32>
    %43 = arith.addf %42, %41 : vector<64x64xf32>
    %44 = arith.mulf %38, %43 : vector<64x64xf32>
    %45 = arith.truncf %44 : vector<64x64xf32> to vector<64x64xbf16>
    %c0_27 = arith.constant 0 : index
    %c0_28 = arith.constant 0 : index
    %46 = vector.load %arg7[%c0_27, %c0_28] : memref<64x32xbf16, #tpu.memory_space<vmem>>, vector<64x32xbf16>
    %cst_29 = arith.constant dense<0.000000e+00> : vector<64x32xf32>
    %47 = tpu.matmul %45, %46, %cst_29 {dimension_numbers = #tpu.dot_dimension_numbers<[1], [0], [0], [1], [0, 0, 1, 1], [], []>} : vector<64x64xbf16>, vector<64x32xbf16>, vector<64x32xf32> -> vector<64x32xf32>
    %c0_30 = arith.constant 0 : index
    %c0_31 = arith.constant 0 : index
    %48 = vector.load %arg8[%c0_30, %c0_31] : memref<16x32xbf16, #tpu.memory_space<vmem>>, vector<16x32xbf16>
    %cst_32 = arith.constant dense<0.000000e+00> : vector<64x32xf32>
    %49 = tpu.matmul %34, %48, %cst_32 {dimension_numbers = #tpu.dot_dimension_numbers<[1], [0], [0], [1], [0, 0, 1, 1], [], []>} : vector<64x16xbf16>, vector<16x32xbf16>, vector<64x32xf32> -> vector<64x32xf32>
    %50 = arith.addf %49, %47 : vector<64x32xf32>
    %c0_33 = arith.constant 0 : index
    %c0_34 = arith.constant 0 : index
    %51 = vector.load %arg9[%c0_33, %c0_34] : memref<2x32xf32, #tpu.memory_space<vmem>>, vector<1x32xf32>
    %52 = vector.broadcast %51 : vector<1x32xf32> to vector<64x32xf32>
    %53 = arith.mulf %50, %52 : vector<64x32xf32>
    %c1_35 = arith.constant 1 : index
    %c0_36 = arith.constant 0 : index
    %54 = vector.load %arg9[%c1_35, %c0_36] : memref<2x32xf32, #tpu.memory_space<vmem>>, vector<1x32xf32>
    %55 = vector.broadcast %54 : vector<1x32xf32> to vector<64x32xf32>
    %56 = arith.addf %53, %55 : vector<64x32xf32>
    %cst_37 = arith.constant 5.000000e-01 : f32
    %57 = vector.broadcast %cst_37 : f32 to vector<64x32xf32>
    %58 = arith.mulf %57, %56 : vector<64x32xf32>
    %cst_38 = arith.constant 0.707106769 : f32
    %59 = vector.broadcast %cst_38 : f32 to vector<64x32xf32>
    %60 = arith.mulf %56, %59 : vector<64x32xf32>
    %61 = math.erf %60 : vector<64x32xf32>
    %cst_39 = arith.constant 1.000000e+00 : f32
    %62 = vector.broadcast %cst_39 : f32 to vector<64x32xf32>
    %63 = arith.addf %62, %61 : vector<64x32xf32>
    %64 = arith.mulf %58, %63 : vector<64x32xf32>
    %c0_40 = arith.constant 0 : index
    %c0_41 = arith.constant 0 : index
    %65 = vector.load %arg17[%c0_40, %c0_41] : memref<64x32xf32, #tpu.memory_space<vmem>>, vector<64x32xf32>
    %c0_42 = arith.constant 0 : index
    %c0_43 = arith.constant 0 : index
    %66 = vector.load %arg19[%c0_42, %c0_43] : memref<4x16xf32, #tpu.memory_space<vmem>>, vector<1x16xf32>
    %c0_44 = arith.constant 0 : index
    %c0_45 = arith.constant 0 : index
    %67 = vector.load %arg12[%c0_44, %c0_45] : memref<2x32xf32, #tpu.memory_space<vmem>>, vector<1x32xf32>
    %c1_46 = arith.constant 1 : index
    %c0_47 = arith.constant 0 : index
    %68 = vector.load %arg12[%c1_46, %c0_47] : memref<2x32xf32, #tpu.memory_space<vmem>>, vector<1x32xf32>
    %cst_48 = arith.constant dense<0.000000e+00> : vector<64xf32>
    %69 = vector.multi_reduction <add>, %64, %cst_48 [1] : vector<64x32xf32> to vector<64xf32>
    %70 = vector.shape_cast %69 : vector<64xf32> to vector<64x1xf32>
    %cst_49 = arith.constant 3.200000e+01 : f32
    %71 = vector.broadcast %cst_49 : f32 to vector<64x1xf32>
    %72 = arith.divf %70, %71 : vector<64x1xf32>
    %73 = vector.broadcast %72 : vector<64x1xf32> to vector<64x32xf32>
    %74 = arith.subf %64, %73 : vector<64x32xf32>
    %75 = arith.mulf %74, %74 : vector<64x32xf32>
    %cst_50 = arith.constant dense<0.000000e+00> : vector<64xf32>
    %76 = vector.multi_reduction <add>, %75, %cst_50 [1] : vector<64x32xf32> to vector<64xf32>
    %77 = vector.shape_cast %76 : vector<64xf32> to vector<64x1xf32>
    %cst_51 = arith.constant 3.200000e+01 : f32
    %78 = vector.broadcast %cst_51 : f32 to vector<64x1xf32>
    %79 = arith.divf %77, %78 : vector<64x1xf32>
    %cst_52 = arith.constant 9.99999997E-7 : f32
    %80 = vector.broadcast %cst_52 : f32 to vector<64x1xf32>
    %81 = arith.addf %79, %80 : vector<64x1xf32>
    %82 = math.rsqrt %81 : vector<64x1xf32>
    %83 = vector.broadcast %82 : vector<64x1xf32> to vector<64x32xf32>
    %84 = arith.mulf %74, %83 : vector<64x32xf32>
    %85 = vector.broadcast %67 : vector<1x32xf32> to vector<64x32xf32>
    %86 = arith.mulf %84, %85 : vector<64x32xf32>
    %87 = vector.broadcast %68 : vector<1x32xf32> to vector<64x32xf32>
    %88 = arith.addf %86, %87 : vector<64x32xf32>
    %89 = arith.truncf %88 : vector<64x32xf32> to vector<64x32xbf16>
    %c0_53 = arith.constant 0 : index
    %c0_54 = arith.constant 0 : index
    %c0_55 = arith.constant 0 : index
    %90 = vector.load %arg13[%c0_53, %c0_54, %c0_55] : memref<2x32x16xbf16, #tpu.memory_space<vmem>>, vector<1x32x16xbf16>
    %91 = vector.shape_cast %90 : vector<1x32x16xbf16> to vector<32x16xbf16>
    %cst_56 = arith.constant dense<0.000000e+00> : vector<64x16xf32>
    %92 = tpu.matmul %89, %91, %cst_56 {dimension_numbers = #tpu.dot_dimension_numbers<[1], [0], [0], [1], [0, 0, 1, 1], [], []>} : vector<64x32xbf16>, vector<32x16xbf16>, vector<64x16xf32> -> vector<64x16xf32>
    %c0_57 = arith.constant 0 : index
    %c0_58 = arith.constant 0 : index
    %c0_59 = arith.constant 0 : index
    %93 = vector.load %arg14[%c0_57, %c0_58, %c0_59] : memref<2x32x16xbf16, #tpu.memory_space<vmem>>, vector<1x32x16xbf16>
    %94 = vector.shape_cast %93 : vector<1x32x16xbf16> to vector<32x16xbf16>
    %cst_60 = arith.constant dense<0.000000e+00> : vector<64x16xf32>
    %95 = tpu.matmul %89, %94, %cst_60 {dimension_numbers = #tpu.dot_dimension_numbers<[1], [0], [0], [1], [0, 0, 1, 1], [], []>} : vector<64x32xbf16>, vector<32x16xbf16>, vector<64x16xf32> -> vector<64x16xf32>
    %96 = arith.truncf %95 : vector<64x16xf32> to vector<64x16xbf16>
    %cst_61 = arith.constant dense<0.000000e+00> : vector<32x16xf32>
    %97 = tpu.matmul %0, %96, %cst_61 {dimension_numbers = #tpu.dot_dimension_numbers<[1], [0], [0], [1], [0, 0, 1, 1], [], []>} : vector<32x64xbf16>, vector<64x16xbf16>, vector<32x16xf32> -> vector<32x16xf32>
    %98 = arith.negf %97 : vector<32x16xf32>
    %99 = math.exp %98 : vector<32x16xf32>
    %cst_62 = arith.constant 1.000000e+00 : f32
    %100 = vector.broadcast %cst_62 : f32 to vector<32x16xf32>
    %101 = arith.addf %100, %99 : vector<32x16xf32>
    %102 = arith.divf %100, %101 : vector<32x16xf32>
    %c0_63 = arith.constant 0 : index
    %c0_64 = arith.constant 0 : index
    %c0_65 = arith.constant 0 : index
    %103 = vector.load %arg15[%c0_63, %c0_64, %c0_65] : memref<2x32x16xbf16, #tpu.memory_space<vmem>>, vector<1x32x16xbf16>
    %104 = vector.shape_cast %103 : vector<1x32x16xbf16> to vector<32x16xbf16>
    %cst_66 = arith.constant dense<0.000000e+00> : vector<64x16xf32>
    %105 = tpu.matmul %89, %104, %cst_66 {dimension_numbers = #tpu.dot_dimension_numbers<[1], [0], [0], [1], [0, 0, 1, 1], [], []>} : vector<64x32xbf16>, vector<32x16xbf16>, vector<64x16xf32> -> vector<64x16xf32>
    %106 = arith.truncf %105 : vector<64x16xf32> to vector<64x16xbf16>
    %cst_67 = arith.constant dense<0.000000e+00> : vector<32x16xf32>
    %107 = tpu.matmul %0, %106, %cst_67 {dimension_numbers = #tpu.dot_dimension_numbers<[1], [0], [0], [1], [0, 0, 1, 1], [], []>} : vector<32x64xbf16>, vector<64x16xbf16>, vector<32x16xf32> -> vector<32x16xf32>
    %108 = arith.negf %107 : vector<32x16xf32>
    %109 = math.exp %108 : vector<32x16xf32>
    %cst_68 = arith.constant 1.000000e+00 : f32
    %110 = vector.broadcast %cst_68 : f32 to vector<32x16xf32>
    %111 = arith.addf %110, %109 : vector<32x16xf32>
    %112 = arith.divf %110, %111 : vector<32x16xf32>
    %113 = arith.truncf %92 : vector<64x16xf32> to vector<64x16xbf16>
    %114 = arith.truncf %102 : vector<32x16xf32> to vector<32x16xbf16>
    %cst_69 = arith.constant dense<0.000000e+00> : vector<64x32xf32>
    %115 = tpu.matmul %113, %114, %cst_69 {dimension_numbers = #tpu.dot_dimension_numbers<[1], [1], [0], [0], [0, 0, 1, 0], [], []>} : vector<64x16xbf16>, vector<32x16xbf16>, vector<64x32xf32> -> vector<64x32xf32>
    %cst_70 = arith.constant 2.500000e-01 : f32
    %116 = vector.broadcast %cst_70 : f32 to vector<64x32xf32>
    %117 = arith.mulf %115, %116 : vector<64x32xf32>
    %118 = arith.addf %117, %65 : vector<64x32xf32>
    %cst_71 = arith.constant dense<0xFF800000> : vector<64xf32>
    %119 = vector.multi_reduction <maximumf>, %118, %cst_71 [1] : vector<64x32xf32> to vector<64xf32>
    %120 = vector.shape_cast %119 : vector<64xf32> to vector<64x1xf32>
    %121 = vector.broadcast %120 : vector<64x1xf32> to vector<64x32xf32>
    %122 = arith.subf %118, %121 : vector<64x32xf32>
    %123 = math.exp %122 : vector<64x32xf32>
    %cst_72 = arith.constant dense<0.000000e+00> : vector<64xf32>
    %124 = vector.multi_reduction <add>, %123, %cst_72 [1] : vector<64x32xf32> to vector<64xf32>
    %125 = vector.shape_cast %124 : vector<64xf32> to vector<64x1xf32>
    %126 = tpu.reciprocal %125 {approx = true} : vector<64x1xf32> -> vector<64x1xf32>
    %127 = vector.broadcast %126 : vector<64x1xf32> to vector<64x32xf32>
    %128 = arith.mulf %123, %127 : vector<64x32xf32>
    %129 = arith.truncf %128 : vector<64x32xf32> to vector<64x32xbf16>
    %130 = arith.truncf %112 : vector<32x16xf32> to vector<32x16xbf16>
    %cst_73 = arith.constant dense<0.000000e+00> : vector<64x16xf32>
    %131 = tpu.matmul %129, %130, %cst_73 {dimension_numbers = #tpu.dot_dimension_numbers<[1], [0], [0], [1], [0, 0, 1, 1], [], []>} : vector<64x32xbf16>, vector<32x16xbf16>, vector<64x16xf32> -> vector<64x16xf32>
    %132 = arith.truncf %131 : vector<64x16xf32> to vector<64x16xbf16>
    %c0_74 = arith.constant 0 : index
    %c0_75 = arith.constant 0 : index
    %c0_76 = arith.constant 0 : index
    %133 = vector.load %arg16[%c0_74, %c0_75, %c0_76] : memref<2x16x16xbf16, #tpu.memory_space<vmem>>, vector<1x16x16xbf16>
    %134 = vector.shape_cast %133 : vector<1x16x16xbf16> to vector<16x16xbf16>
    %cst_77 = arith.constant dense<0.000000e+00> : vector<64x16xf32>
    %135 = tpu.matmul %132, %134, %cst_77 {dimension_numbers = #tpu.dot_dimension_numbers<[1], [0], [0], [1], [0, 0, 1, 1], [], []>} : vector<64x16xbf16>, vector<16x16xbf16>, vector<64x16xf32> -> vector<64x16xf32>
    %c1_78 = arith.constant 1 : index
    %c0_79 = arith.constant 0 : index
    %c0_80 = arith.constant 0 : index
    %136 = vector.load %arg13[%c1_78, %c0_79, %c0_80] : memref<2x32x16xbf16, #tpu.memory_space<vmem>>, vector<1x32x16xbf16>
    %137 = vector.shape_cast %136 : vector<1x32x16xbf16> to vector<32x16xbf16>
    %cst_81 = arith.constant dense<0.000000e+00> : vector<64x16xf32>
    %138 = tpu.matmul %89, %137, %cst_81 {dimension_numbers = #tpu.dot_dimension_numbers<[1], [0], [0], [1], [0, 0, 1, 1], [], []>} : vector<64x32xbf16>, vector<32x16xbf16>, vector<64x16xf32> -> vector<64x16xf32>
    %c1_82 = arith.constant 1 : index
    %c0_83 = arith.constant 0 : index
    %c0_84 = arith.constant 0 : index
    %139 = vector.load %arg14[%c1_82, %c0_83, %c0_84] : memref<2x32x16xbf16, #tpu.memory_space<vmem>>, vector<1x32x16xbf16>
    %140 = vector.shape_cast %139 : vector<1x32x16xbf16> to vector<32x16xbf16>
    %cst_85 = arith.constant dense<0.000000e+00> : vector<64x16xf32>
    %141 = tpu.matmul %89, %140, %cst_85 {dimension_numbers = #tpu.dot_dimension_numbers<[1], [0], [0], [1], [0, 0, 1, 1], [], []>} : vector<64x32xbf16>, vector<32x16xbf16>, vector<64x16xf32> -> vector<64x16xf32>
    %142 = arith.truncf %141 : vector<64x16xf32> to vector<64x16xbf16>
    %cst_86 = arith.constant dense<0.000000e+00> : vector<32x16xf32>
    %143 = tpu.matmul %0, %142, %cst_86 {dimension_numbers = #tpu.dot_dimension_numbers<[1], [0], [0], [1], [0, 0, 1, 1], [], []>} : vector<32x64xbf16>, vector<64x16xbf16>, vector<32x16xf32> -> vector<32x16xf32>
    %144 = arith.negf %143 : vector<32x16xf32>
    %145 = math.exp %144 : vector<32x16xf32>
    %cst_87 = arith.constant 1.000000e+00 : f32
    %146 = vector.broadcast %cst_87 : f32 to vector<32x16xf32>
    %147 = arith.addf %146, %145 : vector<32x16xf32>
    %148 = arith.divf %146, %147 : vector<32x16xf32>
    %c1_88 = arith.constant 1 : index
    %c0_89 = arith.constant 0 : index
    %c0_90 = arith.constant 0 : index
    %149 = vector.load %arg15[%c1_88, %c0_89, %c0_90] : memref<2x32x16xbf16, #tpu.memory_space<vmem>>, vector<1x32x16xbf16>
    %150 = vector.shape_cast %149 : vector<1x32x16xbf16> to vector<32x16xbf16>
    %cst_91 = arith.constant dense<0.000000e+00> : vector<64x16xf32>
    %151 = tpu.matmul %89, %150, %cst_91 {dimension_numbers = #tpu.dot_dimension_numbers<[1], [0], [0], [1], [0, 0, 1, 1], [], []>} : vector<64x32xbf16>, vector<32x16xbf16>, vector<64x16xf32> -> vector<64x16xf32>
    %152 = arith.truncf %151 : vector<64x16xf32> to vector<64x16xbf16>
    %cst_92 = arith.constant dense<0.000000e+00> : vector<32x16xf32>
    %153 = tpu.matmul %0, %152, %cst_92 {dimension_numbers = #tpu.dot_dimension_numbers<[1], [0], [0], [1], [0, 0, 1, 1], [], []>} : vector<32x64xbf16>, vector<64x16xbf16>, vector<32x16xf32> -> vector<32x16xf32>
    %154 = arith.negf %153 : vector<32x16xf32>
    %155 = math.exp %154 : vector<32x16xf32>
    %cst_93 = arith.constant 1.000000e+00 : f32
    %156 = vector.broadcast %cst_93 : f32 to vector<32x16xf32>
    %157 = arith.addf %156, %155 : vector<32x16xf32>
    %158 = arith.divf %156, %157 : vector<32x16xf32>
    %159 = arith.truncf %138 : vector<64x16xf32> to vector<64x16xbf16>
    %160 = arith.truncf %148 : vector<32x16xf32> to vector<32x16xbf16>
    %cst_94 = arith.constant dense<0.000000e+00> : vector<64x32xf32>
    %161 = tpu.matmul %159, %160, %cst_94 {dimension_numbers = #tpu.dot_dimension_numbers<[1], [1], [0], [0], [0, 0, 1, 0], [], []>} : vector<64x16xbf16>, vector<32x16xbf16>, vector<64x32xf32> -> vector<64x32xf32>
    %cst_95 = arith.constant 2.500000e-01 : f32
    %162 = vector.broadcast %cst_95 : f32 to vector<64x32xf32>
    %163 = arith.mulf %161, %162 : vector<64x32xf32>
    %164 = arith.addf %163, %65 : vector<64x32xf32>
    %cst_96 = arith.constant dense<0xFF800000> : vector<64xf32>
    %165 = vector.multi_reduction <maximumf>, %164, %cst_96 [1] : vector<64x32xf32> to vector<64xf32>
    %166 = vector.shape_cast %165 : vector<64xf32> to vector<64x1xf32>
    %167 = vector.broadcast %166 : vector<64x1xf32> to vector<64x32xf32>
    %168 = arith.subf %164, %167 : vector<64x32xf32>
    %169 = math.exp %168 : vector<64x32xf32>
    %cst_97 = arith.constant dense<0.000000e+00> : vector<64xf32>
    %170 = vector.multi_reduction <add>, %169, %cst_97 [1] : vector<64x32xf32> to vector<64xf32>
    %171 = vector.shape_cast %170 : vector<64xf32> to vector<64x1xf32>
    %172 = tpu.reciprocal %171 {approx = true} : vector<64x1xf32> -> vector<64x1xf32>
    %173 = vector.broadcast %172 : vector<64x1xf32> to vector<64x32xf32>
    %174 = arith.mulf %169, %173 : vector<64x32xf32>
    %175 = arith.truncf %174 : vector<64x32xf32> to vector<64x32xbf16>
    %176 = arith.truncf %158 : vector<32x16xf32> to vector<32x16xbf16>
    %cst_98 = arith.constant dense<0.000000e+00> : vector<64x16xf32>
    %177 = tpu.matmul %175, %176, %cst_98 {dimension_numbers = #tpu.dot_dimension_numbers<[1], [0], [0], [1], [0, 0, 1, 1], [], []>} : vector<64x32xbf16>, vector<32x16xbf16>, vector<64x16xf32> -> vector<64x16xf32>
    %178 = arith.truncf %177 : vector<64x16xf32> to vector<64x16xbf16>
    %c1_99 = arith.constant 1 : index
    %c0_100 = arith.constant 0 : index
    %c0_101 = arith.constant 0 : index
    %179 = vector.load %arg16[%c1_99, %c0_100, %c0_101] : memref<2x16x16xbf16, #tpu.memory_space<vmem>>, vector<1x16x16xbf16>
    %180 = vector.shape_cast %179 : vector<1x16x16xbf16> to vector<16x16xbf16>
    %cst_102 = arith.constant dense<0.000000e+00> : vector<64x16xf32>
    %181 = tpu.matmul %178, %180, %cst_102 {dimension_numbers = #tpu.dot_dimension_numbers<[1], [0], [0], [1], [0, 0, 1, 1], [], []>} : vector<64x16xbf16>, vector<16x16xbf16>, vector<64x16xf32> -> vector<64x16xf32>
    %182 = arith.addf %135, %181 : vector<64x16xf32>
    %183 = vector.broadcast %66 : vector<1x16xf32> to vector<64x16xf32>
    %184 = arith.addf %182, %183 : vector<64x16xf32>
    %185 = arith.truncf %64 : vector<64x32xf32> to vector<64x32xbf16>
    %c0_103 = arith.constant 0 : index
    %c0_104 = arith.constant 0 : index
    %186 = vector.load %arg18[%c0_103, %c0_104] : memref<32x16xbf16, #tpu.memory_space<vmem>>, vector<32x16xbf16>
    %cst_105 = arith.constant dense<0.000000e+00> : vector<64x16xf32>
    %187 = tpu.matmul %185, %186, %cst_105 {dimension_numbers = #tpu.dot_dimension_numbers<[1], [0], [0], [1], [0, 0, 1, 1], [], []>} : vector<64x32xbf16>, vector<32x16xbf16>, vector<64x16xf32> -> vector<64x16xf32>
    %188 = arith.addf %187, %184 : vector<64x16xf32>
    %c1_106 = arith.constant 1 : index
    %c0_107 = arith.constant 0 : index
    %189 = vector.load %arg19[%c1_106, %c0_107] : memref<4x16xf32, #tpu.memory_space<vmem>>, vector<1x16xf32>
    %c2 = arith.constant 2 : index
    %c0_108 = arith.constant 0 : index
    %190 = vector.load %arg19[%c2, %c0_108] : memref<4x16xf32, #tpu.memory_space<vmem>>, vector<1x16xf32>
    %c3 = arith.constant 3 : index
    %c0_109 = arith.constant 0 : index
    %191 = vector.load %arg19[%c3, %c0_109] : memref<4x16xf32, #tpu.memory_space<vmem>>, vector<1x16xf32>
    %c0_110 = arith.constant 0 : index
    %c0_111 = arith.constant 0 : index
    %192 = vector.load %arg21[%c0_110, %c0_111] : memref<2x64xf32, #tpu.memory_space<vmem>>, vector<1x64xf32>
    %c1_112 = arith.constant 1 : index
    %c0_113 = arith.constant 0 : index
    %193 = vector.load %arg21[%c1_112, %c0_113] : memref<2x64xf32, #tpu.memory_space<vmem>>, vector<1x64xf32>
    %cst_114 = arith.constant dense<0.000000e+00> : vector<64xf32>
    %194 = vector.multi_reduction <add>, %188, %cst_114 [1] : vector<64x16xf32> to vector<64xf32>
    %195 = vector.shape_cast %194 : vector<64xf32> to vector<64x1xf32>
    %cst_115 = arith.constant 1.600000e+01 : f32
    %196 = vector.broadcast %cst_115 : f32 to vector<64x1xf32>
    %197 = arith.divf %195, %196 : vector<64x1xf32>
    %198 = vector.broadcast %197 : vector<64x1xf32> to vector<64x16xf32>
    %199 = arith.subf %188, %198 : vector<64x16xf32>
    %200 = arith.mulf %199, %199 : vector<64x16xf32>
    %cst_116 = arith.constant dense<0.000000e+00> : vector<64xf32>
    %201 = vector.multi_reduction <add>, %200, %cst_116 [1] : vector<64x16xf32> to vector<64xf32>
    %202 = vector.shape_cast %201 : vector<64xf32> to vector<64x1xf32>
    %cst_117 = arith.constant 1.600000e+01 : f32
    %203 = vector.broadcast %cst_117 : f32 to vector<64x1xf32>
    %204 = arith.divf %202, %203 : vector<64x1xf32>
    %cst_118 = arith.constant 9.99999997E-7 : f32
    %205 = vector.broadcast %cst_118 : f32 to vector<64x1xf32>
    %206 = arith.addf %204, %205 : vector<64x1xf32>
    %207 = math.rsqrt %206 : vector<64x1xf32>
    %208 = vector.broadcast %207 : vector<64x1xf32> to vector<64x16xf32>
    %209 = arith.mulf %199, %208 : vector<64x16xf32>
    %210 = vector.broadcast %189 : vector<1x16xf32> to vector<64x16xf32>
    %211 = arith.mulf %209, %210 : vector<64x16xf32>
    %212 = vector.broadcast %190 : vector<1x16xf32> to vector<64x16xf32>
    %213 = arith.addf %211, %212 : vector<64x16xf32>
    %214 = arith.truncf %213 : vector<64x16xf32> to vector<64x16xbf16>
    %c0_119 = arith.constant 0 : index
    %c0_120 = arith.constant 0 : index
    %215 = vector.load %arg20[%c0_119, %c0_120] : memref<16x64xbf16, #tpu.memory_space<vmem>>, vector<16x64xbf16>
    %cst_121 = arith.constant dense<0.000000e+00> : vector<64x64xf32>
    %216 = tpu.matmul %214, %215, %cst_121 {dimension_numbers = #tpu.dot_dimension_numbers<[1], [0], [0], [1], [0, 0, 1, 1], [], []>} : vector<64x16xbf16>, vector<16x64xbf16>, vector<64x64xf32> -> vector<64x64xf32>
    %217 = vector.broadcast %192 : vector<1x64xf32> to vector<64x64xf32>
    %218 = arith.addf %216, %217 : vector<64x64xf32>
    %cst_122 = arith.constant 5.000000e-01 : f32
    %219 = vector.broadcast %cst_122 : f32 to vector<64x64xf32>
    %220 = arith.mulf %219, %218 : vector<64x64xf32>
    %cst_123 = arith.constant 0.707106769 : f32
    %221 = vector.broadcast %cst_123 : f32 to vector<64x64xf32>
    %222 = arith.mulf %218, %221 : vector<64x64xf32>
    %223 = math.erf %222 : vector<64x64xf32>
    %cst_124 = arith.constant 1.000000e+00 : f32
    %224 = vector.broadcast %cst_124 : f32 to vector<64x64xf32>
    %225 = arith.addf %224, %223 : vector<64x64xf32>
    %226 = arith.mulf %220, %225 : vector<64x64xf32>
    %227 = arith.truncf %226 : vector<64x64xf32> to vector<64x64xbf16>
    %c4 = arith.constant 4 : index
    %c0_125 = arith.constant 0 : index
    %228 = vector.load %arg22[%c4, %c0_125] : memref<9x64xf32, #tpu.memory_space<vmem>>, vector<1x64xf32>
    %229 = vector.broadcast %228 : vector<1x64xf32> to vector<64x64xf32>
    %230 = arith.mulf %226, %229 : vector<64x64xf32>
    %c0_126 = arith.constant 0 : index
    %c0_127 = arith.constant 0 : index
    %c0_128 = arith.constant 0 : index
    %231 = vector.load %arg11[%c0_126, %c0_127, %c0_128] : memref<9x64x64xbf16, #tpu.memory_space<vmem>>, vector<1x64x64xbf16>
    %232 = vector.shape_cast %231 : vector<1x64x64xbf16> to vector<64x64xbf16>
    %cst_129 = arith.constant dense<0.000000e+00> : vector<64x64xf32>
    %233 = tpu.matmul %232, %227, %cst_129 {dimension_numbers = #tpu.dot_dimension_numbers<[1], [0], [0], [1], [0, 0, 1, 1], [], []>} : vector<64x64xbf16>, vector<64x64xbf16>, vector<64x64xf32> -> vector<64x64xf32>
    %c0_130 = arith.constant 0 : index
    %c0_131 = arith.constant 0 : index
    %234 = vector.load %arg22[%c0_130, %c0_131] : memref<9x64xf32, #tpu.memory_space<vmem>>, vector<1x64xf32>
    %235 = vector.broadcast %234 : vector<1x64xf32> to vector<64x64xf32>
    %236 = arith.mulf %233, %235 : vector<64x64xf32>
    %237 = arith.addf %230, %236 : vector<64x64xf32>
    %c1_132 = arith.constant 1 : index
    %c0_133 = arith.constant 0 : index
    %c0_134 = arith.constant 0 : index
    %238 = vector.load %arg11[%c1_132, %c0_133, %c0_134] : memref<9x64x64xbf16, #tpu.memory_space<vmem>>, vector<1x64x64xbf16>
    %239 = vector.shape_cast %238 : vector<1x64x64xbf16> to vector<64x64xbf16>
    %cst_135 = arith.constant dense<0.000000e+00> : vector<64x64xf32>
    %240 = tpu.matmul %239, %227, %cst_135 {dimension_numbers = #tpu.dot_dimension_numbers<[1], [0], [0], [1], [0, 0, 1, 1], [], []>} : vector<64x64xbf16>, vector<64x64xbf16>, vector<64x64xf32> -> vector<64x64xf32>
    %c1_136 = arith.constant 1 : index
    %c0_137 = arith.constant 0 : index
    %241 = vector.load %arg22[%c1_136, %c0_137] : memref<9x64xf32, #tpu.memory_space<vmem>>, vector<1x64xf32>
    %242 = vector.broadcast %241 : vector<1x64xf32> to vector<64x64xf32>
    %243 = arith.mulf %240, %242 : vector<64x64xf32>
    %244 = arith.addf %237, %243 : vector<64x64xf32>
    %c2_138 = arith.constant 2 : index
    %c0_139 = arith.constant 0 : index
    %c0_140 = arith.constant 0 : index
    %245 = vector.load %arg11[%c2_138, %c0_139, %c0_140] : memref<9x64x64xbf16, #tpu.memory_space<vmem>>, vector<1x64x64xbf16>
    %246 = vector.shape_cast %245 : vector<1x64x64xbf16> to vector<64x64xbf16>
    %cst_141 = arith.constant dense<0.000000e+00> : vector<64x64xf32>
    %247 = tpu.matmul %246, %227, %cst_141 {dimension_numbers = #tpu.dot_dimension_numbers<[1], [0], [0], [1], [0, 0, 1, 1], [], []>} : vector<64x64xbf16>, vector<64x64xbf16>, vector<64x64xf32> -> vector<64x64xf32>
    %c2_142 = arith.constant 2 : index
    %c0_143 = arith.constant 0 : index
    %248 = vector.load %arg22[%c2_142, %c0_143] : memref<9x64xf32, #tpu.memory_space<vmem>>, vector<1x64xf32>
    %249 = vector.broadcast %248 : vector<1x64xf32> to vector<64x64xf32>
    %250 = arith.mulf %247, %249 : vector<64x64xf32>
    %251 = arith.addf %244, %250 : vector<64x64xf32>
    %c3_144 = arith.constant 3 : index
    %c0_145 = arith.constant 0 : index
    %c0_146 = arith.constant 0 : index
    %252 = vector.load %arg11[%c3_144, %c0_145, %c0_146] : memref<9x64x64xbf16, #tpu.memory_space<vmem>>, vector<1x64x64xbf16>
    %253 = vector.shape_cast %252 : vector<1x64x64xbf16> to vector<64x64xbf16>
    %cst_147 = arith.constant dense<0.000000e+00> : vector<64x64xf32>
    %254 = tpu.matmul %253, %227, %cst_147 {dimension_numbers = #tpu.dot_dimension_numbers<[1], [0], [0], [1], [0, 0, 1, 1], [], []>} : vector<64x64xbf16>, vector<64x64xbf16>, vector<64x64xf32> -> vector<64x64xf32>
    %c3_148 = arith.constant 3 : index
    %c0_149 = arith.constant 0 : index
    %255 = vector.load %arg22[%c3_148, %c0_149] : memref<9x64xf32, #tpu.memory_space<vmem>>, vector<1x64xf32>
    %256 = vector.broadcast %255 : vector<1x64xf32> to vector<64x64xf32>
    %257 = arith.mulf %254, %256 : vector<64x64xf32>
    %258 = arith.addf %251, %257 : vector<64x64xf32>
    %c5 = arith.constant 5 : index
    %c0_150 = arith.constant 0 : index
    %c0_151 = arith.constant 0 : index
    %259 = vector.load %arg11[%c5, %c0_150, %c0_151] : memref<9x64x64xbf16, #tpu.memory_space<vmem>>, vector<1x64x64xbf16>
    %260 = vector.shape_cast %259 : vector<1x64x64xbf16> to vector<64x64xbf16>
    %cst_152 = arith.constant dense<0.000000e+00> : vector<64x64xf32>
    %261 = tpu.matmul %260, %227, %cst_152 {dimension_numbers = #tpu.dot_dimension_numbers<[1], [0], [0], [1], [0, 0, 1, 1], [], []>} : vector<64x64xbf16>, vector<64x64xbf16>, vector<64x64xf32> -> vector<64x64xf32>
    %c5_153 = arith.constant 5 : index
    %c0_154 = arith.constant 0 : index
    %262 = vector.load %arg22[%c5_153, %c0_154] : memref<9x64xf32, #tpu.memory_space<vmem>>, vector<1x64xf32>
    %263 = vector.broadcast %262 : vector<1x64xf32> to vector<64x64xf32>
    %264 = arith.mulf %261, %263 : vector<64x64xf32>
    %265 = arith.addf %258, %264 : vector<64x64xf32>
    %c6 = arith.constant 6 : index
    %c0_155 = arith.constant 0 : index
    %c0_156 = arith.constant 0 : index
    %266 = vector.load %arg11[%c6, %c0_155, %c0_156] : memref<9x64x64xbf16, #tpu.memory_space<vmem>>, vector<1x64x64xbf16>
    %267 = vector.shape_cast %266 : vector<1x64x64xbf16> to vector<64x64xbf16>
    %cst_157 = arith.constant dense<0.000000e+00> : vector<64x64xf32>
    %268 = tpu.matmul %267, %227, %cst_157 {dimension_numbers = #tpu.dot_dimension_numbers<[1], [0], [0], [1], [0, 0, 1, 1], [], []>} : vector<64x64xbf16>, vector<64x64xbf16>, vector<64x64xf32> -> vector<64x64xf32>
    %c6_158 = arith.constant 6 : index
    %c0_159 = arith.constant 0 : index
    %269 = vector.load %arg22[%c6_158, %c0_159] : memref<9x64xf32, #tpu.memory_space<vmem>>, vector<1x64xf32>
    %270 = vector.broadcast %269 : vector<1x64xf32> to vector<64x64xf32>
    %271 = arith.mulf %268, %270 : vector<64x64xf32>
    %272 = arith.addf %265, %271 : vector<64x64xf32>
    %c7 = arith.constant 7 : index
    %c0_160 = arith.constant 0 : index
    %c0_161 = arith.constant 0 : index
    %273 = vector.load %arg11[%c7, %c0_160, %c0_161] : memref<9x64x64xbf16, #tpu.memory_space<vmem>>, vector<1x64x64xbf16>
    %274 = vector.shape_cast %273 : vector<1x64x64xbf16> to vector<64x64xbf16>
    %cst_162 = arith.constant dense<0.000000e+00> : vector<64x64xf32>
    %275 = tpu.matmul %274, %227, %cst_162 {dimension_numbers = #tpu.dot_dimension_numbers<[1], [0], [0], [1], [0, 0, 1, 1], [], []>} : vector<64x64xbf16>, vector<64x64xbf16>, vector<64x64xf32> -> vector<64x64xf32>
    %c7_163 = arith.constant 7 : index
    %c0_164 = arith.constant 0 : index
    %276 = vector.load %arg22[%c7_163, %c0_164] : memref<9x64xf32, #tpu.memory_space<vmem>>, vector<1x64xf32>
    %277 = vector.broadcast %276 : vector<1x64xf32> to vector<64x64xf32>
    %278 = arith.mulf %275, %277 : vector<64x64xf32>
    %279 = arith.addf %272, %278 : vector<64x64xf32>
    %c8 = arith.constant 8 : index
    %c0_165 = arith.constant 0 : index
    %c0_166 = arith.constant 0 : index
    %280 = vector.load %arg11[%c8, %c0_165, %c0_166] : memref<9x64x64xbf16, #tpu.memory_space<vmem>>, vector<1x64x64xbf16>
    %281 = vector.shape_cast %280 : vector<1x64x64xbf16> to vector<64x64xbf16>
    %cst_167 = arith.constant dense<0.000000e+00> : vector<64x64xf32>
    %282 = tpu.matmul %281, %227, %cst_167 {dimension_numbers = #tpu.dot_dimension_numbers<[1], [0], [0], [1], [0, 0, 1, 1], [], []>} : vector<64x64xbf16>, vector<64x64xbf16>, vector<64x64xf32> -> vector<64x64xf32>
    %c8_168 = arith.constant 8 : index
    %c0_169 = arith.constant 0 : index
    %283 = vector.load %arg22[%c8_168, %c0_169] : memref<9x64xf32, #tpu.memory_space<vmem>>, vector<1x64xf32>
    %284 = vector.broadcast %283 : vector<1x64xf32> to vector<64x64xf32>
    %285 = arith.mulf %282, %284 : vector<64x64xf32>
    %286 = arith.addf %279, %285 : vector<64x64xf32>
    %287 = vector.broadcast %193 : vector<1x64xf32> to vector<64x64xf32>
    %288 = arith.addf %286, %287 : vector<64x64xf32>
    %cst_170 = arith.constant 5.000000e-01 : f32
    %289 = vector.broadcast %cst_170 : f32 to vector<64x64xf32>
    %290 = arith.mulf %289, %288 : vector<64x64xf32>
    %cst_171 = arith.constant 0.707106769 : f32
    %291 = vector.broadcast %cst_171 : f32 to vector<64x64xf32>
    %292 = arith.mulf %288, %291 : vector<64x64xf32>
    %293 = math.erf %292 : vector<64x64xf32>
    %cst_172 = arith.constant 1.000000e+00 : f32
    %294 = vector.broadcast %cst_172 : f32 to vector<64x64xf32>
    %295 = arith.addf %294, %293 : vector<64x64xf32>
    %296 = arith.mulf %290, %295 : vector<64x64xf32>
    %297 = arith.addf %226, %296 : vector<64x64xf32>
    %298 = arith.truncf %297 : vector<64x64xf32> to vector<64x64xbf16>
    %c0_173 = arith.constant 0 : index
    %c0_174 = arith.constant 0 : index
    %299 = vector.load %arg23[%c0_173, %c0_174] : memref<64x16xbf16, #tpu.memory_space<vmem>>, vector<64x16xbf16>
    %cst_175 = arith.constant dense<0.000000e+00> : vector<64x16xf32>
    %300 = tpu.matmul %298, %299, %cst_175 {dimension_numbers = #tpu.dot_dimension_numbers<[1], [0], [0], [1], [0, 0, 1, 1], [], []>} : vector<64x64xbf16>, vector<64x16xbf16>, vector<64x16xf32> -> vector<64x16xf32>
    %301 = vector.broadcast %191 : vector<1x16xf32> to vector<64x16xf32>
    %302 = arith.addf %300, %301 : vector<64x16xf32>
    %303 = arith.addf %302, %188 : vector<64x16xf32>
    %c0_176 = arith.constant 0 : index
    %c0_177 = arith.constant 0 : index
    %304 = vector.load %arg29[%c0_176, %c0_177] : memref<64x32xf32, #tpu.memory_space<vmem>>, vector<64x32xf32>
    %c0_178 = arith.constant 0 : index
    %c0_179 = arith.constant 0 : index
    %305 = vector.load %arg30[%c0_178, %c0_179] : memref<4x16xf32, #tpu.memory_space<vmem>>, vector<1x16xf32>
    %c0_180 = arith.constant 0 : index
    %c0_181 = arith.constant 0 : index
    %306 = vector.load %arg24[%c0_180, %c0_181] : memref<2x16xf32, #tpu.memory_space<vmem>>, vector<1x16xf32>
    %c1_182 = arith.constant 1 : index
    %c0_183 = arith.constant 0 : index
    %307 = vector.load %arg24[%c1_182, %c0_183] : memref<2x16xf32, #tpu.memory_space<vmem>>, vector<1x16xf32>
    %cst_184 = arith.constant dense<0.000000e+00> : vector<64xf32>
    %308 = vector.multi_reduction <add>, %303, %cst_184 [1] : vector<64x16xf32> to vector<64xf32>
    %309 = vector.shape_cast %308 : vector<64xf32> to vector<64x1xf32>
    %cst_185 = arith.constant 1.600000e+01 : f32
    %310 = vector.broadcast %cst_185 : f32 to vector<64x1xf32>
    %311 = arith.divf %309, %310 : vector<64x1xf32>
    %312 = vector.broadcast %311 : vector<64x1xf32> to vector<64x16xf32>
    %313 = arith.subf %303, %312 : vector<64x16xf32>
    %314 = arith.mulf %313, %313 : vector<64x16xf32>
    %cst_186 = arith.constant dense<0.000000e+00> : vector<64xf32>
    %315 = vector.multi_reduction <add>, %314, %cst_186 [1] : vector<64x16xf32> to vector<64xf32>
    %316 = vector.shape_cast %315 : vector<64xf32> to vector<64x1xf32>
    %cst_187 = arith.constant 1.600000e+01 : f32
    %317 = vector.broadcast %cst_187 : f32 to vector<64x1xf32>
    %318 = arith.divf %316, %317 : vector<64x1xf32>
    %cst_188 = arith.constant 9.99999997E-7 : f32
    %319 = vector.broadcast %cst_188 : f32 to vector<64x1xf32>
    %320 = arith.addf %318, %319 : vector<64x1xf32>
    %321 = math.rsqrt %320 : vector<64x1xf32>
    %322 = vector.broadcast %321 : vector<64x1xf32> to vector<64x16xf32>
    %323 = arith.mulf %313, %322 : vector<64x16xf32>
    %324 = vector.broadcast %306 : vector<1x16xf32> to vector<64x16xf32>
    %325 = arith.mulf %323, %324 : vector<64x16xf32>
    %326 = vector.broadcast %307 : vector<1x16xf32> to vector<64x16xf32>
    %327 = arith.addf %325, %326 : vector<64x16xf32>
    %328 = arith.truncf %327 : vector<64x16xf32> to vector<64x16xbf16>
    %c0_189 = arith.constant 0 : index
    %c0_190 = arith.constant 0 : index
    %c0_191 = arith.constant 0 : index
    %329 = vector.load %arg25[%c0_189, %c0_190, %c0_191] : memref<2x16x8xbf16, #tpu.memory_space<vmem>>, vector<1x16x8xbf16>
    %330 = vector.shape_cast %329 : vector<1x16x8xbf16> to vector<16x8xbf16>
    %cst_192 = arith.constant dense<0.000000e+00> : vector<64x8xf32>
    %331 = tpu.matmul %328, %330, %cst_192 {dimension_numbers = #tpu.dot_dimension_numbers<[1], [0], [0], [1], [0, 0, 1, 1], [], []>} : vector<64x16xbf16>, vector<16x8xbf16>, vector<64x8xf32> -> vector<64x8xf32>
    %c0_193 = arith.constant 0 : index
    %c0_194 = arith.constant 0 : index
    %c0_195 = arith.constant 0 : index
    %332 = vector.load %arg26[%c0_193, %c0_194, %c0_195] : memref<2x16x8xbf16, #tpu.memory_space<vmem>>, vector<1x16x8xbf16>
    %333 = vector.shape_cast %332 : vector<1x16x8xbf16> to vector<16x8xbf16>
    %cst_196 = arith.constant dense<0.000000e+00> : vector<64x8xf32>
    %334 = tpu.matmul %328, %333, %cst_196 {dimension_numbers = #tpu.dot_dimension_numbers<[1], [0], [0], [1], [0, 0, 1, 1], [], []>} : vector<64x16xbf16>, vector<16x8xbf16>, vector<64x8xf32> -> vector<64x8xf32>
    %335 = arith.truncf %334 : vector<64x8xf32> to vector<64x8xbf16>
    %cst_197 = arith.constant dense<0.000000e+00> : vector<32x8xf32>
    %336 = tpu.matmul %0, %335, %cst_197 {dimension_numbers = #tpu.dot_dimension_numbers<[1], [0], [0], [1], [0, 0, 1, 1], [], []>} : vector<32x64xbf16>, vector<64x8xbf16>, vector<32x8xf32> -> vector<32x8xf32>
    %337 = arith.negf %336 : vector<32x8xf32>
    %338 = math.exp %337 : vector<32x8xf32>
    %cst_198 = arith.constant 1.000000e+00 : f32
    %339 = vector.broadcast %cst_198 : f32 to vector<32x8xf32>
    %340 = arith.addf %339, %338 : vector<32x8xf32>
    %341 = arith.divf %339, %340 : vector<32x8xf32>
    %c0_199 = arith.constant 0 : index
    %c0_200 = arith.constant 0 : index
    %c0_201 = arith.constant 0 : index
    %342 = vector.load %arg27[%c0_199, %c0_200, %c0_201] : memref<2x16x8xbf16, #tpu.memory_space<vmem>>, vector<1x16x8xbf16>
    %343 = vector.shape_cast %342 : vector<1x16x8xbf16> to vector<16x8xbf16>
    %cst_202 = arith.constant dense<0.000000e+00> : vector<64x8xf32>
    %344 = tpu.matmul %328, %343, %cst_202 {dimension_numbers = #tpu.dot_dimension_numbers<[1], [0], [0], [1], [0, 0, 1, 1], [], []>} : vector<64x16xbf16>, vector<16x8xbf16>, vector<64x8xf32> -> vector<64x8xf32>
    %345 = arith.truncf %344 : vector<64x8xf32> to vector<64x8xbf16>
    %cst_203 = arith.constant dense<0.000000e+00> : vector<32x8xf32>
    %346 = tpu.matmul %0, %345, %cst_203 {dimension_numbers = #tpu.dot_dimension_numbers<[1], [0], [0], [1], [0, 0, 1, 1], [], []>} : vector<32x64xbf16>, vector<64x8xbf16>, vector<32x8xf32> -> vector<32x8xf32>
    %347 = arith.negf %346 : vector<32x8xf32>
    %348 = math.exp %347 : vector<32x8xf32>
    %cst_204 = arith.constant 1.000000e+00 : f32
    %349 = vector.broadcast %cst_204 : f32 to vector<32x8xf32>
    %350 = arith.addf %349, %348 : vector<32x8xf32>
    %351 = arith.divf %349, %350 : vector<32x8xf32>
    %352 = arith.truncf %331 : vector<64x8xf32> to vector<64x8xbf16>
    %353 = arith.truncf %341 : vector<32x8xf32> to vector<32x8xbf16>
    %cst_205 = arith.constant dense<0.000000e+00> : vector<64x32xf32>
    %354 = tpu.matmul %352, %353, %cst_205 {dimension_numbers = #tpu.dot_dimension_numbers<[1], [1], [0], [0], [0, 0, 1, 0], [], []>} : vector<64x8xbf16>, vector<32x8xbf16>, vector<64x32xf32> -> vector<64x32xf32>
    %cst_206 = arith.constant 0.353553385 : f32
    %355 = vector.broadcast %cst_206 : f32 to vector<64x32xf32>
    %356 = arith.mulf %354, %355 : vector<64x32xf32>
    %357 = arith.addf %356, %304 : vector<64x32xf32>
    %cst_207 = arith.constant dense<0xFF800000> : vector<64xf32>
    %358 = vector.multi_reduction <maximumf>, %357, %cst_207 [1] : vector<64x32xf32> to vector<64xf32>
    %359 = vector.shape_cast %358 : vector<64xf32> to vector<64x1xf32>
    %360 = vector.broadcast %359 : vector<64x1xf32> to vector<64x32xf32>
    %361 = arith.subf %357, %360 : vector<64x32xf32>
    %362 = math.exp %361 : vector<64x32xf32>
    %cst_208 = arith.constant dense<0.000000e+00> : vector<64xf32>
    %363 = vector.multi_reduction <add>, %362, %cst_208 [1] : vector<64x32xf32> to vector<64xf32>
    %364 = vector.shape_cast %363 : vector<64xf32> to vector<64x1xf32>
    %365 = tpu.reciprocal %364 {approx = true} : vector<64x1xf32> -> vector<64x1xf32>
    %366 = vector.broadcast %365 : vector<64x1xf32> to vector<64x32xf32>
    %367 = arith.mulf %362, %366 : vector<64x32xf32>
    %368 = arith.truncf %367 : vector<64x32xf32> to vector<64x32xbf16>
    %369 = arith.truncf %351 : vector<32x8xf32> to vector<32x8xbf16>
    %cst_209 = arith.constant dense<0.000000e+00> : vector<64x8xf32>
    %370 = tpu.matmul %368, %369, %cst_209 {dimension_numbers = #tpu.dot_dimension_numbers<[1], [0], [0], [1], [0, 0, 1, 1], [], []>} : vector<64x32xbf16>, vector<32x8xbf16>, vector<64x8xf32> -> vector<64x8xf32>
    %371 = arith.truncf %370 : vector<64x8xf32> to vector<64x8xbf16>
    %c0_210 = arith.constant 0 : index
    %c0_211 = arith.constant 0 : index
    %c0_212 = arith.constant 0 : index
    %372 = vector.load %arg28[%c0_210, %c0_211, %c0_212] : memref<2x8x16xbf16, #tpu.memory_space<vmem>>, vector<1x8x16xbf16>
    %373 = vector.shape_cast %372 : vector<1x8x16xbf16> to vector<8x16xbf16>
    %cst_213 = arith.constant dense<0.000000e+00> : vector<64x16xf32>
    %374 = tpu.matmul %371, %373, %cst_213 {dimension_numbers = #tpu.dot_dimension_numbers<[1], [0], [0], [1], [0, 0, 1, 1], [], []>} : vector<64x8xbf16>, vector<8x16xbf16>, vector<64x16xf32> -> vector<64x16xf32>
    %c1_214 = arith.constant 1 : index
    %c0_215 = arith.constant 0 : index
    %c0_216 = arith.constant 0 : index
    %375 = vector.load %arg25[%c1_214, %c0_215, %c0_216] : memref<2x16x8xbf16, #tpu.memory_space<vmem>>, vector<1x16x8xbf16>
    %376 = vector.shape_cast %375 : vector<1x16x8xbf16> to vector<16x8xbf16>
    %cst_217 = arith.constant dense<0.000000e+00> : vector<64x8xf32>
    %377 = tpu.matmul %328, %376, %cst_217 {dimension_numbers = #tpu.dot_dimension_numbers<[1], [0], [0], [1], [0, 0, 1, 1], [], []>} : vector<64x16xbf16>, vector<16x8xbf16>, vector<64x8xf32> -> vector<64x8xf32>
    %c1_218 = arith.constant 1 : index
    %c0_219 = arith.constant 0 : index
    %c0_220 = arith.constant 0 : index
    %378 = vector.load %arg26[%c1_218, %c0_219, %c0_220] : memref<2x16x8xbf16, #tpu.memory_space<vmem>>, vector<1x16x8xbf16>
    %379 = vector.shape_cast %378 : vector<1x16x8xbf16> to vector<16x8xbf16>
    %cst_221 = arith.constant dense<0.000000e+00> : vector<64x8xf32>
    %380 = tpu.matmul %328, %379, %cst_221 {dimension_numbers = #tpu.dot_dimension_numbers<[1], [0], [0], [1], [0, 0, 1, 1], [], []>} : vector<64x16xbf16>, vector<16x8xbf16>, vector<64x8xf32> -> vector<64x8xf32>
    %381 = arith.truncf %380 : vector<64x8xf32> to vector<64x8xbf16>
    %cst_222 = arith.constant dense<0.000000e+00> : vector<32x8xf32>
    %382 = tpu.matmul %0, %381, %cst_222 {dimension_numbers = #tpu.dot_dimension_numbers<[1], [0], [0], [1], [0, 0, 1, 1], [], []>} : vector<32x64xbf16>, vector<64x8xbf16>, vector<32x8xf32> -> vector<32x8xf32>
    %383 = arith.negf %382 : vector<32x8xf32>
    %384 = math.exp %383 : vector<32x8xf32>
    %cst_223 = arith.constant 1.000000e+00 : f32
    %385 = vector.broadcast %cst_223 : f32 to vector<32x8xf32>
    %386 = arith.addf %385, %384 : vector<32x8xf32>
    %387 = arith.divf %385, %386 : vector<32x8xf32>
    %c1_224 = arith.constant 1 : index
    %c0_225 = arith.constant 0 : index
    %c0_226 = arith.constant 0 : index
    %388 = vector.load %arg27[%c1_224, %c0_225, %c0_226] : memref<2x16x8xbf16, #tpu.memory_space<vmem>>, vector<1x16x8xbf16>
    %389 = vector.shape_cast %388 : vector<1x16x8xbf16> to vector<16x8xbf16>
    %cst_227 = arith.constant dense<0.000000e+00> : vector<64x8xf32>
    %390 = tpu.matmul %328, %389, %cst_227 {dimension_numbers = #tpu.dot_dimension_numbers<[1], [0], [0], [1], [0, 0, 1, 1], [], []>} : vector<64x16xbf16>, vector<16x8xbf16>, vector<64x8xf32> -> vector<64x8xf32>
    %391 = arith.truncf %390 : vector<64x8xf32> to vector<64x8xbf16>
    %cst_228 = arith.constant dense<0.000000e+00> : vector<32x8xf32>
    %392 = tpu.matmul %0, %391, %cst_228 {dimension_numbers = #tpu.dot_dimension_numbers<[1], [0], [0], [1], [0, 0, 1, 1], [], []>} : vector<32x64xbf16>, vector<64x8xbf16>, vector<32x8xf32> -> vector<32x8xf32>
    %393 = arith.negf %392 : vector<32x8xf32>
    %394 = math.exp %393 : vector<32x8xf32>
    %cst_229 = arith.constant 1.000000e+00 : f32
    %395 = vector.broadcast %cst_229 : f32 to vector<32x8xf32>
    %396 = arith.addf %395, %394 : vector<32x8xf32>
    %397 = arith.divf %395, %396 : vector<32x8xf32>
    %398 = arith.truncf %377 : vector<64x8xf32> to vector<64x8xbf16>
    %399 = arith.truncf %387 : vector<32x8xf32> to vector<32x8xbf16>
    %cst_230 = arith.constant dense<0.000000e+00> : vector<64x32xf32>
    %400 = tpu.matmul %398, %399, %cst_230 {dimension_numbers = #tpu.dot_dimension_numbers<[1], [1], [0], [0], [0, 0, 1, 0], [], []>} : vector<64x8xbf16>, vector<32x8xbf16>, vector<64x32xf32> -> vector<64x32xf32>
    %cst_231 = arith.constant 0.353553385 : f32
    %401 = vector.broadcast %cst_231 : f32 to vector<64x32xf32>
    %402 = arith.mulf %400, %401 : vector<64x32xf32>
    %403 = arith.addf %402, %304 : vector<64x32xf32>
    %cst_232 = arith.constant dense<0xFF800000> : vector<64xf32>
    %404 = vector.multi_reduction <maximumf>, %403, %cst_232 [1] : vector<64x32xf32> to vector<64xf32>
    %405 = vector.shape_cast %404 : vector<64xf32> to vector<64x1xf32>
    %406 = vector.broadcast %405 : vector<64x1xf32> to vector<64x32xf32>
    %407 = arith.subf %403, %406 : vector<64x32xf32>
    %408 = math.exp %407 : vector<64x32xf32>
    %cst_233 = arith.constant dense<0.000000e+00> : vector<64xf32>
    %409 = vector.multi_reduction <add>, %408, %cst_233 [1] : vector<64x32xf32> to vector<64xf32>
    %410 = vector.shape_cast %409 : vector<64xf32> to vector<64x1xf32>
    %411 = tpu.reciprocal %410 {approx = true} : vector<64x1xf32> -> vector<64x1xf32>
    %412 = vector.broadcast %411 : vector<64x1xf32> to vector<64x32xf32>
    %413 = arith.mulf %408, %412 : vector<64x32xf32>
    %414 = arith.truncf %413 : vector<64x32xf32> to vector<64x32xbf16>
    %415 = arith.truncf %397 : vector<32x8xf32> to vector<32x8xbf16>
    %cst_234 = arith.constant dense<0.000000e+00> : vector<64x8xf32>
    %416 = tpu.matmul %414, %415, %cst_234 {dimension_numbers = #tpu.dot_dimension_numbers<[1], [0], [0], [1], [0, 0, 1, 1], [], []>} : vector<64x32xbf16>, vector<32x8xbf16>, vector<64x8xf32> -> vector<64x8xf32>
    %417 = arith.truncf %416 : vector<64x8xf32> to vector<64x8xbf16>
    %c1_235 = arith.constant 1 : index
    %c0_236 = arith.constant 0 : index
    %c0_237 = arith.constant 0 : index
    %418 = vector.load %arg28[%c1_235, %c0_236, %c0_237] : memref<2x8x16xbf16, #tpu.memory_space<vmem>>, vector<1x8x16xbf16>
    %419 = vector.shape_cast %418 : vector<1x8x16xbf16> to vector<8x16xbf16>
    %cst_238 = arith.constant dense<0.000000e+00> : vector<64x16xf32>
    %420 = tpu.matmul %417, %419, %cst_238 {dimension_numbers = #tpu.dot_dimension_numbers<[1], [0], [0], [1], [0, 0, 1, 1], [], []>} : vector<64x8xbf16>, vector<8x16xbf16>, vector<64x16xf32> -> vector<64x16xf32>
    %421 = arith.addf %374, %420 : vector<64x16xf32>
    %422 = vector.broadcast %305 : vector<1x16xf32> to vector<64x16xf32>
    %423 = arith.addf %421, %422 : vector<64x16xf32>
    %424 = arith.addf %303, %423 : vector<64x16xf32>
    %c1_239 = arith.constant 1 : index
    %c0_240 = arith.constant 0 : index
    %425 = vector.load %arg30[%c1_239, %c0_240] : memref<4x16xf32, #tpu.memory_space<vmem>>, vector<1x16xf32>
    %c2_241 = arith.constant 2 : index
    %c0_242 = arith.constant 0 : index
    %426 = vector.load %arg30[%c2_241, %c0_242] : memref<4x16xf32, #tpu.memory_space<vmem>>, vector<1x16xf32>
    %c3_243 = arith.constant 3 : index
    %c0_244 = arith.constant 0 : index
    %427 = vector.load %arg30[%c3_243, %c0_244] : memref<4x16xf32, #tpu.memory_space<vmem>>, vector<1x16xf32>
    %c0_245 = arith.constant 0 : index
    %c0_246 = arith.constant 0 : index
    %428 = vector.load %arg32[%c0_245, %c0_246] : memref<2x64xf32, #tpu.memory_space<vmem>>, vector<1x64xf32>
    %c1_247 = arith.constant 1 : index
    %c0_248 = arith.constant 0 : index
    %429 = vector.load %arg32[%c1_247, %c0_248] : memref<2x64xf32, #tpu.memory_space<vmem>>, vector<1x64xf32>
    %cst_249 = arith.constant dense<0.000000e+00> : vector<64xf32>
    %430 = vector.multi_reduction <add>, %424, %cst_249 [1] : vector<64x16xf32> to vector<64xf32>
    %431 = vector.shape_cast %430 : vector<64xf32> to vector<64x1xf32>
    %cst_250 = arith.constant 1.600000e+01 : f32
    %432 = vector.broadcast %cst_250 : f32 to vector<64x1xf32>
    %433 = arith.divf %431, %432 : vector<64x1xf32>
    %434 = vector.broadcast %433 : vector<64x1xf32> to vector<64x16xf32>
    %435 = arith.subf %424, %434 : vector<64x16xf32>
    %436 = arith.mulf %435, %435 : vector<64x16xf32>
    %cst_251 = arith.constant dense<0.000000e+00> : vector<64xf32>
    %437 = vector.multi_reduction <add>, %436, %cst_251 [1] : vector<64x16xf32> to vector<64xf32>
    %438 = vector.shape_cast %437 : vector<64xf32> to vector<64x1xf32>
    %cst_252 = arith.constant 1.600000e+01 : f32
    %439 = vector.broadcast %cst_252 : f32 to vector<64x1xf32>
    %440 = arith.divf %438, %439 : vector<64x1xf32>
    %cst_253 = arith.constant 9.99999997E-7 : f32
    %441 = vector.broadcast %cst_253 : f32 to vector<64x1xf32>
    %442 = arith.addf %440, %441 : vector<64x1xf32>
    %443 = math.rsqrt %442 : vector<64x1xf32>
    %444 = vector.broadcast %443 : vector<64x1xf32> to vector<64x16xf32>
    %445 = arith.mulf %435, %444 : vector<64x16xf32>
    %446 = vector.broadcast %425 : vector<1x16xf32> to vector<64x16xf32>
    %447 = arith.mulf %445, %446 : vector<64x16xf32>
    %448 = vector.broadcast %426 : vector<1x16xf32> to vector<64x16xf32>
    %449 = arith.addf %447, %448 : vector<64x16xf32>
    %450 = arith.truncf %449 : vector<64x16xf32> to vector<64x16xbf16>
    %c0_254 = arith.constant 0 : index
    %c0_255 = arith.constant 0 : index
    %451 = vector.load %arg31[%c0_254, %c0_255] : memref<16x64xbf16, #tpu.memory_space<vmem>>, vector<16x64xbf16>
    %cst_256 = arith.constant dense<0.000000e+00> : vector<64x64xf32>
    %452 = tpu.matmul %450, %451, %cst_256 {dimension_numbers = #tpu.dot_dimension_numbers<[1], [0], [0], [1], [0, 0, 1, 1], [], []>} : vector<64x16xbf16>, vector<16x64xbf16>, vector<64x64xf32> -> vector<64x64xf32>
    %453 = vector.broadcast %428 : vector<1x64xf32> to vector<64x64xf32>
    %454 = arith.addf %452, %453 : vector<64x64xf32>
    %cst_257 = arith.constant 5.000000e-01 : f32
    %455 = vector.broadcast %cst_257 : f32 to vector<64x64xf32>
    %456 = arith.mulf %455, %454 : vector<64x64xf32>
    %cst_258 = arith.constant 0.707106769 : f32
    %457 = vector.broadcast %cst_258 : f32 to vector<64x64xf32>
    %458 = arith.mulf %454, %457 : vector<64x64xf32>
    %459 = math.erf %458 : vector<64x64xf32>
    %cst_259 = arith.constant 1.000000e+00 : f32
    %460 = vector.broadcast %cst_259 : f32 to vector<64x64xf32>
    %461 = arith.addf %460, %459 : vector<64x64xf32>
    %462 = arith.mulf %456, %461 : vector<64x64xf32>
    %463 = arith.truncf %462 : vector<64x64xf32> to vector<64x64xbf16>
    %c4_260 = arith.constant 4 : index
    %c0_261 = arith.constant 0 : index
    %464 = vector.load %arg33[%c4_260, %c0_261] : memref<9x64xf32, #tpu.memory_space<vmem>>, vector<1x64xf32>
    %465 = vector.broadcast %464 : vector<1x64xf32> to vector<64x64xf32>
    %466 = arith.mulf %462, %465 : vector<64x64xf32>
    %c0_262 = arith.constant 0 : index
    %c0_263 = arith.constant 0 : index
    %c0_264 = arith.constant 0 : index
    %467 = vector.load %arg11[%c0_262, %c0_263, %c0_264] : memref<9x64x64xbf16, #tpu.memory_space<vmem>>, vector<1x64x64xbf16>
    %468 = vector.shape_cast %467 : vector<1x64x64xbf16> to vector<64x64xbf16>
    %cst_265 = arith.constant dense<0.000000e+00> : vector<64x64xf32>
    %469 = tpu.matmul %468, %463, %cst_265 {dimension_numbers = #tpu.dot_dimension_numbers<[1], [0], [0], [1], [0, 0, 1, 1], [], []>} : vector<64x64xbf16>, vector<64x64xbf16>, vector<64x64xf32> -> vector<64x64xf32>
    %c0_266 = arith.constant 0 : index
    %c0_267 = arith.constant 0 : index
    %470 = vector.load %arg33[%c0_266, %c0_267] : memref<9x64xf32, #tpu.memory_space<vmem>>, vector<1x64xf32>
    %471 = vector.broadcast %470 : vector<1x64xf32> to vector<64x64xf32>
    %472 = arith.mulf %469, %471 : vector<64x64xf32>
    %473 = arith.addf %466, %472 : vector<64x64xf32>
    %c1_268 = arith.constant 1 : index
    %c0_269 = arith.constant 0 : index
    %c0_270 = arith.constant 0 : index
    %474 = vector.load %arg11[%c1_268, %c0_269, %c0_270] : memref<9x64x64xbf16, #tpu.memory_space<vmem>>, vector<1x64x64xbf16>
    %475 = vector.shape_cast %474 : vector<1x64x64xbf16> to vector<64x64xbf16>
    %cst_271 = arith.constant dense<0.000000e+00> : vector<64x64xf32>
    %476 = tpu.matmul %475, %463, %cst_271 {dimension_numbers = #tpu.dot_dimension_numbers<[1], [0], [0], [1], [0, 0, 1, 1], [], []>} : vector<64x64xbf16>, vector<64x64xbf16>, vector<64x64xf32> -> vector<64x64xf32>
    %c1_272 = arith.constant 1 : index
    %c0_273 = arith.constant 0 : index
    %477 = vector.load %arg33[%c1_272, %c0_273] : memref<9x64xf32, #tpu.memory_space<vmem>>, vector<1x64xf32>
    %478 = vector.broadcast %477 : vector<1x64xf32> to vector<64x64xf32>
    %479 = arith.mulf %476, %478 : vector<64x64xf32>
    %480 = arith.addf %473, %479 : vector<64x64xf32>
    %c2_274 = arith.constant 2 : index
    %c0_275 = arith.constant 0 : index
    %c0_276 = arith.constant 0 : index
    %481 = vector.load %arg11[%c2_274, %c0_275, %c0_276] : memref<9x64x64xbf16, #tpu.memory_space<vmem>>, vector<1x64x64xbf16>
    %482 = vector.shape_cast %481 : vector<1x64x64xbf16> to vector<64x64xbf16>
    %cst_277 = arith.constant dense<0.000000e+00> : vector<64x64xf32>
    %483 = tpu.matmul %482, %463, %cst_277 {dimension_numbers = #tpu.dot_dimension_numbers<[1], [0], [0], [1], [0, 0, 1, 1], [], []>} : vector<64x64xbf16>, vector<64x64xbf16>, vector<64x64xf32> -> vector<64x64xf32>
    %c2_278 = arith.constant 2 : index
    %c0_279 = arith.constant 0 : index
    %484 = vector.load %arg33[%c2_278, %c0_279] : memref<9x64xf32, #tpu.memory_space<vmem>>, vector<1x64xf32>
    %485 = vector.broadcast %484 : vector<1x64xf32> to vector<64x64xf32>
    %486 = arith.mulf %483, %485 : vector<64x64xf32>
    %487 = arith.addf %480, %486 : vector<64x64xf32>
    %c3_280 = arith.constant 3 : index
    %c0_281 = arith.constant 0 : index
    %c0_282 = arith.constant 0 : index
    %488 = vector.load %arg11[%c3_280, %c0_281, %c0_282] : memref<9x64x64xbf16, #tpu.memory_space<vmem>>, vector<1x64x64xbf16>
    %489 = vector.shape_cast %488 : vector<1x64x64xbf16> to vector<64x64xbf16>
    %cst_283 = arith.constant dense<0.000000e+00> : vector<64x64xf32>
    %490 = tpu.matmul %489, %463, %cst_283 {dimension_numbers = #tpu.dot_dimension_numbers<[1], [0], [0], [1], [0, 0, 1, 1], [], []>} : vector<64x64xbf16>, vector<64x64xbf16>, vector<64x64xf32> -> vector<64x64xf32>
    %c3_284 = arith.constant 3 : index
    %c0_285 = arith.constant 0 : index
    %491 = vector.load %arg33[%c3_284, %c0_285] : memref<9x64xf32, #tpu.memory_space<vmem>>, vector<1x64xf32>
    %492 = vector.broadcast %491 : vector<1x64xf32> to vector<64x64xf32>
    %493 = arith.mulf %490, %492 : vector<64x64xf32>
    %494 = arith.addf %487, %493 : vector<64x64xf32>
    %c5_286 = arith.constant 5 : index
    %c0_287 = arith.constant 0 : index
    %c0_288 = arith.constant 0 : index
    %495 = vector.load %arg11[%c5_286, %c0_287, %c0_288] : memref<9x64x64xbf16, #tpu.memory_space<vmem>>, vector<1x64x64xbf16>
    %496 = vector.shape_cast %495 : vector<1x64x64xbf16> to vector<64x64xbf16>
    %cst_289 = arith.constant dense<0.000000e+00> : vector<64x64xf32>
    %497 = tpu.matmul %496, %463, %cst_289 {dimension_numbers = #tpu.dot_dimension_numbers<[1], [0], [0], [1], [0, 0, 1, 1], [], []>} : vector<64x64xbf16>, vector<64x64xbf16>, vector<64x64xf32> -> vector<64x64xf32>
    %c5_290 = arith.constant 5 : index
    %c0_291 = arith.constant 0 : index
    %498 = vector.load %arg33[%c5_290, %c0_291] : memref<9x64xf32, #tpu.memory_space<vmem>>, vector<1x64xf32>
    %499 = vector.broadcast %498 : vector<1x64xf32> to vector<64x64xf32>
    %500 = arith.mulf %497, %499 : vector<64x64xf32>
    %501 = arith.addf %494, %500 : vector<64x64xf32>
    %c6_292 = arith.constant 6 : index
    %c0_293 = arith.constant 0 : index
    %c0_294 = arith.constant 0 : index
    %502 = vector.load %arg11[%c6_292, %c0_293, %c0_294] : memref<9x64x64xbf16, #tpu.memory_space<vmem>>, vector<1x64x64xbf16>
    %503 = vector.shape_cast %502 : vector<1x64x64xbf16> to vector<64x64xbf16>
    %cst_295 = arith.constant dense<0.000000e+00> : vector<64x64xf32>
    %504 = tpu.matmul %503, %463, %cst_295 {dimension_numbers = #tpu.dot_dimension_numbers<[1], [0], [0], [1], [0, 0, 1, 1], [], []>} : vector<64x64xbf16>, vector<64x64xbf16>, vector<64x64xf32> -> vector<64x64xf32>
    %c6_296 = arith.constant 6 : index
    %c0_297 = arith.constant 0 : index
    %505 = vector.load %arg33[%c6_296, %c0_297] : memref<9x64xf32, #tpu.memory_space<vmem>>, vector<1x64xf32>
    %506 = vector.broadcast %505 : vector<1x64xf32> to vector<64x64xf32>
    %507 = arith.mulf %504, %506 : vector<64x64xf32>
    %508 = arith.addf %501, %507 : vector<64x64xf32>
    %c7_298 = arith.constant 7 : index
    %c0_299 = arith.constant 0 : index
    %c0_300 = arith.constant 0 : index
    %509 = vector.load %arg11[%c7_298, %c0_299, %c0_300] : memref<9x64x64xbf16, #tpu.memory_space<vmem>>, vector<1x64x64xbf16>
    %510 = vector.shape_cast %509 : vector<1x64x64xbf16> to vector<64x64xbf16>
    %cst_301 = arith.constant dense<0.000000e+00> : vector<64x64xf32>
    %511 = tpu.matmul %510, %463, %cst_301 {dimension_numbers = #tpu.dot_dimension_numbers<[1], [0], [0], [1], [0, 0, 1, 1], [], []>} : vector<64x64xbf16>, vector<64x64xbf16>, vector<64x64xf32> -> vector<64x64xf32>
    %c7_302 = arith.constant 7 : index
    %c0_303 = arith.constant 0 : index
    %512 = vector.load %arg33[%c7_302, %c0_303] : memref<9x64xf32, #tpu.memory_space<vmem>>, vector<1x64xf32>
    %513 = vector.broadcast %512 : vector<1x64xf32> to vector<64x64xf32>
    %514 = arith.mulf %511, %513 : vector<64x64xf32>
    %515 = arith.addf %508, %514 : vector<64x64xf32>
    %c8_304 = arith.constant 8 : index
    %c0_305 = arith.constant 0 : index
    %c0_306 = arith.constant 0 : index
    %516 = vector.load %arg11[%c8_304, %c0_305, %c0_306] : memref<9x64x64xbf16, #tpu.memory_space<vmem>>, vector<1x64x64xbf16>
    %517 = vector.shape_cast %516 : vector<1x64x64xbf16> to vector<64x64xbf16>
    %cst_307 = arith.constant dense<0.000000e+00> : vector<64x64xf32>
    %518 = tpu.matmul %517, %463, %cst_307 {dimension_numbers = #tpu.dot_dimension_numbers<[1], [0], [0], [1], [0, 0, 1, 1], [], []>} : vector<64x64xbf16>, vector<64x64xbf16>, vector<64x64xf32> -> vector<64x64xf32>
    %c8_308 = arith.constant 8 : index
    %c0_309 = arith.constant 0 : index
    %519 = vector.load %arg33[%c8_308, %c0_309] : memref<9x64xf32, #tpu.memory_space<vmem>>, vector<1x64xf32>
    %520 = vector.broadcast %519 : vector<1x64xf32> to vector<64x64xf32>
    %521 = arith.mulf %518, %520 : vector<64x64xf32>
    %522 = arith.addf %515, %521 : vector<64x64xf32>
    %523 = vector.broadcast %429 : vector<1x64xf32> to vector<64x64xf32>
    %524 = arith.addf %522, %523 : vector<64x64xf32>
    %cst_310 = arith.constant 5.000000e-01 : f32
    %525 = vector.broadcast %cst_310 : f32 to vector<64x64xf32>
    %526 = arith.mulf %525, %524 : vector<64x64xf32>
    %cst_311 = arith.constant 0.707106769 : f32
    %527 = vector.broadcast %cst_311 : f32 to vector<64x64xf32>
    %528 = arith.mulf %524, %527 : vector<64x64xf32>
    %529 = math.erf %528 : vector<64x64xf32>
    %cst_312 = arith.constant 1.000000e+00 : f32
    %530 = vector.broadcast %cst_312 : f32 to vector<64x64xf32>
    %531 = arith.addf %530, %529 : vector<64x64xf32>
    %532 = arith.mulf %526, %531 : vector<64x64xf32>
    %533 = arith.addf %462, %532 : vector<64x64xf32>
    %534 = arith.truncf %533 : vector<64x64xf32> to vector<64x64xbf16>
    %c0_313 = arith.constant 0 : index
    %c0_314 = arith.constant 0 : index
    %535 = vector.load %arg34[%c0_313, %c0_314] : memref<64x16xbf16, #tpu.memory_space<vmem>>, vector<64x16xbf16>
    %cst_315 = arith.constant dense<0.000000e+00> : vector<64x16xf32>
    %536 = tpu.matmul %534, %535, %cst_315 {dimension_numbers = #tpu.dot_dimension_numbers<[1], [0], [0], [1], [0, 0, 1, 1], [], []>} : vector<64x64xbf16>, vector<64x16xbf16>, vector<64x16xf32> -> vector<64x16xf32>
    %537 = vector.broadcast %427 : vector<1x16xf32> to vector<64x16xf32>
    %538 = arith.addf %536, %537 : vector<64x16xf32>
    %539 = arith.addf %538, %424 : vector<64x16xf32>
    %cst_316 = arith.constant dense<0.000000e+00> : vector<16xf32>
    %540 = vector.multi_reduction <add>, %539, %cst_316 [0] : vector<64x16xf32> to vector<16xf32>
    %541 = vector.shape_cast %540 : vector<16xf32> to vector<1x16xf32>
    %cst_317 = arith.constant 6.400000e+01 : f32
    %542 = vector.broadcast %cst_317 : f32 to vector<1x16xf32>
    %543 = arith.divf %541, %542 : vector<1x16xf32>
    %544 = arith.truncf %543 : vector<1x16xf32> to vector<1x16xbf16>
    %c0_318 = arith.constant 0 : index
    %c0_319 = arith.constant 0 : index
    %545 = vector.load %arg35[%c0_318, %c0_319] : memref<16x8xbf16, #tpu.memory_space<vmem>>, vector<16x8xbf16>
    %cst_320 = arith.constant dense<0.000000e+00> : vector<1x8xf32>
    %546 = tpu.matmul %544, %545, %cst_320 {dimension_numbers = #tpu.dot_dimension_numbers<[1], [0], [0], [1], [0, 0, 1, 1], [], []>} : vector<1x16xbf16>, vector<16x8xbf16>, vector<1x8xf32> -> vector<1x8xf32>
    %c0_321 = arith.constant 0 : index
    %c0_322 = arith.constant 0 : index
    %c0_323 = arith.constant 0 : index
    %547 = vector.load %arg36[%c0_321, %c0_322, %c0_323] : memref<1x1x8xf32, #tpu.memory_space<vmem>>, vector<1x1x8xf32>
    %548 = vector.shape_cast %547 : vector<1x1x8xf32> to vector<1x8xf32>
    %549 = vector.shape_cast %546 : vector<1x8xf32> to vector<1x1x8xf32>
    tpu.vector_store %arg36[%c0_321, %c0_322, %c0_323], %549 {strides = array<i32>} : memref<1x1x8xf32, #tpu.memory_space<vmem>>, vector<1x1x8xf32>,
    return
  }
  func.func @transform_0(%arg0: i32) -> (i32, i32, i32) {
    %c0_i32 = arith.constant 0 : i32
    %c0_i32_0 = arith.constant 0 : i32
    %c0_i32_1 = arith.constant 0 : i32
    return %arg0, %c0_i32, %c0_i32_0 : i32, i32, i32
  }
  func.func @transform_1(%arg0: i32) -> (i32, i32) {
    %c0_i32 = arith.constant 0 : i32
    %c0_i32_0 = arith.constant 0 : i32
    %c0_i32_1 = arith.constant 0 : i32
    return %c0_i32, %c0_i32_0 : i32, i32
  }
  func.func @transform_2(%arg0: i32) -> (i32, i32) {
    %c0_i32 = arith.constant 0 : i32
    %c0_i32_0 = arith.constant 0 : i32
    %c0_i32_1 = arith.constant 0 : i32
    return %c0_i32, %c0_i32_0 : i32, i32
  }
  func.func @transform_3(%arg0: i32) -> (i32, i32) {
    %c0_i32 = arith.constant 0 : i32
    %c0_i32_0 = arith.constant 0 : i32
    %c0_i32_1 = arith.constant 0 : i32
    return %c0_i32, %c0_i32_0 : i32, i32
  }
  func.func @transform_4(%arg0: i32) -> (i32, i32) {
    %c0_i32 = arith.constant 0 : i32
    %c0_i32_0 = arith.constant 0 : i32
    %c0_i32_1 = arith.constant 0 : i32
    return %c0_i32, %c0_i32_0 : i32, i32
  }
  func.func @transform_5(%arg0: i32) -> (i32, i32) {
    %c0_i32 = arith.constant 0 : i32
    %c0_i32_0 = arith.constant 0 : i32
    %c0_i32_1 = arith.constant 0 : i32
    return %c0_i32, %c0_i32_0 : i32, i32
  }
  func.func @transform_6(%arg0: i32) -> (i32, i32) {
    %c0_i32 = arith.constant 0 : i32
    %c0_i32_0 = arith.constant 0 : i32
    %c0_i32_1 = arith.constant 0 : i32
    return %c0_i32, %c0_i32_0 : i32, i32
  }
  func.func @transform_7(%arg0: i32) -> (i32, i32) {
    %c0_i32 = arith.constant 0 : i32
    %c0_i32_0 = arith.constant 0 : i32
    %c0_i32_1 = arith.constant 0 : i32
    return %c0_i32, %c0_i32_0 : i32, i32
  }
  func.func @transform_8(%arg0: i32) -> (i32, i32) {
    %c0_i32 = arith.constant 0 : i32
    %c0_i32_0 = arith.constant 0 : i32
    %c0_i32_1 = arith.constant 0 : i32
    return %c0_i32, %c0_i32_0 : i32, i32
  }
  func.func @transform_9(%arg0: i32) -> (i32, i32) {
    %c0_i32 = arith.constant 0 : i32
    %c0_i32_0 = arith.constant 0 : i32
    %c0_i32_1 = arith.constant 0 : i32
    return %c0_i32, %c0_i32_0 : i32, i32
  }
  func.func @transform_10(%arg0: i32) -> (i32, i32, i32) {
    %c0_i32 = arith.constant 0 : i32
    %c0_i32_0 = arith.constant 0 : i32
    %c0_i32_1 = arith.constant 0 : i32
    %c0_i32_2 = arith.constant 0 : i32
    return %c0_i32, %c0_i32_0, %c0_i32_1 : i32, i32, i32
  }
  func.func @transform_11(%arg0: i32) -> (i32, i32) {
    %c0_i32 = arith.constant 0 : i32
    %c0_i32_0 = arith.constant 0 : i32
    %c0_i32_1 = arith.constant 0 : i32
    return %c0_i32, %c0_i32_0 : i32, i32
  }
  func.func @transform_12(%arg0: i32) -> (i32, i32, i32) {
    %c0_i32 = arith.constant 0 : i32
    %c0_i32_0 = arith.constant 0 : i32
    %c0_i32_1 = arith.constant 0 : i32
    %c0_i32_2 = arith.constant 0 : i32
    return %c0_i32, %c0_i32_0, %c0_i32_1 : i32, i32, i32
  }
  func.func @transform_13(%arg0: i32) -> (i32, i32, i32) {
    %c0_i32 = arith.constant 0 : i32
    %c0_i32_0 = arith.constant 0 : i32
    %c0_i32_1 = arith.constant 0 : i32
    %c0_i32_2 = arith.constant 0 : i32
    return %c0_i32, %c0_i32_0, %c0_i32_1 : i32, i32, i32
  }
  func.func @transform_14(%arg0: i32) -> (i32, i32, i32) {
    %c0_i32 = arith.constant 0 : i32
    %c0_i32_0 = arith.constant 0 : i32
    %c0_i32_1 = arith.constant 0 : i32
    %c0_i32_2 = arith.constant 0 : i32
    return %c0_i32, %c0_i32_0, %c0_i32_1 : i32, i32, i32
  }
  func.func @transform_15(%arg0: i32) -> (i32, i32, i32) {
    %c0_i32 = arith.constant 0 : i32
    %c0_i32_0 = arith.constant 0 : i32
    %c0_i32_1 = arith.constant 0 : i32
    %c0_i32_2 = arith.constant 0 : i32
    return %c0_i32, %c0_i32_0, %c0_i32_1 : i32, i32, i32
  }
  func.func @transform_16(%arg0: i32) -> (i32, i32) {
    %c0_i32 = arith.constant 0 : i32
    %c0_i32_0 = arith.constant 0 : i32
    %c0_i32_1 = arith.constant 0 : i32
    return %c0_i32, %c0_i32_0 : i32, i32
  }
  func.func @transform_17(%arg0: i32) -> (i32, i32) {
    %c0_i32 = arith.constant 0 : i32
    %c0_i32_0 = arith.constant 0 : i32
    %c0_i32_1 = arith.constant 0 : i32
    return %c0_i32, %c0_i32_0 : i32, i32
  }
  func.func @transform_18(%arg0: i32) -> (i32, i32) {
    %c0_i32 = arith.constant 0 : i32
    %c0_i32_0 = arith.constant 0 : i32
    %c0_i32_1 = arith.constant 0 : i32
    return %c0_i32, %c0_i32_0 : i32, i32
  }
  func.func @transform_19(%arg0: i32) -> (i32, i32) {
    %c0_i32 = arith.constant 0 : i32
    %c0_i32_0 = arith.constant 0 : i32
    %c0_i32_1 = arith.constant 0 : i32
    return %c0_i32, %c0_i32_0 : i32, i32
  }
  func.func @transform_20(%arg0: i32) -> (i32, i32) {
    %c0_i32 = arith.constant 0 : i32
    %c0_i32_0 = arith.constant 0 : i32
    %c0_i32_1 = arith.constant 0 : i32
    return %c0_i32, %c0_i32_0 : i32, i32
  }
  func.func @transform_21(%arg0: i32) -> (i32, i32) {
    %c0_i32 = arith.constant 0 : i32
    %c0_i32_0 = arith.constant 0 : i32
    %c0_i32_1 = arith.constant 0 : i32
    return %c0_i32, %c0_i32_0 : i32, i32
  }
  func.func @transform_22(%arg0: i32) -> (i32, i32) {
    %c0_i32 = arith.constant 0 : i32
    %c0_i32_0 = arith.constant 0 : i32
    %c0_i32_1 = arith.constant 0 : i32
    return %c0_i32, %c0_i32_0 : i32, i32
  }
  func.func @transform_23(%arg0: i32) -> (i32, i32) {
    %c0_i32 = arith.constant 0 : i32
    %c0_i32_0 = arith.constant 0 : i32
    %c0_i32_1 = arith.constant 0 : i32
    return %c0_i32, %c0_i32_0 : i32, i32
  }
  func.func @transform_24(%arg0: i32) -> (i32, i32, i32) {
    %c0_i32 = arith.constant 0 : i32
    %c0_i32_0 = arith.constant 0 : i32
    %c0_i32_1 = arith.constant 0 : i32
    %c0_i32_2 = arith.constant 0 : i32
    return %c0_i32, %c0_i32_0, %c0_i32_1 : i32, i32, i32
  }
  func.func @transform_25(%arg0: i32) -> (i32, i32, i32) {
    %c0_i32 = arith.constant 0 : i32
    %c0_i32_0 = arith.constant 0 : i32
    %c0_i32_1 = arith.constant 0 : i32
    %c0_i32_2 = arith.constant 0 : i32
    return %c0_i32, %c0_i32_0, %c0_i32_1 : i32, i32, i32
  }
  func.func @transform_26(%arg0: i32) -> (i32, i32, i32) {
    %c0_i32 = arith.constant 0 : i32
    %c0_i32_0 = arith.constant 0 : i32
    %c0_i32_1 = arith.constant 0 : i32
    %c0_i32_2 = arith.constant 0 : i32
    return %c0_i32, %c0_i32_0, %c0_i32_1 : i32, i32, i32
  }
  func.func @transform_27(%arg0: i32) -> (i32, i32, i32) {
    %c0_i32 = arith.constant 0 : i32
    %c0_i32_0 = arith.constant 0 : i32
    %c0_i32_1 = arith.constant 0 : i32
    %c0_i32_2 = arith.constant 0 : i32
    return %c0_i32, %c0_i32_0, %c0_i32_1 : i32, i32, i32
  }
  func.func @transform_28(%arg0: i32) -> (i32, i32) {
    %c0_i32 = arith.constant 0 : i32
    %c0_i32_0 = arith.constant 0 : i32
    %c0_i32_1 = arith.constant 0 : i32
    return %c0_i32, %c0_i32_0 : i32, i32
  }
  func.func @transform_29(%arg0: i32) -> (i32, i32) {
    %c0_i32 = arith.constant 0 : i32
    %c0_i32_0 = arith.constant 0 : i32
    %c0_i32_1 = arith.constant 0 : i32
    return %c0_i32, %c0_i32_0 : i32, i32
  }
  func.func @transform_30(%arg0: i32) -> (i32, i32) {
    %c0_i32 = arith.constant 0 : i32
    %c0_i32_0 = arith.constant 0 : i32
    %c0_i32_1 = arith.constant 0 : i32
    return %c0_i32, %c0_i32_0 : i32, i32
  }
  func.func @transform_31(%arg0: i32) -> (i32, i32) {
    %c0_i32 = arith.constant 0 : i32
    %c0_i32_0 = arith.constant 0 : i32
    %c0_i32_1 = arith.constant 0 : i32
    return %c0_i32, %c0_i32_0 : i32, i32
  }
  func.func @transform_32(%arg0: i32) -> (i32, i32) {
    %c0_i32 = arith.constant 0 : i32
    %c0_i32_0 = arith.constant 0 : i32
    %c0_i32_1 = arith.constant 0 : i32
    return %c0_i32, %c0_i32_0 : i32, i32
  }
  func.func @transform_33(%arg0: i32) -> (i32, i32) {
    %c0_i32 = arith.constant 0 : i32
    %c0_i32_0 = arith.constant 0 : i32
    %c0_i32_1 = arith.constant 0 : i32
    return %c0_i32, %c0_i32_0 : i32, i32
  }
  func.func @transform_34(%arg0: i32) -> (i32, i32) {
    %c0_i32 = arith.constant 0 : i32
    %c0_i32_0 = arith.constant 0 : i32
    %c0_i32_1 = arith.constant 0 : i32
    return %c0_i32, %c0_i32_0 : i32, i32
  }
  func.func @transform_35(%arg0: i32) -> (i32, i32, i32) {
    %c0_i32 = arith.constant 0 : i32
    %c0_i32_0 = arith.constant 0 : i32
    %c0_i32_1 = arith.constant 0 : i32
    return %arg0, %c0_i32, %c0_i32_0 : i32, i32, i32
  }
}

</mosaic_0001>

<bundles_post_ra>
// kernel: passnet_forward.1
= control target key start
LH: loop header
LB: loop body
LE: loop exit
PB: predicated region body
PF: predicated region fallthrough
CT: control target
= control target key end

     0   :  { %s10453_s6 = smov 1   ;;  %s10454_s10 = smov 2   ;;  %s12336_s0 = inlined_call_operand.smem [shape: u32[36], index: -1, kind: input, shape index: {}] }
   0x1   :  { %s10502_s5 = sld [smem:[%s12336_s0]]   ;;  %s10455_s14 = smov 3  }
   0x2   :  { %s10507_s9 = sld [smem:[%s12336_s0 + %s10453_s6]]   ;;  %s10456_s18 = smov 4  }
   0x3   :  { %s10512_s13 = sld [smem:[%s12336_s0 + %s10454_s10]]   ;;  %s10457_s22 = smov 5  }
   0x4   :  { %s10517_s17 = sld [smem:[%s12336_s0 + %s10455_s14]]   ;;  %s10458_s26 = smov 6  }
   0x5   :  { %s10522_s21 = sld [smem:[%s12336_s0 + %s10456_s18]]   ;;  %s10459_s30 = smov 7  }
   0x6   :  { %s10527_s25 = sld [smem:[%s12336_s0 + %s10457_s22]]   ;;  %s10460_s4 = smov 8  }
   0x7   :  { %12374 = sst [smem:[#allocation8_spill]] %s10502_s5  ;;  %s10461_s10 = smov 9  }
   0x8   :  { %s10532_s29 = sld [smem:[%s12336_s0 + %s10458_s26]]   ;;  %s10462_s15 = smov 10  }
   0x9   :  { %s10537_s3 = sld [smem:[%s12336_s0 + %s10459_s30]]   ;;  %s10463_s20 = smov 11  }
   0xa   :  { %s10542_s8 = sld [smem:[%s12336_s0 + %s10460_s4]]   ;;  %s10464_s26 = smov 12  }
   0xb   :  { %s10547_s14 = sld [smem:[%s12336_s0 + %s10461_s10]]   ;;  %s10465_s1 = smov 13  }
   0xc   :  { %s10552_s19 = sld [smem:[%s12336_s0 + %s10462_s15]]   ;;  %s10466_s7 = smov 14  }
   0xd   :  { %s10557_s24 = sld [smem:[%s12336_s0 + %s10463_s20]]   ;;  %s10467_s15 = smov 15  }
   0xe   :  { %s10562_s30 = sld [smem:[%s12336_s0 + %s10464_s26]]   ;;  %s10468_s22 = smov 16  }
   0xf   :  { %12375 = sst [smem:[#allocation9_spill]] %s10537_s3  ;;  %s10469_s28 = smov 17  }
  0x10   :  { %s10567_s6 = sld [smem:[%s12336_s0 + %s10465_s1]]  }
  0x11   :  { %12376 = sst [smem:[#allocation10_spill]] %s10547_s14 }
  0x12   :  { %s10572_s12 = sld [smem:[%s12336_s0 + %s10466_s7]]   ;;  %s10470_s7 = smov 18  }
  0x13   :  { %s10577_s20 = sld [smem:[%s12336_s0 + %s10467_s15]]   ;;  %s10471_s15 = smov 19  }
  0x14   :  { %s10582_s27 = sld [smem:[%s12336_s0 + %s10468_s22]]   ;;  %s10472_s22 = smov 20  }
  0x15   :  { %s10587_s4 = sld [smem:[%s12336_s0 + %s10469_s28]]   ;;  %s10473_s28 = smov 21  }
  0x16   :  { %12377 = sst [smem:[#allocation11_spill]] %s10567_s6 }
  0x17   :  { %s10592_s14 = sld [smem:[%s12336_s0 + %s10470_s7]]   ;;  %s10474_s7 = smov 22  }
  0x19   :  { %12378 = sst [smem:[#allocation12_spill]] %s10577_s20 }
  0x1a   :  { %12379 = sst [smem:[#allocation13_spill]] %s10582_s27 }
  0x1b   :  { %12380 = sst [smem:[#allocation14_spill]] %s10587_s4 }
  0x1c   :  { %s10597_s20 = sld [smem:[%s12336_s0 + %s10471_s15]]   ;;  %s10475_s15 = smov 23  }
  0x1d   :  { %12381 = sst [smem:[#allocation15_spill]] %s10592_s14 }
  0x1e   :  { %s10602_s27 = sld [smem:[%s12336_s0 + %s10472_s22]]   ;;  %s10476_s22 = smov 24  }
  0x1f   :  { %s10607_s4 = sld [smem:[%s12336_s0 + %s10473_s28]]   ;;  %s10477_s28 = smov 25  }
  0x20   :  { %s10612_s14 = sld [smem:[%s12336_s0 + %s10474_s7]]   ;;  %s10478_s7 = smov 26  }
  0x22   :  { %12382 = sst [smem:[#allocation16_spill]] %s10597_s20 }
  0x23   :  { %s10617_s20 = sld [smem:[%s12336_s0 + %s10475_s15]]   ;;  %s10479_s15 = smov 27  }
  0x24   :  { %12383 = sst [smem:[#allocation17_spill]] %s10602_s27 }
  0x25   :  { %12384 = sst [smem:[#allocation18_spill]] %s10607_s4 }
  0x26   :  { %12385 = sst [smem:[#allocation19_spill]] %s10612_s14 }
  0x27   :  { %s10622_s27 = sld [smem:[%s12336_s0 + %s10476_s22]]   ;;  %s10480_s22 = smov 28  }
  0x28   :  { %s10627_s4 = sld [smem:[%s12336_s0 + %s10477_s28]]   ;;  %s10481_s28 = smov 29  }
  0x29   :  { %12386 = sst [smem:[#allocation20_spill]] %s10617_s20 }
  0x2a   :  { %s10632_s14 = sld [smem:[%s12336_s0 + %s10478_s7]]   ;;  %s10482_s7 = smov 30  }
  0x2b   :  { %s10637_s20 = sld [smem:[%s12336_s0 + %s10479_s15]]   ;;  %s10483_s15 = smov 31  }
  0x2d   :  { %12387 = sst [smem:[#allocation21_spill]] %s10622_s27 }
  0x2e   :  { %12388 = sst [smem:[#allocation22_spill]] %s10627_s4 }
  0x2f   :  { %s10642_s27 = sld [smem:[%s12336_s0 + %s10480_s22]]   ;;  %s10484_s22 = smov 32  }
  0x30   :  { %12389 = sst [smem:[#allocation23_spill]] %s10632_s14 }
  0x31   :  { %12390 = sst [smem:[#allocation24_spill]] %s10637_s20 }
  0x32   :  { %s10647_s4 = sld [smem:[%s12336_s0 + %s10481_s28]]   ;;  %s10485_s28 = smov 33  }
  0x33   :  { %s10652_s14 = sld [smem:[%s12336_s0 + %s10482_s7]]   ;;  %s10486_s7 = smov 34  }
  0x34   :  { %s10657_s20 = sld [smem:[%s12336_s0 + %s10483_s15]]   ;;  %s10487_s15 = smov 35  }
  0x35   :  { %12391 = sst [smem:[#allocation25_spill]] %s10642_s27 }
  0x36   :  { %s10662_s27 = sld [smem:[%s12336_s0 + %s10484_s22]]  }
  0x38   :  { %12392 = sst [smem:[#allocation26_spill]] %s10647_s4 }
  0x39   :  { %12393 = sst [smem:[#allocation27_spill]] %s10652_s14 }
  0x3a   :  { %12394 = sst [smem:[#allocation28_spill]] %s10657_s20 }
  0x3b   :  { %s10667_s4 = sld [smem:[%s12336_s0 + %s10485_s28]]  }
  0x3c   :  { %s10672_s14 = sld [smem:[%s12336_s0 + %s10486_s7]]  }
  0x3d   :  { %s10677_s20 = sld [smem:[%s12336_s0 + %s10487_s15]]  }
  0x41   :  { %12395 = sst [smem:[#allocation29_spill]] %s10667_s4 }
  0x42   :  { %76 = vsyncpa [#allocation3], 0 }
  0x43   :  { %77 = vsyncpa [#allocation4], 0 }
  0x44   :  { %79 = vsyncpa [#allocation4 + $0x1], 0  ;;  %s10679_s22 = smov 0   ;;  %s10681_s23 = smov 0  }
  0x45   :  { %s10683_s26 = smov 0   ;;  %s10685_s28 = smov 0  }
  0x46 LB: > { %s12396_s6 = sld [smem:[#allocation11_spill]]  ;;  %s12397_s4 = sld [smem:[#allocation29_spill]]  ;;  %s10443_s23 = sphi %s10681_s23, %s12444_s23   ;;  %s10439_s22 = sphi %s10679_s22, %s12443_s22   ;;  %s10451_s28 = sphi %s10685_s28, %s12440_s28   ;;  %s10447_s26 = sphi %s10683_s26, %s12442_s26  }
  0x47   : > { %12398 = sst [smem:[#allocation30_spill]] %s10447_s26  ;;  %s10700_s0 = sadd.s32 4294967295, %s10451_s28  }
  0x48   : > { %s8121_s1 = sadd.s32 4294967294, %s10451_s28   ;;  %s10704_s2 = sadd.s32 1, %s10451_s28  }
  0x49   : > { %12399 = sst [smem:[#allocation31_spill]] %s10704_s2  ;;  %s832_s7 = sadd.s32 1, %s10447_s26 }
  0x4a   : > { %s829_s10 = ssub.s32 %s10451_s28, %s10704_s2  ;;  %p842_p0 = scmp.ne.s32.totalorder %s10447_s26, %s10443_s23 }
  0x4b   : > { %p830_p1 = scmp.eq.s32.totalorder %s829_s10, 0  ;;  %p843_p2 = scmp.eq.s32.totalorder %s10700_s0, 1 }
  0x4c   : > { %p848_p3 = scmp.ne.s32.totalorder %s10443_s23, %s10439_s22  ;;  %p849_p4 = scmp.eq.s32.totalorder %s8121_s1, 1 }
  0x4d   : > { %s10715_s11 = scalar_select %p830_p1, %s10447_s26, %s832_s7  }
  0x4e   : > { %p10717_p5 = por %p843_p2, %p842_p0  ;;  %p10721_p6 = por %p849_p4, %p848_p3 }
  0x4f   : > { %12400 = sst [smem:[#allocation32_spill]] %s10715_s11  ;;  %p8122_p7 = scmp.ge.s32.totalorder %s10451_s28, 1 }
  0x50   : > { %s12401_s15 = scalar_select %p10717_p5, 1, 0 }
  0x51   : > { %s12402_s16 = scalar_select %p10721_p6, 1, 0 }
  0x52   : > { %p856_p8 = scmp.lt.s32.totalorder %s10451_s28, 3  ;;  %p12356_p9 = scmp.eq.s32.totalorder %s10700_s0, 0 }
  0x53   : > { %12403 = sst [smem:[#allocation33_spill]] %s12402_s16  ;;  %s10488_s1 = smov [#allocation2]  }
  0x54   : > { %p10728_p10 = pnand %p8122_p7, %p856_p8  ;;  %s895_s7 = sshll.u32 %s10488_s1, 4  ;;  %s896_s7 = int_to_ptr.vmem [resolvable:$true] %s895_s7 }
  0x55   : > { %s10357_s11 = scalar_lea.hbm %s10552_s19, 4608 }
  0x56   : > { %s12404_s18 = scalar_select %p10728_p10, 1, 0 }
  0x57   : > { %p9718_p11 = pneg %p10728_p10  ;;  %p10358_p13 = scmp.ne.s32.totalorder %s10552_s19, %s10357_s11 }
  0x58   : > { %p10364_p3 = scmp.lt.u32.totalorder %s10357_s11, %s10552_s19 }
  0x59   : > { %p10736_p12 = pnand %p12356_p9, %p9718_p11 }
  0x5b   : > { %p10359_p0 = pneg %p10736_p12 }
  0x5d   : > { %p10360_p1 = pnand %p10359_p0, %p10358_p13 }
  0x5f   : > { %p10361_p2 = pneg %p10360_p1 }
  0x61   : > { %p10366_p4 = pnand %p10364_p3, %p10361_p2 }
  0x63   : > { %10369 = shalt.err (!%p10366_p4)
}
  0x64   : > { %s10370_s26 = scalar_lea.vmem %s896_s7, 4608  ;;  %p10378_p5 = scmp.lt.s32.totalorder %s896_s7, %s896_s7 }
  0x65   : > { %p10371_p7 = scmp.ne.s32.totalorder %s896_s7, %s10370_s26  ;;  %p10379_p10 = scmp.lt.s32.totalorder %s10370_s26, %s10370_s26 }
  0x67   : > { %p10373_p8 = pnand %p10371_p7, %p10359_p0  ;;  %p10380_p11 = por %p10379_p10, %p10378_p5 }
  0x69   : > { %p10374_p6 = pneg %p10373_p8 }
  0x6b   : > { %p10381_p9 = pnand %p10380_p11, %p10374_p6 }
  0x6d   : > { %10384 = shalt.err (!%p10381_p9)
}
  0x6e   : > { %s10489_s1 = smov 64   ;;  %s10490_s2 = smov 4  }
  0x6f   : > { %9721 = dma.hbm_to_vmem [thread:$0]  (!%p10736_p12), %s10552_s19, 4608, %s896_s7, [#allocation3], %s10489_s1, %s10489_s1, %s10490_s2  }
  0x70   : > { %p12406_p13 = scmp.ne.s32.totalorder %s12404_s18, 0 }
  0x71   : > { %p12407_p1 = scmp.eq.s32.totalorder (!%p12406_p13), %s10700_s0, 0 }
  0x72   : > { %991 = sbr.rel (%p12406_p13) target bundleno = 9064 (0x2368), region = 160 }
  0x79   : > { %10430 = dma.done.wait (%p12407_p1), [#allocation3], 4608   ;;  %p12408_p0 = pmov %p12407_p1 }
  0x7a   : > { %s12409_s5 = sld [smem:[#allocation8_spill]]  ;;  %p1078_p5 = scmp.lt.s32.totalorder %s10700_s0, 1  ;;  %vm1114_vm0 = vcmask 1041408   ;;  %v1100_v0 = vld [vmem:[%s10507_s9] sm:$0x3]  ;;  %vm1101_vm1 = vcmask 31744  }
  0x7b   : > { %10432 = vsyncadd (%p12408_p0), [#allocation3], 4294962688  ;;  %9700 = vmatprep.subr.msk.bf16.mxu0 %vm1114_vm0, %v1100_v0  ;;  %v1116_v3 = vsel %vm1114_vm0, %v1100_v0, 0  ;;  %v9801_v14 = vld [vmem:[%s10512_s13] sm:$0xff]   ;;  %vm1235_vm2 = vcmask 130048   ;;  %s12410_s3 = sld [smem:[#allocation9_spill]] }
  0x7c   : > { %s1079_s26 = scalar_select %p1078_p5, %s10700_s0, 1  ;;  %8897 = vmatpush3.bf16.msra.mxu0 %v1116_v3  ;;  %8906 = vmatprep.subr.bf16.mxu1 %v9801_v14  ;;  %v1313_v15 = vld [vmem:[%s10517_s17] sm:$0x3]  ;;  %vm1613_vm3 = vcmask 523264   ;;  %vm1841_vm4 = vcmask 261120   ;;  %vm5658_vm5 = vcmask 64512  }
  0x7d   : > { %8907 = vmatpush3.bf16.msra.mxu1 %v9801_v14  ;;  %v1315_v53 = vsel %vm1114_vm0, %v1313_v15, 0  ;;  %s12411_s2 = sld [smem:[#allocation10_spill]]  ;;  %s12413_s18 = sld [smem:[#allocation12_spill]]  ;;  %vm6604_vm6 = vcmask 1043456   ;;  %vm10492_vm7 = vmmov 0   ;;  %vm8004_vm8 = vcmask 57344  }
  0x7e   : > { %s8518_s11 = sshll.u32 %s1079_s26, 6  ;;  %9701 = vmatprep.subr.msk.bf16.mxu1 %vm1114_vm0, %v1313_v15  ;;  %s12414_s7 = sld [smem:[#allocation14_spill]] }
  0x7f   : > { %s12415_s10 = sld [smem:[#allocation15_spill]]  ;;  %s12416_s1 = sld [smem:[#allocation16_spill]] }
  0x80   : > { %s1082_s16 = scalar_lea.vmem %s12409_s5, %s8518_s11  ;;  %s12417_s26 = sld [smem:[#allocation17_spill]] }
  0x81   : > { %v1088_v1 = vld [vmem:[%s1082_s16] sm:$0xff]  ;;  %v1089_v2 = vld [vmem:[%s1082_s16 + $0x8] sm:$0xff]  ;;  %v1090_v5 = vld [vmem:[%s1082_s16 + $0x10] sm:$0xff]  ;;  %s12425_s5 = sld [smem:[#allocation20_spill]]  ;;  %p12437_p9 = scmp.ne.s32.totalorder %s12401_s15, 0 }
  0x82   : > { %v10760_v4 = vpack.c.bf16 %v1089_v2, %v1088_v1  ;;  %v1091_v6 = vld [vmem:[%s1082_s16 + $0x18] sm:$0xff]  ;;  %v1092_v7 = vld [vmem:[%s1082_s16 + $0x20] sm:$0xff]  ;;  %v1093_v9 = vld [vmem:[%s1082_s16 + $0x28] sm:$0xff] }
  0x83   : > { %v10762_v8 = vpack.c.bf16 %v1091_v6, %v1090_v5  ;;  %v10766_v10 = vpack.c.bf16 %v1093_v9, %v1092_v7  ;;  %v1094_v11 = vld [vmem:[%s1082_s16 + $0x30] sm:$0xff]  ;;  %v1095_v12 = vld [vmem:[%s1082_s16 + $0x38] sm:$0xff]  ;;  %v9802_v6 = vld [vmem:[%s10527_s25] sm:$0xff]   ;;  %s12412_s16 = sld [smem:[#allocation13_spill]] }
  0x84   : > { %8898 = vmatprep.mubr.msk.bf16.mxu0 %vm1101_vm1, %v10760_v4  ;;  %v10772_v13 = vpack.c.bf16 %v1095_v12, %v1094_v11  ;;  %8926 = vmatprep.subr.bf16.mxu0 %v9802_v6  ;;  %v8142_v7 = vld [vmem:[%s10522_s21] ss:$0 sm:$0xff]  ;;  %v8143_v11 = vld [vmem:[%s10522_s21 + $0x1] ss:$0 sm:$0xff] }
  0x85   : > { %8899 = vmatmul.mubr.msk.bf16.vlgmr.msra.gmra.mrb[0].mxu0 %vm1101_vm1, %v10762_v8 }
  0x86   : > { %8902 = vmatprep.mubr.msk.bf16.mxu0 %vm1101_vm1, %v10766_v10  ;;  %8927 = vmatpush3.bf16.msra.mxu0 %v9802_v6  ;;  %s12418_s11 = smov %s12417_s26 }
  0x8d   : > { %8903 = vmatmul.mubr.msk.bf16.gmra.mrb[4].mxu0 %vm1101_vm1, %v10772_v13 }
 0x158   : > { %v8900_v16 = vpop.f32.mrb[0].mxu0 }
 0x159   : > { %v1193_v17 = vmul.f32 0.70710677, %v8900_v16  ;;  %v1152_v18 = vpop.f32.mrb[1].mxu0  ;;  %v1185_v38 = vmul.f32 0.5, %v8900_v16 }
 0x15a   : > { %v1191_v19 = vmul.f32 0.70710677, %v1152_v18  ;;  %v8901_v20 = vpop.f32.mrb[2].mxu0  ;;  %v1183_v41 = vmul.f32 0.5, %v1152_v18 }
 0x15b   : > { %9875 = verf.f32 %v1193_v17  ;;  %v1194_v21 = vmul.f32 0.70710677, %v8901_v20  ;;  %v1155_v22 = vpop.f32.mrb[3].mxu0  ;;  %v1186_v39 = vmul.f32 0.5, %v8901_v20 }
 0x15c   : > { %9877 = verf.f32 %v1191_v19  ;;  %v1192_v23 = vmul.f32 0.70710677, %v1155_v22  ;;  %v1184_v42 = vmul.f32 0.5, %v1155_v22 }
 0x15d   : > { %9879 = verf.f32 %v1194_v21 }
 0x15e   : > { %9881 = verf.f32 %v1192_v23 }
 0x160   : > { %v8904_v24 = vpop.f32.mrb[4].mxu0 }
 0x161   : > { %v1197_v25 = vmul.f32 0.70710677, %v8904_v24  ;;  %v1168_v26 = vpop.f32.mrb[5].mxu0  ;;  %v1189_v57 = vmul.f32 0.5, %v8904_v24 }
 0x162   : > { %v1195_v27 = vmul.f32 0.70710677, %v1168_v26  ;;  %v8905_v28 = vpop.f32.mrb[6].mxu0  ;;  %v1187_v60 = vmul.f32 0.5, %v1168_v26 }
 0x163   : > { %9883 = verf.f32 %v1197_v25  ;;  %v1198_v29 = vmul.f32 0.70710677, %v8905_v28  ;;  %v1171_v30 = vpop.f32.mrb[7].mxu0  ;;  %v1190_v58 = vmul.f32 0.5, %v8905_v28 }
 0x164   : > { %9885 = verf.f32 %v1195_v27  ;;  %v1196_v31 = vmul.f32 0.70710677, %v1171_v30  ;;  %v1188_v61 = vmul.f32 0.5, %v1171_v30 }
 0x165   : > { %v9876_v32 = vpop.eup %9875  ;;  %9887 = verf.f32 %v1198_v29 }
 0x166   : > { %v9878_v33 = vpop.eup %9877  ;;  %v1209_v34 = vadd.f32 1.0, %v9876_v32  ;;  %9889 = verf.f32 %v1196_v31 }
 0x167   : > { %v9880_v35 = vpop.eup %9879  ;;  %v1207_v36 = vadd.f32 1.0, %v9878_v33 }
 0x168   : > { %v9882_v37 = vpop.eup %9881  ;;  %v1210_v40 = vadd.f32 1.0, %v9880_v35  ;;  %v1217_v44 = vmul.f32 %v1209_v34, %v1185_v38 }
 0x169   : > { %v1208_v43 = vadd.f32 1.0, %v9882_v37  ;;  %v1215_v46 = vmul.f32 %v1207_v36, %v1183_v41 }
 0x16a   : > { %v1218_v45 = vmul.f32 %v1210_v40, %v1186_v39 }
 0x16b   : > { %v1216_v47 = vmul.f32 %v1208_v43, %v1184_v42 }
 0x16c   : > { %v1224_v48 = vpack.c.bf16 %v1218_v45, %v1217_v44 }
 0x16d   : > { %v9884_v49 = vpop.eup %9883  ;;  %v1223_v50 = vpack.c.bf16 %v1216_v47, %v1215_v46 }
 0x16e   : > { %v9886_v51 = vpop.eup %9885  ;;  %v1213_v52 = vadd.f32 1.0, %v9884_v49 }
 0x16f   : > { %v9888_v54 = vpop.eup %9887  ;;  %v1211_v55 = vadd.f32 1.0, %v9886_v51  ;;  %8908 = vmatprep.mubr.msk.bf16.mxu1 %vm1235_vm2, %v1223_v50 }
 0x170   : > { %v9890_v56 = vpop.eup %9889  ;;  %v1214_v59 = vadd.f32 1.0, %v9888_v54  ;;  %8909 = vmatmul.mubr.msk.bf16.vlgmr.msra.gmra.mrb[0].mxu1 %vm1235_vm2, %v1224_v48  ;;  %v1221_v63 = vmul.f32 %v1213_v52, %v1189_v57 }
 0x171   : > { %v1212_v62 = vadd.f32 1.0, %v9890_v56  ;;  %8917 = vmatpush3.bf16.msra.mxu1 %v1315_v53  ;;  %v1219_v1 = vmul.f32 %v1211_v55, %v1187_v60 }
 0x172   : > { %v1222_v0 = vmul.f32 %v1214_v59, %v1190_v58 }
 0x173   : > { %v1220_v2 = vmul.f32 %v1212_v62, %v1188_v61 }
 0x174   : > { %v1226_v3 = vpack.c.bf16 %v1222_v0, %v1221_v63 }
 0x175   : > { %v1225_v5 = vpack.c.bf16 %v1220_v2, %v1219_v1 }
 0x177   : > { %8912 = vmatprep.mubr.msk.bf16.mxu1 %vm1235_vm2, %v1225_v5 }
 0x178   : > { %8913 = vmatmul.mubr.msk.bf16.gmra.mrb[4].mxu1 %vm1235_vm2, %v1226_v3 }
 0x179   : > { %8918 = vmatprep.mubr.msk.bf16.mxu1 %vm1101_vm1, %v10760_v4 }
 0x180   : > { %8919 = vmatmul.mubr.msk.bf16.vlgmr.msra.gmra.mrb[0].mxu1 %vm1101_vm1, %v10762_v8 }
 0x181   : > { %8922 = vmatprep.mubr.msk.bf16.mxu1 %vm1101_vm1, %v10766_v10 }
 0x188   : > { %8923 = vmatmul.mubr.msk.bf16.gmra.mrb[4].mxu1 %vm1101_vm1, %v10772_v13 }
 0x253   : > { %v8920_v9 = vpop.f32.mrb[0].mxu1 }
 0x254   : > { %v1389_v12 = vmul.f32 %v8920_v9, %v8142_v7  ;;  %v1351_v14 = vpop.f32.mrb[1].mxu1 }
 0x255   : > { %v1387_v15 = vmul.f32 %v8142_v7, %v1351_v14  ;;  %v8921_v16 = vpop.f32.mrb[2].mxu1 }
 0x256   : > { %v1402_v4 = vadd.f32 %v8143_v11, %v1389_v12  ;;  %v1390_v17 = vmul.f32 %v8921_v16, %v8142_v7  ;;  %v1354_v18 = vpop.f32.mrb[3].mxu1  ;;  %v9803_v16 = vld [vmem:[%s10532_s29] sm:$0xff]  }
 0x257   : > { %v1400_v8 = vadd.f32 %v8143_v11, %v1387_v15  ;;  %v1388_v19 = vmul.f32 %v8142_v7, %v1354_v18  ;;  %8936 = vmatprep.subr.bf16.mxu0 %v9803_v16  ;;  %v9806_v18 = vld [vmem:[%s10532_s29 + $0x18] sm:$0xff]  }
 0x258   : > { %v1418_v20 = vmul.f32 0.70710677, %v1402_v4  ;;  %v1403_v10 = vadd.f32 %v8143_v11, %v1390_v17  ;;  %v1410_v46 = vmul.f32 0.5, %v1402_v4  ;;  %v9804_v4 = vld [vmem:[%s10532_s29 + $0x8] sm:$0xff]   ;;  %v9805_v17 = vld [vmem:[%s10532_s29 + $0x10] sm:$0xff]  }
 0x259   : > { %v1416_v21 = vmul.f32 0.70710677, %v1400_v8  ;;  %v1401_v22 = vadd.f32 %v8143_v11, %v1388_v19  ;;  %v1408_v49 = vmul.f32 0.5, %v1400_v8  ;;  %v9807_v8 = vld [vmem:[%s12410_s3] sm:$0xff]  }
 0x25a   : > { %9891 = verf.f32 %v1418_v20  ;;  %v1419_v13 = vmul.f32 0.70710677, %v1403_v10  ;;  %v1411_v47 = vmul.f32 0.5, %v1403_v10 }
 0x25b   : > { %9893 = verf.f32 %v1416_v21  ;;  %v1417_v23 = vmul.f32 0.70710677, %v1401_v22  ;;  %v8924_v24 = vpop.f32.mrb[4].mxu1  ;;  %v1409_v50 = vmul.f32 0.5, %v1401_v22 }
 0x25c   : > { %9895 = verf.f32 %v1419_v13  ;;  %v1393_v25 = vmul.f32 %v8924_v24, %v8142_v7  ;;  %v1367_v26 = vpop.f32.mrb[5].mxu1 }
 0x25d   : > { %9897 = verf.f32 %v1417_v23  ;;  %v1391_v27 = vmul.f32 %v8142_v7, %v1367_v26  ;;  %v8925_v28 = vpop.f32.mrb[6].mxu1 }
 0x25e   : > { %v1406_v29 = vadd.f32 %v8143_v11, %v1393_v25  ;;  %v1394_v30 = vmul.f32 %v8925_v28, %v8142_v7  ;;  %v1370_v31 = vpop.f32.mrb[7].mxu1 }
 0x25f   : > { %v1404_v32 = vadd.f32 %v8143_v11, %v1391_v27  ;;  %v1392_v33 = vmul.f32 %v8142_v7, %v1370_v31 }
 0x260   : > { %v1422_v34 = vmul.f32 0.70710677, %v1406_v29  ;;  %v1407_v35 = vadd.f32 %v8143_v11, %v1394_v30  ;;  %v1414_v0 = vmul.f32 0.5, %v1406_v29 }
 0x261   : > { %v1420_v36 = vmul.f32 0.70710677, %v1404_v32  ;;  %v1405_v37 = vadd.f32 %v8143_v11, %v1392_v33  ;;  %v1412_v3 = vmul.f32 0.5, %v1404_v32 }
 0x262   : > { %9899 = verf.f32 %v1422_v34  ;;  %v1423_v38 = vmul.f32 0.70710677, %v1407_v35  ;;  %v1415_v1 = vmul.f32 0.5, %v1407_v35 }
 0x263   : > { %9901 = verf.f32 %v1420_v36  ;;  %v1421_v39 = vmul.f32 0.70710677, %v1405_v37  ;;  %v1413_v5 = vmul.f32 0.5, %v1405_v37 }
 0x264   : > { %v9892_v40 = vpop.eup %9891  ;;  %9903 = verf.f32 %v1423_v38 }
 0x265   : > { %v9894_v41 = vpop.eup %9893  ;;  %v1434_v42 = vadd.f32 1.0, %v9892_v40  ;;  %9905 = verf.f32 %v1421_v39 }
 0x266   : > { %v9896_v43 = vpop.eup %9895  ;;  %v1432_v44 = vadd.f32 1.0, %v9894_v41 }
 0x267   : > { %v9898_v45 = vpop.eup %9897  ;;  %v1435_v48 = vadd.f32 1.0, %v9896_v43  ;;  %v1442_v52 = vmul.f32 %v1434_v42, %v1410_v46 }
 0x268   : > { %v1433_v51 = vadd.f32 1.0, %v9898_v45  ;;  %v1440_v54 = vmul.f32 %v1432_v44, %v1408_v49 }
 0x269   : > { %v1443_v53 = vmul.f32 %v1435_v48, %v1411_v47 }
 0x26a   : > { %v1441_v55 = vmul.f32 %v1433_v51, %v1409_v50 }
 0x26b   : > { %v10795_v56 = vpack.c.bf16 %v1443_v53, %v1442_v52 }
 0x26c   : > { %v9900_v57 = vpop.eup %9899  ;;  %v10797_v58 = vpack.c.bf16 %v1441_v55, %v1440_v54 }
 0x26d   : > { %v9902_v59 = vpop.eup %9901  ;;  %v1438_v60 = vadd.f32 1.0, %v9900_v57 }
 0x26e   : > { %v9904_v61 = vpop.eup %9903  ;;  %v1436_v62 = vadd.f32 1.0, %v9902_v59  ;;  %8928 = vmatprep.mubr.msk.bf16.mxu0 %vm1235_vm2, %v10797_v58 }
 0x26f   : > { %v9906_v63 = vpop.eup %9905  ;;  %v1439_v2 = vadd.f32 1.0, %v9904_v61  ;;  %8929 = vmatmul.mubr.msk.bf16.vlgmr.msra.gmra.mrb[8].mxu0 %vm1235_vm2, %v10795_v56  ;;  %v1446_v7 = vmul.f32 %v1438_v60, %v1414_v0 }
 0x270   : > { %v1437_v6 = vadd.f32 1.0, %v9906_v63  ;;  %v1444_v11 = vmul.f32 %v1436_v62, %v1412_v3  ;;  %8937 = vmatpush3.bf16.msra.mxu0 %v9803_v16 }
 0x271   : > { %v1447_v9 = vmul.f32 %v1439_v2, %v1415_v1  ;;  %8938 = vmatprep.subr.bf16.mxu0 %v9804_v4 }
 0x272   : > { %v1445_v12 = vmul.f32 %v1437_v6, %v1413_v5 }
 0x273   : > { %v10803_v14 = vpack.c.bf16 %v1447_v9, %v1446_v7  ;;  %v8162_v9 = vld [vmem:[%s10542_s8] ss:$0 sm:$0xff] }
 0x274   : > { %v10805_v15 = vpack.c.bf16 %v1445_v12, %v1444_v11  ;;  %8939 = vmatpush3.bf16.msra.mxu0 %v9804_v4  ;;  %v8163_v12 = vld [vmem:[%s10542_s8 + $0x1] ss:$0 sm:$0xff] }
 0x275   : > { %8940 = vmatprep.subr.bf16.mxu0 %v9805_v17 }
 0x276   : > { %8932 = vmatprep.mubr.msk.bf16.mxu0 %vm1235_vm2, %v10805_v15 }
 0x277   : > { %8933 = vmatmul.mubr.msk.bf16.gmra.mrb[12].mxu0 %vm1235_vm2, %v10803_v14 }
 0x278   : > { %8941 = vmatpush3.bf16.msra.mxu0 %v9805_v17 }
 0x279   : > { %8942 = vmatprep.subr.bf16.mxu0 %v9806_v18 }
 0x27c   : > { %8943 = vmatpush3.bf16.msra.mxu0 %v9806_v18 }
 0x27d   : > { %8952 = vmatprep.subr.bf16.mxu0 %v9807_v8 }
 0x342   : > { %v8930_v19 = vpop.f32.mrb[8].mxu0 }
 0x343   : > { %v1547_v20 = vmul.f32 0.70710677, %v8930_v19  ;;  %v1506_v10 = vpop.f32.mrb[9].mxu0  ;;  %v1539_v39 = vmul.f32 0.5, %v8930_v19 }
 0x344   : > { %v1545_v21 = vmul.f32 0.70710677, %v1506_v10  ;;  %v8931_v22 = vpop.f32.mrb[10].mxu0  ;;  %v1537_v42 = vmul.f32 0.5, %v1506_v10 }
 0x345   : > { %9907 = verf.f32 %v1547_v20  ;;  %v1548_v13 = vmul.f32 0.70710677, %v8931_v22  ;;  %v1509_v23 = vpop.f32.mrb[11].mxu0  ;;  %v1540_v40 = vmul.f32 0.5, %v8931_v22 }
 0x346   : > { %9909 = verf.f32 %v1545_v21  ;;  %v1546_v24 = vmul.f32 0.70710677, %v1509_v23  ;;  %v1538_v43 = vmul.f32 0.5, %v1509_v23 }
 0x347   : > { %9911 = verf.f32 %v1548_v13 }
 0x348   : > { %9913 = verf.f32 %v1546_v24 }
 0x34a   : > { %v8934_v25 = vpop.f32.mrb[12].mxu0 }
 0x34b   : > { %v1551_v26 = vmul.f32 0.70710677, %v8934_v25  ;;  %v1522_v27 = vpop.f32.mrb[13].mxu0  ;;  %v1543_v59 = vmul.f32 0.5, %v8934_v25 }
 0x34c   : > { %v1549_v28 = vmul.f32 0.70710677, %v1522_v27  ;;  %v8935_v29 = vpop.f32.mrb[14].mxu0  ;;  %v1541_v62 = vmul.f32 0.5, %v1522_v27 }
 0x34d   : > { %9915 = verf.f32 %v1551_v26  ;;  %v1552_v30 = vmul.f32 0.70710677, %v8935_v29  ;;  %v1525_v31 = vpop.f32.mrb[15].mxu0  ;;  %v1544_v60 = vmul.f32 0.5, %v8935_v29 }
 0x34e   : > { %9917 = verf.f32 %v1549_v28  ;;  %v1550_v32 = vmul.f32 0.70710677, %v1525_v31  ;;  %v1542_v63 = vmul.f32 0.5, %v1525_v31 }
 0x34f   : > { %v9908_v33 = vpop.eup %9907  ;;  %9919 = verf.f32 %v1552_v30 }
 0x350   : > { %v9910_v34 = vpop.eup %9909  ;;  %v1563_v35 = vadd.f32 1.0, %v9908_v33  ;;  %9921 = verf.f32 %v1550_v32 }
 0x351   : > { %v9912_v36 = vpop.eup %9911  ;;  %v1561_v37 = vadd.f32 1.0, %v9910_v34 }
 0x352   : > { %v9914_v38 = vpop.eup %9913  ;;  %v1564_v41 = vadd.f32 1.0, %v9912_v36  ;;  %v1571_v45 = vmul.f32 %v1563_v35, %v1539_v39 }
 0x353   : > { %v1562_v44 = vadd.f32 1.0, %v9914_v38  ;;  %v1569_v47 = vmul.f32 %v1561_v37, %v1537_v42 }
 0x354   : > { %v1572_v46 = vmul.f32 %v1564_v41, %v1540_v40 }
 0x355   : > { %v1570_v48 = vmul.f32 %v1562_v44, %v1538_v43 }
 0x356   : > { %v1578_v49 = vpack.c.bf16 %v1572_v46, %v1571_v45 }
 0x357   : > { %v9916_v50 = vpop.eup %9915  ;;  %v1577_v51 = vpack.c.bf16 %v1570_v48, %v1569_v47 }
 0x358   : > { %v9918_v52 = vpop.eup %9917  ;;  %v1567_v53 = vadd.f32 1.0, %v9916_v50 }
 0x359   : > { %v9920_v54 = vpop.eup %9919  ;;  %v1565_v55 = vadd.f32 1.0, %v9918_v52  ;;  %8944 = vmatprep.mubr.msk.bf16.mxu0 %vm1613_vm3, %v1577_v51 }
 0x35a   : > { %v9922_v57 = vpop.eup %9921  ;;  %v1568_v61 = vadd.f32 1.0, %v9920_v54  ;;  %8945 = vmatmul.mubr.msk.bf16.vlgmr.msra.gmra.mrb[16].mxu0 %vm1613_vm3, %v1578_v49  ;;  %v1575_v1 = vmul.f32 %v1567_v53, %v1543_v59 }
 0x35b   : > { %v1566_v0 = vadd.f32 1.0, %v9922_v57  ;;  %8953 = vmatpush3.bf16.msra.mxu0 %v9807_v8  ;;  %v1573_v3 = vmul.f32 %v1565_v55, %v1541_v62 }
 0x35c   : > { %v1576_v2 = vmul.f32 %v1568_v61, %v1544_v60 }
 0x35d   : > { %v1574_v5 = vmul.f32 %v1566_v0, %v1542_v63 }
 0x35e   : > { %v1580_v6 = vpack.c.bf16 %v1576_v2, %v1575_v1 }
 0x35f   : > { %v1579_v7 = vpack.c.bf16 %v1574_v5, %v1573_v3 }
 0x361   : > { %8948 = vmatprep.mubr.msk.bf16.mxu0 %vm1613_vm3, %v1579_v7 }
 0x362   : > { %8949 = vmatmul.mubr.msk.bf16.gmra.mrb[20].mxu0 %vm1613_vm3, %v1580_v6 }
 0x363   : > { %8954 = vmatprep.mubr.msk.bf16.mxu0 %vm1235_vm2, %v10797_v58 }
 0x36a   : > { %8955 = vmatmul.mubr.msk.bf16.vlgmr.msra.gmra.mrb[16].mxu0 %vm1235_vm2, %v10795_v56 }
 0x36b   : > { %8958 = vmatprep.mubr.msk.bf16.mxu0 %vm1235_vm2, %v10805_v15 }
 0x372   : > { %8959 = vmatmul.mubr.msk.bf16.gmra.mrb[20].mxu0 %vm1235_vm2, %v10803_v14 }
 0x43d   : > { %v8956_v11 = vpop.f32.mrb[16].mxu0 }
 0x43e   : > { %v1771_v16 = vmul.f32 %v8956_v11, %v8162_v9  ;;  %v1733_v4 = vpop.f32.mrb[17].mxu0 }
 0x43f   : > { %v1769_v17 = vmul.f32 %v8162_v9, %v1733_v4  ;;  %v8957_v18 = vpop.f32.mrb[18].mxu0 }
 0x440   : > { %v1784_v8 = vadd.f32 %v8163_v12, %v1771_v16  ;;  %v1772_v19 = vmul.f32 %v8957_v18, %v8162_v9  ;;  %v1736_v20 = vpop.f32.mrb[19].mxu0 }
 0x441   : > { %v1782_v58 = vadd.f32 %v8163_v12, %v1769_v17  ;;  %v1770_v10 = vmul.f32 %v8162_v9, %v1736_v20 }
 0x442   : > { %v1800_v21 = vmul.f32 0.70710677, %v1784_v8  ;;  %v1785_v56 = vadd.f32 %v8163_v12, %v1772_v19  ;;  %v1792_v41 = vmul.f32 0.5, %v1784_v8 }
 0x443   : > { %v1798_v22 = vmul.f32 0.70710677, %v1782_v58  ;;  %v1783_v13 = vadd.f32 %v8163_v12, %v1770_v10  ;;  %v1790_v44 = vmul.f32 0.5, %v1782_v58 }
 0x444   : > { %9923 = verf.f32 %v1800_v21  ;;  %v1801_v15 = vmul.f32 0.70710677, %v1785_v56  ;;  %v1793_v47 = vmul.f32 0.5, %v1785_v56 }
 0x445   : > { %9925 = verf.f32 %v1798_v22  ;;  %v1799_v14 = vmul.f32 0.70710677, %v1783_v13  ;;  %v8960_v23 = vpop.f32.mrb[20].mxu0  ;;  %v1791_v50 = vmul.f32 0.5, %v1783_v13 }
 0x446   : > { %9927 = verf.f32 %v1801_v15  ;;  %v1775_v24 = vmul.f32 %v8960_v23, %v8162_v9  ;;  %v1749_v25 = vpop.f32.mrb[21].mxu0 }
 0x447   : > { %9929 = verf.f32 %v1799_v14  ;;  %v1773_v26 = vmul.f32 %v8162_v9, %v1749_v25  ;;  %v8961_v27 = vpop.f32.mrb[22].mxu0 }
 0x448   : > { %v1788_v28 = vadd.f32 %v8163_v12, %v1775_v24  ;;  %v1776_v29 = vmul.f32 %v8961_v27, %v8162_v9  ;;  %v1752_v30 = vpop.f32.mrb[23].mxu0 }
 0x449   : > { %v1786_v31 = vadd.f32 %v8163_v12, %v1773_v26  ;;  %v1774_v32 = vmul.f32 %v8162_v9, %v1752_v30 }
 0x44a   : > { %v1804_v33 = vmul.f32 0.70710677, %v1788_v28  ;;  %v1789_v34 = vadd.f32 %v8163_v12, %v1776_v29  ;;  %v1796_v5 = vmul.f32 0.5, %v1788_v28 }
 0x44b   : > { %v1802_v35 = vmul.f32 0.70710677, %v1786_v31  ;;  %v1787_v36 = vadd.f32 %v8163_v12, %v1774_v32  ;;  %v1794_v63 = vmul.f32 0.5, %v1786_v31 }
 0x44c   : > { %9931 = verf.f32 %v1804_v33  ;;  %v1805_v37 = vmul.f32 0.70710677, %v1789_v34  ;;  %v1797_v12 = vmul.f32 0.5, %v1789_v34 }
 0x44d   : > { %9933 = verf.f32 %v1802_v35  ;;  %v1803_v38 = vmul.f32 0.70710677, %v1787_v36  ;;  %v1795_v6 = vmul.f32 0.5, %v1787_v36 }
 0x44e   : > { %v9924_v39 = vpop.eup %9923  ;;  %9935 = verf.f32 %v1805_v37 }
 0x44f   : > { %v9926_v40 = vpop.eup %9925  ;;  %9937 = verf.f32 %v1803_v38  ;;  %v1816_v42 = vadd.f32 1.0, %v9924_v39 }
 0x450   : > { %v9928_v43 = vpop.eup %9927  ;;  %v1814_v45 = vadd.f32 1.0, %v9926_v40 }
 0x451   : > { %v9930_v46 = vpop.eup %9929  ;;  %v10830_v48 = vmul.f32 %v1816_v42, %v1792_v41  ;;  %v1817_v49 = vadd.f32 1.0, %v9928_v43 }
 0x452   : > { %v10832_v51 = vmul.f32 %v1814_v45, %v1790_v44  ;;  %v1815_v52 = vadd.f32 1.0, %v9930_v46 }
 0x453   : > { %v1848_v53 = vsel %vm1841_vm4, %v10830_v48, 0.0  ;;  %v10836_v54 = vmul.f32 %v1817_v49, %v1793_v47 }
 0x454   : > { %1849 = vadd.xlane.f32.xlu1 %v1848_v53  ;;  %v1842_v55 = vsel %vm1841_vm4, %v10832_v51, 0.0  ;;  %v10840_v57 = vmul.f32 %v1815_v52, %v1791_v50 }
 0x455   : > { %1843 = vadd.xlane.f32.xlu0 %v1842_v55  ;;  %v1851_v61 = vsel %vm1841_vm4, %v10836_v54, 0.0 }
 0x456   : > { %v9932_v59 = vpop.eup %9931  ;;  %v1845_v0 = vsel %vm1841_vm4, %v10840_v57, 0.0 }
 0x457   : > { %v9934_v60 = vpop.eup %9933  ;;  %v1820_v2 = vadd.f32 1.0, %v9932_v59 }
 0x458   : > { %v9936_v62 = vpop.eup %9935  ;;  %1852 = vadd.xlane.f32.xlu1 %v1851_v61  ;;  %v1818_v1 = vadd.f32 1.0, %v9934_v60  ;;  %v9808_v61 = vld [vmem:[%s10562_s30] sm:$0xff]  }
 0x459   : > { %v9938_v3 = vpop.eup %9937  ;;  %1846 = vadd.xlane.f32.xlu0 %v1845_v0  ;;  %v1821_v11 = vadd.f32 1.0, %v9936_v62  ;;  %v10852_v17 = vmul.f32 %v1820_v2, %v1796_v5  ;;  %8962 = vmatprep.subr.bf16.mxu1 %v9808_v61  ;;  %v9809_v62 = vld [vmem:[%s10562_s30 + $0x8] sm:$0xff]  }
 0x45a   : > { %v10846_v7 = vmul.f32 %v1818_v1, %v1794_v63  ;;  %v1819_v9 = vadd.f32 1.0, %v9938_v3  ;;  %8963 = vmatpush3.bf16.msra.mxu1 %v9808_v61  ;;  %v10913_v63 = vld [vmem:[%s12396_s6] sm:$0xff]  }
 0x45b   : > { %v10856_v8 = vmul.f32 %v1821_v11, %v1797_v12  ;;  %v1860_v19 = vsel %vm1841_vm4, %v10852_v17, 0.0  ;;  %8964 = vmatprep.subr.bf16.mxu1 %v9809_v62 }
 0x45c   : > { %v1854_v16 = vsel %vm1841_vm4, %v10846_v7, 0.0  ;;  %v10850_v4 = vmul.f32 %v1819_v9, %v1795_v6 }
 0x45d   : > { %1855 = vadd.xlane.f32.xlu0 %v1854_v16  ;;  %v1863_v20 = vsel %vm1841_vm4, %v10856_v8, 0.0 }
 0x45e   : > { %v1857_v18 = vsel %vm1841_vm4, %v10850_v4, 0.0  ;;  %8965 = vmatpush3.bf16.msra.mxu1 %v9809_v62 }
 0x45f   : > { %1858 = vadd.xlane.f32.xlu1 %v1857_v18  ;;  %8974 = vmatprep.subr.bf16.mxu1 %v10913_v63 }
 0x461   : > { %1861 = vadd.xlane.f32.xlu0 %v1860_v19 }
 0x463   : > { %1864 = vadd.xlane.f32.xlu1 %v1863_v20 }
 0x4e1   : > { %v1850_v58 = vpop.xlane.xlu1 %1849 }
 0x4e2   : > { %v1869_v10 = vmul.f32 0.03125, %v1850_v58  ;;  %v1844_v21 = vpop.xlane.xlu0 %1843 }
 0x4e3   : > { %v1867_v56 = vmul.f32 0.03125, %v1844_v21 }
 0x4e4   : > { %v10863_v22 = vsub.f32 %v10830_v48, %v1869_v10 }
 0x4e5   : > { %v10866_v13 = vsub.f32 %v10832_v51, %v1867_v56  ;;  %v1853_v15 = vpop.xlane.xlu1 %1852 }
 0x4e6   : > { %v1870_v14 = vmul.f32 0.03125, %v1853_v15  ;;  %v1847_v23 = vpop.xlane.xlu0 %1846  ;;  %v1885_v29 = vmul.f32 %v10863_v22, %v10863_v22 }
 0x4e7   : > { %v1868_v24 = vmul.f32 0.03125, %v1847_v23  ;;  %v1883_v25 = vmul.f32 %v10866_v13, %v10866_v13 }
 0x4e8   : > { %v10871_v26 = vsub.f32 %v10836_v54, %v1870_v14  ;;  %v1897_v37 = vsel %vm1841_vm4, %v1885_v29, 0.0 }
 0x4e9   : > { %v10874_v27 = vsub.f32 %v10840_v57, %v1868_v24  ;;  %v1891_v28 = vsel %vm1841_vm4, %v1883_v25, 0.0 }
 0x4ea   : > { %1892 = vadd.xlane.f32.xlu0 %v1891_v28  ;;  %v1856_v30 = vpop.xlane.xlu0 %1855  ;;  %v1886_v34 = vmul.f32 %v10871_v26, %v10871_v26 }
 0x4eb   : > { %v1871_v31 = vmul.f32 0.03125, %v1856_v30  ;;  %v1884_v32 = vmul.f32 %v10874_v27, %v10874_v27  ;;  %v8164_v30 = vld [vmem:[%s10557_s24] ss:$0 sm:$0xff] }
 0x4ec   : > { %v1859_v33 = vpop.xlane.xlu1 %1858  ;;  %v1900_v44 = vsel %vm1841_vm4, %v1886_v34, 0.0 }
 0x4ed   : > { %v10884_v35 = vsub.f32 %v10846_v7, %v1871_v31  ;;  %v1872_v36 = vmul.f32 0.03125, %v1859_v33  ;;  %v1894_v38 = vsel %vm1841_vm4, %v1884_v32, 0.0 }
 0x4ee   : > { %1898 = vadd.xlane.f32.xlu0 %v1897_v37  ;;  %v1862_v39 = vpop.xlane.xlu0 %1861  ;;  %1895 = vadd.xlane.f32.xlu1 %v1894_v38  ;;  %v8165_v37 = vld [vmem:[%s10557_s24 + $0x1] ss:$0 sm:$0xff] }
 0x4ef   : > { %v10889_v40 = vsub.f32 %v10850_v4, %v1872_v36  ;;  %v1873_v41 = vmul.f32 0.03125, %v1862_v39  ;;  %v1887_v42 = vmul.f32 %v10884_v35, %v10884_v35 }
 0x4f0   : > { %v1865_v43 = vpop.xlane.xlu1 %1864 }
 0x4f1   : > { %v10895_v45 = vsub.f32 %v10852_v17, %v1873_v41  ;;  %v1874_v46 = vmul.f32 0.03125, %v1865_v43  ;;  %v1903_v47 = vsel %vm1841_vm4, %v1887_v42, 0.0  ;;  %v1888_v49 = vmul.f32 %v10889_v40, %v10889_v40 }
 0x4f2   : > { %1904 = vadd.xlane.f32.xlu0 %v1903_v47  ;;  %1901 = vadd.xlane.f32.xlu1 %v1900_v44 }
 0x4f3   : > { %v10901_v50 = vsub.f32 %v10856_v8, %v1874_v46  ;;  %v1889_v52 = vmul.f32 %v10895_v45, %v10895_v45  ;;  %v1906_v55 = vsel %vm1841_vm4, %v1888_v49, 0.0 }
 0x4f5   : > { %v1909_v53 = vsel %vm1841_vm4, %v1889_v52, 0.0  ;;  %v1890_v59 = vmul.f32 %v10901_v50, %v10901_v50 }
 0x4f6   : > { %1910 = vadd.xlane.f32.xlu0 %v1909_v53  ;;  %1907 = vadd.xlane.f32.xlu1 %v1906_v55 }
 0x4f7   : > { %v1912_v60 = vsel %vm1841_vm4, %v1890_v59, 0.0 }
 0x4fa   : > { %1913 = vadd.xlane.f32.xlu1 %v1912_v60 }
 0x577   : > { %v1893_v0 = vpop.xlane.xlu0 %1892 }
 0x578   : > { %v1915_v1 = vmul.f32 0.03125, %v1893_v0 }
 0x57a   : > { %v1923_v2 = vadd.f32 1e-06, %v1915_v1 }
 0x57b   : > { %v1899_v3 = vpop.xlane.xlu0 %1898  ;;  %v1896_v5 = vpop.xlane.xlu1 %1895 }
 0x57c   : > { %9939 = vrsqrt.f32 %v1923_v2  ;;  %v1917_v6 = vmul.f32 0.03125, %v1899_v3  ;;  %v1916_v9 = vmul.f32 0.03125, %v1896_v5 }
 0x57e   : > { %v1925_v11 = vadd.f32 1e-06, %v1917_v6  ;;  %v1924_v12 = vadd.f32 1e-06, %v1916_v9  ;;  %v9812_v9 = vld [vmem:[%s10572_s12] sm:$0xff]  }
 0x57f   : > { %v1905_v16 = vpop.xlane.xlu0 %1904  ;;  %v1902_v18 = vpop.xlane.xlu1 %1901 }
 0x580   : > { %9941 = vrsqrt.f32 %v1925_v11  ;;  %v1919_v19 = vmul.f32 0.03125, %v1905_v16  ;;  %v1918_v20 = vmul.f32 0.03125, %v1902_v18 }
 0x581   : > { %9943 = vrsqrt.f32 %v1924_v12 }
 0x582   : > { %v1927_v58 = vadd.f32 1e-06, %v1919_v19  ;;  %v1926_v10 = vadd.f32 1e-06, %v1918_v20 }
 0x583   : > { %v1911_v21 = vpop.xlane.xlu0 %1910  ;;  %v1908_v56 = vpop.xlane.xlu1 %1907 }
 0x584   : > { %9945 = vrsqrt.f32 %v1927_v58  ;;  %v1921_v15 = vmul.f32 0.03125, %v1911_v21  ;;  %v1920_v14 = vmul.f32 0.03125, %v1908_v56 }
 0x585   : > { %9947 = vrsqrt.f32 %v1926_v10 }
 0x586   : > { %v9940_v23 = vpop.eup %9939  ;;  %v1929_v24 = vadd.f32 1e-06, %v1921_v15  ;;  %v1928_v25 = vadd.f32 1e-06, %v1920_v14 }
 0x587   : > { %v1939_v28 = vmul.f32 %v9940_v23, %v10866_v13  ;;  %v1914_v29 = vpop.xlane.xlu1 %1913 }
 0x588   : > { %9949 = vrsqrt.f32 %v1929_v24  ;;  %v1922_v31 = vmul.f32 0.03125, %v1914_v29 }
 0x589   : > { %9951 = vrsqrt.f32 %v1928_v25  ;;  %v1951_v36 = vmul.f32 %v8164_v30, %v1939_v28 }
 0x58a   : > { %v9942_v32 = vpop.eup %9941  ;;  %v1930_v33 = vadd.f32 1e-06, %v1922_v31 }
 0x58b   : > { %v9944_v34 = vpop.eup %9943  ;;  %v1941_v38 = vmul.f32 %v9942_v32, %v10863_v22  ;;  %v1963_v44 = vadd.f32 %v8165_v37, %v1951_v36 }
 0x58c   : > { %v1940_v39 = vmul.f32 %v9944_v34, %v10874_v27  ;;  %9953 = vrsqrt.f32 %v1930_v33 }
 0x58d   : > { %v1953_v13 = vmul.f32 %v8164_v30, %v1941_v38 }
 0x58e   : > { %v9946_v41 = vpop.eup %9945  ;;  %v1952_v42 = vmul.f32 %v8164_v30, %v1940_v39 }
 0x58f   : > { %v9948_v43 = vpop.eup %9947  ;;  %v1943_v47 = vmul.f32 %v9946_v41, %v10884_v35  ;;  %v1965_v27 = vadd.f32 %v8165_v37, %v1953_v13  ;;  %v10987_v13 = vld [vmem:[%s12411_s2 + $0x8] sm:$0xff]  }
 0x590   : > { %v1964_v46 = vadd.f32 %v8165_v37, %v1952_v42  ;;  %v1942_v49 = vmul.f32 %v9948_v43, %v10871_v26  ;;  %v9811_v26 = vld [vmem:[%s12396_s6 + $0x8] sm:$0xff]  }
 0x591   : > { %v1955_v60 = vmul.f32 %v8164_v30, %v1943_v47 }
 0x592   : > { %v9950_v52 = vpop.eup %9949  ;;  %v1954_v53 = vmul.f32 %v8164_v30, %v1942_v49  ;;  %v10923_v55 = vpack.c.bf16 %v1964_v46, %v1963_v44 }
 0x593   : > { %v9952_v59 = vpop.eup %9951  ;;  %v1945_v22 = vmul.f32 %v9950_v52, %v10895_v45  ;;  %v1967_v5 = vadd.f32 %v8165_v37, %v1955_v60 }
 0x594   : > { %v1966_v61 = vadd.f32 %v8165_v37, %v1954_v53  ;;  %v1944_v62 = vmul.f32 %v9952_v59, %v10889_v40  ;;  %8966 = vmatprep.mubr.msk.bf16.mxu1 %vm1841_vm4, %v10923_v55 }
 0x595   : > { %v1957_v2 = vmul.f32 %v8164_v30, %v1945_v22 }
 0x596   : > { %v9954_v0 = vpop.eup %9953  ;;  %v1956_v35 = vmul.f32 %v8164_v30, %v1944_v62  ;;  %v10929_v1 = vpack.c.bf16 %v1966_v61, %v1965_v27 }
 0x597   : > { %v1946_v3 = vmul.f32 %v9954_v0, %v10901_v50  ;;  %v1969_v11 = vadd.f32 %v8165_v37, %v1957_v2  ;;  %v9813_v50 = vld [vmem:[%s10572_s12 + $0x8] sm:$0xff]  }
 0x598   : > { %v1968_v45 = vadd.f32 %v8165_v37, %v1956_v35  ;;  %8967 = vmatmul.mubr.msk.bf16.vlgmr.msra.gmra.mrb[8].mxu1 %vm1841_vm4, %v10929_v1 }
 0x599   : > { %v1958_v6 = vmul.f32 %v8164_v30, %v1946_v3  ;;  %8975 = vmatpush3.bf16.msra.mxu1 %v10913_v63  ;;  %v10963_v63 = vld [vmem:[%s12411_s2] sm:$0xff]  }
 0x59a   : > { %v10936_v40 = vpack.c.bf16 %v1968_v45, %v1967_v5  ;;  %8976 = vmatprep.subr.bf16.mxu1 %v9811_v26  ;;  %8994 = vmatprep.mubr.msk.bf16.mxu0 %vm1613_vm3, %v10963_v63 }
 0x59b   : > { %v1970_v12 = vadd.f32 %v8165_v37, %v1958_v6 }
 0x59c   : > { %8970 = vmatprep.mubr.msk.bf16.mxu1 %vm1841_vm4, %v10936_v40 }
 0x59d   : > { %v10941_v16 = vpack.c.bf16 %v1970_v12, %v1969_v11  ;;  %8977 = vmatpush3.bf16.msra.mxu1 %v9811_v26 }
 0x59e   : > { %8998 = vmatprep.subr.bf16.mxu1 %v9812_v9 }
 0x5a0   : > { %8971 = vmatmul.mubr.msk.bf16.gmra.mrb[12].mxu1 %vm1841_vm4, %v10941_v16 }
 0x5a1   : > { %8978 = vmatprep.mubr.msk.bf16.mxu1 %vm1841_vm4, %v10923_v55 }
 0x5a8   : > { %8979 = vmatmul.mubr.msk.bf16.vlgmr.msra.gmra.mrb[16].mxu1 %vm1841_vm4, %v10929_v1 }
 0x5a9   : > { %8982 = vmatprep.mubr.msk.bf16.mxu1 %vm1841_vm4, %v10936_v40  ;;  %8999 = vmatpush3.bf16.msra.mxu1 %v9812_v9 }
 0x5aa   : > { %9000 = vmatprep.subr.bf16.mxu1 %v9813_v50 }
 0x5ad   : > { %9001 = vmatpush3.bf16.msra.mxu1 %v9813_v50 }
 0x5b0   : > { %8983 = vmatmul.mubr.msk.bf16.gmra.mrb[20].mxu1 %vm1841_vm4, %v10941_v16 }
 0x5b1   : > { %9002 = vmatprep.mubr.msk.bf16.mxu1 %vm1841_vm4, %v10923_v55 }
 0x5b8   : > { %9003 = vmatmul.mubr.msk.bf16.vlgmr.msra.gmra.mrb[24].mxu1 %vm1841_vm4, %v10929_v1 }
 0x5b9   : > { %9006 = vmatprep.mubr.msk.bf16.mxu1 %vm1841_vm4, %v10936_v40 }
 0x5c0   : > { %9007 = vmatmul.mubr.msk.bf16.gmra.mrb[28].mxu1 %vm1841_vm4, %v10941_v16 }
 0x66b   : > { %v10967_v18 = vpop.f32.mrb[8].mxu1 }
 0x66c   : > { %v2037_v19 = vpop.f32.mrb[9].mxu1 }
 0x66d   : > { %v10969_v20 = vpop.f32.mrb[10].mxu1 }
 0x66e   : > { %v2401_v58 = vpack.c.bf16 %v10969_v20, %v10967_v18  ;;  %v2040_v10 = vpop.f32.mrb[11].mxu1 }
 0x66f   : > { %v2400_v21 = vpack.c.bf16 %v2040_v10, %v2037_v19 }
 0x671   : > { %9026 = vmatprep.mubr.msk.bf16.mxu1 %vm1235_vm2, %v2400_v21 }
 0x673   : > { %v10974_v56 = vpop.f32.mrb[12].mxu1 }
 0x674   : > { %v10976_v15 = vpop.f32.mrb[13].mxu1 }
 0x675   : > { %v10978_v14 = vpop.f32.mrb[14].mxu1 }
 0x676   : > { %v2403_v23 = vpack.c.bf16 %v10978_v14, %v10974_v56  ;;  %v10982_v24 = vpop.f32.mrb[15].mxu1 }
 0x677   : > { %v2402_v25 = vpack.c.bf16 %v10982_v24, %v10976_v15  ;;  %v11027_v24 = vld [vmem:[%s12412_s16 + $0x8] sm:$0xff] }
 0x67b   : > { %v8980_v28 = vpop.f32.mrb[16].mxu1 }
 0x67c   : > { %v2118_v29 = vpop.f32.mrb[17].mxu1 }
 0x67d   : > { %v8981_v30 = vpop.f32.mrb[18].mxu1 }
 0x67e   : > { %v2150_v31 = vpack.c.bf16 %v8981_v30, %v8980_v28  ;;  %v2121_v32 = vpop.f32.mrb[19].mxu1 }
 0x67f   : > { %v2149_v33 = vpack.c.bf16 %v2121_v32, %v2118_v29 }
 0x681   : > { %8986 = vmatprep.subr.bf16.mxu0 %v2149_v33 }
 0x682   : > { %8987 = vmatpush3.bf16.msra.mxu0 %v2149_v33 }
 0x683   : > { %v8984_v34 = vpop.f32.mrb[20].mxu1  ;;  %8988 = vmatprep.subr.bf16.mxu0 %v2150_v31 }
 0x684   : > { %v2134_v36 = vpop.f32.mrb[21].mxu1 }
 0x685   : > { %v8985_v37 = vpop.f32.mrb[22].mxu1 }
 0x686   : > { %v2152_v38 = vpack.c.bf16 %v8985_v37, %v8984_v34  ;;  %v2137_v39 = vpop.f32.mrb[23].mxu1  ;;  %8989 = vmatpush3.bf16.msra.mxu0 %v2150_v31  ;;  %v9816_v34 = vld [vmem:[%s10562_s30 + $0x10] sm:$0xff]   ;;  %v9817_v37 = vld [vmem:[%s10562_s30 + $0x18] sm:$0xff]  }
 0x687   : > { %v2151_v41 = vpack.c.bf16 %v2137_v39, %v2134_v36 }
 0x689   : > { %8990 = vmatprep.subr.bf16.mxu0 %v2151_v41 }
 0x68a   : > { %8991 = vmatpush3.bf16.msra.mxu0 %v2151_v41 }
 0x68b   : > { %8992 = vmatprep.subr.bf16.mxu0 %v2152_v38  ;;  %v9004_v42 = vpop.f32.mrb[24].mxu1 }
 0x68c   : > { %v2292_v43 = vpop.f32.mrb[25].mxu1 }
 0x68d   : > { %v9005_v44 = vpop.f32.mrb[26].mxu1 }
 0x68e   : > { %v2324_v46 = vpack.c.bf16 %v9005_v44, %v9004_v42  ;;  %8993 = vmatpush3.bf16.msra.mxu0 %v2152_v38  ;;  %v2295_v47 = vpop.f32.mrb[27].mxu1  ;;  %v11034_v42 = vld [vmem:[%s12412_s16 + $0x18] sm:$0xff] }
 0x68f   : > { %v2323_v49 = vpack.c.bf16 %v2295_v47, %v2292_v43 }
 0x691   : > { %8995 = vmatmul.mubr.msk.bf16.vlgmr.msra.gmra.mrb[24].mxu0 %vm1613_vm3, %v10987_v13  ;;  %9010 = vmatprep.subr.bf16.mxu0 %v2323_v49 }
 0x692   : > { %9011 = vmatpush3.bf16.msra.mxu0 %v2323_v49  ;;  %9018 = vmatprep.mubr.msk.bf16.mxu0 %vm1613_vm3, %v10963_v63 }
 0x693   : > { %v9008_v52 = vpop.f32.mrb[28].mxu1  ;;  %9012 = vmatprep.subr.bf16.mxu0 %v2324_v46 }
 0x694   : > { %v2308_v53 = vpop.f32.mrb[29].mxu1 }
 0x695   : > { %v9009_v59 = vpop.f32.mrb[30].mxu1 }
 0x696   : > { %v2326_v22 = vpack.c.bf16 %v9009_v59, %v9008_v52  ;;  %v2311_v27 = vpop.f32.mrb[31].mxu1  ;;  %9013 = vmatpush3.bf16.msra.mxu0 %v2324_v46  ;;  %v11049_v59 = vld [vmem:[%s12412_s16 + $0x20] sm:$0xff] }
 0x697   : > { %v2325_v60 = vpack.c.bf16 %v2311_v27, %v2308_v53 }
 0x699   : > { %9014 = vmatprep.subr.bf16.mxu0 %v2325_v60 }
 0x69a   : > { %9015 = vmatpush3.bf16.msra.mxu0 %v2325_v60 }
 0x69b   : > { %9016 = vmatprep.subr.bf16.mxu0 %v2326_v22 }
 0x69e   : > { %9017 = vmatpush3.bf16.msra.mxu0 %v2326_v22 }
 0x6a1   : > { %9019 = vmatmul.mubr.msk.bf16.vlgmr.msra.gmra.mrb[28].mxu0 %vm1613_vm3, %v10987_v13 }
 0x764   : > { %v8996_v61 = vpop.f32.mrb[24].mxu0 }
 0x765   : > { %v8184_v62 = vmul.f32 -1.442695, %v8996_v61  ;;  %v2203_v0 = vpop.f32.mrb[25].mxu0 }
 0x766   : > { %v8182_v35 = vmul.f32 -1.442695, %v2203_v0  ;;  %v8997_v26 = vpop.f32.mrb[26].mxu0  ;;  %v11054_v0 = vld [vmem:[%s12412_s16 + $0x28] sm:$0xff] }
 0x767   : > { %9955 = vpow2.f32 %v8184_v62  ;;  %v8185_v2 = vmul.f32 -1.442695, %v8997_v26  ;;  %v2206_v3 = vpop.f32.mrb[27].mxu0 }
 0x768   : > { %9957 = vpow2.f32 %v8182_v35  ;;  %v8183_v5 = vmul.f32 -1.442695, %v2206_v3  ;;  %v11057_v35 = vld [vmem:[%s12412_s16 + $0x30] sm:$0xff] }
 0x769   : > { %9959 = vpow2.f32 %v8185_v2 }
 0x76a   : > { %9961 = vpow2.f32 %v8183_v5 }
 0x771   : > { %v9956_v45 = vpop.eup %9955 }
 0x772   : > { %v9958_v6 = vpop.eup %9957  ;;  %v2232_v9 = vadd.f32 1.0, %v9956_v45  ;;  %v11063_v45 = vld [vmem:[%s12412_s16 + $0x38] sm:$0xff] }
 0x773   : > { %v9960_v11 = vpop.eup %9959  ;;  %v2230_v12 = vadd.f32 1.0, %v9958_v6 }
 0x774   : > { %v9962_v50 = vpop.eup %9961  ;;  %9963 = vrcp.f32 %v2232_v9  ;;  %v2233_v19 = vadd.f32 1.0, %v9960_v11 }
 0x775   : > { %9965 = vrcp.f32 %v2230_v12  ;;  %v2231_v10 = vadd.f32 1.0, %v9962_v50 }
 0x776   : > { %9967 = vrcp.f32 %v2233_v19 }
 0x777   : > { %9969 = vrcp.f32 %v2231_v10 }
 0x77e   : > { %v9964_v21 = vpop.eup %9963 }
 0x77f   : > { %v9966_v28 = vpop.eup %9965 }
 0x780   : > { %v9968_v29 = vpop.eup %9967 }
 0x781   : > { %v9970_v30 = vpop.eup %9969  ;;  %v2405_v31 = vpack.c.bf16 %v9968_v29, %v9964_v21 }
 0x782   : > { %v2404_v32 = vpack.c.bf16 %v9970_v30, %v9966_v28 }
 0x783   : > { %v2422_v36 = vsel %vm1235_vm2, %v2405_v31, 0 }
 0x784   : > { %9702 = vmatprep.subr.msk.bf16.mxu1 %vm1235_vm2, %v2404_v32  ;;  %v2419_v33 = vsel %vm1235_vm2, %v2404_v32, 0 }
 0x785   : > { %9023 = vmatpush3.bf16.xpose.msra.mxu1 %v2419_v33 }
 0x786   : > { %9703 = vmatprep.subr.msk.bf16.mxu1 %vm1235_vm2, %v2405_v31 }
 0x78d   : > { %9025 = vmatpush3.bf16.xpose.msra.mxu1 %v2422_v36 }
 0x78e   : > { %9046 = vmatprep.subr.bf16.mxu1 %v9816_v34 }
 0x794   : > { %9027 = vmatmul.mubr.msk.bf16.vlgmr.msra.gmra.mrb[32].mxu1 %vm1235_vm2, %v2401_v58  ;;  %v11024_v58 = vld [vmem:[%s12412_s16] sm:$0xff] }
 0x795   : > { %9030 = vmatprep.mubr.msk.bf16.mxu1 %vm1235_vm2, %v2402_v25  ;;  %9047 = vmatpush3.bf16.msra.mxu1 %v9816_v34  ;;  %v11030_v25 = vld [vmem:[%s12412_s16 + $0x10] sm:$0xff] }
 0x796   : > { %9048 = vmatprep.subr.bf16.mxu1 %v9817_v37 }
 0x799   : > { %9049 = vmatpush3.bf16.msra.mxu1 %v9817_v37 }
 0x79c   : > { %9031 = vmatmul.mubr.msk.bf16.gmra.mrb[36].mxu1 %vm1235_vm2, %v2403_v23 }
 0x79d   : > { %9050 = vmatprep.mubr.msk.bf16.mxu1 %vm1841_vm4, %v10923_v55 }
 0x7a4   : > { %9051 = vmatmul.mubr.msk.bf16.vlgmr.msra.gmra.mrb[40].mxu1 %vm1841_vm4, %v10929_v1 }
 0x7a5   : > { %9054 = vmatprep.mubr.msk.bf16.mxu1 %vm1841_vm4, %v10936_v40 }
 0x7ac   : > { %9055 = vmatmul.mubr.msk.bf16.gmra.mrb[44].mxu1 %vm1841_vm4, %v10941_v16 }
 0x7ad   : > { %9078 = vmatprep.mubr.msk.bf16.mxu1 %vm1613_vm3, %v10963_v63 }
 0x867   : > { %v9028_v18 = vpop.f32.mrb[32].mxu1 }
 0x868   : > { %v2458_v20 = vpop.f32.mrb[33].mxu1  ;;  %v2491_v56 = vmul.f32 0.25, %v9028_v18 }
 0x869   : > { %v2489_v15 = vmul.f32 0.25, %v2458_v20  ;;  %v9029_v14 = vpop.f32.mrb[34].mxu1 }
 0x86a   : > { %v2461_v23 = vpop.f32.mrb[35].mxu1  ;;  %v2492_v38 = vmul.f32 0.25, %v9029_v14  ;;  %v11041_v46 = vadd.f32 %v2491_v56, %v11030_v25  ;;  %v9020_v56 = vpop.f32.mrb[28].mxu0 }
 0x86b   : > { %v2490_v39 = vmul.f32 0.25, %v2461_v23  ;;  %v2497_v41 = vadd.f32 %v2489_v15, %v11024_v58  ;;  %v2361_v15 = vpop.f32.mrb[29].mxu0 }
 0x86c   : > { %v11046_v52 = vadd.f32 %v2492_v38, %v11034_v42  ;;  %v2511_v61 = vsel %vm1841_vm4, %v11041_v46, -inf  ;;  %v9021_v14 = vpop.f32.mrb[30].mxu0  ;;  %v8194_v38 = vmul.f32 -1.442695, %v2361_v15 }
 0x86d   : > { %v2505_v43 = vsel %vm1841_vm4, %v2497_v41, -inf  ;;  %v11038_v44 = vadd.f32 %v2490_v39, %v11027_v24  ;;  %v2364_v23 = vpop.f32.mrb[31].mxu0 }
 0x86e   : > { %2506 = vmax.xlane.f32.xlu0 %v2505_v43  ;;  %v2514_v3 = vsel %vm1841_vm4, %v11046_v52, -inf  ;;  %v8195_v43 = vmul.f32 -1.442695, %v2364_v23  ;;  %9971 = vpow2.f32 %v8194_v38 }
 0x86f   : > { %v9032_v47 = vpop.f32.mrb[36].mxu1  ;;  %v2508_v49 = vsel %vm1841_vm4, %v11038_v44, -inf }
 0x870   : > { %2509 = vmax.xlane.f32.xlu1 %v2508_v49  ;;  %v2474_v53 = vpop.f32.mrb[37].mxu1  ;;  %v2495_v22 = vmul.f32 0.25, %v9032_v47  ;;  %9973 = vpow2.f32 %v8195_v43 }
 0x871   : > { %v2493_v27 = vmul.f32 0.25, %v2474_v53  ;;  %v9033_v60 = vpop.f32.mrb[38].mxu1  ;;  %v8196_v53 = vmul.f32 -1.442695, %v9020_v56 }
 0x872   : > { %2512 = vmax.xlane.f32.xlu0 %v2511_v61  ;;  %v2477_v62 = vpop.f32.mrb[39].mxu1  ;;  %v2496_v26 = vmul.f32 0.25, %v9033_v60  ;;  %v11068_v11 = vadd.f32 %v2495_v22, %v11057_v35  ;;  %v8197_v61 = vmul.f32 -1.442695, %v9021_v14 }
 0x873   : > { %v2494_v2 = vmul.f32 0.25, %v2477_v62  ;;  %v2501_v5 = vadd.f32 %v2493_v27, %v11049_v59 }
 0x874   : > { %2515 = vmax.xlane.f32.xlu1 %v2514_v3  ;;  %v11074_v19 = vadd.f32 %v2496_v26, %v11063_v45  ;;  %v2523_v28 = vsel %vm1841_vm4, %v11068_v11, -inf }
 0x875   : > { %v2517_v6 = vsel %vm1841_vm4, %v2501_v5, -inf  ;;  %v2502_v9 = vadd.f32 %v2494_v2, %v11054_v0 }
 0x876   : > { %2518 = vmax.xlane.f32.xlu0 %v2517_v6  ;;  %v2526_v32 = vsel %vm1841_vm4, %v11074_v19, -inf }
 0x877   : > { %v11070_v12 = vpop.f32.mrb[40].mxu1  ;;  %v2520_v50 = vsel %vm1841_vm4, %v2502_v9, -inf }
 0x878   : > { %v11076_v10 = vpop.f32.mrb[41].mxu1  ;;  %2521 = vmax.xlane.f32.xlu1 %v2520_v50  ;;  %v9972_v14 = vpop.eup %9971 }
 0x879   : > { %v11078_v21 = vpop.f32.mrb[42].mxu1 }
 0x87a   : > { %v3083_v29 = vpack.c.bf16 %v11078_v21, %v11070_v12  ;;  %2524 = vmax.xlane.f32.xlu0 %v2523_v28  ;;  %v11084_v30 = vpop.f32.mrb[43].mxu1  ;;  %v9974_v38 = vpop.eup %9973 }
 0x87b   : > { %v3082_v31 = vpack.c.bf16 %v11084_v30, %v11076_v10 }
 0x87c   : > { %2527 = vmax.xlane.f32.xlu1 %v2526_v32 }
 0x87f   : > { %v11090_v33 = vpop.f32.mrb[44].mxu1 }
 0x880   : > { %v11092_v34 = vpop.f32.mrb[45].mxu1 }
 0x881   : > { %v11094_v36 = vpop.f32.mrb[46].mxu1 }
 0x882   : > { %v3085_v37 = vpack.c.bf16 %v11094_v36, %v11090_v33  ;;  %v11098_v18 = vpop.f32.mrb[47].mxu1 }
 0x883   : > { %v3084_v20 = vpack.c.bf16 %v11098_v18, %v11092_v34 }
 0x8fb   : > { %v2507_v39 = vpop.xlane.xlu0 %2506 }
 0x8fc   : > { %v2529_v47 = vsub.f32 %v2497_v41, %v2507_v39 }
 0x8fd   : > { %v2510_v49 = vpop.xlane.xlu1 %2509 }
 0x8fe   : > { %v2537_v22 = vmul.f32 1.442695, %v2529_v47  ;;  %v2530_v27 = vsub.f32 %v11038_v44, %v2510_v49 }
 0x8ff   : > { %v2513_v60 = vpop.xlane.xlu0 %2512 }
 0x900   : > { %9975 = vpow2.f32 %v2537_v22  ;;  %v2539_v62 = vmul.f32 1.442695, %v2530_v27  ;;  %v2531_v26 = vsub.f32 %v11041_v46, %v2513_v60  ;;  %v2389_v27 = vadd.f32 1.0, %v9974_v38 }
 0x901   : > { %v2516_v2 = vpop.xlane.xlu1 %2515  ;;  %9977 = vpow2.f32 %v8196_v53  ;;  %v2388_v53 = vadd.f32 1.0, %v9972_v14 }
 0x902   : > { %9979 = vpow2.f32 %v2539_v62  ;;  %v2541_v3 = vmul.f32 1.442695, %v2531_v26  ;;  %v2532_v6 = vsub.f32 %v11046_v52, %v2516_v2 }
 0x903   : > { %v2519_v41 = vpop.xlane.xlu0 %2518  ;;  %9981 = vpow2.f32 %v8197_v61 }
 0x904   : > { %9983 = vpow2.f32 %v2541_v3  ;;  %v2543_v50 = vmul.f32 1.442695, %v2532_v6  ;;  %v2533_v28 = vsub.f32 %v2501_v5, %v2519_v41 }
 0x905   : > { %v2522_v44 = vpop.xlane.xlu1 %2521 }
 0x906   : > { %9985 = vpow2.f32 %v2543_v50  ;;  %v2545_v32 = vmul.f32 1.442695, %v2533_v28  ;;  %v2534_v56 = vsub.f32 %v2502_v9, %v2522_v44 }
 0x907   : > { %v2525_v15 = vpop.xlane.xlu0 %2524 }
 0x908   : > { %9987 = vpow2.f32 %v2545_v32  ;;  %v2547_v23 = vmul.f32 1.442695, %v2534_v56  ;;  %v2535_v46 = vsub.f32 %v11068_v11, %v2525_v15 }
 0x909   : > { %v2528_v39 = vpop.xlane.xlu1 %2527 }
 0x90a   : > { %v11106_v43 = vpop.eup %9975  ;;  %9989 = vpow2.f32 %v2547_v23  ;;  %v2549_v52 = vmul.f32 1.442695, %v2535_v46  ;;  %v2536_v47 = vsub.f32 %v11074_v19, %v2528_v39 }
 0x90b   : > { %v9978_v49 = vpop.eup %9977  ;;  %v2553_v5 = vsel %vm1841_vm4, %v11106_v43, 0.0 }
 0x90c   : > { %v11111_v9 = vpop.eup %9979  ;;  %9991 = vpow2.f32 %v2549_v52  ;;  %v2551_v22 = vmul.f32 1.442695, %v2536_v47  ;;  %2554 = vadd.xlane.f32.xlu0 %v2553_v5  ;;  %v2390_v62 = vadd.f32 1.0, %v9978_v49  ;;  %v9818_v47 = vld [vmem:[%s12396_s6 + $0x10] sm:$0xff]  }
 0x90d   : > { %v9982_v11 = vpop.eup %9981  ;;  %v2556_v60 = vsel %vm1841_vm4, %v11111_v9, 0.0 }
 0x90e   : > { %v9984_v61 = vpop.eup %9983  ;;  %9993 = vpow2.f32 %v2551_v22  ;;  %2557 = vadd.xlane.f32.xlu1 %v2556_v60  ;;  %v2391_v2 = vadd.f32 1.0, %v9982_v11 }
 0x90f   : > { %v2559_v19 = vsel %vm1841_vm4, %v9984_v61, 0.0  ;;  %9995 = vrcp.f32 %v2388_v53 }
 0x910   : > { %v9986_v26 = vpop.eup %9985  ;;  %2560 = vadd.xlane.f32.xlu0 %v2559_v19  ;;  %9997 = vrcp.f32 %v2389_v27 }
 0x911   : > { %v2562_v3 = vsel %vm1841_vm4, %v9986_v26, 0.0  ;;  %9999 = vrcp.f32 %v2390_v62 }
 0x912   : > { %v9988_v6 = vpop.eup %9987  ;;  %2563 = vadd.xlane.f32.xlu1 %v2562_v3  ;;  %10001 = vrcp.f32 %v2391_v2 }
 0x913   : > { %v2565_v41 = vsel %vm1841_vm4, %v9988_v6, 0.0 }
 0x914   : > { %v9990_v50 = vpop.eup %9989  ;;  %2566 = vadd.xlane.f32.xlu0 %v2565_v41 }
 0x915   : > { %v2568_v28 = vsel %vm1841_vm4, %v9990_v50, 0.0 }
 0x916   : > { %v9992_v44 = vpop.eup %9991  ;;  %2569 = vadd.xlane.f32.xlu1 %v2568_v28 }
 0x917   : > { %v2571_v32 = vsel %vm1841_vm4, %v9992_v44, 0.0 }
 0x918   : > { %v9994_v56 = vpop.eup %9993  ;;  %2572 = vadd.xlane.f32.xlu0 %v2571_v32 }
 0x919   : > { %v9996_v15 = vpop.eup %9995  ;;  %v2574_v14 = vsel %vm1841_vm4, %v9994_v56, 0.0 }
 0x91a   : > { %v9998_v23 = vpop.eup %9997  ;;  %2575 = vadd.xlane.f32.xlu1 %v2574_v14 }
 0x91b   : > { %v10000_v46 = vpop.eup %9999  ;;  %v2597_v38 = vpack.c.bf16 %v9998_v23, %v9996_v15 }
 0x91c   : > { %v10002_v39 = vpop.eup %10001 }
 0x91d   : > { %9034 = vmatprep.subr.bf16.mxu0 %v2597_v38  ;;  %v2598_v52 = vpack.c.bf16 %v10002_v39, %v10000_v46  ;;  %v9819_v39 = vld [vmem:[%s12396_s6 + $0x18] sm:$0xff]  }
 0x91e   : > { %9035 = vmatpush3.bf16.msra.mxu0 %v2597_v38 }
 0x91f   : > { %9036 = vmatprep.subr.bf16.mxu0 %v2598_v52 }
 0x922   : > { %9037 = vmatpush3.bf16.msra.mxu0 %v2598_v52 }
 0x923   : > { %9058 = vmatprep.subr.bf16.mxu0 %v9818_v47 }
 0x999   : > { %v2555_v49 = vpop.xlane.xlu0 %2554 }
 0x99a   : > { %10003 = vrcp.f32 %v2555_v49 }
 0x99b   : > { %v2558_v5 = vpop.xlane.xlu1 %2557 }
 0x99c   : > { %10005 = vrcp.f32 %v2558_v5 }
 0x99d   : > { %v2561_v53 = vpop.xlane.xlu0 %2560 }
 0x99e   : > { %10007 = vrcp.f32 %v2561_v53  ;;  %v9820_v53 = vld [vmem:[%s10572_s12 + $0x10] sm:$0xff]  }
 0x99f   : > { %v2564_v22 = vpop.xlane.xlu1 %2563 }
 0x9a0   : > { %10009 = vrcp.f32 %v2564_v22 }
 0x9a1   : > { %v2567_v27 = vpop.xlane.xlu0 %2566 }
 0x9a2   : > { %10011 = vrcp.f32 %v2567_v27 }
 0x9a3   : > { %v2570_v11 = vpop.xlane.xlu1 %2569 }
 0x9a4   : > { %v10004_v60 = vpop.eup %10003  ;;  %10013 = vrcp.f32 %v2570_v11 }
 0x9a5   : > { %v2573_v19 = vpop.xlane.xlu0 %2572  ;;  %v2585_v3 = vmul.f32 %v10004_v60, %v11106_v43 }
 0x9a6   : > { %v10006_v62 = vpop.eup %10005  ;;  %10015 = vrcp.f32 %v2573_v19 }
 0x9a7   : > { %v2576_v2 = vpop.xlane.xlu1 %2575  ;;  %v2586_v41 = vmul.f32 %v10006_v62, %v11111_v9 }
 0x9a8   : > { %v10008_v28 = vpop.eup %10007  ;;  %10017 = vrcp.f32 %v2576_v2 }
 0x9a9   : > { %v2593_v32 = vpack.c.bf16 %v2586_v41, %v2585_v3  ;;  %v2587_v14 = vmul.f32 %v10008_v28, %v9984_v61 }
 0x9aa   : > { %v10010_v15 = vpop.eup %10009 }
 0x9ab   : > { %v2588_v23 = vmul.f32 %v10010_v15, %v9986_v26  ;;  %9038 = vmatprep.mubr.msk.bf16.mxu0 %vm1841_vm4, %v2593_v32 }
 0x9ac   : > { %v10012_v46 = vpop.eup %10011 }
 0x9ad   : > { %v2594_v38 = vpack.c.bf16 %v2588_v23, %v2587_v14  ;;  %v2589_v49 = vmul.f32 %v10012_v46, %v9988_v6  ;;  %v9821_v6 = vld [vmem:[%s10572_s12 + $0x18] sm:$0xff]  }
 0x9ae   : > { %v10014_v52 = vpop.eup %10013 }
 0x9af   : > { %9039 = vmatmul.mubr.msk.bf16.vlgmr.msra.gmra.mrb[32].mxu0 %vm1841_vm4, %v2594_v38  ;;  %v2590_v43 = vmul.f32 %v10014_v52, %v9990_v50 }
 0x9b0   : > { %v10016_v5 = vpop.eup %10015  ;;  %9059 = vmatpush3.bf16.msra.mxu0 %v9818_v47 }
 0x9b1   : > { %v2595_v9 = vpack.c.bf16 %v2590_v43, %v2589_v49  ;;  %9060 = vmatprep.subr.bf16.mxu0 %v9819_v39  ;;  %v2591_v61 = vmul.f32 %v10016_v5, %v9992_v44 }
 0x9b2   : > { %v10018_v22 = vpop.eup %10017 }
 0x9b3   : > { %9042 = vmatprep.mubr.msk.bf16.mxu0 %vm1841_vm4, %v2595_v9  ;;  %v2592_v26 = vmul.f32 %v10018_v22, %v9994_v56 }
 0x9b4   : > { %9061 = vmatpush3.bf16.msra.mxu0 %v9819_v39 }
 0x9b5   : > { %v2596_v27 = vpack.c.bf16 %v2592_v26, %v2591_v61  ;;  %9082 = vmatprep.subr.bf16.mxu0 %v9820_v53 }
 0x9b7   : > { %9043 = vmatmul.mubr.msk.bf16.gmra.mrb[36].mxu0 %vm1841_vm4, %v2596_v27 }
 0x9b8   : > { %9062 = vmatprep.mubr.msk.bf16.mxu0 %vm1841_vm4, %v10923_v55 }
 0x9bf   : > { %9063 = vmatmul.mubr.msk.bf16.vlgmr.msra.gmra.mrb[40].mxu0 %vm1841_vm4, %v10929_v1 }
 0x9c0   : > { %9066 = vmatprep.mubr.msk.bf16.mxu0 %vm1841_vm4, %v10936_v40  ;;  %9083 = vmatpush3.bf16.msra.mxu0 %v9820_v53 }
 0x9c1   : > { %9084 = vmatprep.subr.bf16.mxu0 %v9821_v6 }
 0x9c4   : > { %9085 = vmatpush3.bf16.msra.mxu0 %v9821_v6 }
 0x9c7   : > { %9067 = vmatmul.mubr.msk.bf16.gmra.mrb[44].mxu0 %vm1841_vm4, %v10941_v16 }
 0x9c8   : > { %9086 = vmatprep.mubr.msk.bf16.mxu0 %vm1841_vm4, %v10923_v55 }
 0x9cf   : > { %9087 = vmatmul.mubr.msk.bf16.vlgmr.msra.gmra.mrb[48].mxu0 %vm1841_vm4, %v10929_v1 }
 0x9d0   : > { %9090 = vmatprep.mubr.msk.bf16.mxu0 %vm1841_vm4, %v10936_v40 }
 0x9d7   : > { %9091 = vmatmul.mubr.msk.bf16.gmra.mrb[52].mxu0 %vm1841_vm4, %v10941_v16 }
 0x9d8   : > { %9110 = vmatprep.mubr.msk.bf16.mxu0 %vm1235_vm2, %v3082_v31 }
 0xa82   : > { %v11151_v50 = vpop.f32.mrb[32].mxu0 }
 0xa83   : > { %v11153_v44 = vpop.f32.mrb[33].mxu0 }
 0xa84   : > { %v11155_v56 = vpop.f32.mrb[34].mxu0 }
 0xa85   : > { %v2677_v55 = vpack.c.bf16 %v11155_v56, %v11151_v50  ;;  %v11159_v1 = vpop.f32.mrb[35].mxu0  ;;  %v3544_v50 = vpack.c.bf16 %v10836_v54, %v10830_v48  ;;  %v3545_v56 = vpack.c.bf16 %v10850_v4, %v10846_v7 }
 0xa86   : > { %v2676_v40 = vpack.c.bf16 %v11159_v1, %v11153_v44  ;;  %v3543_v44 = vpack.c.bf16 %v10840_v57, %v10832_v51  ;;  %v3546_v51 = vpack.c.bf16 %v10856_v8, %v10852_v17  ;;  %v8268_v57 = vld [vmem:[%s12415_s10] ss:$0 sm:$0xff] }
 0xa8a   : > { %v11163_v16 = vpop.f32.mrb[36].mxu0 }
 0xa8b   : > { %v11165_v47 = vpop.f32.mrb[37].mxu0 }
 0xa8c   : > { %v11167_v10 = vpop.f32.mrb[38].mxu0 }
 0xa8d   : > { %v2679_v30 = vpack.c.bf16 %v11167_v10, %v11163_v16  ;;  %v11171_v31 = vpop.f32.mrb[39].mxu0 }
 0xa8e   : > { %v2678_v11 = vpack.c.bf16 %v11171_v31, %v11165_v47 }
 0xa92   : > { %v9064_v60 = vpop.f32.mrb[40].mxu0 }
 0xa93   : > { %v2815_v19 = vpop.f32.mrb[41].mxu0 }
 0xa94   : > { %v9065_v62 = vpop.f32.mrb[42].mxu0 }
 0xa95   : > { %v2847_v2 = vpack.c.bf16 %v9065_v62, %v9064_v60  ;;  %v2818_v3 = vpop.f32.mrb[43].mxu0 }
 0xa96   : > { %v2846_v41 = vpack.c.bf16 %v2818_v3, %v2815_v19 }
 0xa98   : > { %9070 = vmatprep.subr.bf16.mxu1 %v2846_v41 }
 0xa99   : > { %9071 = vmatpush3.bf16.msra.mxu1 %v2846_v41 }
 0xa9a   : > { %v9068_v28 = vpop.f32.mrb[44].mxu0  ;;  %9072 = vmatprep.subr.bf16.mxu1 %v2847_v2 }
 0xa9b   : > { %v2831_v32 = vpop.f32.mrb[45].mxu0 }
 0xa9c   : > { %v9069_v15 = vpop.f32.mrb[46].mxu0 }
 0xa9d   : > { %v2849_v14 = vpack.c.bf16 %v9069_v15, %v9068_v28  ;;  %v2834_v23 = vpop.f32.mrb[47].mxu0  ;;  %9073 = vmatpush3.bf16.msra.mxu1 %v2847_v2 }
 0xa9e   : > { %v2848_v46 = vpack.c.bf16 %v2834_v23, %v2831_v32 }
 0xaa0   : > { %9074 = vmatprep.subr.bf16.mxu1 %v2848_v46 }
 0xaa1   : > { %9075 = vmatpush3.bf16.msra.mxu1 %v2848_v46 }
 0xaa2   : > { %9076 = vmatprep.subr.bf16.mxu1 %v2849_v14  ;;  %v9088_v38 = vpop.f32.mrb[48].mxu0 }
 0xaa3   : > { %v2974_v39 = vpop.f32.mrb[49].mxu0 }
 0xaa4   : > { %v9089_v52 = vpop.f32.mrb[50].mxu0 }
 0xaa5   : > { %v3006_v49 = vpack.c.bf16 %v9089_v52, %v9088_v38  ;;  %9077 = vmatpush3.bf16.msra.mxu1 %v2849_v14  ;;  %v2977_v43 = vpop.f32.mrb[51].mxu0 }
 0xaa6   : > { %v3005_v5 = vpack.c.bf16 %v2977_v43, %v2974_v39 }
 0xaa8   : > { %9079 = vmatmul.mubr.msk.bf16.vlgmr.msra.gmra.mrb[48].mxu1 %vm1613_vm3, %v10987_v13  ;;  %9094 = vmatprep.subr.bf16.mxu1 %v3005_v5 }
 0xaa9   : > { %9095 = vmatpush3.bf16.msra.mxu1 %v3005_v5  ;;  %9102 = vmatprep.mubr.msk.bf16.mxu1 %vm1613_vm3, %v10963_v63 }
 0xaaa   : > { %v9092_v9 = vpop.f32.mrb[52].mxu0  ;;  %9096 = vmatprep.subr.bf16.mxu1 %v3006_v49 }
 0xaab   : > { %v2990_v53 = vpop.f32.mrb[53].mxu0 }
 0xaac   : > { %v9093_v22 = vpop.f32.mrb[54].mxu0 }
 0xaad   : > { %v3008_v61 = vpack.c.bf16 %v9093_v22, %v9092_v9  ;;  %v2993_v26 = vpop.f32.mrb[55].mxu0  ;;  %9097 = vmatpush3.bf16.msra.mxu1 %v3006_v49 }
 0xaae   : > { %v3007_v27 = vpack.c.bf16 %v2993_v26, %v2990_v53 }
 0xab0   : > { %9098 = vmatprep.subr.bf16.mxu1 %v3007_v27 }
 0xab1   : > { %9099 = vmatpush3.bf16.msra.mxu1 %v3007_v27 }
 0xab2   : > { %9100 = vmatprep.subr.bf16.mxu1 %v3008_v61 }
 0xab5   : > { %9101 = vmatpush3.bf16.msra.mxu1 %v3008_v61 }
 0xab8   : > { %9103 = vmatmul.mubr.msk.bf16.vlgmr.msra.gmra.mrb[52].mxu1 %vm1613_vm3, %v10987_v13 }
 0xb7b   : > { %v9080_v6 = vpop.f32.mrb[48].mxu1 }
 0xb7c   : > { %v8230_v60 = vmul.f32 -1.442695, %v9080_v6  ;;  %v2884_v19 = vpop.f32.mrb[49].mxu1 }
 0xb7d   : > { %v8228_v62 = vmul.f32 -1.442695, %v2884_v19  ;;  %v9081_v63 = vpop.f32.mrb[50].mxu1 }
 0xb7e   : > { %10019 = vpow2.f32 %v8230_v60  ;;  %v8231_v2 = vmul.f32 -1.442695, %v9081_v63  ;;  %v2887_v3 = vpop.f32.mrb[51].mxu1 }
 0xb7f   : > { %10021 = vpow2.f32 %v8228_v62  ;;  %v8229_v41 = vmul.f32 -1.442695, %v2887_v3 }
 0xb80   : > { %10023 = vpow2.f32 %v8231_v2 }
 0xb81   : > { %10025 = vpow2.f32 %v8229_v41 }
 0xb88   : > { %v10020_v28 = vpop.eup %10019 }
 0xb89   : > { %v10022_v32 = vpop.eup %10021  ;;  %v2913_v15 = vadd.f32 1.0, %v10020_v28 }
 0xb8a   : > { %v10024_v14 = vpop.eup %10023  ;;  %v2911_v23 = vadd.f32 1.0, %v10022_v32 }
 0xb8b   : > { %v10026_v46 = vpop.eup %10025  ;;  %10027 = vrcp.f32 %v2913_v15  ;;  %v2914_v13 = vadd.f32 1.0, %v10024_v14 }
 0xb8c   : > { %10029 = vrcp.f32 %v2911_v23  ;;  %v2912_v38 = vadd.f32 1.0, %v10026_v46 }
 0xb8d   : > { %10031 = vrcp.f32 %v2914_v13 }
 0xb8e   : > { %10033 = vrcp.f32 %v2912_v38 }
 0xb95   : > { %v10028_v39 = vpop.eup %10027 }
 0xb96   : > { %v10030_v52 = vpop.eup %10029 }
 0xb97   : > { %v10032_v49 = vpop.eup %10031 }
 0xb98   : > { %v10034_v43 = vpop.eup %10033  ;;  %v3087_v5 = vpack.c.bf16 %v10032_v49, %v10028_v39 }
 0xb99   : > { %v3086_v9 = vpack.c.bf16 %v10034_v43, %v10030_v52 }
 0xb9a   : > { %v3104_v22 = vsel %vm1235_vm2, %v3087_v5, 0 }
 0xb9b   : > { %9704 = vmatprep.subr.msk.bf16.mxu0 %vm1235_vm2, %v3086_v9  ;;  %v3101_v53 = vsel %vm1235_vm2, %v3086_v9, 0 }
 0xb9c   : > { %9107 = vmatpush3.bf16.xpose.msra.mxu0 %v3101_v53 }
 0xb9d   : > { %9705 = vmatprep.subr.msk.bf16.mxu0 %vm1235_vm2, %v3087_v5 }
 0xba4   : > { %9109 = vmatpush3.bf16.xpose.msra.mxu0 %v3104_v22 }
 0xbab   : > { %9111 = vmatmul.mubr.msk.bf16.vlgmr.msra.gmra.mrb[56].mxu0 %vm1235_vm2, %v3083_v29 }
 0xbac   : > { %9114 = vmatprep.mubr.msk.bf16.mxu0 %vm1235_vm2, %v3084_v20 }
 0xbb3   : > { %9115 = vmatmul.mubr.msk.bf16.gmra.mrb[60].mxu0 %vm1235_vm2, %v3085_v37 }
 0xc7e   : > { %v9112_v61 = vpop.f32.mrb[56].mxu0 }
 0xc7f   : > { %v3140_v26 = vpop.f32.mrb[57].mxu0  ;;  %v3173_v27 = vmul.f32 0.25, %v9112_v61 }
 0xc80   : > { %v3171_v6 = vmul.f32 0.25, %v3140_v26  ;;  %v9113_v60 = vpop.f32.mrb[58].mxu0 }
 0xc81   : > { %v3143_v19 = vpop.f32.mrb[59].mxu0  ;;  %v3174_v62 = vmul.f32 0.25, %v9113_v60  ;;  %v3181_v18 = vadd.f32 %v3173_v27, %v11030_v25 }
 0xc82   : > { %v3172_v12 = vmul.f32 0.25, %v3143_v19  ;;  %v3179_v21 = vadd.f32 %v3171_v6, %v11024_v58 }
 0xc83   : > { %v3182_v37 = vadd.f32 %v3174_v62, %v11034_v42  ;;  %v3193_v41 = vsel %vm1841_vm4, %v3181_v18, -inf }
 0xc84   : > { %v3187_v29 = vsel %vm1841_vm4, %v3179_v21, -inf  ;;  %v3180_v34 = vadd.f32 %v3172_v12, %v11027_v24 }
 0xc85   : > { %3188 = vmax.xlane.f32.xlu0 %v3187_v29  ;;  %v3196_v24 = vsel %vm1841_vm4, %v3182_v37, -inf }
 0xc86   : > { %v9116_v33 = vpop.f32.mrb[60].mxu0  ;;  %v3190_v36 = vsel %vm1841_vm4, %v3180_v34, -inf }
 0xc87   : > { %3191 = vmax.xlane.f32.xlu1 %v3190_v36  ;;  %v3156_v20 = vpop.f32.mrb[61].mxu0  ;;  %v3177_v63 = vmul.f32 0.25, %v9116_v33 }
 0xc88   : > { %v3175_v2 = vmul.f32 0.25, %v3156_v20  ;;  %v9117_v3 = vpop.f32.mrb[62].mxu0 }
 0xc89   : > { %3194 = vmax.xlane.f32.xlu0 %v3193_v41  ;;  %v3159_v58 = vpop.f32.mrb[63].mxu0  ;;  %v3178_v28 = vmul.f32 0.25, %v9117_v3  ;;  %v3185_v14 = vadd.f32 %v3177_v63, %v11057_v35 }
 0xc8a   : > { %v3176_v32 = vmul.f32 0.25, %v3159_v58  ;;  %v3183_v25 = vadd.f32 %v3175_v2, %v11049_v59  ;;  %v9104_v59 = vpop.f32.mrb[52].mxu1 }
 0xc8b   : > { %3197 = vmax.xlane.f32.xlu1 %v3196_v24  ;;  %v3186_v46 = vadd.f32 %v3178_v28, %v11063_v45  ;;  %v3205_v13 = vsel %vm1841_vm4, %v3185_v14, -inf  ;;  %v3043_v39 = vpop.f32.mrb[53].mxu1  ;;  %v8246_v53 = vmul.f32 -1.442695, %v9104_v59 }
 0xc8c   : > { %v3199_v15 = vsel %vm1841_vm4, %v3183_v25, -inf  ;;  %v3184_v42 = vadd.f32 %v3176_v32, %v11054_v0  ;;  %v9105_v52 = vpop.f32.mrb[54].mxu1  ;;  %v8244_v43 = vmul.f32 -1.442695, %v3043_v39 }
 0xc8d   : > { %3200 = vmax.xlane.f32.xlu0 %v3199_v15  ;;  %v3208_v38 = vsel %vm1841_vm4, %v3186_v46, -inf  ;;  %v3046_v49 = vpop.f32.mrb[55].mxu1  ;;  %v8247_v26 = vmul.f32 -1.442695, %v9105_v52 }
 0xc8e   : > { %v3202_v23 = vsel %vm1841_vm4, %v3184_v42, -inf  ;;  %v8245_v5 = vmul.f32 -1.442695, %v3046_v49  ;;  %10035 = vpow2.f32 %v8244_v43 }
 0xc8f   : > { %3203 = vmax.xlane.f32.xlu1 %v3202_v23 }
 0xc90   : > { %10037 = vpow2.f32 %v8245_v5 }
 0xc91   : > { %3206 = vmax.xlane.f32.xlu0 %v3205_v13 }
 0xc93   : > { %3209 = vmax.xlane.f32.xlu1 %v3208_v38 }
 0xc98   : > { %v10036_v63 = vpop.eup %10035 }
 0xd12   : > { %v3189_v0 = vpop.xlane.xlu0 %3188 }
 0xd13   : > { %v3211_v35 = vsub.f32 %v3179_v21, %v3189_v0 }
 0xd14   : > { %v3192_v9 = vpop.xlane.xlu1 %3191 }
 0xd15   : > { %v3219_v22 = vmul.f32 1.442695, %v3211_v35  ;;  %v3212_v61 = vsub.f32 %v3180_v34, %v3192_v9 }
 0xd16   : > { %v3195_v45 = vpop.xlane.xlu0 %3194 }
 0xd17   : > { %10039 = vpow2.f32 %v3219_v22  ;;  %v3221_v27 = vmul.f32 1.442695, %v3212_v61  ;;  %v3213_v6 = vsub.f32 %v3181_v18, %v3195_v45  ;;  %v10038_v18 = vpop.eup %10037 }
 0xd18   : > { %v3198_v60 = vpop.xlane.xlu1 %3197  ;;  %10041 = vpow2.f32 %v8246_v53  ;;  %v3071_v23 = vadd.f32 1.0, %v10038_v18 }
 0xd19   : > { %10043 = vpow2.f32 %v3221_v27  ;;  %v3223_v19 = vmul.f32 1.442695, %v3213_v6  ;;  %v3214_v62 = vsub.f32 %v3182_v37, %v3198_v60 }
 0xd1a   : > { %v3201_v12 = vpop.xlane.xlu0 %3200  ;;  %10045 = vpow2.f32 %v8247_v26 }
 0xd1b   : > { %10047 = vpow2.f32 %v3223_v19  ;;  %v3225_v21 = vmul.f32 1.442695, %v3214_v62  ;;  %v3215_v29 = vsub.f32 %v3183_v25, %v3201_v12  ;;  %v3070_v25 = vadd.f32 1.0, %v10036_v63  ;;  %v9822_v62 = vld [vmem:[%s12413_s18 + $0x8] sm:$0xff]  }
 0xd1c   : > { %v3204_v33 = vpop.xlane.xlu1 %3203  ;;  %9130 = vmatprep.subr.bf16.mxu0 %v9822_v62 }
 0xd1d   : > { %10049 = vpow2.f32 %v3225_v21  ;;  %v3227_v34 = vmul.f32 1.442695, %v3215_v29  ;;  %v3216_v36 = vsub.f32 %v3184_v42, %v3204_v33  ;;  %9131 = vmatpush3.bf16.msra.mxu0 %v9822_v62 }
 0xd1e   : > { %v3207_v20 = vpop.xlane.xlu0 %3206 }
 0xd1f   : > { %10051 = vpow2.f32 %v3227_v34  ;;  %v3229_v2 = vmul.f32 1.442695, %v3216_v36  ;;  %v3217_v3 = vsub.f32 %v3185_v14, %v3207_v20 }
 0xd20   : > { %v3210_v41 = vpop.xlane.xlu1 %3209 }
 0xd21   : > { %v11213_v58 = vpop.eup %10039  ;;  %10053 = vpow2.f32 %v3229_v2  ;;  %v3231_v37 = vmul.f32 1.442695, %v3217_v3  ;;  %v3218_v28 = vsub.f32 %v3186_v46, %v3210_v41 }
 0xd22   : > { %v10042_v32 = vpop.eup %10041  ;;  %v3235_v24 = vsel %vm1841_vm4, %v11213_v58, 0.0 }
 0xd23   : > { %v11217_v15 = vpop.eup %10043  ;;  %10055 = vpow2.f32 %v3231_v37  ;;  %v3233_v42 = vmul.f32 1.442695, %v3218_v28  ;;  %3236 = vadd.xlane.f32.xlu0 %v3235_v24  ;;  %v3072_v59 = vadd.f32 1.0, %v10042_v32 }
 0xd24   : > { %v10046_v13 = vpop.eup %10045  ;;  %v3238_v14 = vsel %vm1841_vm4, %v11217_v15, 0.0 }
 0xd25   : > { %v10048_v38 = vpop.eup %10047  ;;  %10057 = vpow2.f32 %v3233_v42  ;;  %3239 = vadd.xlane.f32.xlu1 %v3238_v14  ;;  %v3073_v52 = vadd.f32 1.0, %v10046_v13 }
 0xd26   : > { %v3241_v46 = vsel %vm1841_vm4, %v10048_v38, 0.0  ;;  %10059 = vrcp.f32 %v3070_v25 }
 0xd27   : > { %v10050_v39 = vpop.eup %10049  ;;  %3242 = vadd.xlane.f32.xlu0 %v3241_v46  ;;  %10061 = vrcp.f32 %v3071_v23 }
 0xd28   : > { %v3244_v49 = vsel %vm1841_vm4, %v10050_v39, 0.0  ;;  %10063 = vrcp.f32 %v3072_v59 }
 0xd29   : > { %v10052_v43 = vpop.eup %10051  ;;  %3245 = vadd.xlane.f32.xlu1 %v3244_v49  ;;  %10065 = vrcp.f32 %v3073_v52 }
 0xd2a   : > { %v3247_v0 = vsel %vm1841_vm4, %v10052_v43, 0.0 }
 0xd2b   : > { %v10054_v5 = vpop.eup %10053  ;;  %3248 = vadd.xlane.f32.xlu0 %v3247_v0 }
 0xd2c   : > { %v3250_v35 = vsel %vm1841_vm4, %v10054_v5, 0.0 }
 0xd2d   : > { %v10056_v9 = vpop.eup %10055  ;;  %3251 = vadd.xlane.f32.xlu1 %v3250_v35 }
 0xd2e   : > { %v3253_v53 = vsel %vm1841_vm4, %v10056_v9, 0.0 }
 0xd2f   : > { %v10058_v22 = vpop.eup %10057  ;;  %3254 = vadd.xlane.f32.xlu0 %v3253_v53 }
 0xd30   : > { %v10060_v61 = vpop.eup %10059  ;;  %v3256_v45 = vsel %vm1841_vm4, %v10058_v22, 0.0 }
 0xd31   : > { %v10062_v26 = vpop.eup %10061  ;;  %3257 = vadd.xlane.f32.xlu1 %v3256_v45 }
 0xd32   : > { %v10064_v27 = vpop.eup %10063  ;;  %v3279_v6 = vpack.c.bf16 %v10062_v26, %v10060_v61 }
 0xd33   : > { %v10066_v60 = vpop.eup %10065 }
 0xd34   : > { %9118 = vmatprep.subr.bf16.mxu1 %v3279_v6  ;;  %v3280_v19 = vpack.c.bf16 %v10066_v60, %v10064_v27 }
 0xd35   : > { %9119 = vmatpush3.bf16.msra.mxu1 %v3279_v6 }
 0xd36   : > { %9120 = vmatprep.subr.bf16.mxu1 %v3280_v19 }
 0xd39   : > { %9121 = vmatpush3.bf16.msra.mxu1 %v3280_v19  ;;  %v9825_v19 = vld [vmem:[%s12414_s7 + $0x8] sm:$0xff]  }
 0xdb0   : > { %v3237_v12 = vpop.xlane.xlu0 %3236 }
 0xdb1   : > { %10067 = vrcp.f32 %v3237_v12 }
 0xdb2   : > { %v3240_v21 = vpop.xlane.xlu1 %3239 }
 0xdb3   : > { %10069 = vrcp.f32 %v3240_v21 }
 0xdb4   : > { %v3243_v29 = vpop.xlane.xlu0 %3242 }
 0xdb5   : > { %10071 = vrcp.f32 %v3243_v29 }
 0xdb6   : > { %v3246_v33 = vpop.xlane.xlu1 %3245 }
 0xdb7   : > { %10073 = vrcp.f32 %v3246_v33 }
 0xdb8   : > { %v3249_v34 = vpop.xlane.xlu0 %3248 }
 0xdb9   : > { %10075 = vrcp.f32 %v3249_v34 }
 0xdba   : > { %v3252_v36 = vpop.xlane.xlu1 %3251 }
 0xdbb   : > { %v10068_v20 = vpop.eup %10067  ;;  %10077 = vrcp.f32 %v3252_v36 }
 0xdbc   : > { %v3255_v63 = vpop.xlane.xlu0 %3254  ;;  %v3267_v18 = vmul.f32 %v10068_v20, %v11213_v58 }
 0xdbd   : > { %v10070_v2 = vpop.eup %10069  ;;  %10079 = vrcp.f32 %v3255_v63 }
 0xdbe   : > { %v3258_v3 = vpop.xlane.xlu1 %3257  ;;  %v3268_v41 = vmul.f32 %v10070_v2, %v11217_v15 }
 0xdbf   : > { %v10072_v37 = vpop.eup %10071  ;;  %10081 = vrcp.f32 %v3258_v3 }
 0xdc0   : > { %v3275_v28 = vpack.c.bf16 %v3268_v41, %v3267_v18  ;;  %v3269_v24 = vmul.f32 %v10072_v37, %v10048_v38 }
 0xdc1   : > { %v10074_v32 = vpop.eup %10073 }
 0xdc2   : > { %v3270_v25 = vmul.f32 %v10074_v32, %v10050_v39  ;;  %9122 = vmatprep.mubr.msk.bf16.mxu1 %vm1841_vm4, %v3275_v28  ;;  %v9823_v39 = vld [vmem:[%s12413_s18] sm:$0xff]  }
 0xdc3   : > { %v10076_v42 = vpop.eup %10075  ;;  %9140 = vmatprep.subr.bf16.mxu0 %v9823_v39 }
 0xdc4   : > { %v3276_v23 = vpack.c.bf16 %v3270_v25, %v3269_v24  ;;  %v3271_v14 = vmul.f32 %v10076_v42, %v10052_v43 }
 0xdc5   : > { %v10078_v13 = vpop.eup %10077 }
 0xdc6   : > { %9123 = vmatmul.mubr.msk.bf16.vlgmr.msra.gmra.mrb[56].mxu1 %vm1841_vm4, %v3276_v23  ;;  %v3272_v46 = vmul.f32 %v10078_v13, %v10054_v5  ;;  %v9824_v5 = vld [vmem:[%s12414_s7] sm:$0xff]  }
 0xdc7   : > { %v10080_v59 = vpop.eup %10079 }
 0xdc8   : > { %v3277_v58 = vpack.c.bf16 %v3272_v46, %v3271_v14  ;;  %v3273_v52 = vmul.f32 %v10080_v59, %v10056_v9 }
 0xdc9   : > { %v10082_v15 = vpop.eup %10081 }
 0xdca   : > { %9126 = vmatprep.mubr.msk.bf16.mxu1 %vm1841_vm4, %v3277_v58  ;;  %v3274_v49 = vmul.f32 %v10082_v15, %v10058_v22 }
 0xdcc   : > { %v3278_v38 = vpack.c.bf16 %v3274_v49, %v3273_v52 }
 0xdce   : > { %9127 = vmatmul.mubr.msk.bf16.gmra.mrb[60].mxu1 %vm1841_vm4, %v3278_v38 }
 0xe99   : > { %v9124_v0 = vpop.f32.mrb[56].mxu1 }
 0xe9a   : > { %v3327_v35 = vpop.f32.mrb[57].mxu1 }
 0xe9b   : > { %v9125_v53 = vpop.f32.mrb[58].mxu1 }
 0xe9c   : > { %v3359_v61 = vpack.c.bf16 %v9125_v53, %v9124_v0  ;;  %v3330_v45 = vpop.f32.mrb[59].mxu1 }
 0xe9d   : > { %v3358_v43 = vpack.c.bf16 %v3330_v45, %v3327_v35 }
 0xe9f   : > { %9132 = vmatprep.mubr.msk.bf16.mxu0 %vm1235_vm2, %v3358_v43 }
 0xea0   : > { %9133 = vmatmul.mubr.msk.bf16.vlgmr.msra.gmra.mrb[64].mxu0 %vm1235_vm2, %v3359_v61 }
 0xea1   : > { %v9128_v26 = vpop.f32.mrb[60].mxu1  ;;  %9141 = vmatpush3.bf16.msra.mxu0 %v9823_v39 }
 0xea2   : > { %v3343_v9 = vpop.f32.mrb[61].mxu1  ;;  %9150 = vmatprep.subr.bf16.mxu0 %v9824_v5 }
 0xea3   : > { %v9129_v22 = vpop.f32.mrb[62].mxu1 }
 0xea4   : > { %v3361_v27 = vpack.c.bf16 %v9129_v22, %v9128_v26  ;;  %v3346_v6 = vpop.f32.mrb[63].mxu1 }
 0xea5   : > { %v3360_v60 = vpack.c.bf16 %v3346_v6, %v3343_v9 }
 0xea7   : > { %9136 = vmatprep.mubr.msk.bf16.mxu0 %vm1235_vm2, %v3360_v60 }
 0xea8   : > { %9137 = vmatmul.mubr.msk.bf16.gmra.mrb[68].mxu0 %vm1235_vm2, %v3361_v27 }
 0xea9   : > { %9142 = vmatprep.mubr.msk.bf16.mxu0 %vm1235_vm2, %v2676_v40 }
 0xeb0   : > { %9143 = vmatmul.mubr.msk.bf16.vlgmr.msra.gmra.mrb[64].mxu0 %vm1235_vm2, %v2677_v55 }
 0xeb1   : > { %9146 = vmatprep.mubr.msk.bf16.mxu0 %vm1235_vm2, %v2678_v11  ;;  %9151 = vmatpush3.bf16.msra.mxu0 %v9824_v5 }
 0xeb2   : > { %9152 = vmatprep.subr.bf16.mxu0 %v9825_v19 }
 0xeb5   : > { %9153 = vmatpush3.bf16.msra.mxu0 %v9825_v19 }
 0xeb8   : > { %9147 = vmatmul.mubr.msk.bf16.gmra.mrb[68].mxu0 %vm1235_vm2, %v2679_v30 }
 0xeb9   : > { %9154 = vmatprep.mubr.msk.bf16.mxu0 %vm1841_vm4, %v3543_v44 }
 0xec0   : > { %9155 = vmatmul.mubr.msk.bf16.vlgmr.msra.gmra.mrb[64].mxu0 %vm1841_vm4, %v3544_v50 }
 0xec1   : > { %9158 = vmatprep.mubr.msk.bf16.mxu0 %vm1841_vm4, %v3545_v56 }
 0xec8   : > { %9159 = vmatmul.mubr.msk.bf16.gmra.mrb[68].mxu0 %vm1841_vm4, %v3546_v51 }
 0xf93   : > { %v9156_v55 = vpop.f32.mrb[64].mxu0 }
 0xf94   : > { %v3609_v1 = vpop.f32.mrb[65].mxu0  ;;  %v11272_v48 = vadd.f32 %v9156_v55, %v8268_v57  ;;  %v9826_v55 = vld [vmem:[%s12416_s1] sm:$0xff]   ;;  %s12419_s1 = sld [smem:[#allocation19_spill]] }
 0xf95   : > { %v11270_v40 = vadd.f32 %v8268_v57, %v3609_v1  ;;  %v9157_v16 = vpop.f32.mrb[66].mxu0  ;;  %9162 = vmatprep.subr.bf16.mxu1 %v9826_v55 }
 0xf96   : > { %v3612_v47 = vpop.f32.mrb[67].mxu0  ;;  %v11278_v4 = vadd.f32 %v9157_v16, %v8268_v57  ;;  %v3651_v10 = vsel %vm1235_vm2, %v11272_v48, 0.0  ;;  %9163 = vmatpush3.bf16.msra.mxu1 %v9826_v55 }
 0xf97   : > { %v11274_v54 = vadd.f32 %v8268_v57, %v3612_v47  ;;  %v3645_v7 = vsel %vm1235_vm2, %v11270_v40, 0.0 }
 0xf98   : > { %3646 = vadd.xlane.f32.xlu0 %v3645_v7  ;;  %v3654_v62 = vsel %vm1235_vm2, %v11278_v4, 0.0 }
 0xf99   : > { %v3648_v17 = vsel %vm1235_vm2, %v11274_v54, 0.0 }
 0xf9a   : > { %3649 = vadd.xlane.f32.xlu1 %v3648_v17 }
 0xf9b   : > { %v9160_v8 = vpop.f32.mrb[68].mxu0 }
 0xf9c   : > { %v3625_v30 = vpop.f32.mrb[69].mxu0  ;;  %3652 = vadd.xlane.f32.xlu0 %v3651_v10  ;;  %v11288_v21 = vadd.f32 %v9160_v8, %v8268_v57 }
 0xf9d   : > { %v11284_v31 = vadd.f32 %v8268_v57, %v3625_v30  ;;  %v9161_v11 = vpop.f32.mrb[70].mxu0 }
 0xf9e   : > { %v3628_v12 = vpop.f32.mrb[71].mxu0  ;;  %3655 = vadd.xlane.f32.xlu1 %v3654_v62  ;;  %v11294_v34 = vadd.f32 %v9161_v11, %v8268_v57  ;;  %v3663_v20 = vsel %vm1235_vm2, %v11288_v21, 0.0 }
 0xf9f   : > { %v11290_v29 = vadd.f32 %v8268_v57, %v3628_v12  ;;  %v3657_v33 = vsel %vm1235_vm2, %v11284_v31, 0.0 }
 0xfa0   : > { %3658 = vadd.xlane.f32.xlu0 %v3657_v33  ;;  %v3666_v63 = vsel %vm1235_vm2, %v11294_v34, 0.0 }
 0xfa1   : > { %v3660_v36 = vsel %vm1235_vm2, %v11290_v29, 0.0 }
 0xfa2   : > { %3661 = vadd.xlane.f32.xlu1 %v3660_v36 }
 0xfa4   : > { %3664 = vadd.xlane.f32.xlu0 %v3663_v20 }
 0xfa6   : > { %3667 = vadd.xlane.f32.xlu1 %v3666_v63 }
0x1025   : > { %v3647_v2 = vpop.xlane.xlu0 %3646 }
0x1026   : > { %v3670_v3 = vmul.f32 0.0625, %v3647_v2 }
0x1027   : > { %v3650_v18 = vpop.xlane.xlu1 %3649 }
0x1028   : > { %v11303_v41 = vsub.f32 %v11270_v40, %v3670_v3  ;;  %v3671_v37 = vmul.f32 0.0625, %v3650_v18 }
0x1029   : > { %v3653_v28 = vpop.xlane.xlu0 %3652 }
0x102a   : > { %v11306_v32 = vsub.f32 %v11274_v54, %v3671_v37  ;;  %v3672_v24 = vmul.f32 0.0625, %v3653_v28  ;;  %v3686_v25 = vmul.f32 %v11303_v41, %v11303_v41 }
0x102b   : > { %v3656_v42 = vpop.xlane.xlu1 %3655 }
0x102c   : > { %v11311_v23 = vsub.f32 %v11272_v48, %v3672_v24  ;;  %v3673_v13 = vmul.f32 0.0625, %v3656_v42  ;;  %v3694_v14 = vsel %vm1235_vm2, %v3686_v25, 0.0  ;;  %v3687_v46 = vmul.f32 %v11306_v32, %v11306_v32  ;;  %v8275_v42 = vld [vmem:[%s12415_s10 + $0x1] ss:$0 sm:$0xff] }
0x102d   : > { %3695 = vadd.xlane.f32.xlu0 %v3694_v14  ;;  %v3659_v59 = vpop.xlane.xlu0 %3658 }
0x102e   : > { %v11317_v58 = vsub.f32 %v11278_v4, %v3673_v13  ;;  %v3674_v15 = vmul.f32 0.0625, %v3659_v59  ;;  %v3697_v52 = vsel %vm1235_vm2, %v3687_v46, 0.0  ;;  %v3688_v49 = vmul.f32 %v11311_v23, %v11311_v23 }
0x102f   : > { %3698 = vadd.xlane.f32.xlu1 %v3697_v52  ;;  %v3662_v38 = vpop.xlane.xlu1 %3661 }
0x1030   : > { %v11323_v39 = vsub.f32 %v11284_v31, %v3674_v15  ;;  %v3675_v0 = vmul.f32 0.0625, %v3662_v38  ;;  %v3700_v35 = vsel %vm1235_vm2, %v3688_v49, 0.0  ;;  %v3689_v53 = vmul.f32 %v11317_v58, %v11317_v58 }
0x1031   : > { %3701 = vadd.xlane.f32.xlu0 %v3700_v35  ;;  %v3665_v61 = vpop.xlane.xlu0 %3664 }
0x1032   : > { %v11329_v45 = vsub.f32 %v11290_v29, %v3675_v0  ;;  %v3676_v43 = vmul.f32 0.0625, %v3665_v61  ;;  %v3703_v5 = vsel %vm1235_vm2, %v3689_v53, 0.0  ;;  %v3690_v26 = vmul.f32 %v11323_v39, %v11323_v39  ;;  %v8276_v0 = vld [vmem:[%s12415_s10 + $0x2] ss:$0 sm:$0xff] }
0x1033   : > { %3704 = vadd.xlane.f32.xlu1 %v3703_v5  ;;  %v3668_v9 = vpop.xlane.xlu1 %3667 }
0x1034   : > { %v11335_v22 = vsub.f32 %v11288_v21, %v3676_v43  ;;  %v3677_v27 = vmul.f32 0.0625, %v3668_v9  ;;  %v3706_v6 = vsel %vm1235_vm2, %v3690_v26, 0.0  ;;  %v3691_v60 = vmul.f32 %v11329_v45, %v11329_v45 }
0x1035   : > { %3707 = vadd.xlane.f32.xlu0 %v3706_v6 }
0x1036   : > { %v11341_v19 = vsub.f32 %v11294_v34, %v3677_v27  ;;  %v3709_v44 = vsel %vm1235_vm2, %v3691_v60, 0.0  ;;  %v3692_v50 = vmul.f32 %v11335_v22, %v11335_v22 }
0x1037   : > { %3710 = vadd.xlane.f32.xlu1 %v3709_v44 }
0x1038   : > { %v3712_v56 = vsel %vm1235_vm2, %v3692_v50, 0.0  ;;  %v3693_v51 = vmul.f32 %v11341_v19, %v11341_v19 }
0x1039   : > { %3713 = vadd.xlane.f32.xlu0 %v3712_v56 }
0x103a   : > { %v3715_v57 = vsel %vm1235_vm2, %v3693_v51, 0.0 }
0x103b   : > { %3716 = vadd.xlane.f32.xlu1 %v3715_v57 }
0x10ba   : > { %v3696_v1 = vpop.xlane.xlu0 %3695 }
0x10bb   : > { %v3718_v16 = vmul.f32 0.0625, %v3696_v1 }
0x10bc   : > { %v3699_v47 = vpop.xlane.xlu1 %3698 }
0x10bd   : > { %v3726_v7 = vadd.f32 1e-06, %v3718_v16  ;;  %v3719_v17 = vmul.f32 0.0625, %v3699_v47 }
0x10be   : > { %v3702_v8 = vpop.xlane.xlu0 %3701 }
0x10bf   : > { %10083 = vrsqrt.f32 %v3726_v7  ;;  %v3727_v10 = vadd.f32 1e-06, %v3719_v17  ;;  %v3720_v30 = vmul.f32 0.0625, %v3702_v8 }
0x10c0   : > { %v3705_v11 = vpop.xlane.xlu1 %3704 }
0x10c1   : > { %10085 = vrsqrt.f32 %v3727_v10  ;;  %v3728_v62 = vadd.f32 1e-06, %v3720_v30  ;;  %v3721_v12 = vmul.f32 0.0625, %v3705_v11  ;;  %v9829_v11 = vld [vmem:[#allocation2 + $0x40] sm:$0xff]  }
0x10c2   : > { %v3708_v33 = vpop.xlane.xlu0 %3707  ;;  %9212 = vmatprep.mubr.msk.bf16.mxu0 %vm1613_vm3, %v9829_v11 }
0x10c3   : > { %10087 = vrsqrt.f32 %v3728_v62  ;;  %v3729_v36 = vadd.f32 1e-06, %v3721_v12  ;;  %v3722_v20 = vmul.f32 0.0625, %v3708_v33 }
0x10c4   : > { %v3711_v63 = vpop.xlane.xlu1 %3710 }
0x10c5   : > { %10089 = vrsqrt.f32 %v3729_v36  ;;  %v3730_v2 = vadd.f32 1e-06, %v3722_v20  ;;  %v3723_v3 = vmul.f32 0.0625, %v3711_v63 }
0x10c6   : > { %v3714_v18 = vpop.xlane.xlu0 %3713 }
0x10c7   : > { %10091 = vrsqrt.f32 %v3730_v2  ;;  %v3731_v37 = vadd.f32 1e-06, %v3723_v3  ;;  %v3724_v28 = vmul.f32 0.0625, %v3714_v18 }
0x10c8   : > { %v3717_v24 = vpop.xlane.xlu1 %3716 }
0x10c9   : > { %v10084_v25 = vpop.eup %10083  ;;  %10093 = vrsqrt.f32 %v3731_v37  ;;  %v3732_v13 = vadd.f32 1e-06, %v3724_v28  ;;  %v3725_v14 = vmul.f32 0.0625, %v3717_v24 }
0x10ca   : > { %v3742_v46 = vmul.f32 %v10084_v25, %v11303_v41 }
0x10cb   : > { %v10086_v59 = vpop.eup %10085  ;;  %10095 = vrsqrt.f32 %v3732_v13  ;;  %v3733_v15 = vadd.f32 1e-06, %v3725_v14 }
0x10cc   : > { %v3743_v52 = vmul.f32 %v10086_v59, %v11306_v32  ;;  %v3754_v49 = vmul.f32 %v8275_v42, %v3742_v46 }
0x10cd   : > { %v10088_v38 = vpop.eup %10087  ;;  %10097 = vrsqrt.f32 %v3733_v15 }
0x10ce   : > { %v3744_v35 = vmul.f32 %v10088_v38, %v11311_v23  ;;  %v3755_v53 = vmul.f32 %v8275_v42, %v3743_v52  ;;  %v3766_v26 = vadd.f32 %v8276_v0, %v3754_v49 }
0x10cf   : > { %v10090_v61 = vpop.eup %10089 }
0x10d0   : > { %v3756_v43 = vmul.f32 %v8275_v42, %v3744_v35  ;;  %v3745_v5 = vmul.f32 %v10090_v61, %v11317_v58  ;;  %v3767_v9 = vadd.f32 %v8276_v0, %v3755_v53 }
0x10d1   : > { %v10092_v27 = vpop.eup %10091 }
0x10d2   : > { %v3757_v41 = vmul.f32 %v8275_v42, %v3745_v5  ;;  %v3746_v6 = vmul.f32 %v10092_v27, %v11323_v39  ;;  %v3774_v60 = vpack.c.bf16 %v3767_v9, %v3766_v26  ;;  %v3768_v32 = vadd.f32 %v8276_v0, %v3756_v43 }
0x10d3   : > { %v10094_v44 = vpop.eup %10093 }
0x10d4   : > { %v3769_v50 = vadd.f32 %v8276_v0, %v3757_v41  ;;  %v3747_v56 = vmul.f32 %v10094_v44, %v11329_v45  ;;  %9164 = vmatprep.mubr.msk.bf16.mxu1 %vm1235_vm2, %v3774_v60  ;;  %v3758_v23 = vmul.f32 %v8275_v42, %v3746_v6 }
0x10d5   : > { %v10096_v51 = vpop.eup %10095 }
0x10d6   : > { %v3748_v57 = vmul.f32 %v10096_v51, %v11335_v22  ;;  %v3775_v55 = vpack.c.bf16 %v3769_v50, %v3768_v32  ;;  %v3759_v58 = vmul.f32 %v8275_v42, %v3747_v56  ;;  %v3770_v39 = vadd.f32 %v8276_v0, %v3758_v23  ;;  %v9827_v22 = vld [vmem:[#allocation2] sm:$0xff]  }
0x10d7   : > { %v10098_v1 = vpop.eup %10097 }
0x10d8   : > { %v3749_v16 = vmul.f32 %v10098_v1, %v11341_v19  ;;  %9165 = vmatmul.mubr.msk.bf16.vlgmr.msra.gmra.mrb[64].mxu1 %vm1235_vm2, %v3775_v55  ;;  %v3771_v47 = vadd.f32 %v8276_v0, %v3759_v58  ;;  %v3760_v7 = vmul.f32 %v8275_v42, %v3748_v57  ;;  %v8277_v19 = vld [vmem:[%s12417_s26] ss:$0 sm:$0xff]  ;;  %s12420_s26 = sld [smem:[#allocation18_spill]] }
0x10da   : > { %v3776_v17 = vpack.c.bf16 %v3771_v47, %v3770_v39  ;;  %v3761_v8 = vmul.f32 %v8275_v42, %v3749_v16  ;;  %v3772_v45 = vadd.f32 %v8276_v0, %v3760_v7 }
0x10dc   : > { %9168 = vmatprep.mubr.msk.bf16.mxu1 %vm1235_vm2, %v3776_v17  ;;  %v3773_v10 = vadd.f32 %v8276_v0, %v3761_v8 }
0x10de   : > { %v3777_v30 = vpack.c.bf16 %v3773_v10, %v3772_v45  ;;  %s12421_s3 = smov %s12420_s26 }
0x10e0   : > { %9169 = vmatmul.mubr.msk.bf16.gmra.mrb[68].mxu1 %vm1235_vm2, %v3777_v30 }
0x10e1   : > { %9180 = vmatprep.mubr.msk.bf16.mxu1 %vm1613_vm3, %v9827_v22 }
0x11ab   : > { %v9166_v62 = vpop.f32.mrb[64].mxu1 }
0x11ac   : > { %v3845_v12 = vadd.f32 %v9166_v62, %v8277_v19  ;;  %v3836_v33 = vpop.f32.mrb[65].mxu1 }
0x11ad   : > { %v3837_v36 = vadd.f32 %v8277_v19, %v3836_v33  ;;  %v9167_v20 = vpop.f32.mrb[66].mxu1 }
0x11ae   : > { %v3877_v63 = vmul.f32 0.70710677, %v3845_v12  ;;  %v3848_v2 = vadd.f32 %v9167_v20, %v8277_v19  ;;  %v3839_v3 = vpop.f32.mrb[67].mxu1  ;;  %v3869_v32 = vmul.f32 0.5, %v3845_v12  ;;  %v9828_v20 = vld [vmem:[#allocation2 + $0x8] sm:$0xff]  }
0x11af   : > { %v3875_v18 = vmul.f32 0.70710677, %v3837_v36  ;;  %v3840_v37 = vadd.f32 %v8277_v19, %v3839_v3  ;;  %v3867_v9 = vmul.f32 0.5, %v3837_v36  ;;  %v9833_v3 = vld [vmem:[#allocation2 + $0x50] sm:$0xff]  }
0x11b0   : > { %10099 = verf.f32 %v3877_v63  ;;  %v3878_v28 = vmul.f32 0.70710677, %v3848_v2  ;;  %v3870_v6 = vmul.f32 0.5, %v3848_v2  ;;  %v9830_v63 = vld [vmem:[#allocation2 + $0x48] sm:$0xff]   ;;  %v9831_v2 = vld [vmem:[#allocation2 + $0x10] sm:$0xff]  }
0x11b1   : > { %10101 = verf.f32 %v3875_v18  ;;  %v3876_v24 = vmul.f32 0.70710677, %v3840_v37  ;;  %v3868_v60 = vmul.f32 0.5, %v3840_v37  ;;  %v9832_v18 = vld [vmem:[#allocation2 + $0x18] sm:$0xff]  }
0x11b2   : > { %10103 = verf.f32 %v3878_v28  ;;  %v9834_v37 = vld [vmem:[#allocation2 + $0x58] sm:$0xff]   ;;  %v9835_v28 = vld [vmem:[#allocation2 + $0x20] sm:$0xff]  }
0x11b3   : > { %10105 = verf.f32 %v3876_v24  ;;  %v9170_v25 = vpop.f32.mrb[68].mxu1  ;;  %v9837_v24 = vld [vmem:[#allocation2 + $0xa0] sm:$0xff]  }
0x11b4   : > { %v3861_v42 = vadd.f32 %v9170_v25, %v8277_v19  ;;  %v3852_v13 = vpop.f32.mrb[69].mxu1  ;;  %v9836_v25 = vld [vmem:[#allocation2 + $0x28] sm:$0xff]  }
0x11b5   : > { %v3853_v14 = vadd.f32 %v8277_v19, %v3852_v13  ;;  %v9171_v46 = vpop.f32.mrb[70].mxu1  ;;  %v9839_v13 = vld [vmem:[#allocation2 + $0x30] sm:$0xff]  }
0x11b6   : > { %v3881_v59 = vmul.f32 0.70710677, %v3861_v42  ;;  %v3864_v15 = vadd.f32 %v9171_v46, %v8277_v19  ;;  %v3855_v52 = vpop.f32.mrb[71].mxu1  ;;  %v3873_v22 = vmul.f32 0.5, %v3861_v42  ;;  %v9838_v42 = vld [vmem:[#allocation2 + $0xa8] sm:$0xff]   ;;  %v9840_v46 = vld [vmem:[#allocation2 + $0x38] sm:$0xff]  }
0x11b7   : > { %v3879_v49 = vmul.f32 0.70710677, %v3853_v14  ;;  %v3856_v38 = vadd.f32 %v8277_v19, %v3855_v52  ;;  %v3871_v7 = vmul.f32 0.5, %v3853_v14  ;;  %v9845_v14 = vld [vmem:[#allocation2 + $0xb0] sm:$0xff]   ;;  %v9849_v52 = vld [vmem:[#allocation2 + $0xe0] sm:$0xff]  }
0x11b8   : > { %10107 = verf.f32 %v3881_v59  ;;  %v3882_v0 = vmul.f32 0.70710677, %v3864_v15  ;;  %v3874_v45 = vmul.f32 0.5, %v3864_v15  ;;  %v9846_v59 = vld [vmem:[#allocation2 + $0xb8] sm:$0xff]   ;;  %v9841_v15 = vld [vmem:[#allocation2 + $0x60] sm:$0xff]  }
0x11b9   : > { %10109 = verf.f32 %v3879_v49  ;;  %v3880_v35 = vmul.f32 0.70710677, %v3856_v38  ;;  %v3872_v10 = vmul.f32 0.5, %v3856_v38  ;;  %v9842_v49 = vld [vmem:[#allocation2 + $0x68] sm:$0xff]  }
0x11ba   : > { %v10100_v53 = vpop.eup %10099  ;;  %10111 = verf.f32 %v3882_v0  ;;  %v9850_v38 = vld [vmem:[#allocation2 + $0xe8] sm:$0xff]   ;;  %v9843_v0 = vld [vmem:[#allocation2 + $0x70] sm:$0xff]  }
0x11bb   : > { %v10102_v61 = vpop.eup %10101  ;;  %10113 = verf.f32 %v3880_v35  ;;  %v3893_v41 = vadd.f32 1.0, %v10100_v53  ;;  %v9853_v35 = vld [vmem:[#allocation2 + $0xf0] sm:$0xff]   ;;  %v9844_v53 = vld [vmem:[#allocation2 + $0x78] sm:$0xff]  }
0x11bc   : > { %v10104_v43 = vpop.eup %10103  ;;  %v3891_v5 = vadd.f32 1.0, %v10102_v61  ;;  %v9854_v61 = vld [vmem:[#allocation2 + $0xf8] sm:$0xff]  }
0x11bd   : > { %v10106_v26 = vpop.eup %10105  ;;  %v3894_v27 = vadd.f32 1.0, %v10104_v43  ;;  %v11374_v57 = vmul.f32 %v3893_v41, %v3869_v32  ;;  %v9847_v43 = vld [vmem:[#allocation2 + $0xc0] sm:$0xff]   ;;  %v9856_v41 = vld [vmem:[#allocation2 + $0x108] sm:$0xff]  }
0x11be   : > { %v3892_v44 = vadd.f32 1.0, %v10106_v26  ;;  %v11368_v50 = vmul.f32 %v3891_v5, %v3867_v9  ;;  %v9848_v5 = vld [vmem:[#allocation2 + $0xc8] sm:$0xff]   ;;  %v9851_v26 = vld [vmem:[#allocation2 + $0xd0] sm:$0xff]   ;;  %v9852_v9 = vld [vmem:[#allocation2 + $0xd8] sm:$0xff]  }
0x11bf   : > { %v11370_v56 = vmul.f32 %v3894_v27, %v3870_v6  ;;  %v9855_v27 = vld [vmem:[#allocation2 + $0x100] sm:$0xff]   ;;  %v9857_v6 = vld [vmem:[#allocation2 + $0x110] sm:$0xff]   ;;  %v9860_v32 = vld [vmem:[%s12419_s1 + $0x8] sm:$0xff]  }
0x11c0   : > { %v11372_v23 = vmul.f32 %v3892_v44, %v3868_v60  ;;  %v9858_v60 = vld [vmem:[#allocation2 + $0x118] sm:$0xff]   ;;  %v9859_v44 = vld [vmem:[%s12419_s1] sm:$0xff]  }
0x11c1   : > { %v11382_v16 = vpack.c.bf16 %v11370_v56, %v11374_v57 }
0x11c2   : > { %v10108_v51 = vpop.eup %10107  ;;  %v11378_v55 = vpack.c.bf16 %v11372_v23, %v11368_v50 }
0x11c3   : > { %v10110_v58 = vpop.eup %10109  ;;  %v3897_v8 = vadd.f32 1.0, %v10108_v51  ;;  %v9861_v51 = vld [vmem:[%s12419_s1 + $0x10] sm:$0xff]  }
0x11c4   : > { %v10112_v1 = vpop.eup %10111  ;;  %v3895_v39 = vadd.f32 1.0, %v10110_v58  ;;  %9172 = vmatprep.subr.bf16.mxu1 %v11378_v55  ;;  %9204 = vmatprep.subr.bf16.mxu0 %v11378_v55 }
0x11c5   : > { %v10114_v47 = vpop.eup %10113  ;;  %v3898_v17 = vadd.f32 1.0, %v10112_v1  ;;  %9173 = vmatpush3.bf16.msra.mxu1 %v11378_v55  ;;  %9205 = vmatpush3.bf16.msra.mxu0 %v11378_v55  ;;  %v11398_v12 = vmul.f32 %v3897_v8, %v3873_v22 }
0x11c6   : > { %v3896_v30 = vadd.f32 1.0, %v10114_v47  ;;  %9174 = vmatprep.subr.bf16.mxu1 %v11382_v16  ;;  %9206 = vmatprep.subr.bf16.mxu0 %v11382_v16  ;;  %v11390_v11 = vmul.f32 %v3895_v39, %v3871_v7 }
0x11c7   : > { %v11392_v19 = vmul.f32 %v3898_v17, %v3874_v45 }
0x11c8   : > { %v11394_v62 = vmul.f32 %v3896_v30, %v3872_v10 }
0x11c9   : > { %9175 = vmatpush3.bf16.msra.mxu1 %v11382_v16  ;;  %9207 = vmatpush3.bf16.msra.mxu0 %v11382_v16  ;;  %v11406_v36 = vpack.c.bf16 %v11392_v19, %v11398_v12 }
0x11ca   : > { %v11402_v33 = vpack.c.bf16 %v11394_v62, %v11390_v11 }
0x11cc   : > { %9176 = vmatprep.subr.bf16.mxu1 %v11402_v33  ;;  %9208 = vmatprep.subr.bf16.mxu0 %v11402_v33 }
0x11cd   : > { %9177 = vmatpush3.bf16.msra.mxu1 %v11402_v33  ;;  %9209 = vmatpush3.bf16.msra.mxu0 %v11402_v33 }
0x11ce   : > { %9178 = vmatprep.subr.bf16.mxu1 %v11406_v36  ;;  %9210 = vmatprep.subr.bf16.mxu0 %v11406_v36 }
0x11d1   : > { %9179 = vmatpush3.bf16.msra.mxu1 %v11406_v36  ;;  %9211 = vmatpush3.bf16.msra.mxu0 %v11406_v36 }
0x11d2   : > { %9188 = vmatprep.subr.bf16.mxu1 %v11378_v55  ;;  %9236 = vmatprep.subr.bf16.mxu0 %v11378_v55 }
0x11d4   : > { %9181 = vmatmul.mubr.msk.bf16.vlgmr.msra.gmra.mrb[72].mxu1 %vm1613_vm3, %v9828_v20  ;;  %9213 = vmatmul.mubr.msk.bf16.vlgmr.msra.gmra.mrb[72].mxu0 %vm1613_vm3, %v9830_v63 }
0x11d5   : > { %9189 = vmatpush3.bf16.msra.mxu1 %v11378_v55  ;;  %9237 = vmatpush3.bf16.msra.mxu0 %v11378_v55 }
0x11d6   : > { %9190 = vmatprep.subr.bf16.mxu1 %v11382_v16  ;;  %9238 = vmatprep.subr.bf16.mxu0 %v11382_v16 }
0x11d7   : > { %9184 = vmatprep.mubr.msk.bf16.mxu1 %vm1613_vm3, %v9831_v2  ;;  %9216 = vmatprep.mubr.msk.bf16.mxu0 %vm1613_vm3, %v9833_v3  ;;  %v8283_v3 = vld [vmem:[%s12421_s3 + $0x4] ss:$0 sm:$0xff] }
0x11d9   : > { %9191 = vmatpush3.bf16.msra.mxu1 %v11382_v16  ;;  %9239 = vmatpush3.bf16.msra.mxu0 %v11382_v16 }
0x11da   : > { %9192 = vmatprep.subr.bf16.mxu1 %v11402_v33  ;;  %9240 = vmatprep.subr.bf16.mxu0 %v11402_v33 }
0x11dc   : > { %9185 = vmatmul.mubr.msk.bf16.gmra.mrb[76].mxu1 %vm1613_vm3, %v9832_v18  ;;  %9217 = vmatmul.mubr.msk.bf16.gmra.mrb[76].mxu0 %vm1613_vm3, %v9834_v37 }
0x11dd   : > { %9193 = vmatpush3.bf16.msra.mxu1 %v11402_v33  ;;  %9241 = vmatpush3.bf16.msra.mxu0 %v11402_v33 }
0x11de   : > { %9194 = vmatprep.subr.bf16.mxu1 %v11406_v36  ;;  %9242 = vmatprep.subr.bf16.mxu0 %v11406_v36 }
0x11df   : > { %9196 = vmatprep.mubr.msk.bf16.mxu1 %vm1613_vm3, %v9835_v28  ;;  %9244 = vmatprep.mubr.msk.bf16.mxu0 %vm1613_vm3, %v9837_v24  ;;  %v11507_v28 = vld [vmem:[%s12421_s3 + $0x1] ss:$0 sm:$0xff]  ;;  %v11510_v24 = vld [vmem:[%s12421_s3 + $0x2] ss:$0 sm:$0xff] }
0x11e1   : > { %9195 = vmatpush3.bf16.msra.mxu1 %v11406_v36  ;;  %9243 = vmatpush3.bf16.msra.mxu0 %v11406_v36 }
0x11e2   : > { %9220 = vmatprep.subr.bf16.mxu1 %v11378_v55  ;;  %9268 = vmatprep.subr.bf16.mxu0 %v11378_v55 }
0x11e4   : > { %9197 = vmatmul.mubr.msk.bf16.vlgmr.msra.gmra.mrb[80].mxu1 %vm1613_vm3, %v9836_v25  ;;  %9245 = vmatmul.mubr.msk.bf16.vlgmr.msra.gmra.mrb[80].mxu0 %vm1613_vm3, %v9838_v42  ;;  %v3918_v25 = vmul.f32 %v8283_v3, %v11374_v57 }
0x11e5   : > { %9221 = vmatpush3.bf16.msra.mxu1 %v11378_v55  ;;  %9269 = vmatpush3.bf16.msra.mxu0 %v11378_v55 }
0x11e6   : > { %9222 = vmatprep.subr.bf16.mxu1 %v11382_v16  ;;  %9270 = vmatprep.subr.bf16.mxu0 %v11382_v16 }
0x11e7   : > { %9200 = vmatprep.mubr.msk.bf16.mxu1 %vm1613_vm3, %v9839_v13  ;;  %9248 = vmatprep.mubr.msk.bf16.mxu0 %vm1613_vm3, %v9845_v14  ;;  %v3916_v13 = vmul.f32 %v8283_v3, %v11368_v50 }
0x11e9   : > { %9223 = vmatpush3.bf16.msra.mxu1 %v11382_v16  ;;  %9271 = vmatpush3.bf16.msra.mxu0 %v11382_v16 }
0x11ea   : > { %9224 = vmatprep.subr.bf16.mxu1 %v11402_v33  ;;  %9272 = vmatprep.subr.bf16.mxu0 %v11402_v33 }
0x11ec   : > { %9201 = vmatmul.mubr.msk.bf16.gmra.mrb[84].mxu1 %vm1613_vm3, %v9840_v46  ;;  %9249 = vmatmul.mubr.msk.bf16.gmra.mrb[84].mxu0 %vm1613_vm3, %v9846_v59 }
0x11ed   : > { %9225 = vmatpush3.bf16.msra.mxu1 %v11402_v33  ;;  %9273 = vmatpush3.bf16.msra.mxu0 %v11402_v33 }
0x11ee   : > { %9226 = vmatprep.subr.bf16.mxu1 %v11406_v36  ;;  %9274 = vmatprep.subr.bf16.mxu0 %v11406_v36 }
0x11ef   : > { %9228 = vmatprep.mubr.msk.bf16.mxu1 %vm1613_vm3, %v9841_v15  ;;  %9276 = vmatprep.mubr.msk.bf16.mxu0 %vm1613_vm3, %v9849_v52  ;;  %v3919_v52 = vmul.f32 %v8283_v3, %v11370_v56 }
0x11f1   : > { %9227 = vmatpush3.bf16.msra.mxu1 %v11406_v36  ;;  %9275 = vmatpush3.bf16.msra.mxu0 %v11406_v36 }
0x11f2   : > { %9252 = vmatprep.subr.bf16.mxu1 %v11378_v55  ;;  %9300 = vmatprep.subr.bf16.mxu0 %v9859_v44 }
0x11f4   : > { %9229 = vmatmul.mubr.msk.bf16.vlgmr.msra.gmra.mrb[88].mxu1 %vm1613_vm3, %v9842_v49  ;;  %9277 = vmatmul.mubr.msk.bf16.vlgmr.msra.gmra.mrb[88].mxu0 %vm1613_vm3, %v9850_v38 }
0x11f5   : > { %9253 = vmatpush3.bf16.msra.mxu1 %v11378_v55  ;;  %9232 = vmatprep.mubr.msk.bf16.mxu1 %vm1613_vm3, %v9843_v0 }
0x11f6   : > { %9254 = vmatprep.subr.bf16.mxu1 %v11382_v16  ;;  %9280 = vmatprep.mubr.msk.bf16.mxu0 %vm1613_vm3, %v9853_v35 }
0x11f7   : > { %9301 = vmatpush3.bf16.msra.mxu0 %v9859_v44 }
0x11f8   : > { %9302 = vmatprep.subr.bf16.mxu0 %v9860_v32 }
0x11f9   : > { %9255 = vmatpush3.bf16.msra.mxu1 %v11382_v16 }
0x11fa   : > { %9256 = vmatprep.subr.bf16.mxu1 %v11402_v33 }
0x11fb   : > { %9303 = vmatpush3.bf16.msra.mxu0 %v9860_v32 }
0x11fc   : > { %9233 = vmatmul.mubr.msk.bf16.gmra.mrb[92].mxu1 %vm1613_vm3, %v9844_v53  ;;  %9281 = vmatmul.mubr.msk.bf16.gmra.mrb[92].mxu0 %vm1613_vm3, %v9854_v61  ;;  %v3917_v61 = vmul.f32 %v8283_v3, %v11372_v23 }
0x11fd   : > { %9257 = vmatpush3.bf16.msra.mxu1 %v11402_v33  ;;  %9260 = vmatprep.mubr.msk.bf16.mxu1 %vm1613_vm3, %v9847_v43 }
0x11fe   : > { %9258 = vmatprep.subr.bf16.mxu1 %v11406_v36  ;;  %9304 = vmatprep.subr.bf16.mxu0 %v9861_v51 }
0x11ff   : > { %9305 = vmatpush3.bf16.msra.mxu0 %v9861_v51 }
0x1201   : > { %9259 = vmatpush3.bf16.msra.mxu1 %v11406_v36 }
0x1202   : > { %9284 = vmatprep.subr.bf16.mxu1 %v11378_v55 }
0x1204   : > { %9261 = vmatmul.mubr.msk.bf16.vlgmr.msra.gmra.mrb[96].mxu1 %vm1613_vm3, %v9848_v5 }
0x1205   : > { %9285 = vmatpush3.bf16.msra.mxu1 %v11378_v55  ;;  %9264 = vmatprep.mubr.msk.bf16.mxu1 %vm1613_vm3, %v9851_v26  ;;  %v9862_v55 = vld [vmem:[%s12419_s1 + $0x18] sm:$0xff]  }
0x1206   : > { %9286 = vmatprep.subr.bf16.mxu1 %v11382_v16  ;;  %9306 = vmatprep.subr.bf16.mxu0 %v9862_v55 }
0x1207   : > { %9307 = vmatpush3.bf16.msra.mxu0 %v9862_v55 }
0x1209   : > { %9287 = vmatpush3.bf16.msra.mxu1 %v11382_v16 }
0x120a   : > { %9288 = vmatprep.subr.bf16.mxu1 %v11402_v33 }
0x120c   : > { %9265 = vmatmul.mubr.msk.bf16.gmra.mrb[100].mxu1 %vm1613_vm3, %v9852_v9 }
0x120d   : > { %9289 = vmatpush3.bf16.msra.mxu1 %v11402_v33  ;;  %9292 = vmatprep.mubr.msk.bf16.mxu1 %vm1613_vm3, %v9855_v27  ;;  %v8292_v33 = vld [vmem:[%s12420_s26] ss:$0 sm:$0xff]  ;;  %s12422_s26 = sld [smem:[#allocation22_spill]] }
0x120e   : > { %9290 = vmatprep.subr.bf16.mxu1 %v11406_v36 }
0x1211   : > { %9291 = vmatpush3.bf16.msra.mxu1 %v11406_v36 }
0x1213   : > { %s12423_s1 = smov %s12422_s26 }
0x1214   : > { %9293 = vmatmul.mubr.msk.bf16.vlgmr.msra.gmra.mrb[104].mxu1 %vm1613_vm3, %v9856_v41 }
0x1215   : > { %9296 = vmatprep.mubr.msk.bf16.mxu1 %vm1613_vm3, %v9857_v6 }
0x121c   : > { %9297 = vmatmul.mubr.msk.bf16.gmra.mrb[108].mxu1 %vm1613_vm3, %v9858_v60 }
0x12a7   : > { %v9182_v58 = vpop.f32.mrb[72].mxu1  ;;  %v9214_v1 = vpop.f32.mrb[72].mxu0 }
0x12a8   : > { %v3998_v16 = vpop.f32.mrb[73].mxu1  ;;  %v4252_v39 = vpop.f32.mrb[73].mxu0  ;;  %v4036_v18 = vmul.f32 %v9182_v58, %v8292_v33  ;;  %v4290_v0 = vmul.f32 %v9214_v1, %v11510_v24 }
0x12a9   : > { %v9183_v47 = vpop.f32.mrb[74].mxu1  ;;  %v9215_v7 = vpop.f32.mrb[74].mxu0  ;;  %v4034_v37 = vmul.f32 %v8292_v33, %v3998_v16  ;;  %v4288_v26 = vmul.f32 %v11510_v24, %v4252_v39 }
0x12aa   : > { %v4001_v17 = vpop.f32.mrb[75].mxu1  ;;  %v4255_v8 = vpop.f32.mrb[75].mxu0  ;;  %v4037_v42 = vmul.f32 %v9183_v47, %v8292_v33  ;;  %v4044_v15 = vadd.f32 %v4036_v18, %v3918_v25  ;;  %v4291_v44 = vmul.f32 %v9215_v7, %v11510_v24  ;;  %v3922_v25 = vmul.f32 %v8283_v3, %v11398_v12 }
0x12ab   : > { %v4035_v14 = vmul.f32 %v8292_v33, %v4001_v17  ;;  %v4042_v53 = vadd.f32 %v4034_v37, %v3916_v13  ;;  %v4289_v1 = vmul.f32 %v11510_v24, %v4255_v8  ;;  %v3920_v7 = vmul.f32 %v8283_v3, %v11390_v11 }
0x12ac   : > { %v4045_v27 = vadd.f32 %v4037_v42, %v3919_v52 }
0x12ad   : > { %v4043_v51 = vadd.f32 %v4035_v14, %v3917_v61  ;;  %v3921_v61 = vmul.f32 %v8283_v3, %v11394_v62 }
0x12af   : > { %v9186_v45 = vpop.f32.mrb[76].mxu1  ;;  %v9218_v10 = vpop.f32.mrb[76].mxu0 }
0x12b0   : > { %v4014_v30 = vpop.f32.mrb[77].mxu1  ;;  %v11498_v22 = vpop.f32.mrb[77].mxu0  ;;  %v4040_v16 = vmul.f32 %v9186_v45, %v8292_v33 }
0x12b1   : > { %v9187_v36 = vpop.f32.mrb[78].mxu1  ;;  %v11501_v20 = vpop.f32.mrb[78].mxu0  ;;  %v4038_v17 = vmul.f32 %v8292_v33, %v4014_v30  ;;  %v4294_v30 = vmul.f32 %v9218_v10, %v11510_v24 }
0x12b2   : > { %v4017_v63 = vpop.f32.mrb[79].mxu1  ;;  %v11503_v2 = vpop.f32.mrb[79].mxu0  ;;  %v4041_v42 = vmul.f32 %v9187_v36, %v8292_v33  ;;  %v4295_v10 = vmul.f32 %v11501_v20, %v11510_v24 }
0x12b7   : > { %v9198_v46 = vpop.f32.mrb[80].mxu1  ;;  %v11514_v59 = vpop.f32.mrb[80].mxu0 }
0x12b8   : > { %v4163_v49 = vmul.f32 %v9198_v46, %v11507_v28  ;;  %v4125_v38 = vpop.f32.mrb[81].mxu1  ;;  %v11519_v35 = vpop.f32.mrb[81].mxu0  ;;  %v4039_v46 = vmul.f32 %v8292_v33, %v4017_v63  ;;  %v4292_v33 = vmul.f32 %v11510_v24, %v11498_v22 }
0x12b9   : > { %v4161_v43 = vmul.f32 %v11507_v28, %v4125_v38  ;;  %v9199_v5 = vpop.f32.mrb[82].mxu1  ;;  %v11524_v9 = vpop.f32.mrb[82].mxu0  ;;  %v3923_v38 = vmul.f32 %v8283_v3, %v11392_v19 }
0x12ba   : > { %v4171_v41 = vadd.f32 %v4163_v49, %v4044_v15  ;;  %v4164_v6 = vmul.f32 %v9199_v5, %v11507_v28  ;;  %v4128_v60 = vpop.f32.mrb[83].mxu1  ;;  %v11528_v32 = vpop.f32.mrb[83].mxu0  ;;  %v4048_v49 = vadd.f32 %v4040_v16, %v3922_v25  ;;  %v8319_v16 = vld [vmem:[%s12421_s3 + $0x3] ss:$0 sm:$0xff] }
0x12bb   : > { %v4169_v55 = vadd.f32 %v4161_v43, %v4042_v53  ;;  %v4162_v58 = vmul.f32 %v11507_v28, %v4128_v60  ;;  %v4046_v53 = vadd.f32 %v4038_v17, %v3920_v7  ;;  %v4049_v5 = vadd.f32 %v4041_v42, %v3923_v38 }
0x12bc   : > { %v4172_v47 = vadd.f32 %v4164_v6, %v4045_v27  ;;  %v4298_v39 = vadd.f32 %v4290_v0, %v4171_v41  ;;  %v4047_v60 = vadd.f32 %v4039_v46, %v3921_v61 }
0x12bd   : > { %v4170_v18 = vadd.f32 %v4162_v58, %v4043_v51  ;;  %v4296_v37 = vadd.f32 %v4288_v26, %v4169_v55  ;;  %v4293_v51 = vmul.f32 %v11510_v24, %v11503_v2 }
0x12be   : > { %v4299_v13 = vadd.f32 %v4291_v44, %v4172_v47  ;;  %v8328_v47 = vld [vmem:[%s12421_s3 + $0x5] ss:$0 sm:$0xff] }
0x12bf   : > { %v4297_v15 = vadd.f32 %v4289_v1, %v4170_v18  ;;  %v9202_v14 = vpop.f32.mrb[84].mxu1  ;;  %v9250_v52 = vpop.f32.mrb[84].mxu0  ;;  %v4544_v46 = vmul.f32 %v11514_v59, %v8328_v47  ;;  %v4542_v38 = vmul.f32 %v8328_v47, %v11519_v35 }
0x12c0   : > { %v4167_v8 = vmul.f32 %v9202_v14, %v11507_v28  ;;  %v4141_v45 = vpop.f32.mrb[85].mxu1  ;;  %v4522_v0 = vpop.f32.mrb[85].mxu0 }
0x12c1   : > { %v4165_v36 = vmul.f32 %v11507_v28, %v4141_v45  ;;  %v9203_v43 = vpop.f32.mrb[86].mxu1  ;;  %v9251_v63 = vpop.f32.mrb[86].mxu0 }
0x12c2   : > { %v4175_v26 = vadd.f32 %v4167_v8, %v4048_v49  ;;  %v4168_v27 = vmul.f32 %v9203_v43, %v11507_v28  ;;  %v4144_v41 = vpop.f32.mrb[87].mxu1  ;;  %v4525_v6 = vpop.f32.mrb[87].mxu0  ;;  %v4543_v43 = vmul.f32 %v8328_v47, %v11528_v32 }
0x12c3   : > { %v4173_v3 = vadd.f32 %v4165_v36, %v4046_v53  ;;  %v4166_v44 = vmul.f32 %v11507_v28, %v4144_v41 }
0x12c4   : > { %v4176_v22 = vadd.f32 %v4168_v27, %v4049_v5  ;;  %v4302_v55 = vadd.f32 %v4294_v30, %v4175_v26  ;;  %v4545_v30 = vmul.f32 %v11524_v9, %v8328_v47 }
0x12c5   : > { %v4174_v58 = vadd.f32 %v4166_v44, %v4047_v60  ;;  %v4300_v1 = vadd.f32 %v4292_v33, %v4173_v3 }
0x12c6   : > { %v4303_v17 = vadd.f32 %v4295_v10, %v4176_v22 }
0x12c7   : > { %v4301_v18 = vadd.f32 %v4293_v51, %v4174_v58  ;;  %v9230_v25 = vpop.f32.mrb[88].mxu1  ;;  %v9278_v42 = vpop.f32.mrb[88].mxu0 }
0x12c8   : > { %v4417_v7 = vmul.f32 %v9230_v25, %v8319_v16  ;;  %v4379_v20 = vpop.f32.mrb[89].mxu1  ;;  %v4760_v14 = vpop.f32.mrb[89].mxu0  ;;  %v4549_v25 = vmul.f32 %v9251_v63, %v8328_v47 }
0x12c9   : > { %v4415_v49 = vmul.f32 %v8319_v16, %v4379_v20  ;;  %v9231_v28 = vpop.f32.mrb[90].mxu1  ;;  %v9279_v2 = vpop.f32.mrb[90].mxu0 }
0x12ca   : > { %v4425_v24 = vadd.f32 %v4417_v7, %v4298_v39  ;;  %v4418_v8 = vmul.f32 %v9231_v28, %v8319_v16  ;;  %v4382_v45 = vpop.f32.mrb[91].mxu1  ;;  %v4763_v53 = vpop.f32.mrb[91].mxu0  ;;  %v4548_v39 = vmul.f32 %v9250_v52, %v8328_v47  ;;  %v8337_v52 = vld [vmem:[%s12421_s3 + $0x6] ss:$0 sm:$0xff] }
0x12cb   : > { %v4423_v61 = vadd.f32 %v4415_v49, %v4296_v37  ;;  %v4416_v36 = vmul.f32 %v8319_v16, %v4382_v45  ;;  %v4546_v37 = vmul.f32 %v8328_v47, %v4522_v0 }
0x12cc   : > { %v4426_v33 = vadd.f32 %v4418_v8, %v4299_v13  ;;  %v4552_v5 = vadd.f32 %v4544_v46, %v4425_v24  ;;  %v4547_v46 = vmul.f32 %v8328_v47, %v4525_v6  ;;  %v8346_v8 = vld [vmem:[%s12421_s3 + $0x7] ss:$0 sm:$0xff] }
0x12cd   : > { %v4424_v26 = vadd.f32 %v4416_v36, %v4297_v15  ;;  %v4550_v59 = vadd.f32 %v4542_v38, %v4423_v61 }
0x12ce   : > { %v4553_v27 = vadd.f32 %v4545_v30, %v4426_v33 }
0x12cf   : > { %v4551_v41 = vadd.f32 %v4543_v43, %v4424_v26  ;;  %v9234_v10 = vpop.f32.mrb[92].mxu1  ;;  %v9282_v60 = vpop.f32.mrb[92].mxu0  ;;  %v4798_v43 = vmul.f32 %v9278_v42, %v8346_v8  ;;  %v4796_v26 = vmul.f32 %v8346_v8, %v4760_v14 }
0x12d0   : > { %v4421_v35 = vmul.f32 %v9234_v10, %v8319_v16  ;;  %v4395_v3 = vpop.f32.mrb[93].mxu1  ;;  %v4776_v44 = vpop.f32.mrb[93].mxu0  ;;  %v4802_v42 = vmul.f32 %v9282_v60, %v8346_v8 }
0x12d1   : > { %v4419_v51 = vmul.f32 %v8319_v16, %v4395_v3  ;;  %v9235_v9 = vpop.f32.mrb[94].mxu1  ;;  %v9283_v22 = vpop.f32.mrb[94].mxu0 }
0x12d2   : > { %v4429_v58 = vadd.f32 %v4421_v35, %v4302_v55  ;;  %v4422_v32 = vmul.f32 %v9235_v9, %v8319_v16  ;;  %v4398_v13 = vpop.f32.mrb[95].mxu1  ;;  %v4779_v15 = vpop.f32.mrb[95].mxu0 }
0x12d3   : > { %v4427_v7 = vadd.f32 %v4419_v51, %v4300_v1  ;;  %v4420_v20 = vmul.f32 %v8319_v16, %v4398_v13  ;;  %v4799_v16 = vmul.f32 %v9279_v2, %v8346_v8 }
0x12d4   : > { %v4430_v49 = vadd.f32 %v4422_v32, %v4303_v17  ;;  %v4556_v28 = vadd.f32 %v4548_v39, %v4429_v58  ;;  %v4797_v17 = vmul.f32 %v8346_v8, %v4763_v53 }
0x12d5   : > { %v4428_v38 = vadd.f32 %v4420_v20, %v4301_v18  ;;  %v4554_v24 = vadd.f32 %v4546_v37, %v4427_v7  ;;  %v4801_v20 = vmul.f32 %v8346_v8, %v4779_v15 }
0x12d6   : > { %v4557_v45 = vadd.f32 %v4549_v25, %v4430_v49 }
0x12d7   : > { %v4555_v30 = vadd.f32 %v4547_v46, %v4428_v38  ;;  %v9262_v61 = vpop.f32.mrb[96].mxu1 }
0x12d8   : > { %v4671_v36 = vmul.f32 %v9262_v61, %v8337_v52  ;;  %v4633_v0 = vpop.f32.mrb[97].mxu1  ;;  %v8355_v61 = vld [vmem:[%s12421_s3 + $0x8] ss:$0 sm:$0xff]  ;;  %s12424_s3 = sld [smem:[#allocation21_spill]] }
0x12d9   : > { %v4669_v55 = vmul.f32 %v8337_v52, %v4633_v0  ;;  %v9263_v33 = vpop.f32.mrb[98].mxu1 }
0x12da   : > { %v4679_v63 = vadd.f32 %v4671_v36, %v4552_v5  ;;  %v4672_v10 = vmul.f32 %v9263_v33, %v8337_v52  ;;  %v4636_v1 = vpop.f32.mrb[99].mxu1  ;;  %v4800_v5 = vmul.f32 %v8346_v8, %v4776_v44  ;;  %v8356_v33 = vld [vmem:[%s12418_s11 + $0x1] ss:$0 sm:$0xff] }
0x12db   : > { %v4677_v6 = vadd.f32 %v4669_v55, %v4550_v59  ;;  %v4670_v47 = vmul.f32 %v8337_v52, %v4636_v1  ;;  %v4803_v59 = vmul.f32 %v9283_v22, %v8346_v8 }
0x12dc   : > { %v4680_v18 = vadd.f32 %v4672_v10, %v4553_v27  ;;  %v4806_v35 = vadd.f32 %v4798_v43, %v4679_v63 }
0x12dd   : > { %v4678_v3 = vadd.f32 %v4670_v47, %v4551_v41  ;;  %v4804_v39 = vadd.f32 %v4796_v26, %v4677_v6 }
0x12de   : > { %v4807_v51 = vadd.f32 %v4799_v16, %v4680_v18 }
0x12df   : > { %v4805_v9 = vadd.f32 %v4797_v17, %v4678_v3  ;;  %v9266_v37 = vpop.f32.mrb[100].mxu1 }
0x12e0   : > { %v4675_v58 = vmul.f32 %v9266_v37, %v8337_v52  ;;  %v4649_v32 = vpop.f32.mrb[101].mxu1 }
0x12e1   : > { %v4673_v13 = vmul.f32 %v8337_v52, %v4649_v32  ;;  %v9267_v14 = vpop.f32.mrb[102].mxu1 }
0x12e2   : > { %v4683_v25 = vadd.f32 %v4675_v58, %v4556_v28  ;;  %v4676_v7 = vmul.f32 %v9267_v14, %v8337_v52  ;;  %v4652_v2 = vpop.f32.mrb[103].mxu1 }
0x12e3   : > { %v4681_v53 = vadd.f32 %v4673_v13, %v4554_v24  ;;  %v4674_v27 = vmul.f32 %v8337_v52, %v4652_v2 }
0x12e4   : > { %v4684_v41 = vadd.f32 %v4676_v7, %v4557_v45  ;;  %v4810_v46 = vadd.f32 %v4802_v42, %v4683_v25 }
0x12e5   : > { %v4682_v49 = vadd.f32 %v4674_v27, %v4555_v30  ;;  %v4808_v38 = vadd.f32 %v4800_v5, %v4681_v53 }
0x12e6   : > { %v4811_v36 = vadd.f32 %v4803_v59, %v4684_v41 }
0x12e7   : > { %v4809_v0 = vadd.f32 %v4801_v20, %v4682_v49  ;;  %v9294_v43 = vpop.f32.mrb[104].mxu1 }
0x12e8   : > { %v4925_v60 = vmul.f32 %v9294_v43, %v8355_v61  ;;  %v4887_v55 = vpop.f32.mrb[105].mxu1 }
0x12e9   : > { %v4923_v44 = vmul.f32 %v8355_v61, %v4887_v55  ;;  %v9295_v28 = vpop.f32.mrb[106].mxu1 }
0x12ea   : > { %v4933_v26 = vadd.f32 %v4925_v60, %v4806_v35  ;;  %v4926_v63 = vmul.f32 %v9295_v28, %v8355_v61  ;;  %v4890_v10 = vpop.f32.mrb[107].mxu1 }
0x12eb   : > { %v4931_v22 = vadd.f32 %v4923_v44, %v4804_v39  ;;  %v4924_v24 = vmul.f32 %v8355_v61, %v4890_v10 }
0x12ec   : > { %v4945_v52 = vadd.f32 %v8356_v33, %v4933_v26  ;;  %v4934_v15 = vadd.f32 %v4926_v63, %v4807_v51 }
0x12ed   : > { %v4943_v8 = vadd.f32 %v8356_v33, %v4931_v22  ;;  %v4932_v45 = vadd.f32 %v4924_v24, %v4805_v9 }
0x12ee   : > { %v4961_v30 = vmul.f32 0.70710677, %v4945_v52  ;;  %v4946_v1 = vadd.f32 %v8356_v33, %v4934_v15  ;;  %v4953_v49 = vmul.f32 0.5, %v4945_v52 }
0x12ef   : > { %v4959_v16 = vmul.f32 0.70710677, %v4943_v8  ;;  %v4944_v6 = vadd.f32 %v8356_v33, %v4932_v45  ;;  %v9298_v47 = vpop.f32.mrb[108].mxu1 }
0x12f0   : > { %10115 = verf.f32 %v4961_v30  ;;  %v4962_v17 = vmul.f32 0.70710677, %v4946_v1  ;;  %v4929_v18 = vmul.f32 %v9298_v47, %v8355_v61  ;;  %v4903_v3 = vpop.f32.mrb[109].mxu1 }
0x12f1   : > { %10117 = verf.f32 %v4959_v16  ;;  %v4960_v37 = vmul.f32 0.70710677, %v4944_v6  ;;  %v4927_v35 = vmul.f32 %v8355_v61, %v4903_v3  ;;  %v9299_v58 = vpop.f32.mrb[110].mxu1  ;;  %v4952_v26 = vmul.f32 0.5, %v4944_v6 }
0x12f2   : > { %10119 = verf.f32 %v4962_v17  ;;  %v4937_v39 = vadd.f32 %v4929_v18, %v4810_v46  ;;  %v4930_v32 = vmul.f32 %v9299_v58, %v8355_v61  ;;  %v4906_v42 = vpop.f32.mrb[111].mxu1 }
0x12f3   : > { %10121 = verf.f32 %v4960_v37  ;;  %v4935_v51 = vadd.f32 %v4927_v35, %v4808_v38  ;;  %v4928_v9 = vmul.f32 %v8355_v61, %v4906_v42  ;;  %v4951_v61 = vmul.f32 0.5, %v4943_v8 }
0x12f4   : > { %v4949_v13 = vadd.f32 %v8356_v33, %v4937_v39  ;;  %v4938_v14 = vadd.f32 %v4930_v32, %v4811_v36 }
0x12f5   : > { %v4947_v5 = vadd.f32 %v8356_v33, %v4935_v51  ;;  %v4936_v25 = vadd.f32 %v4928_v9, %v4809_v0  ;;  %v4954_v0 = vmul.f32 0.5, %v4946_v1 }
0x12f6   : > { %v4965_v7 = vmul.f32 0.70710677, %v4949_v13  ;;  %v4950_v2 = vadd.f32 %v8356_v33, %v4938_v14  ;;  %v4957_v16 = vmul.f32 0.5, %v4949_v13 }
0x12f7   : > { %v4963_v59 = vmul.f32 0.70710677, %v4947_v5  ;;  %v4948_v53 = vadd.f32 %v8356_v33, %v4936_v25  ;;  %v4955_v17 = vmul.f32 0.5, %v4947_v5  ;;  %v8357_v5 = vld [vmem:[%s12415_s10 + $0x3] ss:$0 sm:$0xff] }
0x12f8   : > { %10123 = verf.f32 %v4965_v7  ;;  %v4966_v27 = vmul.f32 0.70710677, %v4950_v2  ;;  %v4958_v35 = vmul.f32 0.5, %v4950_v2 }
0x12f9   : > { %10125 = verf.f32 %v4963_v59  ;;  %v4964_v20 = vmul.f32 0.70710677, %v4948_v53 }
0x12fa   : > { %v10116_v41 = vpop.eup %10115  ;;  %10127 = verf.f32 %v4966_v27 }
0x12fb   : > { %v10118_v46 = vpop.eup %10117  ;;  %v4977_v43 = vadd.f32 1.0, %v10116_v41  ;;  %10129 = verf.f32 %v4964_v20 }
0x12fc   : > { %v10120_v38 = vpop.eup %10119  ;;  %v4975_v60 = vadd.f32 1.0, %v10118_v46 }
0x12fd   : > { %v10122_v36 = vpop.eup %10121  ;;  %v4985_v55 = vmul.f32 %v4977_v43, %v4953_v49  ;;  %v4978_v44 = vadd.f32 1.0, %v10120_v38 }
0x12fe   : > { %v4983_v28 = vmul.f32 %v4975_v60, %v4951_v61  ;;  %v4976_v33 = vadd.f32 1.0, %v10122_v36 }
0x12ff   : > { %v4986_v63 = vmul.f32 %v4978_v44, %v4954_v0  ;;  %v4993_v22 = vadd.f32 %v4985_v55, %v11374_v57 }
0x1300   : > { %v4984_v10 = vmul.f32 %v4976_v33, %v4952_v26  ;;  %v4991_v52 = vadd.f32 %v4983_v28, %v11368_v50 }
0x1301   : > { %v4994_v24 = vadd.f32 %v4986_v63, %v11370_v56  ;;  %v4956_v56 = vmul.f32 0.5, %v4948_v53 }
0x1302   : > { %v10124_v15 = vpop.eup %10123  ;;  %v4992_v45 = vadd.f32 %v4984_v10, %v11372_v23 }
0x1303   : > { %v10126_v8 = vpop.eup %10125  ;;  %v5000_v30 = vpack.c.bf16 %v4994_v24, %v4993_v22  ;;  %v4981_v47 = vadd.f32 1.0, %v10124_v15 }
0x1304   : > { %v10128_v1 = vpop.eup %10127  ;;  %v4979_v18 = vadd.f32 1.0, %v10126_v8  ;;  %v4999_v6 = vpack.c.bf16 %v4992_v45, %v4991_v52 }
0x1305   : > { %v10130_v3 = vpop.eup %10129  ;;  %v4989_v37 = vmul.f32 %v4981_v47, %v4957_v16  ;;  %v4982_v58 = vadd.f32 1.0, %v10128_v1 }
0x1306   : > { %v4987_v57 = vmul.f32 %v4979_v18, %v4955_v17  ;;  %v4980_v39 = vadd.f32 1.0, %v10130_v3  ;;  %9308 = vmatprep.mubr.msk.bf16.mxu0 %vm1613_vm3, %v4999_v6 }
0x1307   : > { %v4990_v50 = vmul.f32 %v4982_v58, %v4958_v35  ;;  %9309 = vmatmul.mubr.msk.bf16.vlgmr.msra.gmra.mrb[96].mxu0 %vm1613_vm3, %v5000_v30  ;;  %v4997_v32 = vadd.f32 %v4989_v37, %v11398_v12 }
0x1308   : > { %v4988_v23 = vmul.f32 %v4980_v39, %v4956_v56  ;;  %v4995_v51 = vadd.f32 %v4987_v57, %v11390_v11 }
0x1309   : > { %v4998_v42 = vadd.f32 %v4990_v50, %v11392_v19 }
0x130a   : > { %v4996_v9 = vadd.f32 %v4988_v23, %v11394_v62 }
0x130b   : > { %v5002_v13 = vpack.c.bf16 %v4998_v42, %v4997_v32 }
0x130c   : > { %v5001_v14 = vpack.c.bf16 %v4996_v9, %v4995_v51 }
0x130e   : > { %9312 = vmatprep.mubr.msk.bf16.mxu0 %vm1613_vm3, %v5001_v14 }
0x130f   : > { %9313 = vmatmul.mubr.msk.bf16.gmra.mrb[100].mxu0 %vm1613_vm3, %v5002_v13 }
0x13da   : > { %v9310_v25 = vpop.f32.mrb[96].mxu0 }
0x13db   : > { %v5085_v7 = vpop.f32.mrb[97].mxu0  ;;  %v5094_v2 = vadd.f32 %v9310_v25, %v8357_v5 }
0x13dc   : > { %v5086_v59 = vadd.f32 %v8357_v5, %v5085_v7  ;;  %v9311_v53 = vpop.f32.mrb[98].mxu0 }
0x13dd   : > { %v5088_v27 = vpop.f32.mrb[99].mxu0  ;;  %v5097_v19 = vadd.f32 %v9311_v53, %v8357_v5  ;;  %v11574_v62 = vadd.f32 %v11272_v48, %v5094_v2 }
0x13de   : > { %v11571_v12 = vadd.f32 %v11270_v40, %v5086_v59  ;;  %v5089_v11 = vadd.f32 %v8357_v5, %v5088_v27 }
0x13df   : > { %v11582_v46 = vadd.f32 %v11278_v4, %v5097_v19 }
0x13e0   : > { %v11577_v20 = vadd.f32 %v11274_v54, %v5089_v11  ;;  %v5135_v41 = vsel %vm1235_vm2, %v11571_v12, 0.0  ;;  %v5141_v54 = vsel %vm1235_vm2, %v11574_v62, 0.0 }
0x13e1   : > { %5136 = vadd.xlane.f32.xlu0 %v5135_v41  ;;  %v5144_v0 = vsel %vm1235_vm2, %v11582_v46, 0.0  ;;  %v9863_v41 = vld [vmem:[%s12422_s26] sm:$0xff]   ;;  %s12426_s26 = sld [smem:[#allocation23_spill]] }
0x13e2   : > { %v9314_v49 = vpop.f32.mrb[100].mxu0  ;;  %v5138_v40 = vsel %vm1235_vm2, %v11577_v20, 0.0  ;;  %9326 = vmatprep.subr.bf16.mxu0 %v9863_v41 }
0x13e3   : > { %5139 = vadd.xlane.f32.xlu1 %v5138_v40  ;;  %v5101_v43 = vpop.f32.mrb[101].mxu0  ;;  %v5110_v38 = vadd.f32 %v9314_v49, %v8357_v5  ;;  %v9864_v49 = vld [vmem:[%s12424_s3] sm:$0xff]   ;;  %9327 = vmatpush3.bf16.msra.mxu0 %v9863_v41 }
0x13e4   : > { %v5102_v61 = vadd.f32 %v8357_v5, %v5101_v43  ;;  %v9315_v48 = vpop.f32.mrb[102].mxu0  ;;  %9316 = vmatprep.subr.bf16.mxu1 %v9864_v49 }
0x13e5   : > { %5142 = vadd.xlane.f32.xlu0 %v5141_v54  ;;  %v5104_v60 = vpop.f32.mrb[103].mxu0  ;;  %v5113_v55 = vadd.f32 %v9315_v48, %v8357_v5  ;;  %v11594_v44 = vadd.f32 %v11288_v21, %v5110_v38  ;;  %9317 = vmatpush3.bf16.msra.mxu1 %v9864_v49 }
0x13e6   : > { %v11589_v36 = vadd.f32 %v11284_v31, %v5102_v61  ;;  %v5105_v4 = vadd.f32 %v8357_v5, %v5104_v60 }
0x13e7   : > { %5145 = vadd.xlane.f32.xlu1 %v5144_v0  ;;  %v11602_v33 = vadd.f32 %v11294_v34, %v5113_v55  ;;  %v5153_v63 = vsel %vm1235_vm2, %v11594_v44, 0.0 }
0x13e8   : > { %v11597_v28 = vadd.f32 %v11290_v29, %v5105_v4  ;;  %v5147_v26 = vsel %vm1235_vm2, %v11589_v36, 0.0 }
0x13e9   : > { %5148 = vadd.xlane.f32.xlu0 %v5147_v26  ;;  %v5156_v21 = vsel %vm1235_vm2, %v11602_v33, 0.0 }
0x13ea   : > { %v5150_v31 = vsel %vm1235_vm2, %v11597_v28, 0.0 }
0x13eb   : > { %5151 = vadd.xlane.f32.xlu1 %v5150_v31 }
0x13ed   : > { %5154 = vadd.xlane.f32.xlu0 %v5153_v63 }
0x13ef   : > { %5157 = vadd.xlane.f32.xlu1 %v5156_v21 }
0x146e   : > { %v5137_v29 = vpop.xlane.xlu0 %5136 }
0x146f   : > { %v5159_v10 = vmul.f32 0.0625, %v5137_v29 }
0x1470   : > { %v5140_v22 = vpop.xlane.xlu1 %5139 }
0x1471   : > { %v11611_v24 = vsub.f32 %v11571_v12, %v5159_v10  ;;  %v5160_v34 = vmul.f32 0.0625, %v5140_v22 }
0x1472   : > { %v5143_v15 = vpop.xlane.xlu0 %5142 }
0x1473   : > { %v11614_v52 = vsub.f32 %v11577_v20, %v5160_v34  ;;  %v5161_v45 = vmul.f32 0.0625, %v5143_v15  ;;  %v5175_v8 = vmul.f32 %v11611_v24, %v11611_v24 }
0x1474   : > { %v5146_v30 = vpop.xlane.xlu1 %5145 }
0x1475   : > { %v11619_v16 = vsub.f32 %v11574_v62, %v5161_v45  ;;  %v5162_v47 = vmul.f32 0.0625, %v5146_v30  ;;  %v5183_v1 = vsel %vm1235_vm2, %v5175_v8, 0.0  ;;  %v5176_v17 = vmul.f32 %v11614_v52, %v11614_v52 }
0x1476   : > { %5184 = vadd.xlane.f32.xlu0 %v5183_v1  ;;  %v5149_v18 = vpop.xlane.xlu0 %5148 }
0x1477   : > { %v11625_v6 = vsub.f32 %v11582_v46, %v5162_v47  ;;  %v5163_v3 = vmul.f32 0.0625, %v5149_v18  ;;  %v5186_v37 = vsel %vm1235_vm2, %v5176_v17, 0.0  ;;  %v5177_v35 = vmul.f32 %v11619_v16, %v11619_v16  ;;  %v8366_v47 = vld [vmem:[%s12425_s5] ss:$0 sm:$0xff] }
0x1478   : > { %5187 = vadd.xlane.f32.xlu1 %v5186_v37  ;;  %v5152_v58 = vpop.xlane.xlu1 %5151 }
0x1479   : > { %v11631_v57 = vsub.f32 %v11589_v36, %v5163_v3  ;;  %v5164_v56 = vmul.f32 0.0625, %v5152_v58  ;;  %v5189_v39 = vsel %vm1235_vm2, %v5177_v35, 0.0  ;;  %v5178_v50 = vmul.f32 %v11625_v6, %v11625_v6 }
0x147a   : > { %5190 = vadd.xlane.f32.xlu0 %v5189_v39  ;;  %v5155_v23 = vpop.xlane.xlu0 %5154  ;;  %v8367_v39 = vld [vmem:[%s12425_s5 + $0x1] ss:$0 sm:$0xff]  ;;  %s12427_s5 = smov %s12426_s26 }
0x147b   : > { %v11637_v32 = vsub.f32 %v11597_v28, %v5164_v56  ;;  %v5165_v42 = vmul.f32 0.0625, %v5155_v23  ;;  %v5192_v51 = vsel %vm1235_vm2, %v5178_v50, 0.0  ;;  %v5179_v9 = vmul.f32 %v11631_v57, %v11631_v57 }
0x147c   : > { %5193 = vadd.xlane.f32.xlu1 %v5192_v51  ;;  %v5158_v13 = vpop.xlane.xlu1 %5157 }
0x147d   : > { %v11643_v14 = vsub.f32 %v11594_v44, %v5165_v42  ;;  %v5166_v5 = vmul.f32 0.0625, %v5158_v13  ;;  %v5195_v25 = vsel %vm1235_vm2, %v5179_v9, 0.0  ;;  %v5180_v7 = vmul.f32 %v11637_v32, %v11637_v32 }
0x147e   : > { %5196 = vadd.xlane.f32.xlu0 %v5195_v25 }
0x147f   : > { %v11649_v2 = vsub.f32 %v11602_v33, %v5166_v5  ;;  %v5198_v59 = vsel %vm1235_vm2, %v5180_v7, 0.0  ;;  %v5181_v53 = vmul.f32 %v11643_v14, %v11643_v14 }
0x1480   : > { %5199 = vadd.xlane.f32.xlu1 %v5198_v59 }
0x1481   : > { %v5201_v27 = vsel %vm1235_vm2, %v5181_v53, 0.0  ;;  %v5182_v19 = vmul.f32 %v11649_v2, %v11649_v2 }
0x1482   : > { %5202 = vadd.xlane.f32.xlu0 %v5201_v27 }
0x1483   : > { %v5204_v11 = vsel %vm1235_vm2, %v5182_v19, 0.0 }
0x1484   : > { %5205 = vadd.xlane.f32.xlu1 %v5204_v11 }
0x1503   : > { %v5185_v40 = vpop.xlane.xlu0 %5184 }
0x1504   : > { %v5207_v43 = vmul.f32 0.0625, %v5185_v40 }
0x1505   : > { %v5188_v38 = vpop.xlane.xlu1 %5187 }
0x1506   : > { %v5215_v61 = vadd.f32 1e-06, %v5207_v43  ;;  %v5208_v48 = vmul.f32 0.0625, %v5188_v38 }
0x1507   : > { %v5191_v54 = vpop.xlane.xlu0 %5190 }
0x1508   : > { %10131 = vrsqrt.f32 %v5215_v61  ;;  %v5216_v60 = vadd.f32 1e-06, %v5208_v48  ;;  %v5209_v55 = vmul.f32 0.0625, %v5191_v54 }
0x1509   : > { %v5194_v4 = vpop.xlane.xlu1 %5193 }
0x150a   : > { %10133 = vrsqrt.f32 %v5216_v60  ;;  %v5217_v0 = vadd.f32 1e-06, %v5209_v55  ;;  %v5210_v26 = vmul.f32 0.0625, %v5194_v4 }
0x150b   : > { %v5197_v31 = vpop.xlane.xlu0 %5196 }
0x150c   : > { %10135 = vrsqrt.f32 %v5217_v0  ;;  %v5218_v63 = vadd.f32 1e-06, %v5210_v26  ;;  %v5211_v21 = vmul.f32 0.0625, %v5197_v31 }
0x150d   : > { %v5200_v29 = vpop.xlane.xlu1 %5199 }
0x150e   : > { %10137 = vrsqrt.f32 %v5218_v63  ;;  %v5219_v10 = vadd.f32 1e-06, %v5211_v21  ;;  %v5212_v22 = vmul.f32 0.0625, %v5200_v29 }
0x150f   : > { %v5203_v34 = vpop.xlane.xlu0 %5202 }
0x1510   : > { %10139 = vrsqrt.f32 %v5219_v10  ;;  %v5220_v15 = vadd.f32 1e-06, %v5212_v22  ;;  %v5213_v45 = vmul.f32 0.0625, %v5203_v34 }
0x1511   : > { %v5206_v8 = vpop.xlane.xlu1 %5205 }
0x1512   : > { %v10132_v30 = vpop.eup %10131  ;;  %10141 = vrsqrt.f32 %v5220_v15  ;;  %v5221_v1 = vadd.f32 1e-06, %v5213_v45  ;;  %v5214_v17 = vmul.f32 0.0625, %v5206_v8 }
0x1513   : > { %v5231_v18 = vmul.f32 %v10132_v30, %v11611_v24 }
0x1514   : > { %v10134_v3 = vpop.eup %10133  ;;  %10143 = vrsqrt.f32 %v5221_v1  ;;  %v5222_v37 = vadd.f32 1e-06, %v5214_v17 }
0x1515   : > { %v5243_v35 = vmul.f32 %v8366_v47, %v5231_v18  ;;  %v5232_v58 = vmul.f32 %v10134_v3, %v11614_v52 }
0x1516   : > { %v10136_v56 = vpop.eup %10135  ;;  %10145 = vrsqrt.f32 %v5222_v37 }
0x1517   : > { %v5244_v50 = vmul.f32 %v8366_v47, %v5232_v58  ;;  %v5233_v23 = vmul.f32 %v10136_v56, %v11619_v16  ;;  %v5255_v51 = vadd.f32 %v8367_v39, %v5243_v35 }
0x1518   : > { %v10138_v42 = vpop.eup %10137 }
0x1519   : > { %v5256_v9 = vadd.f32 %v8367_v39, %v5244_v50  ;;  %v5245_v13 = vmul.f32 %v8366_v47, %v5233_v23  ;;  %v5234_v5 = vmul.f32 %v10138_v42, %v11625_v6  ;;  %v11721_v50 = vld [vmem:[%s12411_s2 + $0x8] sm:$0xff]  }
0x151a   : > { %v10140_v25 = vpop.eup %10139 }
0x151b   : > { %v5246_v24 = vmul.f32 %v8366_v47, %v5234_v5  ;;  %v5235_v7 = vmul.f32 %v10140_v25, %v11631_v57  ;;  %v11667_v59 = vpack.c.bf16 %v5256_v9, %v5255_v51  ;;  %v5257_v52 = vadd.f32 %v8367_v39, %v5245_v13 }
0x151c   : > { %v10142_v53 = vpop.eup %10141 }
0x151d   : > { %v5258_v27 = vadd.f32 %v8367_v39, %v5246_v24  ;;  %v5247_v19 = vmul.f32 %v8366_v47, %v5235_v7  ;;  %v5236_v11 = vmul.f32 %v10142_v53, %v11637_v32  ;;  %9318 = vmatprep.mubr.msk.bf16.mxu1 %vm1235_vm2, %v11667_v59  ;;  %9328 = vmatprep.mubr.msk.bf16.mxu0 %vm1235_vm2, %v11667_v59 }
0x151e   : > { %v10144_v16 = vpop.eup %10143 }
0x151f   : > { %v5248_v6 = vmul.f32 %v8366_v47, %v5236_v11  ;;  %v5237_v41 = vmul.f32 %v10144_v16, %v11643_v14  ;;  %v11675_v49 = vpack.c.bf16 %v5258_v27, %v5257_v52  ;;  %v5259_v40 = vadd.f32 %v8367_v39, %v5247_v19 }
0x1520   : > { %v10146_v57 = vpop.eup %10145 }
0x1521   : > { %v5260_v43 = vadd.f32 %v8367_v39, %v5248_v6  ;;  %v5249_v38 = vmul.f32 %v8366_v47, %v5237_v41  ;;  %v5238_v61 = vmul.f32 %v10146_v57, %v11649_v2  ;;  %9319 = vmatmul.mubr.msk.bf16.vlgmr.msra.gmra.mrb[112].mxu1 %vm1235_vm2, %v11675_v49  ;;  %9329 = vmatmul.mubr.msk.bf16.vlgmr.msra.gmra.mrb[104].mxu0 %vm1235_vm2, %v11675_v49  ;;  %v11695_v2 = vld [vmem:[%s12411_s2] sm:$0xff]  }
0x1523   : > { %v5250_v32 = vmul.f32 %v8366_v47, %v5238_v61  ;;  %v11682_v48 = vpack.c.bf16 %v5260_v43, %v5259_v40  ;;  %v5261_v54 = vadd.f32 %v8367_v39, %v5249_v38 }
0x1525   : > { %v5262_v14 = vadd.f32 %v8367_v39, %v5250_v32  ;;  %9322 = vmatprep.mubr.msk.bf16.mxu1 %vm1235_vm2, %v11682_v48  ;;  %9332 = vmatprep.mubr.msk.bf16.mxu0 %vm1235_vm2, %v11682_v48  ;;  %v9865_v39 = vld [vmem:[%s12426_s26] sm:$0xff]   ;;  %s12428_s26 = sld [smem:[#allocation25_spill]] }
0x1527   : > { %v11688_v60 = vpack.c.bf16 %v5262_v14, %v5261_v54 }
0x1529   : > { %9323 = vmatmul.mubr.msk.bf16.gmra.mrb[116].mxu1 %vm1235_vm2, %v11688_v60  ;;  %9333 = vmatmul.mubr.msk.bf16.gmra.mrb[108].mxu0 %vm1235_vm2, %v11688_v60 }
0x152a   : > { %9344 = vmatprep.mubr.msk.bf16.mxu1 %vm1613_vm3, %v11695_v2  ;;  %9366 = vmatprep.mubr.msk.bf16.mxu0 %vm1613_vm3, %v11695_v2 }
0x152b   : > { %s12429_s2 = smov %s12428_s26 }
0x15f4   : > { %v11701_v55 = vpop.f32.mrb[112].mxu1  ;;  %v9330_v4 = vpop.f32.mrb[104].mxu0 }
0x15f5   : > { %v5321_v0 = vpop.f32.mrb[113].mxu1  ;;  %v5394_v26 = vpop.f32.mrb[105].mxu0 }
0x15f6   : > { %v11703_v31 = vpop.f32.mrb[114].mxu1  ;;  %v9331_v63 = vpop.f32.mrb[106].mxu0 }
0x15f7   : > { %v5653_v21 = vpack.c.bf16 %v11703_v31, %v11701_v55  ;;  %v5426_v29 = vpack.c.bf16 %v9331_v63, %v9330_v4  ;;  %v5324_v10 = vpop.f32.mrb[115].mxu1  ;;  %v5397_v22 = vpop.f32.mrb[107].mxu0 }
0x15f8   : > { %v5652_v34 = vpack.c.bf16 %v5324_v10, %v5321_v0  ;;  %v5425_v15 = vpack.c.bf16 %v5397_v22, %v5394_v26 }
0x15fa   : > { %9336 = vmatprep.subr.bf16.mxu1 %v5425_v15 }
0x15fb   : > { %9337 = vmatpush3.bf16.msra.mxu1 %v5425_v15 }
0x15fc   : > { %v11707_v45 = vpop.f32.mrb[116].mxu1  ;;  %v9334_v8 = vpop.f32.mrb[108].mxu0  ;;  %9338 = vmatprep.subr.bf16.mxu1 %v5426_v29 }
0x15fd   : > { %v11709_v30 = vpop.f32.mrb[117].mxu1  ;;  %v5410_v47 = vpop.f32.mrb[109].mxu0 }
0x15fe   : > { %v11711_v1 = vpop.f32.mrb[118].mxu1  ;;  %v9335_v17 = vpop.f32.mrb[110].mxu0 }
0x15ff   : > { %v5655_v18 = vpack.c.bf16 %v11711_v1, %v11707_v45  ;;  %v5428_v3 = vpack.c.bf16 %v9335_v17, %v9334_v8  ;;  %v11715_v37 = vpop.f32.mrb[119].mxu1  ;;  %v5413_v35 = vpop.f32.mrb[111].mxu0  ;;  %9339 = vmatpush3.bf16.msra.mxu1 %v5426_v29 }
0x1600   : > { %v5654_v58 = vpack.c.bf16 %v11715_v37, %v11709_v30  ;;  %v5427_v56 = vpack.c.bf16 %v5413_v35, %v5410_v47  ;;  %v9866_v47 = vld [vmem:[%s12423_s1 + $0x8] sm:$0xff]   ;;  %v11777_v35 = vld [vmem:[%s12429_s2 + $0x10] sm:$0xff] }
0x1601   : > { %v11774_v37 = vld [vmem:[%s12429_s2 + $0x8] sm:$0xff] }
0x1602   : > { %9340 = vmatprep.subr.bf16.mxu1 %v5427_v56 }
0x1603   : > { %9341 = vmatpush3.bf16.msra.mxu1 %v5427_v56 }
0x1604   : > { %9342 = vmatprep.subr.bf16.mxu1 %v5428_v3 }
0x1607   : > { %9343 = vmatpush3.bf16.msra.mxu1 %v5428_v3  ;;  %v9867_v3 = vld [vmem:[%s12427_s5 + $0x8] sm:$0xff]  }
0x1608   : > { %9348 = vmatprep.subr.bf16.mxu1 %v9865_v39 }
0x160a   : > { %9345 = vmatmul.mubr.msk.bf16.vlgmr.msra.gmra.mrb[120].mxu1 %vm1613_vm3, %v11721_v50 }
0x160b   : > { %9350 = vmatprep.mubr.msk.bf16.mxu1 %vm1235_vm2, %v11667_v59  ;;  %9349 = vmatpush3.bf16.msra.mxu1 %v9865_v39 }
0x1612   : > { %9351 = vmatmul.mubr.msk.bf16.vlgmr.msra.gmra.mrb[124].mxu1 %vm1235_vm2, %v11675_v49 }
0x1613   : > { %9354 = vmatprep.mubr.msk.bf16.mxu1 %vm1235_vm2, %v11682_v48 }
0x161a   : > { %9355 = vmatmul.mubr.msk.bf16.gmra.mrb[128].mxu1 %vm1235_vm2, %v11688_v60 }
0x161b   : > { %9374 = vmatprep.mubr.msk.bf16.mxu1 %vm5658_vm5, %v5652_v34 }
0x16dd   : > { %v9346_v23 = vpop.f32.mrb[120].mxu1 }
0x16de   : > { %v8382_v42 = vmul.f32 -1.442695, %v9346_v23  ;;  %v5463_v51 = vpop.f32.mrb[121].mxu1  ;;  %v11783_v23 = vld [vmem:[%s12429_s2 + $0x18] sm:$0xff] }
0x16df   : > { %v8380_v9 = vmul.f32 -1.442695, %v5463_v51  ;;  %v9347_v13 = vpop.f32.mrb[122].mxu1 }
0x16e0   : > { %10147 = vpow2.f32 %v8382_v42  ;;  %v8383_v5 = vmul.f32 -1.442695, %v9347_v13  ;;  %v5466_v25 = vpop.f32.mrb[123].mxu1 }
0x16e1   : > { %10149 = vpow2.f32 %v8380_v9  ;;  %v8381_v24 = vmul.f32 -1.442695, %v5466_v25 }
0x16e2   : > { %10151 = vpow2.f32 %v8383_v5 }
0x16e3   : > { %10153 = vpow2.f32 %v8381_v24 }
0x16e5   : > { %v9352_v7 = vpop.f32.mrb[124].mxu1 }
0x16e6   : > { %v5544_v53 = vpop.f32.mrb[125].mxu1 }
0x16e7   : > { %v9353_v52 = vpop.f32.mrb[126].mxu1 }
0x16e8   : > { %v5576_v27 = vpack.c.bf16 %v9353_v52, %v9352_v7  ;;  %v5547_v19 = vpop.f32.mrb[127].mxu1  ;;  %v11799_v7 = vld [vmem:[%s12429_s2 + $0x20] sm:$0xff] }
0x16e9   : > { %v5575_v11 = vpack.c.bf16 %v5547_v19, %v5544_v53 }
0x16ea   : > { %v10148_v16 = vpop.eup %10147 }
0x16eb   : > { %v10150_v6 = vpop.eup %10149  ;;  %v5492_v41 = vadd.f32 1.0, %v10148_v16  ;;  %9358 = vmatprep.subr.bf16.mxu0 %v5575_v11  ;;  %v11804_v16 = vld [vmem:[%s12429_s2 + $0x28] sm:$0xff] }
0x16ec   : > { %v10152_v57 = vpop.eup %10151  ;;  %v5490_v40 = vadd.f32 1.0, %v10150_v6  ;;  %9359 = vmatpush3.bf16.msra.mxu0 %v5575_v11  ;;  %v11807_v6 = vld [vmem:[%s12429_s2 + $0x30] sm:$0xff] }
0x16ed   : > { %v10154_v43 = vpop.eup %10153  ;;  %10155 = vrcp.f32 %v5492_v41  ;;  %v5493_v38 = vadd.f32 1.0, %v10152_v57  ;;  %v9356_v61 = vpop.f32.mrb[128].mxu1  ;;  %9360 = vmatprep.subr.bf16.mxu0 %v5576_v27 }
0x16ee   : > { %10157 = vrcp.f32 %v5490_v40  ;;  %v5491_v32 = vadd.f32 1.0, %v10154_v43  ;;  %v5560_v54 = vpop.f32.mrb[129].mxu1 }
0x16ef   : > { %10159 = vrcp.f32 %v5493_v38  ;;  %v9357_v14 = vpop.f32.mrb[130].mxu1  ;;  %v11815_v38 = vld [vmem:[%s12429_s2 + $0x38] sm:$0xff] }
0x16f0   : > { %10161 = vrcp.f32 %v5491_v32  ;;  %v5578_v4 = vpack.c.bf16 %v9357_v14, %v9356_v61  ;;  %v5563_v0 = vpop.f32.mrb[131].mxu1  ;;  %9361 = vmatpush3.bf16.msra.mxu0 %v5576_v27 }
0x16f1   : > { %v5577_v26 = vpack.c.bf16 %v5563_v0, %v5560_v54 }
0x16f3   : > { %9362 = vmatprep.subr.bf16.mxu0 %v5577_v26 }
0x16f4   : > { %9363 = vmatpush3.bf16.msra.mxu0 %v5577_v26 }
0x16f5   : > { %9364 = vmatprep.subr.bf16.mxu0 %v5578_v4 }
0x16f7   : > { %v10156_v63 = vpop.eup %10155 }
0x16f8   : > { %v10158_v29 = vpop.eup %10157  ;;  %9365 = vmatpush3.bf16.msra.mxu0 %v5578_v4 }
0x16f9   : > { %v10160_v10 = vpop.eup %10159 }
0x16fa   : > { %v10162_v22 = vpop.eup %10161  ;;  %v5657_v34 = vpack.c.bf16 %v10160_v10, %v10156_v63 }
0x16fb   : > { %v5656_v15 = vpack.c.bf16 %v10162_v22, %v10158_v29  ;;  %9367 = vmatmul.mubr.msk.bf16.vlgmr.msra.gmra.mrb[112].mxu0 %vm1613_vm3, %v11721_v50 }
0x16fc   : > { %v5675_v17 = vsel %vm5658_vm5, %v5657_v34, 0 }
0x16fd   : > { %9706 = vmatprep.subr.msk.bf16.mxu1 %vm5658_vm5, %v5656_v15  ;;  %v5672_v8 = vsel %vm5658_vm5, %v5656_v15, 0 }
0x16fe   : > { %9371 = vmatpush3.bf16.xpose.msra.mxu1 %v5672_v8 }
0x16ff   : > { %9707 = vmatprep.subr.msk.bf16.mxu1 %vm5658_vm5, %v5657_v34 }
0x1706   : > { %9373 = vmatpush3.bf16.xpose.msra.mxu1 %v5675_v17 }
0x1707   : > { %9404 = vmatprep.subr.bf16.mxu1 %v9866_v47 }
0x170d   : > { %9375 = vmatmul.mubr.msk.bf16.vlgmr.msra.gmra.mrb[132].mxu1 %vm5658_vm5, %v5653_v21  ;;  %v11771_v21 = vld [vmem:[%s12428_s26] sm:$0xff]  ;;  %s12430_s26 = sld [smem:[#allocation24_spill]] }
0x170e   : > { %9378 = vmatprep.mubr.msk.bf16.mxu1 %vm5658_vm5, %v5654_v58  ;;  %9405 = vmatpush3.bf16.msra.mxu1 %v9866_v47 }
0x170f   : > { %9426 = vmatprep.subr.bf16.mxu1 %v9867_v3 }
0x1713   : > { %s12431_s1 = smov %s12430_s26 }
0x1715   : > { %9379 = vmatmul.mubr.msk.bf16.gmra.mrb[136].mxu1 %vm5658_vm5, %v5655_v18 }
0x1716   : > { %9406 = vmatprep.mubr.msk.bf16.mxu1 %vm1235_vm2, %v11667_v59 }
0x171d   : > { %9407 = vmatmul.mubr.msk.bf16.vlgmr.msra.gmra.mrb[140].mxu1 %vm1235_vm2, %v11675_v49 }
0x171e   : > { %9410 = vmatprep.mubr.msk.bf16.mxu1 %vm1235_vm2, %v11682_v48  ;;  %9427 = vmatpush3.bf16.msra.mxu1 %v9867_v3 }
0x1725   : > { %9411 = vmatmul.mubr.msk.bf16.gmra.mrb[144].mxu1 %vm1235_vm2, %v11688_v60 }
0x1726   : > { %9428 = vmatprep.mubr.msk.bf16.mxu1 %vm1235_vm2, %v11667_v59 }
0x172d   : > { %9429 = vmatmul.mubr.msk.bf16.vlgmr.msra.gmra.mrb[148].mxu1 %vm1235_vm2, %v11675_v49 }
0x172e   : > { %9432 = vmatprep.mubr.msk.bf16.mxu1 %vm1235_vm2, %v11682_v48 }
0x1735   : > { %9433 = vmatmul.mubr.msk.bf16.gmra.mrb[152].mxu1 %vm1235_vm2, %v11688_v60 }
0x17e0   : > { %v9376_v55 = vpop.f32.mrb[132].mxu1 }
0x17e1   : > { %v5711_v31 = vpop.f32.mrb[133].mxu1  ;;  %v5744_v45 = vmul.f32 0.35355338, %v9376_v55 }
0x17e2   : > { %v5742_v30 = vmul.f32 0.35355338, %v5711_v31  ;;  %v9377_v1 = vpop.f32.mrb[134].mxu1 }
0x17e3   : > { %v5714_v18 = vpop.f32.mrb[135].mxu1  ;;  %v5745_v58 = vmul.f32 0.35355338, %v9377_v1  ;;  %v11791_v9 = vadd.f32 %v5744_v45, %v11777_v35 }
0x17e4   : > { %v5743_v56 = vmul.f32 0.35355338, %v5714_v18  ;;  %v11780_v39 = vadd.f32 %v5742_v30, %v11771_v21 }
0x17e5   : > { %v11796_v25 = vadd.f32 %v5745_v58, %v11783_v23  ;;  %v5764_v19 = vsel %vm1841_vm4, %v11791_v9, -inf }
0x17e6   : > { %v5758_v42 = vsel %vm1841_vm4, %v11780_v39, -inf  ;;  %v11788_v51 = vadd.f32 %v5743_v56, %v11774_v37 }
0x17e7   : > { %5759 = vmax.xlane.f32.xlu0 %v5758_v42  ;;  %v5767_v40 = vsel %vm1841_vm4, %v11796_v25, -inf }
0x17e8   : > { %v9380_v13 = vpop.f32.mrb[136].mxu1  ;;  %v5761_v5 = vsel %vm1841_vm4, %v11788_v51, -inf }
0x17e9   : > { %5762 = vmax.xlane.f32.xlu1 %v5761_v5  ;;  %v5727_v24 = vpop.f32.mrb[137].mxu1  ;;  %v5748_v53 = vmul.f32 0.35355338, %v9380_v13 }
0x17ea   : > { %v5746_v52 = vmul.f32 0.35355338, %v5727_v24  ;;  %v9381_v27 = vpop.f32.mrb[138].mxu1 }
0x17eb   : > { %5765 = vmax.xlane.f32.xlu0 %v5764_v19  ;;  %v5730_v11 = vpop.f32.mrb[139].mxu1  ;;  %v5749_v41 = vmul.f32 0.35355338, %v9381_v27  ;;  %v11823_v54 = vadd.f32 %v5748_v53, %v11807_v6  ;;  %v9368_v27 = vpop.f32.mrb[112].mxu0 }
0x17ec   : > { %v5747_v57 = vmul.f32 0.35355338, %v5730_v11  ;;  %v11812_v43 = vadd.f32 %v5746_v52, %v11799_v7  ;;  %v5613_v19 = vpop.f32.mrb[113].mxu0 }
0x17ed   : > { %5768 = vmax.xlane.f32.xlu1 %v5767_v40  ;;  %v11828_v0 = vadd.f32 %v5749_v41, %v11815_v38  ;;  %v5776_v29 = vsel %vm1841_vm4, %v11823_v54, -inf  ;;  %v9369_v11 = vpop.f32.mrb[114].mxu0 }
0x17ee   : > { %v5770_v61 = vsel %vm1841_vm4, %v11812_v43, -inf  ;;  %v11820_v32 = vadd.f32 %v5747_v57, %v11804_v16  ;;  %v5616_v41 = vpop.f32.mrb[115].mxu0  ;;  %v8391_v57 = vmul.f32 -1.442695, %v5613_v19 }
0x17ef   : > { %5771 = vmax.xlane.f32.xlu0 %v5770_v61  ;;  %v5779_v15 = vsel %vm1841_vm4, %v11828_v0, -inf  ;;  %v8392_v61 = vmul.f32 -1.442695, %v5616_v41 }
0x17f0   : > { %v9408_v14 = vpop.f32.mrb[140].mxu1  ;;  %v5773_v4 = vsel %vm1841_vm4, %v11820_v32, -inf  ;;  %10163 = vpow2.f32 %v8391_v57 }
0x17f1   : > { %v6051_v26 = vpop.f32.mrb[141].mxu1  ;;  %5774 = vmax.xlane.f32.xlu1 %v5773_v4  ;;  %10165 = vpow2.f32 %v8392_v61 }
0x17f2   : > { %v9409_v63 = vpop.f32.mrb[142].mxu1 }
0x17f3   : > { %v11832_v10 = vpack.c.bf16 %v9409_v63, %v9408_v14  ;;  %5777 = vmax.xlane.f32.xlu0 %v5776_v29  ;;  %v6054_v22 = vpop.f32.mrb[143].mxu1 }
0x17f4   : > { %v11834_v34 = vpack.c.bf16 %v6054_v22, %v6051_v26  ;;  %v8393_v26 = vmul.f32 -1.442695, %v9368_v27 }
0x17f5   : > { %5780 = vmax.xlane.f32.xlu1 %v5779_v15  ;;  %v8394_v15 = vmul.f32 -1.442695, %v9369_v11 }
0x17f8   : > { %v9412_v8 = vpop.f32.mrb[144].mxu1 }
0x17f9   : > { %v6067_v47 = vpop.f32.mrb[145].mxu1 }
0x17fa   : > { %v9413_v17 = vpop.f32.mrb[146].mxu1 }
0x17fb   : > { %v11838_v3 = vpack.c.bf16 %v9413_v17, %v9412_v8  ;;  %v6070_v55 = vpop.f32.mrb[147].mxu1 }
0x17fc   : > { %v11840_v31 = vpack.c.bf16 %v6070_v55, %v6067_v47 }
0x1800   : > { %v9430_v45 = vpop.f32.mrb[148].mxu1 }
0x1801   : > { %v6202_v30 = vpop.f32.mrb[149].mxu1 }
0x1802   : > { %v9431_v1 = vpop.f32.mrb[150].mxu1 }
0x1803   : > { %v11842_v18 = vpack.c.bf16 %v9431_v1, %v9430_v45  ;;  %v6205_v58 = vpop.f32.mrb[151].mxu1 }
0x1804   : > { %v11844_v56 = vpack.c.bf16 %v6205_v58, %v6202_v30 }
0x1808   : > { %v9434_v42 = vpop.f32.mrb[152].mxu1 }
0x1809   : > { %v6218_v13 = vpop.f32.mrb[153].mxu1 }
0x180a   : > { %v9435_v5 = vpop.f32.mrb[154].mxu1 }
0x180b   : > { %v11846_v24 = vpack.c.bf16 %v9435_v5, %v9434_v42  ;;  %v6221_v53 = vpop.f32.mrb[155].mxu1  ;;  %v10164_v5 = vpop.eup %10163 }
0x180c   : > { %v11848_v52 = vpack.c.bf16 %v6221_v53, %v6218_v13  ;;  %v10166_v27 = vpop.eup %10165 }
0x1874   : > { %v5760_v40 = vpop.xlane.xlu0 %5759 }
0x1875   : > { %v5782_v14 = vsub.f32 %v11780_v39, %v5760_v40  ;;  %v5640_v40 = vadd.f32 1.0, %v10164_v5 }
0x1876   : > { %v5763_v4 = vpop.xlane.xlu1 %5762 }
0x1877   : > { %v5790_v63 = vmul.f32 1.442695, %v5782_v14  ;;  %v5783_v29 = vsub.f32 %v11788_v51, %v5763_v4  ;;  %v5641_v14 = vadd.f32 1.0, %v10166_v27 }
0x1878   : > { %v5766_v22 = vpop.xlane.xlu0 %5765 }
0x1879   : > { %10167 = vpow2.f32 %v5790_v63  ;;  %v5792_v8 = vmul.f32 1.442695, %v5783_v29  ;;  %v5784_v47 = vsub.f32 %v11791_v9, %v5766_v22 }
0x187a   : > { %v5769_v17 = vpop.xlane.xlu1 %5768  ;;  %10169 = vpow2.f32 %v8393_v26 }
0x187b   : > { %10171 = vpow2.f32 %v5792_v8  ;;  %v5794_v55 = vmul.f32 1.442695, %v5784_v47  ;;  %v5785_v45 = vsub.f32 %v11796_v25, %v5769_v17 }
0x187c   : > { %v5772_v39 = vpop.xlane.xlu0 %5771  ;;  %10173 = vpow2.f32 %v8394_v15 }
0x187d   : > { %10175 = vpow2.f32 %v5794_v55  ;;  %v5796_v30 = vmul.f32 1.442695, %v5785_v45  ;;  %v5786_v51 = vsub.f32 %v11812_v43, %v5772_v39 }
0x187e   : > { %v5775_v1 = vpop.xlane.xlu1 %5774 }
0x187f   : > { %10177 = vpow2.f32 %v5796_v30  ;;  %v5798_v58 = vmul.f32 1.442695, %v5786_v51  ;;  %v5787_v42 = vsub.f32 %v11820_v32, %v5775_v1 }
0x1880   : > { %v5778_v13 = vpop.xlane.xlu0 %5777 }
0x1881   : > { %10179 = vpow2.f32 %v5798_v58  ;;  %v5800_v9 = vmul.f32 1.442695, %v5787_v42  ;;  %v5788_v53 = vsub.f32 %v11823_v54, %v5778_v13 }
0x1882   : > { %v5781_v19 = vpop.xlane.xlu1 %5780 }
0x1883   : > { %v11857_v25 = vpop.eup %10167  ;;  %10181 = vpow2.f32 %v5800_v9  ;;  %v5802_v11 = vmul.f32 1.442695, %v5788_v53  ;;  %v5789_v41 = vsub.f32 %v11828_v0, %v5781_v19  ;;  %v9868_v53 = vld [vmem:[%s12424_s3 + $0x8] sm:$0xff]  }
0x1884   : > { %v10170_v43 = vpop.eup %10169  ;;  %v5806_v57 = vsel %vm1841_vm4, %v11857_v25, 0.0 }
0x1885   : > { %v11862_v32 = vpop.eup %10171  ;;  %10183 = vpow2.f32 %v5802_v11  ;;  %v5804_v61 = vmul.f32 1.442695, %v5789_v41  ;;  %5807 = vadd.xlane.f32.xlu0 %v5806_v57  ;;  %v5642_v63 = vadd.f32 1.0, %v10170_v43 }
0x1886   : > { %v10174_v54 = vpop.eup %10173  ;;  %v5809_v4 = vsel %vm1841_vm4, %v11862_v32, 0.0 }
0x1887   : > { %v10176_v26 = vpop.eup %10175  ;;  %10185 = vpow2.f32 %v5804_v61  ;;  %5810 = vadd.xlane.f32.xlu1 %v5809_v4  ;;  %v5643_v22 = vadd.f32 1.0, %v10174_v54 }
0x1888   : > { %v5812_v0 = vsel %vm1841_vm4, %v10176_v26, 0.0  ;;  %10187 = vrcp.f32 %v5640_v40 }
0x1889   : > { %v10178_v29 = vpop.eup %10177  ;;  %5813 = vadd.xlane.f32.xlu0 %v5812_v0  ;;  %10189 = vrcp.f32 %v5641_v14 }
0x188a   : > { %v5815_v15 = vsel %vm1841_vm4, %v10178_v29, 0.0  ;;  %10191 = vrcp.f32 %v5642_v63 }
0x188b   : > { %v10180_v8 = vpop.eup %10179  ;;  %5816 = vadd.xlane.f32.xlu1 %v5815_v15  ;;  %10193 = vrcp.f32 %v5643_v22 }
0x188c   : > { %v5818_v47 = vsel %vm1841_vm4, %v10180_v8, 0.0 }
0x188d   : > { %v10182_v17 = vpop.eup %10181  ;;  %5819 = vadd.xlane.f32.xlu0 %v5818_v47 }
0x188e   : > { %v5821_v55 = vsel %vm1841_vm4, %v10182_v17, 0.0 }
0x188f   : > { %v10184_v45 = vpop.eup %10183  ;;  %5822 = vadd.xlane.f32.xlu1 %v5821_v55 }
0x1890   : > { %v5824_v39 = vsel %vm1841_vm4, %v10184_v45, 0.0 }
0x1891   : > { %v10186_v30 = vpop.eup %10185  ;;  %5825 = vadd.xlane.f32.xlu0 %v5824_v39 }
0x1892   : > { %v10188_v51 = vpop.eup %10187  ;;  %v5827_v1 = vsel %vm1841_vm4, %v10186_v30, 0.0 }
0x1893   : > { %v10190_v58 = vpop.eup %10189  ;;  %5828 = vadd.xlane.f32.xlu1 %v5827_v1 }
0x1894   : > { %v10192_v42 = vpop.eup %10191  ;;  %v5850_v13 = vpack.c.bf16 %v10190_v58, %v10188_v51 }
0x1895   : > { %v10194_v5 = vpop.eup %10193 }
0x1896   : > { %9382 = vmatprep.subr.bf16.mxu0 %v5850_v13  ;;  %v5851_v9 = vpack.c.bf16 %v10194_v5, %v10192_v42 }
0x1897   : > { %9383 = vmatpush3.bf16.msra.mxu0 %v5850_v13 }
0x1898   : > { %9384 = vmatprep.subr.bf16.mxu0 %v5851_v9 }
0x189b   : > { %9385 = vmatpush3.bf16.msra.mxu0 %v5851_v9 }
0x189c   : > { %9394 = vmatprep.subr.bf16.mxu0 %v9868_v53 }
0x1912   : > { %v5808_v27 = vpop.xlane.xlu0 %5807 }
0x1913   : > { %10195 = vrcp.f32 %v5808_v27 }
0x1914   : > { %v5811_v19 = vpop.xlane.xlu1 %5810 }
0x1915   : > { %10197 = vrcp.f32 %v5811_v19 }
0x1916   : > { %v5814_v11 = vpop.xlane.xlu0 %5813 }
0x1917   : > { %10199 = vrcp.f32 %v5814_v11 }
0x1918   : > { %v5817_v41 = vpop.xlane.xlu1 %5816 }
0x1919   : > { %10201 = vrcp.f32 %v5817_v41 }
0x191a   : > { %v5820_v43 = vpop.xlane.xlu0 %5819 }
0x191b   : > { %10203 = vrcp.f32 %v5820_v43 }
0x191c   : > { %v5823_v57 = vpop.xlane.xlu1 %5822 }
0x191d   : > { %v10196_v40 = vpop.eup %10195  ;;  %10205 = vrcp.f32 %v5823_v57 }
0x191e   : > { %v5826_v61 = vpop.xlane.xlu0 %5825  ;;  %v5838_v4 = vmul.f32 %v10196_v40, %v11857_v25 }
0x191f   : > { %v10198_v14 = vpop.eup %10197  ;;  %10207 = vrcp.f32 %v5826_v61 }
0x1920   : > { %v5829_v54 = vpop.xlane.xlu1 %5828  ;;  %v5839_v0 = vmul.f32 %v10198_v14, %v11862_v32 }
0x1921   : > { %v10200_v63 = vpop.eup %10199  ;;  %10209 = vrcp.f32 %v5829_v54 }
0x1922   : > { %v5846_v22 = vpack.c.bf16 %v5839_v0, %v5838_v4  ;;  %v5840_v47 = vmul.f32 %v10200_v63, %v10176_v26 }
0x1923   : > { %v10202_v15 = vpop.eup %10201 }
0x1924   : > { %v5841_v55 = vmul.f32 %v10202_v15, %v10178_v29  ;;  %9386 = vmatprep.mubr.msk.bf16.mxu0 %vm1841_vm4, %v5846_v22 }
0x1925   : > { %v10204_v39 = vpop.eup %10203 }
0x1926   : > { %v5847_v51 = vpack.c.bf16 %v5841_v55, %v5840_v47  ;;  %v5842_v58 = vmul.f32 %v10204_v39, %v10180_v8 }
0x1927   : > { %v10206_v1 = vpop.eup %10205 }
0x1928   : > { %9387 = vmatmul.mubr.msk.bf16.vlgmr.msra.gmra.mrb[116].mxu0 %vm1841_vm4, %v5847_v51  ;;  %v5843_v42 = vmul.f32 %v10206_v1, %v10182_v17 }
0x1929   : > { %v10208_v13 = vpop.eup %10207  ;;  %9395 = vmatpush3.bf16.msra.mxu0 %v9868_v53 }
0x192a   : > { %9414 = vmatprep.subr.bf16.mxu0 %v11834_v34  ;;  %v5848_v25 = vpack.c.bf16 %v5843_v42, %v5842_v58  ;;  %v5844_v5 = vmul.f32 %v10208_v13, %v10184_v45 }
0x192b   : > { %v10210_v32 = vpop.eup %10209 }
0x192c   : > { %9390 = vmatprep.mubr.msk.bf16.mxu0 %vm1841_vm4, %v5848_v25  ;;  %v5845_v26 = vmul.f32 %v10210_v32, %v10186_v30 }
0x192e   : > { %v5849_v29 = vpack.c.bf16 %v5845_v26, %v5844_v5 }
0x1930   : > { %9391 = vmatmul.mubr.msk.bf16.gmra.mrb[120].mxu0 %vm1841_vm4, %v5849_v29 }
0x1931   : > { %9396 = vmatprep.mubr.msk.bf16.mxu0 %vm1235_vm2, %v11667_v59 }
0x1938   : > { %9397 = vmatmul.mubr.msk.bf16.vlgmr.msra.gmra.mrb[124].mxu0 %vm1235_vm2, %v11675_v49 }
0x1939   : > { %9415 = vmatpush3.bf16.msra.mxu0 %v11834_v34  ;;  %9400 = vmatprep.mubr.msk.bf16.mxu0 %vm1235_vm2, %v11682_v48 }
0x193a   : > { %9416 = vmatprep.subr.bf16.mxu0 %v11832_v10 }
0x193d   : > { %9417 = vmatpush3.bf16.msra.mxu0 %v11832_v10 }
0x193e   : > { %9418 = vmatprep.subr.bf16.mxu0 %v11840_v31 }
0x1940   : > { %9401 = vmatmul.mubr.msk.bf16.gmra.mrb[128].mxu0 %vm1235_vm2, %v11688_v60 }
0x1941   : > { %9419 = vmatpush3.bf16.msra.mxu0 %v11840_v31  ;;  %9422 = vmatprep.mubr.msk.bf16.mxu0 %vm1613_vm3, %v11695_v2 }
0x1942   : > { %9420 = vmatprep.subr.bf16.mxu0 %v11838_v3 }
0x1945   : > { %9421 = vmatpush3.bf16.msra.mxu0 %v11838_v3 }
0x1946   : > { %9436 = vmatprep.subr.bf16.mxu0 %v11844_v56 }
0x1948   : > { %9423 = vmatmul.mubr.msk.bf16.vlgmr.msra.gmra.mrb[132].mxu0 %vm1613_vm3, %v11721_v50 }
0x1949   : > { %9437 = vmatpush3.bf16.msra.mxu0 %v11844_v56  ;;  %9444 = vmatprep.mubr.msk.bf16.mxu0 %vm1613_vm3, %v11695_v2 }
0x194a   : > { %9438 = vmatprep.subr.bf16.mxu0 %v11842_v18 }
0x194d   : > { %9439 = vmatpush3.bf16.msra.mxu0 %v11842_v18 }
0x194e   : > { %9440 = vmatprep.subr.bf16.mxu0 %v11848_v52 }
0x1951   : > { %9441 = vmatpush3.bf16.msra.mxu0 %v11848_v52 }
0x1952   : > { %9442 = vmatprep.subr.bf16.mxu0 %v11846_v24 }
0x1955   : > { %9443 = vmatpush3.bf16.msra.mxu0 %v11846_v24 }
0x1958   : > { %9445 = vmatmul.mubr.msk.bf16.vlgmr.msra.gmra.mrb[136].mxu0 %vm1613_vm3, %v11721_v50 }
0x19fb   : > { %v11911_v59 = vpop.f32.mrb[116].mxu0 }
0x19fc   : > { %v11913_v49 = vpop.f32.mrb[117].mxu0 }
0x19fd   : > { %v11915_v48 = vpop.f32.mrb[118].mxu0 }
0x19fe   : > { %v5930_v60 = vpack.c.bf16 %v11915_v48, %v11911_v59  ;;  %v11919_v2 = vpop.f32.mrb[119].mxu0 }
0x19ff   : > { %v5929_v10 = vpack.c.bf16 %v11919_v2, %v11913_v49 }
0x1a03   : > { %v11923_v34 = vpop.f32.mrb[120].mxu0 }
0x1a04   : > { %v11925_v3 = vpop.f32.mrb[121].mxu0 }
0x1a05   : > { %v11927_v31 = vpop.f32.mrb[122].mxu0 }
0x1a06   : > { %v5932_v50 = vpack.c.bf16 %v11927_v31, %v11923_v34  ;;  %v11931_v18 = vpop.f32.mrb[123].mxu0 }
0x1a07   : > { %v5931_v56 = vpack.c.bf16 %v11931_v18, %v11925_v3 }
0x1a0b   : > { %v9398_v24 = vpop.f32.mrb[124].mxu0 }
0x1a0c   : > { %v5977_v52 = vpop.f32.mrb[125].mxu0 }
0x1a0d   : > { %v9399_v8 = vpop.f32.mrb[126].mxu0 }
0x1a0e   : > { %v6311_v17 = vpack.c.bf16 %v9399_v8, %v9398_v24  ;;  %v5980_v45 = vpop.f32.mrb[127].mxu0 }
0x1a0f   : > { %v6310_v30 = vpack.c.bf16 %v5980_v45, %v5977_v52 }
0x1a11   : > { %9452 = vmatprep.mubr.msk.bf16.mxu1 %vm5658_vm5, %v6310_v30 }
0x1a13   : > { %v9402_v9 = vpop.f32.mrb[128].mxu0 }
0x1a14   : > { %v5993_v53 = vpop.f32.mrb[129].mxu0 }
0x1a15   : > { %v9403_v27 = vpop.f32.mrb[130].mxu0 }
0x1a16   : > { %v6313_v19 = vpack.c.bf16 %v9403_v27, %v9402_v9  ;;  %v5996_v11 = vpop.f32.mrb[131].mxu0 }
0x1a17   : > { %v6312_v41 = vpack.c.bf16 %v5996_v11, %v5993_v53 }
0x1a1b   : > { %v9424_v43 = vpop.f32.mrb[132].mxu0 }
0x1a1c   : > { %v8421_v57 = vmul.f32 -1.442695, %v9424_v43  ;;  %v6120_v40 = vpop.f32.mrb[133].mxu0 }
0x1a1d   : > { %v8419_v61 = vmul.f32 -1.442695, %v6120_v40  ;;  %v9425_v14 = vpop.f32.mrb[134].mxu0 }
0x1a1e   : > { %10211 = vpow2.f32 %v8421_v57  ;;  %v8422_v54 = vmul.f32 -1.442695, %v9425_v14  ;;  %v6123_v4 = vpop.f32.mrb[135].mxu0 }
0x1a1f   : > { %10213 = vpow2.f32 %v8419_v61  ;;  %v8420_v0 = vmul.f32 -1.442695, %v6123_v4 }
0x1a20   : > { %10215 = vpow2.f32 %v8422_v54 }
0x1a21   : > { %10217 = vpow2.f32 %v8420_v0 }
0x1a28   : > { %v10212_v63 = vpop.eup %10211 }
0x1a29   : > { %v10214_v22 = vpop.eup %10213  ;;  %v6149_v15 = vadd.f32 1.0, %v10212_v63 }
0x1a2a   : > { %v10216_v47 = vpop.eup %10215  ;;  %v6147_v55 = vadd.f32 1.0, %v10214_v22 }
0x1a2b   : > { %v10218_v39 = vpop.eup %10217  ;;  %10219 = vrcp.f32 %v6149_v15  ;;  %v6150_v51 = vadd.f32 1.0, %v10216_v47 }
0x1a2c   : > { %10221 = vrcp.f32 %v6147_v55  ;;  %v6148_v1 = vadd.f32 1.0, %v10218_v39 }
0x1a2d   : > { %10223 = vrcp.f32 %v6150_v51 }
0x1a2e   : > { %10225 = vrcp.f32 %v6148_v1  ;;  %v9446_v1 = vpop.f32.mrb[136].mxu0 }
0x1a35   : > { %v10220_v58 = vpop.eup %10219 }
0x1a36   : > { %v10222_v42 = vpop.eup %10221 }
0x1a37   : > { %v10224_v13 = vpop.eup %10223 }
0x1a38   : > { %v10226_v25 = vpop.eup %10225  ;;  %v6315_v32 = vpack.c.bf16 %v10224_v13, %v10220_v58  ;;  %v6271_v58 = vpop.f32.mrb[137].mxu0 }
0x1a39   : > { %v6314_v5 = vpack.c.bf16 %v10226_v25, %v10222_v42  ;;  %v9447_v42 = vpop.f32.mrb[138].mxu0  ;;  %v8432_v13 = vmul.f32 -1.442695, %v6271_v58 }
0x1a3a   : > { %v6332_v29 = vsel %vm5658_vm5, %v6315_v32, 0 }
0x1a3b   : > { %9708 = vmatprep.subr.msk.bf16.mxu1 %vm5658_vm5, %v6314_v5  ;;  %v6329_v26 = vsel %vm5658_vm5, %v6314_v5, 0  ;;  %10227 = vpow2.f32 %v8432_v13 }
0x1a3c   : > { %9449 = vmatpush3.bf16.xpose.msra.mxu1 %v6329_v26  ;;  %v8434_v26 = vmul.f32 -1.442695, %v9446_v1 }
0x1a3d   : > { %9709 = vmatprep.subr.msk.bf16.mxu1 %vm5658_vm5, %v6315_v32 }
0x1a44   : > { %9451 = vmatpush3.bf16.xpose.msra.mxu1 %v6332_v29 }
0x1a4b   : > { %9453 = vmatmul.mubr.msk.bf16.vlgmr.msra.gmra.mrb[156].mxu1 %vm5658_vm5, %v6311_v17 }
0x1a4c   : > { %9456 = vmatprep.mubr.msk.bf16.mxu1 %vm5658_vm5, %v6312_v41 }
0x1a53   : > { %9457 = vmatmul.mubr.msk.bf16.gmra.mrb[160].mxu1 %vm5658_vm5, %v6313_v19 }
0x1b1e   : > { %v9454_v24 = vpop.f32.mrb[156].mxu1 }
0x1b1f   : > { %v6368_v52 = vpop.f32.mrb[157].mxu1  ;;  %v6401_v8 = vmul.f32 0.35355338, %v9454_v24 }
0x1b20   : > { %v6399_v45 = vmul.f32 0.35355338, %v6368_v52  ;;  %v9455_v30 = vpop.f32.mrb[158].mxu1  ;;  %v8435_v52 = vmul.f32 -1.442695, %v9447_v42 }
0x1b21   : > { %v6371_v9 = vpop.f32.mrb[159].mxu1  ;;  %v6402_v53 = vmul.f32 0.35355338, %v9455_v30  ;;  %v6409_v43 = vadd.f32 %v6401_v8, %v11777_v35 }
0x1b22   : > { %v6400_v27 = vmul.f32 0.35355338, %v6371_v9  ;;  %v6407_v11 = vadd.f32 %v6399_v45, %v11771_v21 }
0x1b23   : > { %v6410_v41 = vadd.f32 %v6402_v53, %v11783_v23  ;;  %v6421_v0 = vsel %vm1841_vm4, %v6409_v43, -inf }
0x1b24   : > { %v6415_v57 = vsel %vm1841_vm4, %v6407_v11, -inf  ;;  %v6408_v17 = vadd.f32 %v6400_v27, %v11774_v37 }
0x1b25   : > { %6416 = vmax.xlane.f32.xlu0 %v6415_v57  ;;  %v6424_v37 = vsel %vm1841_vm4, %v6410_v41, -inf }
0x1b26   : > { %v9458_v19 = vpop.f32.mrb[160].mxu1  ;;  %v6418_v40 = vsel %vm1841_vm4, %v6408_v17, -inf }
0x1b27   : > { %6419 = vmax.xlane.f32.xlu1 %v6418_v40  ;;  %v6384_v61 = vpop.f32.mrb[161].mxu1  ;;  %v6405_v14 = vmul.f32 0.35355338, %v9458_v19 }
0x1b28   : > { %v6403_v54 = vmul.f32 0.35355338, %v6384_v61  ;;  %v9459_v4 = vpop.f32.mrb[162].mxu1 }
0x1b29   : > { %6422 = vmax.xlane.f32.xlu0 %v6421_v0  ;;  %v6387_v21 = vpop.f32.mrb[163].mxu1  ;;  %v6406_v63 = vmul.f32 0.35355338, %v9459_v4  ;;  %v6413_v23 = vadd.f32 %v6405_v14, %v11807_v6  ;;  %v6274_v6 = vpop.f32.mrb[139].mxu0 }
0x1b2a   : > { %v6411_v35 = vadd.f32 %v6403_v54, %v11799_v7  ;;  %v6404_v22 = vmul.f32 0.35355338, %v6387_v21  ;;  %v8433_v25 = vmul.f32 -1.442695, %v6274_v6  ;;  %v10228_v14 = vpop.eup %10227 }
0x1b2b   : > { %6425 = vmax.xlane.f32.xlu1 %v6424_v37  ;;  %v6414_v55 = vadd.f32 %v6406_v63, %v11815_v38  ;;  %v6433_v51 = vsel %vm1841_vm4, %v6413_v23, -inf }
0x1b2c   : > { %v6412_v15 = vadd.f32 %v6404_v22, %v11804_v16  ;;  %v6427_v47 = vsel %vm1841_vm4, %v6411_v35, -inf  ;;  %10229 = vpow2.f32 %v8433_v25 }
0x1b2d   : > { %6428 = vmax.xlane.f32.xlu0 %v6427_v47  ;;  %v6436_v7 = vsel %vm1841_vm4, %v6414_v55, -inf  ;;  %v6298_v47 = vadd.f32 1.0, %v10228_v14 }
0x1b2e   : > { %v6430_v39 = vsel %vm1841_vm4, %v6412_v15, -inf }
0x1b2f   : > { %6431 = vmax.xlane.f32.xlu1 %v6430_v39 }
0x1b31   : > { %6434 = vmax.xlane.f32.xlu0 %v6433_v51 }
0x1b33   : > { %6437 = vmax.xlane.f32.xlu1 %v6436_v7 }
0x1bb2   : > { %v6417_v16 = vpop.xlane.xlu0 %6416 }
0x1bb3   : > { %v6439_v32 = vsub.f32 %v6407_v11, %v6417_v16 }
0x1bb4   : > { %v6420_v5 = vpop.xlane.xlu1 %6419 }
0x1bb5   : > { %v6447_v38 = vmul.f32 1.442695, %v6439_v32  ;;  %v6440_v29 = vsub.f32 %v6408_v17, %v6420_v5 }
0x1bb6   : > { %v6423_v24 = vpop.xlane.xlu0 %6422 }
0x1bb7   : > { %10231 = vpow2.f32 %v6447_v38  ;;  %v6449_v8 = vmul.f32 1.442695, %v6440_v29  ;;  %v6441_v45 = vsub.f32 %v6409_v43, %v6423_v24  ;;  %v10230_v43 = vpop.eup %10229 }
0x1bb8   : > { %v6426_v30 = vpop.xlane.xlu1 %6425  ;;  %10233 = vpow2.f32 %v8434_v26  ;;  %v6299_v51 = vadd.f32 1.0, %v10230_v43 }
0x1bb9   : > { %10235 = vpow2.f32 %v6449_v8  ;;  %v6451_v9 = vmul.f32 1.442695, %v6441_v45  ;;  %v6442_v53 = vsub.f32 %v6410_v41, %v6426_v30 }
0x1bba   : > { %v6429_v27 = vpop.xlane.xlu0 %6428  ;;  %10237 = vpow2.f32 %v8435_v52 }
0x1bbb   : > { %10239 = vpow2.f32 %v6451_v9  ;;  %v6453_v11 = vmul.f32 1.442695, %v6442_v53  ;;  %v6443_v57 = vsub.f32 %v6411_v35, %v6429_v27  ;;  %v8444_v53 = vld [vmem:[%s12430_s26 + $0x4] sm:$0xf]  ;;  %s12432_s26 = sld [smem:[#allocation26_spill]] }
0x1bbc   : > { %v6432_v19 = vpop.xlane.xlu1 %6431  ;;  %9710 = vmatprep.subr.msk.bf16.mxu1 %vm6604_vm6, %v8444_v53  ;;  %v6606_v27 = vsel %vm6604_vm6, %v8444_v53, 0  ;;  %v10325_v53 = vld [vmem:[#allocation2 + $0x20] sm:$0xff]  }
0x1bbd   : > { %10241 = vpow2.f32 %v6453_v11  ;;  %v6455_v17 = vmul.f32 1.442695, %v6443_v57  ;;  %v6444_v40 = vsub.f32 %v6412_v15, %v6432_v19  ;;  %9473 = vmatpush3.bf16.msra.mxu1 %v6606_v27 }
0x1bbe   : > { %v6435_v61 = vpop.xlane.xlu0 %6434 }
0x1bbf   : > { %10243 = vpow2.f32 %v6455_v17  ;;  %v6457_v54 = vmul.f32 1.442695, %v6444_v40  ;;  %v6445_v4 = vsub.f32 %v6413_v23, %v6435_v61 }
0x1bc0   : > { %v6438_v0 = vpop.xlane.xlu1 %6437 }
0x1bc1   : > { %v11959_v21 = vpop.eup %10231  ;;  %10245 = vpow2.f32 %v6457_v54  ;;  %v6459_v41 = vmul.f32 1.442695, %v6445_v4  ;;  %v6446_v63 = vsub.f32 %v6414_v55, %v6438_v0  ;;  %s12433_s2 = smov %s12432_s26  ;;  %v8453_v49 = vld [vmem:[%s12432_s26] ss:$0 sm:$0xff]  ;;  %s12434_s26 = sld [smem:[#allocation27_spill]] }
0x1bc2   : > { %v10234_v22 = vpop.eup %10233  ;;  %v6463_v35 = vsel %vm1841_vm4, %v11959_v21, 0.0 }
0x1bc3   : > { %v11963_v37 = vpop.eup %10235  ;;  %10247 = vpow2.f32 %v6459_v41  ;;  %v6461_v15 = vmul.f32 1.442695, %v6446_v63  ;;  %6464 = vadd.xlane.f32.xlu0 %v6463_v35  ;;  %v6300_v58 = vadd.f32 1.0, %v10234_v22 }
0x1bc4   : > { %v10238_v39 = vpop.eup %10237  ;;  %v6466_v23 = vsel %vm1841_vm4, %v11963_v37, 0.0 }
0x1bc5   : > { %v11967_v7 = vpop.eup %10239  ;;  %10249 = vpow2.f32 %v6461_v15  ;;  %6467 = vadd.xlane.f32.xlu1 %v6466_v23  ;;  %v6301_v6 = vadd.f32 1.0, %v10238_v39 }
0x1bc6   : > { %v6469_v55 = vsel %vm1841_vm4, %v11967_v7, 0.0  ;;  %10251 = vrcp.f32 %v6298_v47 }
0x1bc7   : > { %v10242_v1 = vpop.eup %10241  ;;  %6470 = vadd.xlane.f32.xlu0 %v6469_v55  ;;  %10253 = vrcp.f32 %v6299_v51 }
0x1bc8   : > { %v6472_v42 = vsel %vm1841_vm4, %v10242_v1, 0.0  ;;  %10255 = vrcp.f32 %v6300_v58 }
0x1bc9   : > { %v10244_v13 = vpop.eup %10243  ;;  %6473 = vadd.xlane.f32.xlu1 %v6472_v42  ;;  %10257 = vrcp.f32 %v6301_v6 }
0x1bca   : > { %v6475_v16 = vsel %vm1841_vm4, %v10244_v13, 0.0 }
0x1bcb   : > { %v10246_v25 = vpop.eup %10245  ;;  %6476 = vadd.xlane.f32.xlu0 %v6475_v16 }
0x1bcc   : > { %v6478_v32 = vsel %vm1841_vm4, %v10246_v25, 0.0 }
0x1bcd   : > { %v10248_v5 = vpop.eup %10247  ;;  %6479 = vadd.xlane.f32.xlu1 %v6478_v32 }
0x1bce   : > { %v6481_v26 = vsel %vm1841_vm4, %v10248_v5, 0.0 }
0x1bcf   : > { %v10250_v38 = vpop.eup %10249  ;;  %6482 = vadd.xlane.f32.xlu0 %v6481_v26 }
0x1bd0   : > { %v6484_v29 = vsel %vm1841_vm4, %v10250_v38, 0.0  ;;  %v10252_v24 = vpop.eup %10251 }
0x1bd1   : > { %6485 = vadd.xlane.f32.xlu1 %v6484_v29  ;;  %v10254_v52 = vpop.eup %10253 }
0x1bd2   : > { %v10256_v8 = vpop.eup %10255  ;;  %v6507_v45 = vpack.c.bf16 %v10254_v52, %v10252_v24 }
0x1bd3   : > { %v10258_v30 = vpop.eup %10257 }
0x1bd4   : > { %9460 = vmatprep.subr.bf16.mxu0 %v6507_v45  ;;  %v6508_v9 = vpack.c.bf16 %v10258_v30, %v10256_v8 }
0x1bd5   : > { %9461 = vmatpush3.bf16.msra.mxu0 %v6507_v45 }
0x1bd6   : > { %9462 = vmatprep.subr.bf16.mxu0 %v6508_v9 }
0x1bd9   : > { %9463 = vmatpush3.bf16.msra.mxu0 %v6508_v9 }
0x1c50   : > { %v6465_v11 = vpop.xlane.xlu0 %6464 }
0x1c51   : > { %10259 = vrcp.f32 %v6465_v11 }
0x1c52   : > { %v6468_v57 = vpop.xlane.xlu1 %6467 }
0x1c53   : > { %10261 = vrcp.f32 %v6468_v57 }
0x1c54   : > { %v6471_v19 = vpop.xlane.xlu0 %6470 }
0x1c55   : > { %10263 = vrcp.f32 %v6471_v19 }
0x1c56   : > { %v6474_v17 = vpop.xlane.xlu1 %6473 }
0x1c57   : > { %10265 = vrcp.f32 %v6474_v17 }
0x1c58   : > { %v6477_v40 = vpop.xlane.xlu0 %6476 }
0x1c59   : > { %10267 = vrcp.f32 %v6477_v40 }
0x1c5a   : > { %v6480_v61 = vpop.xlane.xlu1 %6479 }
0x1c5b   : > { %v10260_v14 = vpop.eup %10259  ;;  %10269 = vrcp.f32 %v6480_v61 }
0x1c5c   : > { %v6483_v54 = vpop.xlane.xlu0 %6482  ;;  %v6495_v0 = vmul.f32 %v10260_v14, %v11959_v21 }
0x1c5d   : > { %v10262_v4 = vpop.eup %10261  ;;  %10271 = vrcp.f32 %v6483_v54 }
0x1c5e   : > { %v6486_v43 = vpop.xlane.xlu1 %6485  ;;  %v6496_v41 = vmul.f32 %v10262_v4, %v11963_v37 }
0x1c5f   : > { %v10264_v63 = vpop.eup %10263  ;;  %10273 = vrcp.f32 %v6486_v43 }
0x1c60   : > { %v6503_v22 = vpack.c.bf16 %v6496_v41, %v6495_v0  ;;  %v6497_v15 = vmul.f32 %v10264_v63, %v11967_v7  ;;  %v5933_v7 = vld [vmem:[%s12431_s1] sm:$0xf] }
0x1c61   : > { %v10266_v35 = vpop.eup %10265  ;;  %9711 = vmatprep.subr.msk.bf16.mxu1 %vm6604_vm6, %v5933_v7 }
0x1c62   : > { %v6498_v47 = vmul.f32 %v10266_v35, %v10242_v1  ;;  %9464 = vmatprep.mubr.msk.bf16.mxu0 %vm1841_vm4, %v6503_v22 }
0x1c63   : > { %v10268_v39 = vpop.eup %10267 }
0x1c64   : > { %v6504_v23 = vpack.c.bf16 %v6498_v47, %v6497_v15  ;;  %v6499_v55 = vmul.f32 %v10268_v39, %v10244_v13 }
0x1c65   : > { %v10270_v51 = vpop.eup %10269 }
0x1c66   : > { %9465 = vmatmul.mubr.msk.bf16.vlgmr.msra.gmra.mrb[140].mxu0 %vm1841_vm4, %v6504_v23  ;;  %v6500_v58 = vmul.f32 %v10270_v51, %v10246_v25  ;;  %v6686_v25 = vsel %vm6604_vm6, %v5933_v7, 0 }
0x1c67   : > { %v10272_v21 = vpop.eup %10271 }
0x1c68   : > { %v6505_v42 = vpack.c.bf16 %v6500_v58, %v6499_v55  ;;  %v6501_v6 = vmul.f32 %v10272_v21, %v10248_v5 }
0x1c69   : > { %v10274_v37 = vpop.eup %10273 }
0x1c6a   : > { %9468 = vmatprep.mubr.msk.bf16.mxu0 %vm1841_vm4, %v6505_v42  ;;  %v6502_v16 = vmul.f32 %v10274_v37, %v10250_v38 }
0x1c6c   : > { %v6506_v32 = vpack.c.bf16 %v6502_v16, %v6501_v6 }
0x1c6e   : > { %9469 = vmatmul.mubr.msk.bf16.gmra.mrb[144].mxu0 %vm1841_vm4, %v6506_v32 }
0x1d39   : > { %v9466_v1 = vpop.f32.mrb[140].mxu0 }
0x1d3a   : > { %v6555_v26 = vpop.f32.mrb[141].mxu0 }
0x1d3b   : > { %v9467_v29 = vpop.f32.mrb[142].mxu0 }
0x1d3c   : > { %v6587_v24 = vpack.c.bf16 %v9467_v29, %v9466_v1  ;;  %v6558_v52 = vpop.f32.mrb[143].mxu0 }
0x1d3d   : > { %v6586_v13 = vpack.c.bf16 %v6558_v52, %v6555_v26 }
0x1d3f   : > { %9474 = vmatprep.mubr.msk.bf16.mxu1 %vm5658_vm5, %v6586_v13 }
0x1d40   : > { %9475 = vmatmul.mubr.msk.bf16.vlgmr.msra.gmra.mrb[164].mxu1 %vm5658_vm5, %v6587_v24 }
0x1d41   : > { %v9470_v5 = vpop.f32.mrb[144].mxu0  ;;  %9483 = vmatpush3.bf16.msra.mxu1 %v6686_v25 }
0x1d42   : > { %v6571_v38 = vpop.f32.mrb[145].mxu0 }
0x1d43   : > { %v9471_v8 = vpop.f32.mrb[146].mxu0 }
0x1d44   : > { %v6589_v45 = vpack.c.bf16 %v9471_v8, %v9470_v5  ;;  %v6574_v30 = vpop.f32.mrb[147].mxu0 }
0x1d45   : > { %v6588_v9 = vpack.c.bf16 %v6574_v30, %v6571_v38 }
0x1d47   : > { %9478 = vmatprep.mubr.msk.bf16.mxu1 %vm5658_vm5, %v6588_v9 }
0x1d48   : > { %9479 = vmatmul.mubr.msk.bf16.gmra.mrb[168].mxu1 %vm5658_vm5, %v6589_v45 }
0x1d49   : > { %9484 = vmatprep.mubr.msk.bf16.mxu1 %vm5658_vm5, %v5929_v10 }
0x1d50   : > { %9485 = vmatmul.mubr.msk.bf16.vlgmr.msra.gmra.mrb[164].mxu1 %vm5658_vm5, %v5930_v60 }
0x1d51   : > { %9488 = vmatprep.mubr.msk.bf16.mxu1 %vm5658_vm5, %v5931_v56 }
0x1d58   : > { %9489 = vmatmul.mubr.msk.bf16.gmra.mrb[168].mxu1 %vm5658_vm5, %v5932_v50 }
0x1d59   : > { %9526 = vmatprep.mubr.msk.bf16.mxu1 %vm1613_vm3, %v10325_v53 }
0x1e23   : > { %v9486_v2 = vpop.f32.mrb[164].mxu1 }
0x1e24   : > { %v6722_v10 = vpop.f32.mrb[165].mxu1  ;;  %v6759_v27 = vadd.f32 %v9486_v2, %v8453_v49 }
0x1e25   : > { %v6757_v59 = vadd.f32 %v8453_v49, %v6722_v10  ;;  %v9487_v48 = vpop.f32.mrb[166].mxu1 }
0x1e26   : > { %v6725_v60 = vpop.f32.mrb[167].mxu1  ;;  %v6760_v3 = vadd.f32 %v9487_v48, %v8453_v49  ;;  %v12015_v56 = vadd.f32 %v6759_v27, %v11574_v62 }
0x1e27   : > { %v12012_v11 = vadd.f32 %v6757_v59, %v11571_v12  ;;  %v6758_v18 = vadd.f32 %v8453_v49, %v6725_v60 }
0x1e28   : > { %v12023_v50 = vadd.f32 %v6760_v3, %v11582_v46 }
0x1e29   : > { %v12018_v34 = vadd.f32 %v6758_v18, %v11577_v20  ;;  %v6778_v31 = vsel %vm1235_vm2, %v12012_v11, 0.0  ;;  %v6784_v20 = vsel %vm1235_vm2, %v12015_v56, 0.0 }
0x1e2a   : > { %6779 = vadd.xlane.f32.xlu0 %v6778_v31  ;;  %v6787_v4 = vsel %vm1235_vm2, %v12023_v50, 0.0  ;;  %v9869_v31 = vld [vmem:[%s12434_s26] sm:$0xff]   ;;  %s12435_s26 = sld [smem:[#allocation28_spill]] }
0x1e2b   : > { %v9490_v57 = vpop.f32.mrb[168].mxu1  ;;  %v6781_v12 = vsel %vm1235_vm2, %v12018_v34, 0.0  ;;  %9492 = vmatprep.subr.bf16.mxu0 %v9869_v31 }
0x1e2c   : > { %6782 = vadd.xlane.f32.xlu1 %v6781_v12  ;;  %v6738_v19 = vpop.f32.mrb[169].mxu1  ;;  %v6763_v17 = vadd.f32 %v9490_v57, %v8453_v49  ;;  %9493 = vmatpush3.bf16.msra.mxu0 %v9869_v31 }
0x1e2d   : > { %v6761_v40 = vadd.f32 %v8453_v49, %v6738_v19  ;;  %v9491_v62 = vpop.f32.mrb[170].mxu1 }
0x1e2e   : > { %6785 = vadd.xlane.f32.xlu0 %v6784_v20  ;;  %v6741_v61 = vpop.f32.mrb[171].mxu1  ;;  %v6764_v54 = vadd.f32 %v9491_v62, %v8453_v49  ;;  %v12035_v43 = vadd.f32 %v6763_v17, %v11594_v44 }
0x1e2f   : > { %v12030_v14 = vadd.f32 %v6761_v40, %v11589_v36  ;;  %v6762_v46 = vadd.f32 %v8453_v49, %v6741_v61 }
0x1e30   : > { %6788 = vadd.xlane.f32.xlu1 %v6787_v4  ;;  %v12043_v63 = vadd.f32 %v6764_v54, %v11602_v33  ;;  %v6796_v22 = vsel %vm1235_vm2, %v12035_v43, 0.0  ;;  %s12436_s1 = smov %s12435_s26 }
0x1e31   : > { %v12038_v0 = vadd.f32 %v6762_v46, %v11597_v28  ;;  %v6790_v41 = vsel %vm1235_vm2, %v12030_v14, 0.0 }
0x1e32   : > { %6791 = vadd.xlane.f32.xlu0 %v6790_v41  ;;  %v6799_v44 = vsel %vm1235_vm2, %v12043_v63, 0.0 }
0x1e33   : > { %v6793_v36 = vsel %vm1235_vm2, %v12038_v0, 0.0 }
0x1e34   : > { %6794 = vadd.xlane.f32.xlu1 %v6793_v36 }
0x1e36   : > { %6797 = vadd.xlane.f32.xlu0 %v6796_v22 }
0x1e38   : > { %6800 = vadd.xlane.f32.xlu1 %v6799_v44 }
0x1eb7   : > { %v6780_v28 = vpop.xlane.xlu0 %6779 }
0x1eb8   : > { %v6802_v35 = vmul.f32 0.0625, %v6780_v28 }
0x1eb9   : > { %v6783_v15 = vpop.xlane.xlu1 %6782 }
0x1eba   : > { %v12052_v47 = vsub.f32 %v12012_v11, %v6802_v35  ;;  %v6803_v33 = vmul.f32 0.0625, %v6783_v15 }
0x1ebb   : > { %v6786_v39 = vpop.xlane.xlu0 %6785 }
0x1ebc   : > { %v12055_v23 = vsub.f32 %v12018_v34, %v6803_v33  ;;  %v6804_v51 = vmul.f32 0.0625, %v6786_v39  ;;  %v6818_v55 = vmul.f32 %v12052_v47, %v12052_v47 }
0x1ebd   : > { %v6789_v58 = vpop.xlane.xlu1 %6788 }
0x1ebe   : > { %v12060_v21 = vsub.f32 %v12015_v56, %v6804_v51  ;;  %v6805_v42 = vmul.f32 0.0625, %v6789_v58  ;;  %v6826_v37 = vsel %vm1235_vm2, %v6818_v55, 0.0  ;;  %v6819_v6 = vmul.f32 %v12055_v23, %v12055_v23  ;;  %v8454_v58 = vld [vmem:[%s12433_s2 + $0x1] ss:$0 sm:$0xff] }
0x1ebf   : > { %6827 = vadd.xlane.f32.xlu0 %v6826_v37  ;;  %v6792_v16 = vpop.xlane.xlu0 %6791 }
0x1ec0   : > { %v12066_v32 = vsub.f32 %v12023_v50, %v6805_v42  ;;  %v6806_v7 = vmul.f32 0.0625, %v6792_v16  ;;  %v6829_v1 = vsel %vm1235_vm2, %v6819_v6, 0.0  ;;  %v6820_v26 = vmul.f32 %v12060_v21, %v12060_v21 }
0x1ec1   : > { %6830 = vadd.xlane.f32.xlu1 %v6829_v1  ;;  %v6795_v29 = vpop.xlane.xlu1 %6794 }
0x1ec2   : > { %v12072_v24 = vsub.f32 %v12030_v14, %v6806_v7  ;;  %v6807_v52 = vmul.f32 0.0625, %v6795_v29  ;;  %v6832_v13 = vsel %vm1235_vm2, %v6820_v26, 0.0  ;;  %v6821_v25 = vmul.f32 %v12066_v32, %v12066_v32 }
0x1ec3   : > { %6833 = vadd.xlane.f32.xlu0 %v6832_v13  ;;  %v6798_v5 = vpop.xlane.xlu0 %6797 }
0x1ec4   : > { %v12078_v38 = vsub.f32 %v12038_v0, %v6807_v52  ;;  %v6808_v8 = vmul.f32 0.0625, %v6798_v5  ;;  %v6835_v45 = vsel %vm1235_vm2, %v6821_v25, 0.0  ;;  %v6822_v30 = vmul.f32 %v12072_v24, %v12072_v24  ;;  %v8455_v52 = vld [vmem:[%s12433_s2 + $0x2] ss:$0 sm:$0xff] }
0x1ec5   : > { %6836 = vadd.xlane.f32.xlu1 %v6835_v45  ;;  %v6801_v9 = vpop.xlane.xlu1 %6800 }
0x1ec6   : > { %v12084_v53 = vsub.f32 %v12035_v43, %v6808_v8  ;;  %v6809_v49 = vmul.f32 0.0625, %v6801_v9  ;;  %v6838_v2 = vsel %vm1235_vm2, %v6822_v30, 0.0  ;;  %v6823_v10 = vmul.f32 %v12078_v38, %v12078_v38 }
0x1ec7   : > { %6839 = vadd.xlane.f32.xlu0 %v6838_v2 }
0x1ec8   : > { %v12090_v27 = vsub.f32 %v12043_v63, %v6809_v49  ;;  %v6841_v59 = vsel %vm1235_vm2, %v6823_v10, 0.0  ;;  %v6824_v48 = vmul.f32 %v12084_v53, %v12084_v53 }
0x1ec9   : > { %6842 = vadd.xlane.f32.xlu1 %v6841_v59 }
0x1eca   : > { %v6844_v60 = vsel %vm1235_vm2, %v6824_v48, 0.0  ;;  %v6825_v3 = vmul.f32 %v12090_v27, %v12090_v27 }
0x1ecb   : > { %6845 = vadd.xlane.f32.xlu0 %v6844_v60 }
0x1ecc   : > { %v6847_v18 = vsel %vm1235_vm2, %v6825_v3, 0.0 }
0x1ecd   : > { %6848 = vadd.xlane.f32.xlu1 %v6847_v18 }
0x1f4c   : > { %v6828_v57 = vpop.xlane.xlu0 %6827 }
0x1f4d   : > { %v6850_v12 = vmul.f32 0.0625, %v6828_v57 }
0x1f4e   : > { %v6831_v19 = vpop.xlane.xlu1 %6830 }
0x1f4f   : > { %v6858_v17 = vadd.f32 1e-06, %v6850_v12  ;;  %v6851_v40 = vmul.f32 0.0625, %v6831_v19 }
0x1f50   : > { %v6834_v62 = vpop.xlane.xlu0 %6833 }
0x1f51   : > { %10275 = vrsqrt.f32 %v6858_v17  ;;  %v6859_v20 = vadd.f32 1e-06, %v6851_v40  ;;  %v6852_v61 = vmul.f32 0.0625, %v6834_v62 }
0x1f52   : > { %v6837_v54 = vpop.xlane.xlu1 %6836 }
0x1f53   : > { %10277 = vrsqrt.f32 %v6859_v20  ;;  %v6860_v46 = vadd.f32 1e-06, %v6852_v61  ;;  %v6853_v4 = vmul.f32 0.0625, %v6837_v54  ;;  %v8456_v54 = vld [vmem:[%s12435_s26] ss:$0 sm:$0xff]  ;;  %s1076_s26 = sand.u32 1, %s10443_s23  }
0x1f54   : > { %v6840_v41 = vpop.xlane.xlu0 %6839  ;;  %s8007_s5 = scalar_lea.sflag [#allocation4], %s1076_s26 }
0x1f55   : > { %10279 = vrsqrt.f32 %v6860_v46  ;;  %v6861_v36 = vadd.f32 1e-06, %v6853_v4  ;;  %v6854_v22 = vmul.f32 0.0625, %v6840_v41 }
0x1f56   : > { %v6843_v44 = vpop.xlane.xlu1 %6842 }
0x1f57   : > { %10281 = vrsqrt.f32 %v6861_v36  ;;  %v6862_v28 = vadd.f32 1e-06, %v6854_v22  ;;  %v6855_v35 = vmul.f32 0.0625, %v6843_v44 }
0x1f58   : > { %v6846_v15 = vpop.xlane.xlu0 %6845 }
0x1f59   : > { %10283 = vrsqrt.f32 %v6862_v28  ;;  %v6863_v33 = vadd.f32 1e-06, %v6855_v35  ;;  %v6856_v39 = vmul.f32 0.0625, %v6846_v15 }
0x1f5a   : > { %v6849_v51 = vpop.xlane.xlu1 %6848 }
0x1f5b   : > { %v10276_v55 = vpop.eup %10275  ;;  %10285 = vrsqrt.f32 %v6863_v33  ;;  %v6864_v42 = vadd.f32 1e-06, %v6856_v39  ;;  %v6857_v37 = vmul.f32 0.0625, %v6849_v51 }
0x1f5c   : > { %v6874_v6 = vmul.f32 %v10276_v55, %v12052_v47 }
0x1f5d   : > { %v10278_v16 = vpop.eup %10277  ;;  %10287 = vrsqrt.f32 %v6864_v42  ;;  %v6865_v7 = vadd.f32 1e-06, %v6857_v37 }
0x1f5e   : > { %v6875_v1 = vmul.f32 %v10278_v16, %v12055_v23  ;;  %v6886_v26 = vmul.f32 %v8454_v58, %v6874_v6 }
0x1f5f   : > { %v10280_v29 = vpop.eup %10279  ;;  %10289 = vrsqrt.f32 %v6865_v7 }
0x1f60   : > { %v6876_v13 = vmul.f32 %v10280_v29, %v12060_v21  ;;  %v6887_v25 = vmul.f32 %v8454_v58, %v6875_v1  ;;  %v6898_v30 = vadd.f32 %v8455_v52, %v6886_v26 }
0x1f61   : > { %v10282_v5 = vpop.eup %10281 }
0x1f62   : > { %v6888_v8 = vmul.f32 %v8454_v58, %v6876_v13  ;;  %v6877_v45 = vmul.f32 %v10282_v5, %v12066_v32  ;;  %v6899_v9 = vadd.f32 %v8455_v52, %v6887_v25 }
0x1f63   : > { %v10284_v49 = vpop.eup %10283 }
0x1f64   : > { %v6889_v47 = vmul.f32 %v8454_v58, %v6877_v45  ;;  %v6878_v2 = vmul.f32 %v10284_v49, %v12072_v24  ;;  %v6906_v10 = vpack.c.bf16 %v6899_v9, %v6898_v30  ;;  %v6900_v23 = vadd.f32 %v8455_v52, %v6888_v8 }
0x1f65   : > { %v10286_v59 = vpop.eup %10285 }
0x1f66   : > { %v6901_v48 = vadd.f32 %v8455_v52, %v6889_v47  ;;  %v6879_v60 = vmul.f32 %v10286_v59, %v12078_v38  ;;  %9494 = vmatprep.mubr.msk.bf16.mxu0 %vm1235_vm2, %v6906_v10  ;;  %v6890_v21 = vmul.f32 %v8454_v58, %v6878_v2 }
0x1f67   : > { %v10288_v3 = vpop.eup %10287 }
0x1f68   : > { %v6880_v18 = vmul.f32 %v10288_v3, %v12084_v53  ;;  %v6907_v31 = vpack.c.bf16 %v6901_v48, %v6900_v23  ;;  %v6891_v32 = vmul.f32 %v8454_v58, %v6879_v60  ;;  %v6902_v24 = vadd.f32 %v8455_v52, %v6890_v21  ;;  %v10326_v53 = vld [vmem:[#allocation2] sm:$0xff]  }
0x1f69   : > { %v10290_v57 = vpop.eup %10289 }
0x1f6a   : > { %v6881_v12 = vmul.f32 %v10290_v57, %v12090_v27  ;;  %9495 = vmatmul.mubr.msk.bf16.vlgmr.msra.gmra.mrb[148].mxu0 %vm1235_vm2, %v6907_v31  ;;  %v6903_v19 = vadd.f32 %v8455_v52, %v6891_v32  ;;  %v6892_v17 = vmul.f32 %v8454_v58, %v6880_v18 }
0x1f6c   : > { %v6908_v40 = vpack.c.bf16 %v6903_v19, %v6902_v24  ;;  %v6893_v62 = vmul.f32 %v8454_v58, %v6881_v12  ;;  %v6904_v38 = vadd.f32 %v8455_v52, %v6892_v17 }
0x1f6e   : > { %9498 = vmatprep.mubr.msk.bf16.mxu0 %vm1235_vm2, %v6908_v40  ;;  %v6905_v20 = vadd.f32 %v8455_v52, %v6893_v62 }
0x1f70   : > { %v6909_v61 = vpack.c.bf16 %v6905_v20, %v6904_v38 }
0x1f72   : > { %9499 = vmatmul.mubr.msk.bf16.gmra.mrb[152].mxu0 %vm1235_vm2, %v6909_v61 }
0x1f73   : > { %9510 = vmatprep.mubr.msk.bf16.mxu0 %vm1613_vm3, %v10326_v53 }
0x203d   : > { %v9496_v46 = vpop.f32.mrb[148].mxu0 }
0x203e   : > { %v6977_v27 = vadd.f32 %v9496_v46, %v8456_v54  ;;  %v6968_v4 = vpop.f32.mrb[149].mxu0 }
0x203f   : > { %v6969_v41 = vadd.f32 %v8456_v54, %v6968_v4  ;;  %v9497_v36 = vpop.f32.mrb[150].mxu0 }
0x2040   : > { %v7009_v22 = vmul.f32 0.70710677, %v6977_v27  ;;  %v6980_v44 = vadd.f32 %v9497_v36, %v8456_v54  ;;  %v6971_v28 = vpop.f32.mrb[151].mxu0  ;;  %v7001_v59 = vmul.f32 0.5, %v6977_v27  ;;  %v10327_v36 = vld [vmem:[#allocation2 + $0x8] sm:$0xff]  }
0x2041   : > { %v7007_v35 = vmul.f32 0.70710677, %v6969_v41  ;;  %v6972_v15 = vadd.f32 %v8456_v54, %v6971_v28  ;;  %v6999_v30 = vmul.f32 0.5, %v6969_v41  ;;  %v10330_v28 = vld [vmem:[#allocation2 + $0x30] sm:$0xff]  }
0x2042   : > { %10291 = verf.f32 %v7009_v22  ;;  %v7010_v33 = vmul.f32 0.70710677, %v6980_v44  ;;  %v7002_v47 = vmul.f32 0.5, %v6980_v44  ;;  %v10328_v22 = vld [vmem:[#allocation2 + $0x28] sm:$0xff]   ;;  %v10329_v44 = vld [vmem:[#allocation2 + $0x10] sm:$0xff]  }
0x2043   : > { %10293 = verf.f32 %v7007_v35  ;;  %v7008_v39 = vmul.f32 0.70710677, %v6972_v15  ;;  %v7000_v2 = vmul.f32 0.5, %v6972_v15  ;;  %v10331_v35 = vld [vmem:[#allocation2 + $0x18] sm:$0xff]  }
0x2044   : > { %10295 = verf.f32 %v7010_v33  ;;  %v10332_v15 = vld [vmem:[#allocation2 + $0x38] sm:$0xff]   ;;  %v10333_v33 = vld [vmem:[#allocation2 + $0x40] sm:$0xff]  }
0x2045   : > { %10297 = verf.f32 %v7008_v39  ;;  %v9500_v51 = vpop.f32.mrb[152].mxu0  ;;  %v10334_v39 = vld [vmem:[#allocation2 + $0x60] sm:$0xff]  }
0x2046   : > { %v6993_v55 = vadd.f32 %v9500_v51, %v8456_v54  ;;  %v6984_v58 = vpop.f32.mrb[153].mxu0  ;;  %v10335_v51 = vld [vmem:[#allocation2 + $0x48] sm:$0xff]  }
0x2047   : > { %v6985_v42 = vadd.f32 %v8456_v54, %v6984_v58  ;;  %v9501_v37 = vpop.f32.mrb[154].mxu0  ;;  %v10337_v58 = vld [vmem:[#allocation2 + $0x50] sm:$0xff]  }
0x2048   : > { %v7013_v6 = vmul.f32 0.70710677, %v6993_v55  ;;  %v6996_v16 = vadd.f32 %v9501_v37, %v8456_v54  ;;  %v6987_v7 = vpop.f32.mrb[155].mxu0  ;;  %v7005_v61 = vmul.f32 0.5, %v6993_v55  ;;  %v10336_v55 = vld [vmem:[#allocation2 + $0x68] sm:$0xff]   ;;  %v10339_v37 = vld [vmem:[#allocation2 + $0x58] sm:$0xff]  }
0x2049   : > { %v7011_v1 = vmul.f32 0.70710677, %v6985_v42  ;;  %v6988_v26 = vadd.f32 %v8456_v54, %v6987_v7  ;;  %v7003_v19 = vmul.f32 0.5, %v6985_v42  ;;  %v10338_v42 = vld [vmem:[#allocation2 + $0x70] sm:$0xff]   ;;  %v10342_v7 = vld [vmem:[#allocation2 + $0xc0] sm:$0xff]  }
0x204a   : > { %10299 = verf.f32 %v7013_v6  ;;  %v7014_v29 = vmul.f32 0.70710677, %v6996_v16  ;;  %v7006_v62 = vmul.f32 0.5, %v6996_v16  ;;  %v10340_v6 = vld [vmem:[#allocation2 + $0x78] sm:$0xff]   ;;  %v10341_v16 = vld [vmem:[#allocation2 + $0xa0] sm:$0xff]  }
0x204b   : > { %10301 = verf.f32 %v7011_v1  ;;  %v7012_v52 = vmul.f32 0.70710677, %v6988_v26  ;;  %v7004_v38 = vmul.f32 0.5, %v6988_v26  ;;  %v10343_v1 = vld [vmem:[#allocation2 + $0xa8] sm:$0xff]  }
0x204c   : > { %v10292_v13 = vpop.eup %10291  ;;  %10303 = verf.f32 %v7014_v29  ;;  %v10344_v26 = vld [vmem:[#allocation2 + $0xc8] sm:$0xff]   ;;  %v10345_v29 = vld [vmem:[#allocation2 + $0xb0] sm:$0xff]  }
0x204d   : > { %v10294_v25 = vpop.eup %10293  ;;  %10305 = verf.f32 %v7012_v52  ;;  %v7025_v49 = vadd.f32 1.0, %v10292_v13  ;;  %v10346_v52 = vld [vmem:[#allocation2 + $0xd0] sm:$0xff]   ;;  %v10347_v13 = vld [vmem:[#allocation2 + $0xb8] sm:$0xff]  }
0x204e   : > { %v10296_v5 = vpop.eup %10295  ;;  %v7023_v8 = vadd.f32 1.0, %v10294_v25  ;;  %v10348_v25 = vld [vmem:[#allocation2 + $0xd8] sm:$0xff]  }
0x204f   : > { %v10298_v45 = vpop.eup %10297  ;;  %v7026_v9 = vadd.f32 1.0, %v10296_v5  ;;  %v12122_v3 = vmul.f32 %v7025_v49, %v7001_v59  ;;  %v10349_v5 = vld [vmem:[#allocation2 + $0xe0] sm:$0xff]   ;;  %v10354_v49 = vld [vmem:[#allocation2 + $0x110] sm:$0xff]   ;;  %v9871_v59 = vld [vmem:[%s12397_s4 + $0x8] sm:$0xff]  }
0x2050   : > { %v7024_v10 = vadd.f32 1.0, %v10298_v45  ;;  %v12116_v23 = vmul.f32 %v7023_v8, %v6999_v30  ;;  %v10350_v8 = vld [vmem:[#allocation2 + $0x100] sm:$0xff]   ;;  %v10351_v45 = vld [vmem:[#allocation2 + $0xe8] sm:$0xff]  }
0x2051   : > { %v12118_v48 = vmul.f32 %v7026_v9, %v7002_v47  ;;  %v10352_v30 = vld [vmem:[#allocation2 + $0x108] sm:$0xff]   ;;  %v10353_v9 = vld [vmem:[#allocation2 + $0xf0] sm:$0xff]   ;;  %v10355_v47 = vld [vmem:[#allocation2 + $0xf8] sm:$0xff]  }
0x2052   : > { %v12120_v60 = vmul.f32 %v7024_v10, %v7000_v2  ;;  %v10356_v2 = vld [vmem:[#allocation2 + $0x118] sm:$0xff]   ;;  %v9870_v10 = vld [vmem:[%s12397_s4] sm:$0xff]  }
0x2053   : > { %v12130_v57 = vpack.c.bf16 %v12118_v48, %v12122_v3 }
0x2054   : > { %v10300_v21 = vpop.eup %10299  ;;  %v12126_v18 = vpack.c.bf16 %v12120_v60, %v12116_v23 }
0x2055   : > { %v10302_v31 = vpop.eup %10301  ;;  %v7029_v40 = vadd.f32 1.0, %v10300_v21  ;;  %v9872_v21 = vld [vmem:[%s12397_s4 + $0x10] sm:$0xff]  }
0x2056   : > { %v10304_v32 = vpop.eup %10303  ;;  %v7027_v12 = vadd.f32 1.0, %v10302_v31  ;;  %9502 = vmatprep.subr.bf16.mxu0 %v12126_v18  ;;  %9518 = vmatprep.subr.bf16.mxu1 %v12126_v18  ;;  %v8462_v31 = vld [vmem:[%s10662_s27 + $0x4] ss:$0 sm:$0xff] }
0x2057   : > { %v10306_v24 = vpop.eup %10305  ;;  %v7030_v17 = vadd.f32 1.0, %v10304_v32  ;;  %9503 = vmatpush3.bf16.msra.mxu0 %v12126_v18  ;;  %9519 = vmatpush3.bf16.msra.mxu1 %v12126_v18  ;;  %v12146_v27 = vmul.f32 %v7029_v40, %v7005_v61  ;;  %v8467_v32 = vld [vmem:[%s10662_s27] ss:$0 sm:$0xff] }
0x2058   : > { %v7028_v20 = vadd.f32 1.0, %v10306_v24  ;;  %9504 = vmatprep.subr.bf16.mxu0 %v12130_v57  ;;  %9520 = vmatprep.subr.bf16.mxu1 %v12130_v57  ;;  %v12138_v53 = vmul.f32 %v7027_v12, %v7003_v19  ;;  %v7050_v19 = vmul.f32 %v8462_v31, %v12122_v3 }
0x2059   : > { %v12140_v54 = vmul.f32 %v7030_v17, %v7006_v62 }
0x205a   : > { %v12142_v46 = vmul.f32 %v7028_v20, %v7004_v38  ;;  %v7048_v20 = vmul.f32 %v8462_v31, %v12116_v23 }
0x205b   : > { %9505 = vmatpush3.bf16.msra.mxu0 %v12130_v57  ;;  %9521 = vmatpush3.bf16.msra.mxu1 %v12130_v57  ;;  %v12154_v41 = vpack.c.bf16 %v12140_v54, %v12146_v27 }
0x205c   : > { %v12150_v4 = vpack.c.bf16 %v12142_v46, %v12138_v53 }
0x205e   : > { %9506 = vmatprep.subr.bf16.mxu0 %v12150_v4  ;;  %9522 = vmatprep.subr.bf16.mxu1 %v12150_v4 }
0x205f   : > { %9507 = vmatpush3.bf16.msra.mxu0 %v12150_v4  ;;  %9523 = vmatpush3.bf16.msra.mxu1 %v12150_v4 }
0x2060   : > { %9508 = vmatprep.subr.bf16.mxu0 %v12154_v41  ;;  %9524 = vmatprep.subr.bf16.mxu1 %v12154_v41 }
0x2063   : > { %9509 = vmatpush3.bf16.msra.mxu0 %v12154_v41  ;;  %9525 = vmatpush3.bf16.msra.mxu1 %v12154_v41 }
0x2064   : > { %9534 = vmatprep.subr.bf16.mxu0 %v12126_v18  ;;  %9550 = vmatprep.subr.bf16.mxu1 %v12126_v18 }
0x2066   : > { %9511 = vmatmul.mubr.msk.bf16.vlgmr.msra.gmra.mrb[156].mxu0 %vm1613_vm3, %v10327_v36  ;;  %9527 = vmatmul.mubr.msk.bf16.vlgmr.msra.gmra.mrb[172].mxu1 %vm1613_vm3, %v10328_v22 }
0x2067   : > { %9535 = vmatpush3.bf16.msra.mxu0 %v12126_v18  ;;  %9551 = vmatpush3.bf16.msra.mxu1 %v12126_v18 }
0x2068   : > { %9536 = vmatprep.subr.bf16.mxu0 %v12130_v57  ;;  %9552 = vmatprep.subr.bf16.mxu1 %v12130_v57 }
0x2069   : > { %9514 = vmatprep.mubr.msk.bf16.mxu0 %vm1613_vm3, %v10329_v44  ;;  %9530 = vmatprep.mubr.msk.bf16.mxu1 %vm1613_vm3, %v10330_v28  ;;  %v7051_v44 = vmul.f32 %v8462_v31, %v12118_v48 }
0x206b   : > { %9537 = vmatpush3.bf16.msra.mxu0 %v12130_v57  ;;  %9553 = vmatpush3.bf16.msra.mxu1 %v12130_v57 }
0x206c   : > { %9538 = vmatprep.subr.bf16.mxu0 %v12150_v4  ;;  %9554 = vmatprep.subr.bf16.mxu1 %v12150_v4 }
0x206e   : > { %9515 = vmatmul.mubr.msk.bf16.gmra.mrb[160].mxu0 %vm1613_vm3, %v10331_v35  ;;  %9531 = vmatmul.mubr.msk.bf16.gmra.mrb[176].mxu1 %vm1613_vm3, %v10332_v15 }
0x206f   : > { %9539 = vmatpush3.bf16.msra.mxu0 %v12150_v4  ;;  %9555 = vmatpush3.bf16.msra.mxu1 %v12150_v4 }
0x2070   : > { %9540 = vmatprep.subr.bf16.mxu0 %v12154_v41  ;;  %9556 = vmatprep.subr.bf16.mxu1 %v12154_v41 }
0x2071   : > { %9542 = vmatprep.mubr.msk.bf16.mxu0 %vm1613_vm3, %v10333_v33  ;;  %9558 = vmatprep.mubr.msk.bf16.mxu1 %vm1613_vm3, %v10334_v39  ;;  %v7049_v39 = vmul.f32 %v8462_v31, %v12120_v60 }
0x2073   : > { %9541 = vmatpush3.bf16.msra.mxu0 %v12154_v41  ;;  %9557 = vmatpush3.bf16.msra.mxu1 %v12154_v41 }
0x2074   : > { %9566 = vmatprep.subr.bf16.mxu0 %v12126_v18  ;;  %9582 = vmatprep.subr.bf16.mxu1 %v12126_v18 }
0x2076   : > { %9543 = vmatmul.mubr.msk.bf16.vlgmr.msra.gmra.mrb[164].mxu0 %vm1613_vm3, %v10335_v51  ;;  %9559 = vmatmul.mubr.msk.bf16.vlgmr.msra.gmra.mrb[180].mxu1 %vm1613_vm3, %v10336_v55 }
0x2077   : > { %9567 = vmatpush3.bf16.msra.mxu0 %v12126_v18  ;;  %9583 = vmatpush3.bf16.msra.mxu1 %v12126_v18 }
0x2078   : > { %9568 = vmatprep.subr.bf16.mxu0 %v12130_v57  ;;  %9584 = vmatprep.subr.bf16.mxu1 %v12130_v57 }
0x2079   : > { %9546 = vmatprep.mubr.msk.bf16.mxu0 %vm1613_vm3, %v10337_v58  ;;  %9562 = vmatprep.mubr.msk.bf16.mxu1 %vm1613_vm3, %v10338_v42 }
0x207b   : > { %9569 = vmatpush3.bf16.msra.mxu0 %v12130_v57  ;;  %9585 = vmatpush3.bf16.msra.mxu1 %v12130_v57 }
0x207c   : > { %9570 = vmatprep.subr.bf16.mxu0 %v12150_v4  ;;  %9586 = vmatprep.subr.bf16.mxu1 %v12150_v4 }
0x207e   : > { %9547 = vmatmul.mubr.msk.bf16.gmra.mrb[168].mxu0 %vm1613_vm3, %v10339_v37  ;;  %9563 = vmatmul.mubr.msk.bf16.gmra.mrb[184].mxu1 %vm1613_vm3, %v10340_v6 }
0x207f   : > { %9571 = vmatpush3.bf16.msra.mxu0 %v12150_v4  ;;  %9587 = vmatpush3.bf16.msra.mxu1 %v12150_v4 }
0x2080   : > { %9572 = vmatprep.subr.bf16.mxu0 %v12154_v41  ;;  %9588 = vmatprep.subr.bf16.mxu1 %v12154_v41 }
0x2081   : > { %9574 = vmatprep.mubr.msk.bf16.mxu0 %vm1613_vm3, %v10341_v16  ;;  %9590 = vmatprep.mubr.msk.bf16.mxu1 %vm1613_vm3, %v10342_v7 }
0x2083   : > { %9573 = vmatpush3.bf16.msra.mxu0 %v12154_v41  ;;  %9589 = vmatpush3.bf16.msra.mxu1 %v12154_v41 }
0x2084   : > { %9598 = vmatprep.subr.bf16.mxu0 %v12126_v18  ;;  %9614 = vmatprep.subr.bf16.mxu1 %v12126_v18 }
0x2086   : > { %9575 = vmatmul.mubr.msk.bf16.vlgmr.msra.gmra.mrb[172].mxu0 %vm1613_vm3, %v10343_v1  ;;  %9591 = vmatmul.mubr.msk.bf16.vlgmr.msra.gmra.mrb[188].mxu1 %vm1613_vm3, %v10344_v26 }
0x2087   : > { %9599 = vmatpush3.bf16.msra.mxu0 %v12126_v18  ;;  %9615 = vmatpush3.bf16.msra.mxu1 %v12126_v18  ;;  %v9873_v18 = vld [vmem:[%s12397_s4 + $0x18] sm:$0xff]  }
0x2088   : > { %9600 = vmatprep.subr.bf16.mxu0 %v12130_v57  ;;  %9616 = vmatprep.subr.bf16.mxu1 %v12130_v57 }
0x2089   : > { %9578 = vmatprep.mubr.msk.bf16.mxu0 %vm1613_vm3, %v10345_v29  ;;  %9594 = vmatprep.mubr.msk.bf16.mxu1 %vm1613_vm3, %v10346_v52  ;;  %v7054_v52 = vmul.f32 %v8462_v31, %v12146_v27 }
0x208b   : > { %9601 = vmatpush3.bf16.msra.mxu0 %v12130_v57  ;;  %9617 = vmatpush3.bf16.msra.mxu1 %v12130_v57  ;;  %v8472_v57 = vld [vmem:[%s10662_s27 + $0x1] ss:$0 sm:$0xff] }
0x208c   : > { %9602 = vmatprep.subr.bf16.mxu0 %v12150_v4  ;;  %9618 = vmatprep.subr.bf16.mxu1 %v12150_v4 }
0x208e   : > { %9579 = vmatmul.mubr.msk.bf16.gmra.mrb[176].mxu0 %vm1613_vm3, %v10347_v13  ;;  %9595 = vmatmul.mubr.msk.bf16.gmra.mrb[192].mxu1 %vm1613_vm3, %v10348_v25 }
0x208f   : > { %9603 = vmatpush3.bf16.msra.mxu0 %v12150_v4  ;;  %9619 = vmatpush3.bf16.msra.mxu1 %v12150_v4 }
0x2090   : > { %9604 = vmatprep.subr.bf16.mxu0 %v12154_v41  ;;  %9620 = vmatprep.subr.bf16.mxu1 %v12154_v41 }
0x2091   : > { %9606 = vmatprep.mubr.msk.bf16.mxu0 %vm1613_vm3, %v10349_v5  ;;  %9622 = vmatprep.mubr.msk.bf16.mxu1 %vm1613_vm3, %v10350_v8 }
0x2093   : > { %9605 = vmatpush3.bf16.msra.mxu0 %v12154_v41  ;;  %9621 = vmatpush3.bf16.msra.mxu1 %v12154_v41 }
0x2094   : > { %9630 = vmatprep.subr.bf16.mxu0 %v9870_v10 }
0x2096   : > { %9607 = vmatmul.mubr.msk.bf16.vlgmr.msra.gmra.mrb[180].mxu0 %vm1613_vm3, %v10351_v45  ;;  %9623 = vmatmul.mubr.msk.bf16.vlgmr.msra.gmra.mrb[196].mxu1 %vm1613_vm3, %v10352_v30  ;;  %v7052_v45 = vmul.f32 %v8462_v31, %v12138_v53 }
0x2097   : > { %9610 = vmatprep.mubr.msk.bf16.mxu0 %vm1613_vm3, %v10353_v9  ;;  %9626 = vmatprep.mubr.msk.bf16.mxu1 %vm1613_vm3, %v10354_v49 }
0x2098   : > { %9631 = vmatpush3.bf16.msra.mxu0 %v9870_v10  ;;  %v7055_v10 = vmul.f32 %v8462_v31, %v12140_v54 }
0x2099   : > { %9632 = vmatprep.subr.bf16.mxu0 %v9871_v59 }
0x209c   : > { %9633 = vmatpush3.bf16.msra.mxu0 %v9871_v59 }
0x209d   : > { %9634 = vmatprep.subr.bf16.mxu0 %v9872_v21 }
0x209e   : > { %9611 = vmatmul.mubr.msk.bf16.gmra.mrb[184].mxu0 %vm1613_vm3, %v10355_v47  ;;  %9627 = vmatmul.mubr.msk.bf16.gmra.mrb[200].mxu1 %vm1613_vm3, %v10356_v2 }
0x20a0   : > { %9635 = vmatpush3.bf16.msra.mxu0 %v9872_v21 }
0x20a1   : > { %9636 = vmatprep.subr.bf16.mxu0 %v9873_v18 }
0x20a4   : > { %9637 = vmatpush3.bf16.msra.mxu0 %v9873_v18 }
0x2139   : > { %v9512_v12 = vpop.f32.mrb[156].mxu0  ;;  %v9528_v24 = vpop.f32.mrb[172].mxu1 }
0x213a   : > { %v7128_v17 = vmul.f32 %v9512_v12, %v8467_v32  ;;  %v7214_v40 = vmul.f32 %v9528_v24, %v8472_v57  ;;  %v7090_v62 = vpop.f32.mrb[157].mxu0  ;;  %v7176_v38 = vpop.f32.mrb[173].mxu1  ;;  %v7053_v24 = vmul.f32 %v8462_v31, %v12142_v46 }
0x213b   : > { %v7126_v61 = vmul.f32 %v8467_v32, %v7090_v62  ;;  %v7212_v4 = vmul.f32 %v8472_v57, %v7176_v38  ;;  %v9513_v41 = vpop.f32.mrb[158].mxu0  ;;  %v9529_v36 = vpop.f32.mrb[174].mxu1 }
0x213c   : > { %v7136_v22 = vadd.f32 %v7128_v17, %v7050_v19  ;;  %v7129_v28 = vmul.f32 %v9513_v41, %v8467_v32  ;;  %v7093_v35 = vpop.f32.mrb[159].mxu0  ;;  %v7179_v15 = vpop.f32.mrb[175].mxu1  ;;  %v7215_v42 = vmul.f32 %v9529_v36, %v8472_v57  ;;  %v8482_v41 = vld [vmem:[%s10662_s27 + $0x3] ss:$0 sm:$0xff] }
0x213d   : > { %v7134_v33 = vadd.f32 %v7126_v61, %v7048_v20  ;;  %v7127_v51 = vmul.f32 %v8467_v32, %v7093_v35  ;;  %v7213_v16 = vmul.f32 %v8472_v57, %v7179_v15 }
0x213e   : > { %v7222_v55 = vadd.f32 %v7214_v40, %v7136_v22  ;;  %v7137_v58 = vadd.f32 %v7129_v28, %v7051_v44 }
0x213f   : > { %v7220_v37 = vadd.f32 %v7212_v4, %v7134_v33  ;;  %v7135_v6 = vadd.f32 %v7127_v51, %v7049_v39  ;;  %v8477_v4 = vld [vmem:[%s10662_s27 + $0x2] ss:$0 sm:$0xff] }
0x2140   : > { %v7223_v7 = vadd.f32 %v7215_v42, %v7137_v58 }
0x2141   : > { %v7221_v1 = vadd.f32 %v7213_v16, %v7135_v6  ;;  %v9516_v26 = vpop.f32.mrb[160].mxu0  ;;  %v9532_v29 = vpop.f32.mrb[176].mxu1 }
0x2142   : > { %v7132_v13 = vmul.f32 %v9516_v26, %v8467_v32  ;;  %v7218_v25 = vmul.f32 %v9532_v29, %v8472_v57  ;;  %v7106_v5 = vpop.f32.mrb[161].mxu0  ;;  %v7192_v8 = vpop.f32.mrb[177].mxu1 }
0x2143   : > { %v7130_v30 = vmul.f32 %v8467_v32, %v7106_v5  ;;  %v7216_v9 = vmul.f32 %v8472_v57, %v7192_v8  ;;  %v9517_v49 = vpop.f32.mrb[162].mxu0  ;;  %v9533_v47 = vpop.f32.mrb[178].mxu1 }
0x2144   : > { %v7140_v2 = vadd.f32 %v7132_v13, %v7054_v52  ;;  %v7133_v59 = vmul.f32 %v9517_v49, %v8467_v32  ;;  %v7109_v21 = vpop.f32.mrb[163].mxu0  ;;  %v7195_v18 = vpop.f32.mrb[179].mxu1  ;;  %v7219_v62 = vmul.f32 %v9533_v47, %v8472_v57 }
0x2145   : > { %v7138_v12 = vadd.f32 %v7130_v30, %v7052_v45  ;;  %v7131_v19 = vmul.f32 %v8467_v32, %v7109_v21  ;;  %v7217_v61 = vmul.f32 %v8472_v57, %v7195_v18 }
0x2146   : > { %v7226_v17 = vadd.f32 %v7218_v25, %v7140_v2  ;;  %v7141_v40 = vadd.f32 %v7133_v59, %v7055_v10 }
0x2147   : > { %v7224_v38 = vadd.f32 %v7216_v9, %v7138_v12  ;;  %v7139_v20 = vadd.f32 %v7131_v19, %v7053_v24 }
0x2148   : > { %v7227_v36 = vadd.f32 %v7219_v62, %v7141_v40 }
0x2149   : > { %v7225_v22 = vadd.f32 %v7217_v61, %v7139_v20  ;;  %v9544_v44 = vpop.f32.mrb[164].mxu0  ;;  %v9560_v28 = vpop.f32.mrb[180].mxu1 }
0x214a   : > { %v7300_v35 = vmul.f32 %v9544_v44, %v8477_v4  ;;  %v7386_v15 = vmul.f32 %v9560_v28, %v8482_v41  ;;  %v7262_v33 = vpop.f32.mrb[165].mxu0  ;;  %v7348_v39 = vpop.f32.mrb[181].mxu1 }
0x214b   : > { %v7298_v51 = vmul.f32 %v8477_v4, %v7262_v33  ;;  %v7384_v58 = vmul.f32 %v8482_v41, %v7348_v39  ;;  %v9545_v31 = vpop.f32.mrb[166].mxu0  ;;  %v9561_v32 = vpop.f32.mrb[182].mxu1  ;;  %v8487_v33 = vld [vmem:[%s10662_s27 + $0x5] ss:$0 sm:$0xff]  ;;  %v8492_v39 = vld [vmem:[%s10662_s27 + $0x6] ss:$0 sm:$0xff] }
0x214c   : > { %v7308_v42 = vadd.f32 %v7300_v35, %v7222_v55  ;;  %v7301_v6 = vmul.f32 %v9545_v31, %v8477_v4  ;;  %v7265_v16 = vpop.f32.mrb[167].mxu0  ;;  %v7351_v26 = vpop.f32.mrb[183].mxu1  ;;  %v7387_v25 = vmul.f32 %v9561_v32, %v8482_v41 }
0x214d   : > { %v7306_v29 = vadd.f32 %v7298_v51, %v7220_v37  ;;  %v7299_v57 = vmul.f32 %v8477_v4, %v7265_v16  ;;  %v7385_v45 = vmul.f32 %v8482_v41, %v7351_v26 }
0x214e   : > { %v7394_v52 = vadd.f32 %v7386_v15, %v7308_v42  ;;  %v7309_v13 = vadd.f32 %v7301_v6, %v7223_v7 }
0x214f   : > { %v7392_v5 = vadd.f32 %v7384_v58, %v7306_v29  ;;  %v7307_v8 = vadd.f32 %v7299_v57, %v7221_v1 }
0x2150   : > { %v7395_v30 = vadd.f32 %v7387_v25, %v7309_v13 }
0x2151   : > { %v7393_v9 = vadd.f32 %v7385_v45, %v7307_v8  ;;  %v9548_v49 = vpop.f32.mrb[168].mxu0  ;;  %v9564_v47 = vpop.f32.mrb[184].mxu1 }
0x2152   : > { %v7304_v2 = vmul.f32 %v9548_v49, %v8477_v4  ;;  %v7390_v10 = vmul.f32 %v9564_v47, %v8482_v41  ;;  %v7278_v59 = vpop.f32.mrb[169].mxu0  ;;  %v7364_v21 = vpop.f32.mrb[185].mxu1 }
0x2153   : > { %v7302_v55 = vmul.f32 %v8477_v4, %v7278_v59  ;;  %v7388_v18 = vmul.f32 %v8482_v41, %v7364_v21  ;;  %v9549_v37 = vpop.f32.mrb[170].mxu0  ;;  %v9565_v12 = vpop.f32.mrb[186].mxu1 }
0x2154   : > { %v7312_v24 = vadd.f32 %v7304_v2, %v7226_v17  ;;  %v7305_v7 = vmul.f32 %v9549_v37, %v8477_v4  ;;  %v7281_v19 = vpop.f32.mrb[171].mxu0  ;;  %v7367_v40 = vpop.f32.mrb[187].mxu1  ;;  %v7391_v44 = vmul.f32 %v9565_v12, %v8482_v41 }
0x2155   : > { %v7310_v1 = vadd.f32 %v7302_v55, %v7224_v38  ;;  %v7303_v62 = vmul.f32 %v8477_v4, %v7281_v19  ;;  %v7389_v15 = vmul.f32 %v8482_v41, %v7367_v40 }
0x2156   : > { %v7398_v20 = vadd.f32 %v7390_v10, %v7312_v24  ;;  %v7313_v61 = vadd.f32 %v7305_v7, %v7227_v36 }
0x2157   : > { %v7396_v28 = vadd.f32 %v7388_v18, %v7310_v1  ;;  %v7311_v35 = vadd.f32 %v7303_v62, %v7225_v22 }
0x2158   : > { %v7399_v51 = vadd.f32 %v7391_v44, %v7313_v61 }
0x2159   : > { %v7397_v58 = vadd.f32 %v7389_v15, %v7311_v35  ;;  %v9576_v31 = vpop.f32.mrb[172].mxu0  ;;  %v9592_v32 = vpop.f32.mrb[188].mxu1 }
0x215a   : > { %v7472_v42 = vmul.f32 %v9576_v31, %v8487_v33  ;;  %v7558_v6 = vmul.f32 %v9592_v32, %v8492_v39  ;;  %v7434_v17 = vpop.f32.mrb[173].mxu0  ;;  %v7520_v16 = vpop.f32.mrb[189].mxu1 }
0x215b   : > { %v7470_v26 = vmul.f32 %v8487_v33, %v7434_v17  ;;  %v7556_v29 = vmul.f32 %v8492_v39, %v7520_v16  ;;  %v9577_v38 = vpop.f32.mrb[174].mxu0  ;;  %v9593_v4 = vpop.f32.mrb[190].mxu1  ;;  %v8497_v17 = vld [vmem:[%s10662_s27 + $0x7] ss:$0 sm:$0xff]  ;;  %v8502_v16 = vld [vmem:[%s10662_s27 + $0x8] ss:$0 sm:$0xff] }
0x215c   : > { %v7480_v57 = vadd.f32 %v7472_v42, %v7394_v52  ;;  %v7473_v36 = vmul.f32 %v9577_v38, %v8487_v33  ;;  %v7437_v13 = vpop.f32.mrb[175].mxu0  ;;  %v7523_v25 = vpop.f32.mrb[191].mxu1  ;;  %v7559_v49 = vmul.f32 %v9593_v4, %v8492_v39 }
0x215d   : > { %v7478_v22 = vadd.f32 %v7470_v26, %v7392_v5  ;;  %v7471_v41 = vmul.f32 %v8487_v33, %v7437_v13  ;;  %v7557_v10 = vmul.f32 %v8492_v39, %v7523_v25 }
0x215e   : > { %v7566_v8 = vadd.f32 %v7558_v6, %v7480_v57  ;;  %v7481_v45 = vadd.f32 %v7473_v36, %v7395_v30 }
0x215f   : > { %v7564_v47 = vadd.f32 %v7556_v29, %v7478_v22  ;;  %v7479_v2 = vadd.f32 %v7471_v41, %v7393_v9 }
0x2160   : > { %v7567_v59 = vadd.f32 %v7559_v49, %v7481_v45 }
0x2161   : > { %v7565_v21 = vadd.f32 %v7557_v10, %v7479_v2  ;;  %v9580_v55 = vpop.f32.mrb[176].mxu0  ;;  %v9596_v18 = vpop.f32.mrb[192].mxu1 }
0x2162   : > { %v7476_v37 = vmul.f32 %v9580_v55, %v8487_v33  ;;  %v7562_v12 = vmul.f32 %v9596_v18, %v8492_v39  ;;  %v7450_v24 = vpop.f32.mrb[177].mxu0  ;;  %v7536_v7 = vpop.f32.mrb[193].mxu1 }
0x2163   : > { %v7474_v52 = vmul.f32 %v8487_v33, %v7450_v24  ;;  %v7560_v19 = vmul.f32 %v8492_v39, %v7536_v7  ;;  %v9581_v5 = vpop.f32.mrb[178].mxu0  ;;  %v9597_v40 = vpop.f32.mrb[194].mxu1 }
0x2164   : > { %v7484_v1 = vadd.f32 %v7476_v37, %v7398_v20  ;;  %v7477_v30 = vmul.f32 %v9581_v5, %v8487_v33  ;;  %v7453_v62 = vpop.f32.mrb[179].mxu0  ;;  %v7539_v61 = vpop.f32.mrb[195].mxu1  ;;  %v7563_v31 = vmul.f32 %v9597_v40, %v8492_v39 }
0x2165   : > { %v7482_v9 = vadd.f32 %v7474_v52, %v7396_v28  ;;  %v7475_v44 = vmul.f32 %v8487_v33, %v7453_v62  ;;  %v7561_v6 = vmul.f32 %v8492_v39, %v7539_v61  ;;  %v8503_v39 = vld [vmem:[%s12436_s1 + $0x1] ss:$0 sm:$0xff]  ;;  %s8515_s1 = sshll.u32 %s10700_s0, 4  ;;  %s10493_s0 = smov [#allocation5]  }
0x2166   : > { %v7570_v35 = vadd.f32 %v7562_v12, %v7484_v1  ;;  %v7485_v15 = vadd.f32 %v7477_v30, %v7399_v51  ;;  %s12298_s4 = scalar_lea.hbm %s10677_s20, %s8515_s1  ;;  %s10389_s7 = sshll.u32 %s10493_s0, 4  ;;  %s10390_s7 = int_to_ptr.vmem [resolvable:$false] %s10389_s7 }
0x2167   : > { %v7568_v32 = vadd.f32 %v7560_v19, %v7482_v9  ;;  %v7483_v42 = vadd.f32 %v7475_v44, %v7397_v58  ;;  %s10391_s1 = scalar_lea.vmem %s10390_s7, 32 }
0x2168   : > { %v7571_v26 = vadd.f32 %v7563_v31, %v7485_v15 }
0x2169   : > { %v7569_v29 = vadd.f32 %v7561_v6, %v7483_v42  ;;  %v9608_v38 = vpop.f32.mrb[180].mxu0  ;;  %v9624_v4 = vpop.f32.mrb[196].mxu1 }
0x216a   : > { %v7644_v57 = vmul.f32 %v9608_v38, %v8497_v17  ;;  %v7730_v20 = vmul.f32 %v9624_v4, %v8502_v16  ;;  %v7606_v36 = vpop.f32.mrb[181].mxu0  ;;  %v7692_v13 = vpop.f32.mrb[197].mxu1 }
0x216b   : > { %v7642_v25 = vmul.f32 %v8497_v17, %v7606_v36  ;;  %v7728_v28 = vmul.f32 %v8502_v16, %v7692_v13  ;;  %v9609_v33 = vpop.f32.mrb[182].mxu0  ;;  %v9625_v22 = vpop.f32.mrb[198].mxu1 }
0x216c   : > { %v7652_v51 = vadd.f32 %v7644_v57, %v7566_v8  ;;  %v7645_v41 = vmul.f32 %v9609_v33, %v8497_v17  ;;  %v7609_v45 = vpop.f32.mrb[183].mxu0  ;;  %v7695_v58 = vpop.f32.mrb[199].mxu1  ;;  %v7731_v18 = vmul.f32 %v9625_v22, %v8502_v16 }
0x216d   : > { %v7650_v49 = vadd.f32 %v7642_v25, %v7564_v47  ;;  %v7643_v2 = vmul.f32 %v8497_v17, %v7609_v45  ;;  %v7729_v24 = vmul.f32 %v8502_v16, %v7695_v58 }
0x216e   : > { %v7738_v10 = vadd.f32 %v7730_v20, %v7652_v51  ;;  %v7653_v55 = vadd.f32 %v7645_v41, %v7567_v59 }
0x216f   : > { %v7736_v37 = vadd.f32 %v7728_v28, %v7650_v49  ;;  %v7651_v12 = vadd.f32 %v7643_v2, %v7565_v21 }
0x2170   : > { %v7750_v7 = vadd.f32 %v8503_v39, %v7738_v10  ;;  %v7739_v52 = vadd.f32 %v7731_v18, %v7653_v55 }
0x2171   : > { %v7748_v19 = vadd.f32 %v8503_v39, %v7736_v37  ;;  %v7737_v5 = vadd.f32 %v7729_v24, %v7651_v12  ;;  %v9612_v40 = vpop.f32.mrb[184].mxu0  ;;  %v9628_v1 = vpop.f32.mrb[200].mxu1 }
0x2172   : > { %v7766_v30 = vmul.f32 0.70710677, %v7750_v7  ;;  %v7751_v8 = vadd.f32 %v8503_v39, %v7739_v52  ;;  %v7648_v62 = vmul.f32 %v9612_v40, %v8497_v17  ;;  %v7622_v61 = vpop.f32.mrb[185].mxu0  ;;  %v7708_v9 = vpop.f32.mrb[201].mxu1  ;;  %v7734_v15 = vmul.f32 %v9628_v1, %v8502_v16 }
0x2173   : > { %v7764_v44 = vmul.f32 0.70710677, %v7748_v19  ;;  %v7749_v47 = vadd.f32 %v8503_v39, %v7737_v5  ;;  %v9613_v31 = vpop.f32.mrb[186].mxu0  ;;  %v9629_v59 = vpop.f32.mrb[202].mxu1  ;;  %v7646_v57 = vmul.f32 %v8497_v17, %v7622_v61  ;;  %v7732_v36 = vmul.f32 %v8502_v16, %v7708_v9 }
0x2174   : > { %10307 = verf.f32 %v7766_v30  ;;  %v7767_v42 = vmul.f32 0.70710677, %v7751_v8  ;;  %v7656_v21 = vadd.f32 %v7648_v62, %v7570_v35  ;;  %v7625_v6 = vpop.f32.mrb[187].mxu0  ;;  %v7711_v38 = vpop.f32.mrb[203].mxu1  ;;  %v7649_v13 = vmul.f32 %v9613_v31, %v8497_v17 }
0x2175   : > { %10309 = verf.f32 %v7764_v44  ;;  %v7765_v4 = vmul.f32 0.70710677, %v7749_v47  ;;  %v7654_v25 = vadd.f32 %v7646_v57, %v7568_v32  ;;  %v7647_v28 = vmul.f32 %v8497_v17, %v7625_v6 }
0x2176   : > { %10311 = verf.f32 %v7767_v42  ;;  %v7742_v20 = vadd.f32 %v7734_v15, %v7656_v21  ;;  %v7657_v22 = vadd.f32 %v7649_v13, %v7571_v26  ;;  %v7735_v51 = vmul.f32 %v9629_v59, %v8502_v16 }
0x2177   : > { %10313 = verf.f32 %v7765_v4  ;;  %v7740_v41 = vadd.f32 %v7732_v36, %v7654_v25  ;;  %v7655_v45 = vadd.f32 %v7647_v28, %v7569_v29  ;;  %v7733_v58 = vmul.f32 %v8502_v16, %v7711_v38 }
0x2178   : > { %v7754_v33 = vadd.f32 %v8503_v39, %v7742_v20  ;;  %v7743_v35 = vadd.f32 %v7735_v51, %v7657_v22  ;;  %v7758_v5 = vmul.f32 0.5, %v7750_v7  ;;  %v7756_v40 = vmul.f32 0.5, %v7748_v19 }
0x2179   : > { %v7752_v2 = vadd.f32 %v8503_v39, %v7740_v41  ;;  %v7741_v10 = vadd.f32 %v7733_v58, %v7655_v45  ;;  %v7759_v30 = vmul.f32 0.5, %v7751_v8  ;;  %v7757_v9 = vmul.f32 0.5, %v7749_v47 }
0x217a   : > { %v7770_v49 = vmul.f32 0.70710677, %v7754_v33  ;;  %v7755_v55 = vadd.f32 %v8503_v39, %v7743_v35  ;;  %v7762_v4 = vmul.f32 0.5, %v7754_v33  ;;  %v9874_v35 = vld [vmem:[%s10672_s14] sm:$0xff]  }
0x217b   : > { %v7768_v18 = vmul.f32 0.70710677, %v7752_v2  ;;  %v7753_v37 = vadd.f32 %v8503_v39, %v7741_v10  ;;  %v7760_v20 = vmul.f32 0.5, %v7752_v2  ;;  %v10491_v2 = vmov 0.0   ;;  %v8504_v10 = vld [vmem:[%s12433_s2 + $0x3] ss:$0 sm:$0xff] }
0x217c   : > { %10315 = verf.f32 %v7770_v49  ;;  %v7771_v24 = vmul.f32 0.70710677, %v7755_v55  ;;  %9646 = vmatprep.subr.bf16.mxu1 %v10491_v2  ;;  %9648 = vmatprep.mubr.msk.bf16.mxu1 %vm10492_vm7, %v10491_v2  ;;  %s1077_s2 = scalar_lea.vmem [#allocation5], %s1076_s26 }
0x217d   : > { %10317 = verf.f32 %v7768_v18  ;;  %v7769_v17 = vmul.f32 0.70710677, %v7753_v37  ;;  %v7761_v25 = vmul.f32 0.5, %v7753_v37  ;;  %9647 = vmatpush3.bf16.msra.mxu1 %v9874_v35  ;;  %s8019_s3 = sshll.u32 %s1077_s2, 4  ;;  %s12300_s3 = int_to_ptr.vmem [resolvable:$true] %s8019_s3 }
0x217e   : > { %v10308_v12 = vpop.eup %10307  ;;  %10319 = verf.f32 %v7771_v24  ;;  %s10385_s6 = scalar_lea.vmem %s12300_s3, 16  ;;  %p10392_p2 = scmp.lt.s32.totalorder %s12300_s3, %s10390_s7 }
0x217f   : > { %v10310_v52 = vpop.eup %10309  ;;  %v7782_v32 = vadd.f32 1.0, %v10308_v12  ;;  %10321 = verf.f32 %v7769_v17  ;;  %p10386_p6 = scmp.ne.s32.totalorder %s12300_s3, %s10385_s6  ;;  %p10393_p3 = scmp.lt.s32.totalorder %s10391_s1, %s10385_s6 }
0x2180   : > { %v10312_v26 = vpop.eup %10311  ;;  %v7780_v1 = vadd.f32 1.0, %v10310_v52 }
0x2181   : > { %v10314_v16 = vpop.eup %10313  ;;  %v7790_v29 = vmul.f32 %v7782_v32, %v7758_v5  ;;  %v7783_v62 = vadd.f32 1.0, %v10312_v26  ;;  %p10387_p10 = pnand %p10386_p6, %p12437_p9  ;;  %p10394_p4 = por %p10393_p3, %p10392_p2 }
0x2182   : > { %v7788_v61 = vmul.f32 %v7780_v1, %v7756_v40  ;;  %v7781_v44 = vadd.f32 1.0, %v10314_v16 }
0x2183   : > { %v7791_v39 = vmul.f32 %v7783_v62, %v7759_v30  ;;  %v7798_v31 = vadd.f32 %v7790_v29, %v12122_v3  ;;  %v7763_v3 = vmul.f32 0.5, %v7755_v55  ;;  %p10388_p12 = pneg %p10387_p10 }
0x2184   : > { %v7789_v15 = vmul.f32 %v7781_v44, %v7757_v9  ;;  %v7796_v42 = vadd.f32 %v7788_v61, %v12116_v23 }
0x2185   : > { %v7799_v7 = vadd.f32 %v7791_v39, %v12118_v48  ;;  %p10395_p7 = pnand %p10394_p4, %p10388_p12 }
0x2186   : > { %v10316_v59 = vpop.eup %10315  ;;  %v7797_v19 = vadd.f32 %v7789_v15, %v12120_v60 }
0x2187   : > { %v7805_v21 = vpack.c.bf16 %v7799_v7, %v7798_v31  ;;  %v7786_v6 = vadd.f32 1.0, %v10316_v59  ;;  %v10318_v8 = vpop.eup %10317 }
0x2188   : > { %v7804_v38 = vpack.c.bf16 %v7797_v19, %v7796_v42  ;;  %v10320_v57 = vpop.eup %10319  ;;  %v7784_v47 = vadd.f32 1.0, %v10318_v8 }
0x2189   : > { %v10322_v36 = vpop.eup %10321  ;;  %v7794_v13 = vmul.f32 %v7786_v6, %v7762_v4  ;;  %v7787_v48 = vadd.f32 1.0, %v10320_v57 }
0x218a   : > { %9638 = vmatprep.mubr.msk.bf16.mxu0 %vm1613_vm3, %v7804_v38  ;;  %v7792_v23 = vmul.f32 %v7784_v47, %v7760_v20  ;;  %v7785_v60 = vadd.f32 1.0, %v10322_v36 }
0x218b   : > { %9639 = vmatmul.mubr.msk.bf16.vlgmr.msra.gmra.mrb[188].mxu0 %vm1613_vm3, %v7805_v21  ;;  %v7795_v28 = vmul.f32 %v7787_v48, %v7763_v3  ;;  %v7802_v33 = vadd.f32 %v7794_v13, %v12146_v27 }
0x218c   : > { %v7793_v22 = vmul.f32 %v7785_v60, %v7761_v25  ;;  %v7800_v41 = vadd.f32 %v7792_v23, %v12138_v53 }
0x218d   : > { %v7803_v51 = vadd.f32 %v7795_v28, %v12140_v54 }
0x218e   : > { %v7801_v45 = vadd.f32 %v7793_v22, %v12142_v46 }
0x218f   : > { %v7807_v58 = vpack.c.bf16 %v7803_v51, %v7802_v33 }
0x2190   : > { %v7806_v49 = vpack.c.bf16 %v7801_v45, %v7800_v41 }
0x2192   : > { %9642 = vmatprep.mubr.msk.bf16.mxu0 %vm1613_vm3, %v7806_v49 }
0x2193   : > { %9643 = vmatmul.mubr.msk.bf16.gmra.mrb[192].mxu0 %vm1613_vm3, %v7807_v58 }
0x225e   : > { %v9640_v27 = vpop.f32.mrb[188].mxu0 }
0x225f   : > { %v7890_v55 = vpop.f32.mrb[189].mxu0  ;;  %v7899_v54 = vadd.f32 %v9640_v27, %v8504_v10 }
0x2260   : > { %v7891_v18 = vadd.f32 %v8504_v10, %v7890_v55  ;;  %v9641_v53 = vpop.f32.mrb[190].mxu0 }
0x2261   : > { %v7893_v37 = vpop.f32.mrb[191].mxu0  ;;  %v7902_v12 = vadd.f32 %v9641_v53, %v8504_v10  ;;  %v7923_v52 = vadd.f32 %v7899_v54, %v12015_v56 }
0x2262   : > { %v7921_v46 = vadd.f32 %v7891_v18, %v12012_v11  ;;  %v7894_v24 = vadd.f32 %v8504_v10, %v7893_v37 }
0x2263   : > { %v7924_v17 = vadd.f32 %v7902_v12, %v12023_v50  ;;  %v7932_v1 = vsel %vm1235_vm2, %v7923_v52, 0.0 }
0x2264   : > { %v7922_v5 = vadd.f32 %v7894_v24, %v12018_v34  ;;  %v7929_v32 = vsel %vm1235_vm2, %v7921_v46, 0.0 }
0x2265   : > { %v7934_v11 = vsel %vm1235_vm2, %v7924_v17, 0.0 }
0x2266   : > { %v7930_v26 = vsel %vm1235_vm2, %v7922_v5, 0.0  ;;  %v9644_v16 = vpop.f32.mrb[192].mxu0 }
0x2267   : > { %v7931_v40 = vadd.f32 %v7930_v26, %v7929_v32  ;;  %v7906_v30 = vpop.f32.mrb[193].mxu0  ;;  %v7915_v62 = vadd.f32 %v9644_v16, %v8504_v10 }
0x2268   : > { %v7907_v61 = vadd.f32 %v8504_v10, %v7906_v30  ;;  %v9645_v9 = vpop.f32.mrb[194].mxu0 }
0x2269   : > { %v7933_v29 = vadd.f32 %v7932_v1, %v7931_v40  ;;  %v7909_v44 = vpop.f32.mrb[195].mxu0  ;;  %v7918_v39 = vadd.f32 %v9645_v9, %v8504_v10  ;;  %v7927_v50 = vadd.f32 %v7915_v62, %v12035_v43 }
0x226a   : > { %v7925_v34 = vadd.f32 %v7907_v61, %v12030_v14  ;;  %v7910_v15 = vadd.f32 %v8504_v10, %v7909_v44 }
0x226b   : > { %v7935_v56 = vadd.f32 %v7934_v11, %v7933_v29  ;;  %v7928_v42 = vadd.f32 %v7918_v39, %v12043_v63  ;;  %v7940_v6 = vsel %vm1235_vm2, %v7927_v50, 0.0 }
0x226c   : > { %v7936_v31 = vsel %vm1235_vm2, %v7925_v34, 0.0  ;;  %v7926_v7 = vadd.f32 %v7910_v15, %v12038_v0 }
0x226d   : > { %v7937_v59 = vadd.f32 %v7936_v31, %v7935_v56  ;;  %v7942_v14 = vsel %vm1235_vm2, %v7928_v42, 0.0 }
0x226e   : > { %v7938_v19 = vsel %vm1235_vm2, %v7926_v7, 0.0 }
0x226f   : > { %v7939_v21 = vadd.f32 %v7938_v19, %v7937_v59 }
0x2271   : > { %v7941_v38 = vadd.f32 %v7940_v6, %v7939_v21 }
0x2273   : > { %v7943_v8 = vadd.f32 %v7942_v14, %v7941_v38 }
0x2275   : > { %v7944_v43 = vrot.slane %v7943_v8, 4 }
0x2277   : > { %v7945_v4 = vadd.f32 %v7944_v43, %v7943_v8 }
0x2279   : > { %v7946_v57 = vrot.slane %v7945_v4, 2 }
0x227b   : > { %v7947_v20 = vadd.f32 %v7946_v57, %v7945_v4 }
0x227d   : > { %v7948_v0 = vrot.slane %v7947_v20, 1 }
0x227f   : > { %v7949_v47 = vadd.f32 %v7948_v0, %v7947_v20 }
0x2281   : > { %v7951_v36 = vmul.f32 0.015625, %v7949_v47 }
0x2283   : > { %v7952_v63 = vpack.c.bf16 %v7951_v36, %v7951_v36 }
0x2285   : > { %9649 = vmatmul.mubr.msk.bf16.vlgmr.msra.gmra.mrb[204].mxu1 %vm1235_vm2, %v7952_v63 }
0x2358   : > { %v7998_v13 = vpop.f32.mrb[204].mxu1 }
0x2359   : > { %8005 = vst.msk [vmem:[%s1077_s2] sm:$0x1] %vm8004_vm8, %v7998_v13  ;;  %v9650_v3 = vpop.f32.mrb[205].mxu1 }
0x235a   : > { %v8001_v48 = vpop.f32.mrb[206].mxu1 }
0x235b   : > { %10398 = shalt.err (!%p10395_p7)
}
0x235c   : > { %s10399_s2 = scalar_lea.hbm %s12298_s4, 16  ;;  %s10403_s26 = scalar_lea.hbm %s10677_s20, 32 }
0x235d   : > { %p10400_p8 = scmp.ne.s32.totalorder %s12298_s4, %s10399_s2  ;;  %p10404_p1 = scmp.lt.u32.totalorder %s12298_s4, %s10677_s20 }
0x235e   : > { %p10405_p0 = scmp.lt.u32.totalorder %s10403_s26, %s10399_s2  ;;  %p10407_p6 = scmp.lt.u32.totalorder %s10399_s2, %s12298_s4 }
0x235f   : > { %p10401_p11 = pnand %p10400_p8, %p12437_p9 }
0x2360   : > { %p10406_p5 = por %p10405_p0, %p10404_p1 }
0x2361   : > { %p10402_p13 = pneg %p10401_p11 }
0x2362   : > { %p10408_p10 = por %p10407_p6, %p10406_p5 }
0x2364   : > { %p10409_p12 = pnand %p10408_p10, %p10402_p13 }
0x2366   : > { %10412 = shalt.err (!%p10409_p12)
}
0x2367   : > { %9716 = dma.vmem_to_hbm [thread:$0]  (%p12437_p9), %s12300_s3, 16, %s12298_s4, %s8007_s5   ;;  %v9651_v23 = vpop.f32.mrb[207].mxu1 }
0x2368 PF: > { %s12438_s6 = sld [smem:[#allocation33_spill]]  ;;  %p9728_p2 = scmp.ge.s32.totalorder %s10451_s28, 2 }
0x2369   : > { %s8031_s7 = sand.u32 1, %s10439_s22  }
0x236a   : > { %s8032_s0 = scalar_lea.sflag [#allocation4], %s8031_s7 }
0x236e   : > { %p12439_p3 = scmp.ne.s32.totalorder %s12438_s6, 0 }
0x2370   : > { %p9723_p4 = pnand %p9728_p2, %p12439_p3 }
0x2372   : > { %10434 = dma.done.wait (!%p9723_p4), %s8032_s0, 16  }
0x2373   : > { %10436 = vsyncadd (!%p9723_p4), %s8032_s0, 4294967280  ;;  %s12440_s28 = sld [smem:[#allocation31_spill]]  ;;  %s12441_s1 = sld [smem:[#allocation30_spill]] }
0x2374   : > { %s12442_s26 = sld [smem:[#allocation32_spill]]  ;;  %s12443_s22 = smov %s10443_s23 }
0x2379   : > { %p82_p7 = scmp.ge.s32.totalorder %s12440_s28, 4   ;;  %s12444_s23 = smov %s12441_s1 }
0x237b   :  { %84 = sbr.rel (!%p82_p7) target bundleno = 70 (0x46), region = 250 }
0x2382   :  { %8036 = vsyncpa [#allocation3], 1 }
0x2383   :  { %8038 = vsyncpa [#allocation3 + $0x1], 1 }
0x2384   :  { %8039 = vsyncpa [#allocation4], 1 }
0x2385   :  { %8041 = vsyncpa [#allocation4 + $0x1], 1 }

</bundles_post_ra>
